<compile_context>
chip_gen: v5e
topology: v5e:2x2
jax: 0.10.0
libtpu: 0.0.40
codegen_flags: <defaults>
</compile_context>

<pallas_src>
import functools

import jax
import jax.numpy as jnp
from jax.experimental import pallas as pl
from jax.experimental.pallas import tpu as pltpu


# ----------------------------------------------------------------------------
# Fused kernel: one grid step == one image, everything VMEM-resident.
# ----------------------------------------------------------------------------
def _fused_kernel(x_ref, w1_ref, b1_ref, w2_ref, b2_ref, w3e_ref, b3_ref,
                  o_ref, xp_ref, h1p_ref, h2p_ref, *, H, W):
    # x_ref  : (1, H, W, 1)        input image
    # w1_ref : (3, 3, 1, 32)       conv1 weight (HWIO)
    # b1_ref : (1, 32)
    # w2_ref : (3, 3, 32, 64)      conv2 weight (HWIO)
    # b2_ref : (1, 64)
    # w3e_ref: (4, 4, 1, 64)       upsample+conv3 fused phase weights
    #                              [2*ry+rx, 2*a+b, 1, cin]
    # b3_ref : (1, 1)
    # o_ref  : (1, 4, H*W, 1)      4 output phases; phase p=2*ry+rx holds
    #                              out[2y+ry, 2x+rx] at row y*W+x
    # xp_ref : (H+2, W+2, 1)   f32 VMEM scratch: zero-padded input
    # h1p_ref: (H+2, W+2, 32)  f32 VMEM scratch: zero-padded conv1 output
    # h2p_ref: (H+2, W+2, 64)  f32 VMEM scratch: zero-padded conv2 output
    f32 = jnp.float32

    # ---- in-kernel "same" padding of the input (no wrapper jnp.pad) --------
    xp_ref[...] = jnp.zeros((H + 2, W + 2, 1), f32)
    xp_ref[1:H + 1, 1:W + 1, :] = x_ref[0]

    # ---- conv1: 1 -> 32.  Degenerate K=1 taps = lane-broadcast FMAs (VPU) --
    acc1 = jnp.zeros((H * W, 32), f32)
    for dy in range(3):
        for dx in range(3):
            patch = xp_ref[dy:dy + H, dx:dx + W, :].reshape(H * W, 1)
            acc1 = acc1 + patch * w1_ref[dy, dx]          # (H*W,1)*(1,32)
    acc1 = acc1 + b1_ref[...]

    h1p_ref[...] = jnp.zeros((H + 2, W + 2, 32), f32)
    h1p_ref[1:H + 1, 1:W + 1, :] = acc1.reshape(H, W, 32)

    # ---- conv2: 32 -> 64.  9 taps as (H*W,32)@(32,64) f32 MXU matmuls ------
    acc2 = jnp.zeros((H * W, 64), f32)
    for dy in range(3):
        for dx in range(3):
            patch = h1p_ref[dy:dy + H, dx:dx + W, :].reshape(H * W, 32)
            acc2 = acc2 + jnp.dot(patch, w2_ref[dy, dx],
                                  preferred_element_type=f32)
    acc2 = acc2 + b2_ref[...]

    h2p_ref[...] = jnp.zeros((H + 2, W + 2, 64), f32)
    h2p_ref[1:H + 1, 1:W + 1, :] = acc2.reshape(H, W, 64)

    # ---- nearest-2x upsample + conv3 (64 -> 1), fused via 4 output phases --
    # out[2y+ry, 2x+rx] = b3 + sum_{a,b in {0,1}} w3e[ry,rx,a,b,:] . h2p[y+ry+a, x+rx+b, :]
    # Per phase: accumulate weighted taps in (H*W, 64), ONE channel reduce.
    for ry in range(2):
        for rx in range(2):
            acc3 = jnp.zeros((H * W, 64), f32)
            for a in range(2):
                for b in range(2):
                    patch = h2p_ref[ry + a:ry + a + H,
                                    rx + b:rx + b + W, :].reshape(H * W, 64)
                    acc3 = acc3 + patch * w3e_ref[2 * ry + rx, 2 * a + b]
            phase = jnp.sum(acc3, axis=-1, keepdims=True) + b3_ref[...]
            o_ref[0, 2 * ry + rx] = phase                 # (H*W, 1)


def _conv3_phase_weights(w3):
    """Fold nearest-2x upsample into conv3.

    For output phase (ry, rx) the composition upsample(2x nearest) -> conv3
    (3x3, pad=1) is exactly a 2x2 conv over the 1-zero-padded conv2 output:
        out[2y+ry, 2x+rx] = sum_{a,b} Weff[ry,rx,a,b,:] . h2p[y+ry+a, x+rx+b, :]
    Returns Weff as (4, 4, 1, Cin) = [2*ry+rx, 2*a+b, 1, cin].
    """
    w = w3[..., 0]                                        # (3, 3, Cin) [dy,dx,c]
    # combine over dy for each (ry, a)
    row = jnp.stack([
        jnp.stack([w[0], w[1] + w[2]], axis=0),           # ry = 0
        jnp.stack([w[0] + w[1], w[2]], axis=0),           # ry = 1
    ], axis=0)                                            # (2,2,3,Cin) [ry,a,dx,c]
    # combine over dx for each (rx, b)
    rx0 = jnp.stack([row[:, :, 0, :], row[:, :, 1, :] + row[:, :, 2, :]], axis=2)
    rx1 = jnp.stack([row[:, :, 0, :] + row[:, :, 1, :], row[:, :, 2, :]], axis=2)
    eff = jnp.stack([rx0, rx1], axis=1)                   # (2,2,2,2,Cin) [ry,rx,a,b,c]
    cin = w.shape[-1]
    return eff.reshape(4, 4, 1, cin)


# ----------------------------------------------------------------------------
# Full forward pass (PyTorch NCHW in / NCHW out).
# ----------------------------------------------------------------------------
def upsample_net_forward(x_nchw, params):
    N, C, H, W = x_nchw.shape
    assert C == 1
    x = x_nchw.reshape(N, H, W, 1)                        # C=1: NCHW -> NHWC for free

    w1 = params["w1"]                                     # (3, 3, 1, 32)
    b1 = params["b1"].reshape(1, 32)
    w2 = params["w2"]                                     # (3, 3, 32, 64)
    b2 = params["b2"].reshape(1, 64)
    w3e = _conv3_phase_weights(params["w3"])              # (4, 4, 1, 64)
    b3 = params["b3"].reshape(1, 1)

    kernel = functools.partial(_fused_kernel, H=H, W=W)
    phases = pl.pallas_call(
        kernel,
        out_shape=jax.ShapeDtypeStruct((N, 4, H * W, 1), jnp.float32),
        grid=(N,),
        in_specs=[
            pl.BlockSpec((1, H, W, 1), lambda n: (n, 0, 0, 0)),
            pl.BlockSpec((3, 3, 1, 32), lambda n: (0, 0, 0, 0)),
            pl.BlockSpec((1, 32), lambda n: (0, 0)),
            pl.BlockSpec((3, 3, 32, 64), lambda n: (0, 0, 0, 0)),
            pl.BlockSpec((1, 64), lambda n: (0, 0)),
            pl.BlockSpec((4, 4, 1, 64), lambda n: (0, 0, 0, 0)),
            pl.BlockSpec((1, 1), lambda n: (0, 0)),
        ],
        out_specs=pl.BlockSpec((1, 4, H * W, 1), lambda n: (n, 0, 0, 0)),
        scratch_shapes=[
            pltpu.VMEM((H + 2, W + 2, 1), jnp.float32),
            pltpu.VMEM((H + 2, W + 2, 32), jnp.float32),
            pltpu.VMEM((H + 2, W + 2, 64), jnp.float32),
        ],
        compiler_params=pltpu.CompilerParams(
            dimension_semantics=("parallel",)),
    )(x, w1, b1, w2, b2, w3e, b3)

    # Interleave phases: out[n, 0, 2y+ry, 2x+rx] = phases[n, 2*ry+rx, y*W+x, 0].
    y = phases.reshape(N, 2, 2, H, W)                     # [n, ry, rx, y, x]
    y = jnp.transpose(y, (0, 3, 1, 4, 2))                 # [n, y, ry, x, rx]
    return y.reshape(N, 1, 2 * H, 2 * W)


def init_params(key):
    """Deterministic PyTorch-style (kaiming-uniform-ish) init, HWIO weights."""
    ks = jax.random.split(key, 6)

    def conv_init(kw, kb, cin, cout):
        fan_in = cin * 3 * 3
        bound = 1.0 / (fan_in ** 0.5)
        w = jax.random.uniform(kw, (3, 3, cin, cout), jnp.float32, -bound, bound)
        b = jax.random.uniform(kb, (cout,), jnp.float32, -bound, bound)
        return w, b

    w1, b1 = conv_init(ks[0], ks[1], 1, 32)
    w2, b2 = conv_init(ks[2], ks[3], 32, 64)
    w3, b3 = conv_init(ks[4], ks[5], 64, 1)
    return dict(w1=w1, b1=b1, w2=w2, b2=b2, w3=w3, b3=b3)


# Pure-JAX reference (correctness check only).
def _ref_forward(x_nchw, p):
    dn = ("NHWC", "HWIO", "NHWC")

    def conv(x, w, b):
        y = jax.lax.conv_general_dilated(
            x, w, window_strides=(1, 1), padding="SAME",
            dimension_numbers=dn, precision=jax.lax.Precision.HIGHEST)
        return y + b

    xh = jnp.transpose(x_nchw, (0, 2, 3, 1))
    xh = conv(xh, p["w1"], p["b1"])
    xh = conv(xh, p["w2"], p["b2"])
    xh = jnp.repeat(jnp.repeat(xh, 2, axis=1), 2, axis=2)
    xh = conv(xh, p["w3"], p["b3"])
    return jnp.transpose(xh, (0, 3, 1, 2))


if __name__ == "__main__":
    key = jax.random.PRNGKey(0)
    kx, kp = jax.random.split(key)

    # PyTorch module: conv1 expects 1 input channel -> NCHW input (2, 1, 16, 16)
    x = jax.random.normal(kx, (2, 1, 16, 16), dtype=jnp.float32)
    params = init_params(kp)

    out = jax.block_until_ready(jax.jit(upsample_net_forward)(x, params))
    assert out.shape == (2, 1, 32, 32), out.shape

    ref = jax.block_until_ready(_ref_forward(x, params))
    assert jnp.allclose(out, ref, atol=2e-2, rtol=2e-2), (
        float(jnp.max(jnp.abs(out - ref))))

    print("KERNEL_OK")
</pallas_src>

<mosaic_0001>
module attributes {stable_mosaic.version = 11 : i64} {
  func.func @_fused_kernel(%arg0: i32, %arg1: memref<1x16x16x1xf32, #tpu.memory_space<vmem>>, %arg2: memref<3x3x1x32xf32, #tpu.memory_space<vmem>>, %arg3: memref<1x32xf32, #tpu.memory_space<vmem>>, %arg4: memref<3x3x32x64xf32, #tpu.memory_space<vmem>>, %arg5: memref<1x64xf32, #tpu.memory_space<vmem>>, %arg6: memref<4x4x1x64xf32, #tpu.memory_space<vmem>>, %arg7: memref<1x1xf32, #tpu.memory_space<vmem>>, %arg8: memref<1x4x256x1xf32, #tpu.memory_space<vmem>>, %arg9: memref<18x18x1xf32, #tpu.memory_space<vmem>>, %arg10: memref<18x18x32xf32, #tpu.memory_space<vmem>>, %arg11: memref<18x18x64xf32, #tpu.memory_space<vmem>>) attributes {dimension_semantics = [#tpu.dimension_semantics<parallel>], iteration_bounds = array<i64: 2>, scalar_prefetch = 0 : i64, scratch_operands = 3 : i64, tpu.core_type = #tpu.core_type<tc>, window_params = [{transform_indices = @transform_0, window_bounds = array<i64: 1, 16, 16, 1>}, {pipeline_mode = #tpu.pipeline_mode<synchronous>, transform_indices = @transform_1, window_bounds = array<i64: 3, 3, 1, 32>}, {pipeline_mode = #tpu.pipeline_mode<synchronous>, transform_indices = @transform_2, window_bounds = array<i64: 1, 32>}, {pipeline_mode = #tpu.pipeline_mode<synchronous>, transform_indices = @transform_3, window_bounds = array<i64: 3, 3, 32, 64>}, {pipeline_mode = #tpu.pipeline_mode<synchronous>, transform_indices = @transform_4, window_bounds = array<i64: 1, 64>}, {pipeline_mode = #tpu.pipeline_mode<synchronous>, transform_indices = @transform_5, window_bounds = array<i64: 4, 4, 1, 64>}, {pipeline_mode = #tpu.pipeline_mode<synchronous>, transform_indices = @transform_6, window_bounds = array<i64: 1, 1>}, {transform_indices = @transform_7, window_bounds = array<i64: 1, 4, 256, 1>}]} {
    %cst = arith.constant 0.000000e+00 : f32
    %0 = vector.broadcast %cst : f32 to vector<18x18x1xf32>
    %c0 = arith.constant 0 : index
    %c0_0 = arith.constant 0 : index
    %c0_1 = arith.constant 0 : index
    %1 = vector.load %arg9[%c0, %c0_0, %c0_1] : memref<18x18x1xf32, #tpu.memory_space<vmem>>, vector<18x18x1xf32>
    tpu.vector_store %arg9[%c0, %c0_0, %c0_1], %0 {strides = array<i32>} : memref<18x18x1xf32, #tpu.memory_space<vmem>>, vector<18x18x1xf32>,
    %c0_2 = arith.constant 0 : index
    %c0_3 = arith.constant 0 : index
    %c0_4 = arith.constant 0 : index
    %c0_5 = arith.constant 0 : index
    %2 = vector.load %arg1[%c0_2, %c0_3, %c0_4, %c0_5] : memref<1x16x16x1xf32, #tpu.memory_space<vmem>>, vector<1x16x16x1xf32>
    %3 = vector.shape_cast %2 : vector<1x16x16x1xf32> to vector<16x16x1xf32>
    %c1 = arith.constant 1 : index
    %c1_6 = arith.constant 1 : index
    %c0_7 = arith.constant 0 : index
    %4 = vector.load %arg9[%c1, %c1_6, %c0_7] : memref<18x18x1xf32, #tpu.memory_space<vmem>>, vector<16x16x1xf32>
    tpu.vector_store %arg9[%c1, %c1_6, %c0_7], %3 {strides = array<i32>} : memref<18x18x1xf32, #tpu.memory_space<vmem>>, vector<16x16x1xf32>,
    %cst_8 = arith.constant 0.000000e+00 : f32
    %5 = vector.broadcast %cst_8 : f32 to vector<256x32xf32>
    %c0_9 = arith.constant 0 : index
    %c0_10 = arith.constant 0 : index
    %c0_11 = arith.constant 0 : index
    %6 = vector.load %arg9[%c0_9, %c0_10, %c0_11] : memref<18x18x1xf32, #tpu.memory_space<vmem>>, vector<16x16x1xf32>
    %7 = vector.shape_cast %6 : vector<16x16x1xf32> to vector<256x1xf32>
    %c0_12 = arith.constant 0 : index
    %c0_13 = arith.constant 0 : index
    %c0_14 = arith.constant 0 : index
    %c0_15 = arith.constant 0 : index
    %8 = vector.load %arg2[%c0_12, %c0_13, %c0_14, %c0_15] : memref<3x3x1x32xf32, #tpu.memory_space<vmem>>, vector<1x1x1x32xf32>
    %9 = vector.shape_cast %8 : vector<1x1x1x32xf32> to vector<1x32xf32>
    %10 = vector.broadcast %7 : vector<256x1xf32> to vector<256x32xf32>
    %11 = vector.broadcast %9 : vector<1x32xf32> to vector<256x32xf32>
    %12 = arith.mulf %10, %11 : vector<256x32xf32>
    %13 = arith.addf %5, %12 : vector<256x32xf32>
    %c0_16 = arith.constant 0 : index
    %c1_17 = arith.constant 1 : index
    %c0_18 = arith.constant 0 : index
    %14 = vector.load %arg9[%c0_16, %c1_17, %c0_18] : memref<18x18x1xf32, #tpu.memory_space<vmem>>, vector<16x16x1xf32>
    %15 = vector.shape_cast %14 : vector<16x16x1xf32> to vector<256x1xf32>
    %c0_19 = arith.constant 0 : index
    %c1_20 = arith.constant 1 : index
    %c0_21 = arith.constant 0 : index
    %c0_22 = arith.constant 0 : index
    %16 = vector.load %arg2[%c0_19, %c1_20, %c0_21, %c0_22] : memref<3x3x1x32xf32, #tpu.memory_space<vmem>>, vector<1x1x1x32xf32>
    %17 = vector.shape_cast %16 : vector<1x1x1x32xf32> to vector<1x32xf32>
    %18 = vector.broadcast %15 : vector<256x1xf32> to vector<256x32xf32>
    %19 = vector.broadcast %17 : vector<1x32xf32> to vector<256x32xf32>
    %20 = arith.mulf %18, %19 : vector<256x32xf32>
    %21 = arith.addf %13, %20 : vector<256x32xf32>
    %c0_23 = arith.constant 0 : index
    %c2 = arith.constant 2 : index
    %c0_24 = arith.constant 0 : index
    %22 = vector.load %arg9[%c0_23, %c2, %c0_24] : memref<18x18x1xf32, #tpu.memory_space<vmem>>, vector<16x16x1xf32>
    %23 = vector.shape_cast %22 : vector<16x16x1xf32> to vector<256x1xf32>
    %c0_25 = arith.constant 0 : index
    %c2_26 = arith.constant 2 : index
    %c0_27 = arith.constant 0 : index
    %c0_28 = arith.constant 0 : index
    %24 = vector.load %arg2[%c0_25, %c2_26, %c0_27, %c0_28] : memref<3x3x1x32xf32, #tpu.memory_space<vmem>>, vector<1x1x1x32xf32>
    %25 = vector.shape_cast %24 : vector<1x1x1x32xf32> to vector<1x32xf32>
    %26 = vector.broadcast %23 : vector<256x1xf32> to vector<256x32xf32>
    %27 = vector.broadcast %25 : vector<1x32xf32> to vector<256x32xf32>
    %28 = arith.mulf %26, %27 : vector<256x32xf32>
    %29 = arith.addf %21, %28 : vector<256x32xf32>
    %c1_29 = arith.constant 1 : index
    %c0_30 = arith.constant 0 : index
    %c0_31 = arith.constant 0 : index
    %30 = vector.load %arg9[%c1_29, %c0_30, %c0_31] : memref<18x18x1xf32, #tpu.memory_space<vmem>>, vector<16x16x1xf32>
    %31 = vector.shape_cast %30 : vector<16x16x1xf32> to vector<256x1xf32>
    %c1_32 = arith.constant 1 : index
    %c0_33 = arith.constant 0 : index
    %c0_34 = arith.constant 0 : index
    %c0_35 = arith.constant 0 : index
    %32 = vector.load %arg2[%c1_32, %c0_33, %c0_34, %c0_35] : memref<3x3x1x32xf32, #tpu.memory_space<vmem>>, vector<1x1x1x32xf32>
    %33 = vector.shape_cast %32 : vector<1x1x1x32xf32> to vector<1x32xf32>
    %34 = vector.broadcast %31 : vector<256x1xf32> to vector<256x32xf32>
    %35 = vector.broadcast %33 : vector<1x32xf32> to vector<256x32xf32>
    %36 = arith.mulf %34, %35 : vector<256x32xf32>
    %37 = arith.addf %29, %36 : vector<256x32xf32>
    %c1_36 = arith.constant 1 : index
    %c1_37 = arith.constant 1 : index
    %c0_38 = arith.constant 0 : index
    %38 = vector.load %arg9[%c1_36, %c1_37, %c0_38] : memref<18x18x1xf32, #tpu.memory_space<vmem>>, vector<16x16x1xf32>
    %39 = vector.shape_cast %38 : vector<16x16x1xf32> to vector<256x1xf32>
    %c1_39 = arith.constant 1 : index
    %c1_40 = arith.constant 1 : index
    %c0_41 = arith.constant 0 : index
    %c0_42 = arith.constant 0 : index
    %40 = vector.load %arg2[%c1_39, %c1_40, %c0_41, %c0_42] : memref<3x3x1x32xf32, #tpu.memory_space<vmem>>, vector<1x1x1x32xf32>
    %41 = vector.shape_cast %40 : vector<1x1x1x32xf32> to vector<1x32xf32>
    %42 = vector.broadcast %39 : vector<256x1xf32> to vector<256x32xf32>
    %43 = vector.broadcast %41 : vector<1x32xf32> to vector<256x32xf32>
    %44 = arith.mulf %42, %43 : vector<256x32xf32>
    %45 = arith.addf %37, %44 : vector<256x32xf32>
    %c1_43 = arith.constant 1 : index
    %c2_44 = arith.constant 2 : index
    %c0_45 = arith.constant 0 : index
    %46 = vector.load %arg9[%c1_43, %c2_44, %c0_45] : memref<18x18x1xf32, #tpu.memory_space<vmem>>, vector<16x16x1xf32>
    %47 = vector.shape_cast %46 : vector<16x16x1xf32> to vector<256x1xf32>
    %c1_46 = arith.constant 1 : index
    %c2_47 = arith.constant 2 : index
    %c0_48 = arith.constant 0 : index
    %c0_49 = arith.constant 0 : index
    %48 = vector.load %arg2[%c1_46, %c2_47, %c0_48, %c0_49] : memref<3x3x1x32xf32, #tpu.memory_space<vmem>>, vector<1x1x1x32xf32>
    %49 = vector.shape_cast %48 : vector<1x1x1x32xf32> to vector<1x32xf32>
    %50 = vector.broadcast %47 : vector<256x1xf32> to vector<256x32xf32>
    %51 = vector.broadcast %49 : vector<1x32xf32> to vector<256x32xf32>
    %52 = arith.mulf %50, %51 : vector<256x32xf32>
    %53 = arith.addf %45, %52 : vector<256x32xf32>
    %c2_50 = arith.constant 2 : index
    %c0_51 = arith.constant 0 : index
    %c0_52 = arith.constant 0 : index
    %54 = vector.load %arg9[%c2_50, %c0_51, %c0_52] : memref<18x18x1xf32, #tpu.memory_space<vmem>>, vector<16x16x1xf32>
    %55 = vector.shape_cast %54 : vector<16x16x1xf32> to vector<256x1xf32>
    %c2_53 = arith.constant 2 : index
    %c0_54 = arith.constant 0 : index
    %c0_55 = arith.constant 0 : index
    %c0_56 = arith.constant 0 : index
    %56 = vector.load %arg2[%c2_53, %c0_54, %c0_55, %c0_56] : memref<3x3x1x32xf32, #tpu.memory_space<vmem>>, vector<1x1x1x32xf32>
    %57 = vector.shape_cast %56 : vector<1x1x1x32xf32> to vector<1x32xf32>
    %58 = vector.broadcast %55 : vector<256x1xf32> to vector<256x32xf32>
    %59 = vector.broadcast %57 : vector<1x32xf32> to vector<256x32xf32>
    %60 = arith.mulf %58, %59 : vector<256x32xf32>
    %61 = arith.addf %53, %60 : vector<256x32xf32>
    %c2_57 = arith.constant 2 : index
    %c1_58 = arith.constant 1 : index
    %c0_59 = arith.constant 0 : index
    %62 = vector.load %arg9[%c2_57, %c1_58, %c0_59] : memref<18x18x1xf32, #tpu.memory_space<vmem>>, vector<16x16x1xf32>
    %63 = vector.shape_cast %62 : vector<16x16x1xf32> to vector<256x1xf32>
    %c2_60 = arith.constant 2 : index
    %c1_61 = arith.constant 1 : index
    %c0_62 = arith.constant 0 : index
    %c0_63 = arith.constant 0 : index
    %64 = vector.load %arg2[%c2_60, %c1_61, %c0_62, %c0_63] : memref<3x3x1x32xf32, #tpu.memory_space<vmem>>, vector<1x1x1x32xf32>
    %65 = vector.shape_cast %64 : vector<1x1x1x32xf32> to vector<1x32xf32>
    %66 = vector.broadcast %63 : vector<256x1xf32> to vector<256x32xf32>
    %67 = vector.broadcast %65 : vector<1x32xf32> to vector<256x32xf32>
    %68 = arith.mulf %66, %67 : vector<256x32xf32>
    %69 = arith.addf %61, %68 : vector<256x32xf32>
    %c2_64 = arith.constant 2 : index
    %c2_65 = arith.constant 2 : index
    %c0_66 = arith.constant 0 : index
    %70 = vector.load %arg9[%c2_64, %c2_65, %c0_66] : memref<18x18x1xf32, #tpu.memory_space<vmem>>, vector<16x16x1xf32>
    %71 = vector.shape_cast %70 : vector<16x16x1xf32> to vector<256x1xf32>
    %c2_67 = arith.constant 2 : index
    %c2_68 = arith.constant 2 : index
    %c0_69 = arith.constant 0 : index
    %c0_70 = arith.constant 0 : index
    %72 = vector.load %arg2[%c2_67, %c2_68, %c0_69, %c0_70] : memref<3x3x1x32xf32, #tpu.memory_space<vmem>>, vector<1x1x1x32xf32>
    %73 = vector.shape_cast %72 : vector<1x1x1x32xf32> to vector<1x32xf32>
    %74 = vector.broadcast %71 : vector<256x1xf32> to vector<256x32xf32>
    %75 = vector.broadcast %73 : vector<1x32xf32> to vector<256x32xf32>
    %76 = arith.mulf %74, %75 : vector<256x32xf32>
    %77 = arith.addf %69, %76 : vector<256x32xf32>
    %c0_71 = arith.constant 0 : index
    %c0_72 = arith.constant 0 : index
    %78 = vector.load %arg3[%c0_71, %c0_72] : memref<1x32xf32, #tpu.memory_space<vmem>>, vector<1x32xf32>
    %79 = vector.broadcast %78 : vector<1x32xf32> to vector<256x32xf32>
    %80 = arith.addf %77, %79 : vector<256x32xf32>
    %cst_73 = arith.constant 0.000000e+00 : f32
    %81 = vector.broadcast %cst_73 : f32 to vector<18x18x32xf32>
    %c0_74 = arith.constant 0 : index
    %c0_75 = arith.constant 0 : index
    %c0_76 = arith.constant 0 : index
    %82 = vector.load %arg10[%c0_74, %c0_75, %c0_76] : memref<18x18x32xf32, #tpu.memory_space<vmem>>, vector<18x18x32xf32>
    tpu.vector_store %arg10[%c0_74, %c0_75, %c0_76], %81 {strides = array<i32>} : memref<18x18x32xf32, #tpu.memory_space<vmem>>, vector<18x18x32xf32>,
    %83 = vector.shape_cast %80 : vector<256x32xf32> to vector<16x16x32xf32>
    %c1_77 = arith.constant 1 : index
    %c1_78 = arith.constant 1 : index
    %c0_79 = arith.constant 0 : index
    %84 = vector.load %arg10[%c1_77, %c1_78, %c0_79] : memref<18x18x32xf32, #tpu.memory_space<vmem>>, vector<16x16x32xf32>
    tpu.vector_store %arg10[%c1_77, %c1_78, %c0_79], %83 {strides = array<i32>} : memref<18x18x32xf32, #tpu.memory_space<vmem>>, vector<16x16x32xf32>,
    %cst_80 = arith.constant 0.000000e+00 : f32
    %85 = vector.broadcast %cst_80 : f32 to vector<256x64xf32>
    %c0_81 = arith.constant 0 : index
    %c0_82 = arith.constant 0 : index
    %c0_83 = arith.constant 0 : index
    %86 = vector.load %arg10[%c0_81, %c0_82, %c0_83] : memref<18x18x32xf32, #tpu.memory_space<vmem>>, vector<16x16x32xf32>
    %87 = vector.shape_cast %86 : vector<16x16x32xf32> to vector<256x32xf32>
    %c0_84 = arith.constant 0 : index
    %c0_85 = arith.constant 0 : index
    %c0_86 = arith.constant 0 : index
    %c0_87 = arith.constant 0 : index
    %88 = vector.load %arg4[%c0_84, %c0_85, %c0_86, %c0_87] : memref<3x3x32x64xf32, #tpu.memory_space<vmem>>, vector<1x1x32x64xf32>
    %89 = vector.shape_cast %88 : vector<1x1x32x64xf32> to vector<32x64xf32>
    %cst_88 = arith.constant dense<0.000000e+00> : vector<256x64xf32>
    %90 = tpu.matmul %87, %89, %cst_88 {dimension_numbers = #tpu.dot_dimension_numbers<[1], [0], [0], [1], [0, 0, 1, 1], [], []>} : vector<256x32xf32>, vector<32x64xf32>, vector<256x64xf32> -> vector<256x64xf32>
    %91 = arith.addf %85, %90 : vector<256x64xf32>
    %c0_89 = arith.constant 0 : index
    %c1_90 = arith.constant 1 : index
    %c0_91 = arith.constant 0 : index
    %92 = vector.load %arg10[%c0_89, %c1_90, %c0_91] : memref<18x18x32xf32, #tpu.memory_space<vmem>>, vector<16x16x32xf32>
    %93 = vector.shape_cast %92 : vector<16x16x32xf32> to vector<256x32xf32>
    %c0_92 = arith.constant 0 : index
    %c1_93 = arith.constant 1 : index
    %c0_94 = arith.constant 0 : index
    %c0_95 = arith.constant 0 : index
    %94 = vector.load %arg4[%c0_92, %c1_93, %c0_94, %c0_95] : memref<3x3x32x64xf32, #tpu.memory_space<vmem>>, vector<1x1x32x64xf32>
    %95 = vector.shape_cast %94 : vector<1x1x32x64xf32> to vector<32x64xf32>
    %cst_96 = arith.constant dense<0.000000e+00> : vector<256x64xf32>
    %96 = tpu.matmul %93, %95, %cst_96 {dimension_numbers = #tpu.dot_dimension_numbers<[1], [0], [0], [1], [0, 0, 1, 1], [], []>} : vector<256x32xf32>, vector<32x64xf32>, vector<256x64xf32> -> vector<256x64xf32>
    %97 = arith.addf %91, %96 : vector<256x64xf32>
    %c0_97 = arith.constant 0 : index
    %c2_98 = arith.constant 2 : index
    %c0_99 = arith.constant 0 : index
    %98 = vector.load %arg10[%c0_97, %c2_98, %c0_99] : memref<18x18x32xf32, #tpu.memory_space<vmem>>, vector<16x16x32xf32>
    %99 = vector.shape_cast %98 : vector<16x16x32xf32> to vector<256x32xf32>
    %c0_100 = arith.constant 0 : index
    %c2_101 = arith.constant 2 : index
    %c0_102 = arith.constant 0 : index
    %c0_103 = arith.constant 0 : index
    %100 = vector.load %arg4[%c0_100, %c2_101, %c0_102, %c0_103] : memref<3x3x32x64xf32, #tpu.memory_space<vmem>>, vector<1x1x32x64xf32>
    %101 = vector.shape_cast %100 : vector<1x1x32x64xf32> to vector<32x64xf32>
    %cst_104 = arith.constant dense<0.000000e+00> : vector<256x64xf32>
    %102 = tpu.matmul %99, %101, %cst_104 {dimension_numbers = #tpu.dot_dimension_numbers<[1], [0], [0], [1], [0, 0, 1, 1], [], []>} : vector<256x32xf32>, vector<32x64xf32>, vector<256x64xf32> -> vector<256x64xf32>
    %103 = arith.addf %97, %102 : vector<256x64xf32>
    %c1_105 = arith.constant 1 : index
    %c0_106 = arith.constant 0 : index
    %c0_107 = arith.constant 0 : index
    %104 = vector.load %arg10[%c1_105, %c0_106, %c0_107] : memref<18x18x32xf32, #tpu.memory_space<vmem>>, vector<16x16x32xf32>
    %105 = vector.shape_cast %104 : vector<16x16x32xf32> to vector<256x32xf32>
    %c1_108 = arith.constant 1 : index
    %c0_109 = arith.constant 0 : index
    %c0_110 = arith.constant 0 : index
    %c0_111 = arith.constant 0 : index
    %106 = vector.load %arg4[%c1_108, %c0_109, %c0_110, %c0_111] : memref<3x3x32x64xf32, #tpu.memory_space<vmem>>, vector<1x1x32x64xf32>
    %107 = vector.shape_cast %106 : vector<1x1x32x64xf32> to vector<32x64xf32>
    %cst_112 = arith.constant dense<0.000000e+00> : vector<256x64xf32>
    %108 = tpu.matmul %105, %107, %cst_112 {dimension_numbers = #tpu.dot_dimension_numbers<[1], [0], [0], [1], [0, 0, 1, 1], [], []>} : vector<256x32xf32>, vector<32x64xf32>, vector<256x64xf32> -> vector<256x64xf32>
    %109 = arith.addf %103, %108 : vector<256x64xf32>
    %c1_113 = arith.constant 1 : index
    %c1_114 = arith.constant 1 : index
    %c0_115 = arith.constant 0 : index
    %110 = vector.load %arg10[%c1_113, %c1_114, %c0_115] : memref<18x18x32xf32, #tpu.memory_space<vmem>>, vector<16x16x32xf32>
    %111 = vector.shape_cast %110 : vector<16x16x32xf32> to vector<256x32xf32>
    %c1_116 = arith.constant 1 : index
    %c1_117 = arith.constant 1 : index
    %c0_118 = arith.constant 0 : index
    %c0_119 = arith.constant 0 : index
    %112 = vector.load %arg4[%c1_116, %c1_117, %c0_118, %c0_119] : memref<3x3x32x64xf32, #tpu.memory_space<vmem>>, vector<1x1x32x64xf32>
    %113 = vector.shape_cast %112 : vector<1x1x32x64xf32> to vector<32x64xf32>
    %cst_120 = arith.constant dense<0.000000e+00> : vector<256x64xf32>
    %114 = tpu.matmul %111, %113, %cst_120 {dimension_numbers = #tpu.dot_dimension_numbers<[1], [0], [0], [1], [0, 0, 1, 1], [], []>} : vector<256x32xf32>, vector<32x64xf32>, vector<256x64xf32> -> vector<256x64xf32>
    %115 = arith.addf %109, %114 : vector<256x64xf32>
    %c1_121 = arith.constant 1 : index
    %c2_122 = arith.constant 2 : index
    %c0_123 = arith.constant 0 : index
    %116 = vector.load %arg10[%c1_121, %c2_122, %c0_123] : memref<18x18x32xf32, #tpu.memory_space<vmem>>, vector<16x16x32xf32>
    %117 = vector.shape_cast %116 : vector<16x16x32xf32> to vector<256x32xf32>
    %c1_124 = arith.constant 1 : index
    %c2_125 = arith.constant 2 : index
    %c0_126 = arith.constant 0 : index
    %c0_127 = arith.constant 0 : index
    %118 = vector.load %arg4[%c1_124, %c2_125, %c0_126, %c0_127] : memref<3x3x32x64xf32, #tpu.memory_space<vmem>>, vector<1x1x32x64xf32>
    %119 = vector.shape_cast %118 : vector<1x1x32x64xf32> to vector<32x64xf32>
    %cst_128 = arith.constant dense<0.000000e+00> : vector<256x64xf32>
    %120 = tpu.matmul %117, %119, %cst_128 {dimension_numbers = #tpu.dot_dimension_numbers<[1], [0], [0], [1], [0, 0, 1, 1], [], []>} : vector<256x32xf32>, vector<32x64xf32>, vector<256x64xf32> -> vector<256x64xf32>
    %121 = arith.addf %115, %120 : vector<256x64xf32>
    %c2_129 = arith.constant 2 : index
    %c0_130 = arith.constant 0 : index
    %c0_131 = arith.constant 0 : index
    %122 = vector.load %arg10[%c2_129, %c0_130, %c0_131] : memref<18x18x32xf32, #tpu.memory_space<vmem>>, vector<16x16x32xf32>
    %123 = vector.shape_cast %122 : vector<16x16x32xf32> to vector<256x32xf32>
    %c2_132 = arith.constant 2 : index
    %c0_133 = arith.constant 0 : index
    %c0_134 = arith.constant 0 : index
    %c0_135 = arith.constant 0 : index
    %124 = vector.load %arg4[%c2_132, %c0_133, %c0_134, %c0_135] : memref<3x3x32x64xf32, #tpu.memory_space<vmem>>, vector<1x1x32x64xf32>
    %125 = vector.shape_cast %124 : vector<1x1x32x64xf32> to vector<32x64xf32>
    %cst_136 = arith.constant dense<0.000000e+00> : vector<256x64xf32>
    %126 = tpu.matmul %123, %125, %cst_136 {dimension_numbers = #tpu.dot_dimension_numbers<[1], [0], [0], [1], [0, 0, 1, 1], [], []>} : vector<256x32xf32>, vector<32x64xf32>, vector<256x64xf32> -> vector<256x64xf32>
    %127 = arith.addf %121, %126 : vector<256x64xf32>
    %c2_137 = arith.constant 2 : index
    %c1_138 = arith.constant 1 : index
    %c0_139 = arith.constant 0 : index
    %128 = vector.load %arg10[%c2_137, %c1_138, %c0_139] : memref<18x18x32xf32, #tpu.memory_space<vmem>>, vector<16x16x32xf32>
    %129 = vector.shape_cast %128 : vector<16x16x32xf32> to vector<256x32xf32>
    %c2_140 = arith.constant 2 : index
    %c1_141 = arith.constant 1 : index
    %c0_142 = arith.constant 0 : index
    %c0_143 = arith.constant 0 : index
    %130 = vector.load %arg4[%c2_140, %c1_141, %c0_142, %c0_143] : memref<3x3x32x64xf32, #tpu.memory_space<vmem>>, vector<1x1x32x64xf32>
    %131 = vector.shape_cast %130 : vector<1x1x32x64xf32> to vector<32x64xf32>
    %cst_144 = arith.constant dense<0.000000e+00> : vector<256x64xf32>
    %132 = tpu.matmul %129, %131, %cst_144 {dimension_numbers = #tpu.dot_dimension_numbers<[1], [0], [0], [1], [0, 0, 1, 1], [], []>} : vector<256x32xf32>, vector<32x64xf32>, vector<256x64xf32> -> vector<256x64xf32>
    %133 = arith.addf %127, %132 : vector<256x64xf32>
    %c2_145 = arith.constant 2 : index
    %c2_146 = arith.constant 2 : index
    %c0_147 = arith.constant 0 : index
    %134 = vector.load %arg10[%c2_145, %c2_146, %c0_147] : memref<18x18x32xf32, #tpu.memory_space<vmem>>, vector<16x16x32xf32>
    %135 = vector.shape_cast %134 : vector<16x16x32xf32> to vector<256x32xf32>
    %c2_148 = arith.constant 2 : index
    %c2_149 = arith.constant 2 : index
    %c0_150 = arith.constant 0 : index
    %c0_151 = arith.constant 0 : index
    %136 = vector.load %arg4[%c2_148, %c2_149, %c0_150, %c0_151] : memref<3x3x32x64xf32, #tpu.memory_space<vmem>>, vector<1x1x32x64xf32>
    %137 = vector.shape_cast %136 : vector<1x1x32x64xf32> to vector<32x64xf32>
    %cst_152 = arith.constant dense<0.000000e+00> : vector<256x64xf32>
    %138 = tpu.matmul %135, %137, %cst_152 {dimension_numbers = #tpu.dot_dimension_numbers<[1], [0], [0], [1], [0, 0, 1, 1], [], []>} : vector<256x32xf32>, vector<32x64xf32>, vector<256x64xf32> -> vector<256x64xf32>
    %139 = arith.addf %133, %138 : vector<256x64xf32>
    %c0_153 = arith.constant 0 : index
    %c0_154 = arith.constant 0 : index
    %140 = vector.load %arg5[%c0_153, %c0_154] : memref<1x64xf32, #tpu.memory_space<vmem>>, vector<1x64xf32>
    %141 = vector.broadcast %140 : vector<1x64xf32> to vector<256x64xf32>
    %142 = arith.addf %139, %141 : vector<256x64xf32>
    %cst_155 = arith.constant 0.000000e+00 : f32
    %143 = vector.broadcast %cst_155 : f32 to vector<18x18x64xf32>
    %c0_156 = arith.constant 0 : index
    %c0_157 = arith.constant 0 : index
    %c0_158 = arith.constant 0 : index
    %144 = vector.load %arg11[%c0_156, %c0_157, %c0_158] : memref<18x18x64xf32, #tpu.memory_space<vmem>>, vector<18x18x64xf32>
    tpu.vector_store %arg11[%c0_156, %c0_157, %c0_158], %143 {strides = array<i32>} : memref<18x18x64xf32, #tpu.memory_space<vmem>>, vector<18x18x64xf32>,
    %145 = vector.shape_cast %142 : vector<256x64xf32> to vector<16x16x64xf32>
    %c1_159 = arith.constant 1 : index
    %c1_160 = arith.constant 1 : index
    %c0_161 = arith.constant 0 : index
    %146 = vector.load %arg11[%c1_159, %c1_160, %c0_161] : memref<18x18x64xf32, #tpu.memory_space<vmem>>, vector<16x16x64xf32>
    tpu.vector_store %arg11[%c1_159, %c1_160, %c0_161], %145 {strides = array<i32>} : memref<18x18x64xf32, #tpu.memory_space<vmem>>, vector<16x16x64xf32>,
    %cst_162 = arith.constant 0.000000e+00 : f32
    %147 = vector.broadcast %cst_162 : f32 to vector<256x64xf32>
    %c0_163 = arith.constant 0 : index
    %c0_164 = arith.constant 0 : index
    %c0_165 = arith.constant 0 : index
    %148 = vector.load %arg11[%c0_163, %c0_164, %c0_165] : memref<18x18x64xf32, #tpu.memory_space<vmem>>, vector<16x16x64xf32>
    %149 = vector.shape_cast %148 : vector<16x16x64xf32> to vector<256x64xf32>
    %c0_166 = arith.constant 0 : index
    %c0_167 = arith.constant 0 : index
    %c0_168 = arith.constant 0 : index
    %c0_169 = arith.constant 0 : index
    %150 = vector.load %arg6[%c0_166, %c0_167, %c0_168, %c0_169] : memref<4x4x1x64xf32, #tpu.memory_space<vmem>>, vector<1x1x1x64xf32>
    %151 = vector.shape_cast %150 : vector<1x1x1x64xf32> to vector<1x64xf32>
    %152 = vector.broadcast %151 : vector<1x64xf32> to vector<256x64xf32>
    %153 = arith.mulf %149, %152 : vector<256x64xf32>
    %154 = arith.addf %147, %153 : vector<256x64xf32>
    %c0_170 = arith.constant 0 : index
    %c1_171 = arith.constant 1 : index
    %c0_172 = arith.constant 0 : index
    %155 = vector.load %arg11[%c0_170, %c1_171, %c0_172] : memref<18x18x64xf32, #tpu.memory_space<vmem>>, vector<16x16x64xf32>
    %156 = vector.shape_cast %155 : vector<16x16x64xf32> to vector<256x64xf32>
    %c0_173 = arith.constant 0 : index
    %c1_174 = arith.constant 1 : index
    %c0_175 = arith.constant 0 : index
    %c0_176 = arith.constant 0 : index
    %157 = vector.load %arg6[%c0_173, %c1_174, %c0_175, %c0_176] : memref<4x4x1x64xf32, #tpu.memory_space<vmem>>, vector<1x1x1x64xf32>
    %158 = vector.shape_cast %157 : vector<1x1x1x64xf32> to vector<1x64xf32>
    %159 = vector.broadcast %158 : vector<1x64xf32> to vector<256x64xf32>
    %160 = arith.mulf %156, %159 : vector<256x64xf32>
    %161 = arith.addf %154, %160 : vector<256x64xf32>
    %c1_177 = arith.constant 1 : index
    %c0_178 = arith.constant 0 : index
    %c0_179 = arith.constant 0 : index
    %162 = vector.load %arg11[%c1_177, %c0_178, %c0_179] : memref<18x18x64xf32, #tpu.memory_space<vmem>>, vector<16x16x64xf32>
    %163 = vector.shape_cast %162 : vector<16x16x64xf32> to vector<256x64xf32>
    %c0_180 = arith.constant 0 : index
    %c2_181 = arith.constant 2 : index
    %c0_182 = arith.constant 0 : index
    %c0_183 = arith.constant 0 : index
    %164 = vector.load %arg6[%c0_180, %c2_181, %c0_182, %c0_183] : memref<4x4x1x64xf32, #tpu.memory_space<vmem>>, vector<1x1x1x64xf32>
    %165 = vector.shape_cast %164 : vector<1x1x1x64xf32> to vector<1x64xf32>
    %166 = vector.broadcast %165 : vector<1x64xf32> to vector<256x64xf32>
    %167 = arith.mulf %163, %166 : vector<256x64xf32>
    %168 = arith.addf %161, %167 : vector<256x64xf32>
    %c1_184 = arith.constant 1 : index
    %c1_185 = arith.constant 1 : index
    %c0_186 = arith.constant 0 : index
    %169 = vector.load %arg11[%c1_184, %c1_185, %c0_186] : memref<18x18x64xf32, #tpu.memory_space<vmem>>, vector<16x16x64xf32>
    %170 = vector.shape_cast %169 : vector<16x16x64xf32> to vector<256x64xf32>
    %c0_187 = arith.constant 0 : index
    %c3 = arith.constant 3 : index
    %c0_188 = arith.constant 0 : index
    %c0_189 = arith.constant 0 : index
    %171 = vector.load %arg6[%c0_187, %c3, %c0_188, %c0_189] : memref<4x4x1x64xf32, #tpu.memory_space<vmem>>, vector<1x1x1x64xf32>
    %172 = vector.shape_cast %171 : vector<1x1x1x64xf32> to vector<1x64xf32>
    %173 = vector.broadcast %172 : vector<1x64xf32> to vector<256x64xf32>
    %174 = arith.mulf %170, %173 : vector<256x64xf32>
    %175 = arith.addf %168, %174 : vector<256x64xf32>
    %cst_190 = arith.constant dense<0.000000e+00> : vector<256xf32>
    %176 = vector.multi_reduction <add>, %175, %cst_190 [1] : vector<256x64xf32> to vector<256xf32>
    %177 = vector.shape_cast %176 : vector<256xf32> to vector<256x1xf32>
    %c0_191 = arith.constant 0 : index
    %c0_192 = arith.constant 0 : index
    %178 = vector.load %arg7[%c0_191, %c0_192] : memref<1x1xf32, #tpu.memory_space<vmem>>, vector<1x1xf32>
    %179 = vector.broadcast %178 : vector<1x1xf32> to vector<256x1xf32>
    %180 = arith.addf %177, %179 : vector<256x1xf32>
    %c0_193 = arith.constant 0 : index
    %c0_194 = arith.constant 0 : index
    %c0_195 = arith.constant 0 : index
    %c0_196 = arith.constant 0 : index
    %181 = vector.load %arg8[%c0_193, %c0_194, %c0_195, %c0_196] : memref<1x4x256x1xf32, #tpu.memory_space<vmem>>, vector<1x1x256x1xf32>
    %182 = vector.shape_cast %181 : vector<1x1x256x1xf32> to vector<256x1xf32>
    %183 = vector.shape_cast %180 : vector<256x1xf32> to vector<1x1x256x1xf32>
    tpu.vector_store %arg8[%c0_193, %c0_194, %c0_195, %c0_196], %183 {strides = array<i32>} : memref<1x4x256x1xf32, #tpu.memory_space<vmem>>, vector<1x1x256x1xf32>,
    %cst_197 = arith.constant 0.000000e+00 : f32
    %184 = vector.broadcast %cst_197 : f32 to vector<256x64xf32>
    %c0_198 = arith.constant 0 : index
    %c1_199 = arith.constant 1 : index
    %c0_200 = arith.constant 0 : index
    %185 = vector.load %arg11[%c0_198, %c1_199, %c0_200] : memref<18x18x64xf32, #tpu.memory_space<vmem>>, vector<16x16x64xf32>
    %186 = vector.shape_cast %185 : vector<16x16x64xf32> to vector<256x64xf32>
    %c1_201 = arith.constant 1 : index
    %c0_202 = arith.constant 0 : index
    %c0_203 = arith.constant 0 : index
    %c0_204 = arith.constant 0 : index
    %187 = vector.load %arg6[%c1_201, %c0_202, %c0_203, %c0_204] : memref<4x4x1x64xf32, #tpu.memory_space<vmem>>, vector<1x1x1x64xf32>
    %188 = vector.shape_cast %187 : vector<1x1x1x64xf32> to vector<1x64xf32>
    %189 = vector.broadcast %188 : vector<1x64xf32> to vector<256x64xf32>
    %190 = arith.mulf %186, %189 : vector<256x64xf32>
    %191 = arith.addf %184, %190 : vector<256x64xf32>
    %c0_205 = arith.constant 0 : index
    %c2_206 = arith.constant 2 : index
    %c0_207 = arith.constant 0 : index
    %192 = vector.load %arg11[%c0_205, %c2_206, %c0_207] : memref<18x18x64xf32, #tpu.memory_space<vmem>>, vector<16x16x64xf32>
    %193 = vector.shape_cast %192 : vector<16x16x64xf32> to vector<256x64xf32>
    %c1_208 = arith.constant 1 : index
    %c1_209 = arith.constant 1 : index
    %c0_210 = arith.constant 0 : index
    %c0_211 = arith.constant 0 : index
    %194 = vector.load %arg6[%c1_208, %c1_209, %c0_210, %c0_211] : memref<4x4x1x64xf32, #tpu.memory_space<vmem>>, vector<1x1x1x64xf32>
    %195 = vector.shape_cast %194 : vector<1x1x1x64xf32> to vector<1x64xf32>
    %196 = vector.broadcast %195 : vector<1x64xf32> to vector<256x64xf32>
    %197 = arith.mulf %193, %196 : vector<256x64xf32>
    %198 = arith.addf %191, %197 : vector<256x64xf32>
    %c1_212 = arith.constant 1 : index
    %c1_213 = arith.constant 1 : index
    %c0_214 = arith.constant 0 : index
    %199 = vector.load %arg11[%c1_212, %c1_213, %c0_214] : memref<18x18x64xf32, #tpu.memory_space<vmem>>, vector<16x16x64xf32>
    %200 = vector.shape_cast %199 : vector<16x16x64xf32> to vector<256x64xf32>
    %c1_215 = arith.constant 1 : index
    %c2_216 = arith.constant 2 : index
    %c0_217 = arith.constant 0 : index
    %c0_218 = arith.constant 0 : index
    %201 = vector.load %arg6[%c1_215, %c2_216, %c0_217, %c0_218] : memref<4x4x1x64xf32, #tpu.memory_space<vmem>>, vector<1x1x1x64xf32>
    %202 = vector.shape_cast %201 : vector<1x1x1x64xf32> to vector<1x64xf32>
    %203 = vector.broadcast %202 : vector<1x64xf32> to vector<256x64xf32>
    %204 = arith.mulf %200, %203 : vector<256x64xf32>
    %205 = arith.addf %198, %204 : vector<256x64xf32>
    %c1_219 = arith.constant 1 : index
    %c2_220 = arith.constant 2 : index
    %c0_221 = arith.constant 0 : index
    %206 = vector.load %arg11[%c1_219, %c2_220, %c0_221] : memref<18x18x64xf32, #tpu.memory_space<vmem>>, vector<16x16x64xf32>
    %207 = vector.shape_cast %206 : vector<16x16x64xf32> to vector<256x64xf32>
    %c1_222 = arith.constant 1 : index
    %c3_223 = arith.constant 3 : index
    %c0_224 = arith.constant 0 : index
    %c0_225 = arith.constant 0 : index
    %208 = vector.load %arg6[%c1_222, %c3_223, %c0_224, %c0_225] : memref<4x4x1x64xf32, #tpu.memory_space<vmem>>, vector<1x1x1x64xf32>
    %209 = vector.shape_cast %208 : vector<1x1x1x64xf32> to vector<1x64xf32>
    %210 = vector.broadcast %209 : vector<1x64xf32> to vector<256x64xf32>
    %211 = arith.mulf %207, %210 : vector<256x64xf32>
    %212 = arith.addf %205, %211 : vector<256x64xf32>
    %cst_226 = arith.constant dense<0.000000e+00> : vector<256xf32>
    %213 = vector.multi_reduction <add>, %212, %cst_226 [1] : vector<256x64xf32> to vector<256xf32>
    %214 = vector.shape_cast %213 : vector<256xf32> to vector<256x1xf32>
    %c0_227 = arith.constant 0 : index
    %c0_228 = arith.constant 0 : index
    %215 = vector.load %arg7[%c0_227, %c0_228] : memref<1x1xf32, #tpu.memory_space<vmem>>, vector<1x1xf32>
    %216 = vector.broadcast %215 : vector<1x1xf32> to vector<256x1xf32>
    %217 = arith.addf %214, %216 : vector<256x1xf32>
    %c0_229 = arith.constant 0 : index
    %c1_230 = arith.constant 1 : index
    %c0_231 = arith.constant 0 : index
    %c0_232 = arith.constant 0 : index
    %218 = vector.load %arg8[%c0_229, %c1_230, %c0_231, %c0_232] : memref<1x4x256x1xf32, #tpu.memory_space<vmem>>, vector<1x1x256x1xf32>
    %219 = vector.shape_cast %218 : vector<1x1x256x1xf32> to vector<256x1xf32>
    %220 = vector.shape_cast %217 : vector<256x1xf32> to vector<1x1x256x1xf32>
    tpu.vector_store %arg8[%c0_229, %c1_230, %c0_231, %c0_232], %220 {strides = array<i32>} : memref<1x4x256x1xf32, #tpu.memory_space<vmem>>, vector<1x1x256x1xf32>,
    %cst_233 = arith.constant 0.000000e+00 : f32
    %221 = vector.broadcast %cst_233 : f32 to vector<256x64xf32>
    %c1_234 = arith.constant 1 : index
    %c0_235 = arith.constant 0 : index
    %c0_236 = arith.constant 0 : index
    %222 = vector.load %arg11[%c1_234, %c0_235, %c0_236] : memref<18x18x64xf32, #tpu.memory_space<vmem>>, vector<16x16x64xf32>
    %223 = vector.shape_cast %222 : vector<16x16x64xf32> to vector<256x64xf32>
    %c2_237 = arith.constant 2 : index
    %c0_238 = arith.constant 0 : index
    %c0_239 = arith.constant 0 : index
    %c0_240 = arith.constant 0 : index
    %224 = vector.load %arg6[%c2_237, %c0_238, %c0_239, %c0_240] : memref<4x4x1x64xf32, #tpu.memory_space<vmem>>, vector<1x1x1x64xf32>
    %225 = vector.shape_cast %224 : vector<1x1x1x64xf32> to vector<1x64xf32>
    %226 = vector.broadcast %225 : vector<1x64xf32> to vector<256x64xf32>
    %227 = arith.mulf %223, %226 : vector<256x64xf32>
    %228 = arith.addf %221, %227 : vector<256x64xf32>
    %c1_241 = arith.constant 1 : index
    %c1_242 = arith.constant 1 : index
    %c0_243 = arith.constant 0 : index
    %229 = vector.load %arg11[%c1_241, %c1_242, %c0_243] : memref<18x18x64xf32, #tpu.memory_space<vmem>>, vector<16x16x64xf32>
    %230 = vector.shape_cast %229 : vector<16x16x64xf32> to vector<256x64xf32>
    %c2_244 = arith.constant 2 : index
    %c1_245 = arith.constant 1 : index
    %c0_246 = arith.constant 0 : index
    %c0_247 = arith.constant 0 : index
    %231 = vector.load %arg6[%c2_244, %c1_245, %c0_246, %c0_247] : memref<4x4x1x64xf32, #tpu.memory_space<vmem>>, vector<1x1x1x64xf32>
    %232 = vector.shape_cast %231 : vector<1x1x1x64xf32> to vector<1x64xf32>
    %233 = vector.broadcast %232 : vector<1x64xf32> to vector<256x64xf32>
    %234 = arith.mulf %230, %233 : vector<256x64xf32>
    %235 = arith.addf %228, %234 : vector<256x64xf32>
    %c2_248 = arith.constant 2 : index
    %c0_249 = arith.constant 0 : index
    %c0_250 = arith.constant 0 : index
    %236 = vector.load %arg11[%c2_248, %c0_249, %c0_250] : memref<18x18x64xf32, #tpu.memory_space<vmem>>, vector<16x16x64xf32>
    %237 = vector.shape_cast %236 : vector<16x16x64xf32> to vector<256x64xf32>
    %c2_251 = arith.constant 2 : index
    %c2_252 = arith.constant 2 : index
    %c0_253 = arith.constant 0 : index
    %c0_254 = arith.constant 0 : index
    %238 = vector.load %arg6[%c2_251, %c2_252, %c0_253, %c0_254] : memref<4x4x1x64xf32, #tpu.memory_space<vmem>>, vector<1x1x1x64xf32>
    %239 = vector.shape_cast %238 : vector<1x1x1x64xf32> to vector<1x64xf32>
    %240 = vector.broadcast %239 : vector<1x64xf32> to vector<256x64xf32>
    %241 = arith.mulf %237, %240 : vector<256x64xf32>
    %242 = arith.addf %235, %241 : vector<256x64xf32>
    %c2_255 = arith.constant 2 : index
    %c1_256 = arith.constant 1 : index
    %c0_257 = arith.constant 0 : index
    %243 = vector.load %arg11[%c2_255, %c1_256, %c0_257] : memref<18x18x64xf32, #tpu.memory_space<vmem>>, vector<16x16x64xf32>
    %244 = vector.shape_cast %243 : vector<16x16x64xf32> to vector<256x64xf32>
    %c2_258 = arith.constant 2 : index
    %c3_259 = arith.constant 3 : index
    %c0_260 = arith.constant 0 : index
    %c0_261 = arith.constant 0 : index
    %245 = vector.load %arg6[%c2_258, %c3_259, %c0_260, %c0_261] : memref<4x4x1x64xf32, #tpu.memory_space<vmem>>, vector<1x1x1x64xf32>
    %246 = vector.shape_cast %245 : vector<1x1x1x64xf32> to vector<1x64xf32>
    %247 = vector.broadcast %246 : vector<1x64xf32> to vector<256x64xf32>
    %248 = arith.mulf %244, %247 : vector<256x64xf32>
    %249 = arith.addf %242, %248 : vector<256x64xf32>
    %cst_262 = arith.constant dense<0.000000e+00> : vector<256xf32>
    %250 = vector.multi_reduction <add>, %249, %cst_262 [1] : vector<256x64xf32> to vector<256xf32>
    %251 = vector.shape_cast %250 : vector<256xf32> to vector<256x1xf32>
    %c0_263 = arith.constant 0 : index
    %c0_264 = arith.constant 0 : index
    %252 = vector.load %arg7[%c0_263, %c0_264] : memref<1x1xf32, #tpu.memory_space<vmem>>, vector<1x1xf32>
    %253 = vector.broadcast %252 : vector<1x1xf32> to vector<256x1xf32>
    %254 = arith.addf %251, %253 : vector<256x1xf32>
    %c0_265 = arith.constant 0 : index
    %c2_266 = arith.constant 2 : index
    %c0_267 = arith.constant 0 : index
    %c0_268 = arith.constant 0 : index
    %255 = vector.load %arg8[%c0_265, %c2_266, %c0_267, %c0_268] : memref<1x4x256x1xf32, #tpu.memory_space<vmem>>, vector<1x1x256x1xf32>
    %256 = vector.shape_cast %255 : vector<1x1x256x1xf32> to vector<256x1xf32>
    %257 = vector.shape_cast %254 : vector<256x1xf32> to vector<1x1x256x1xf32>
    tpu.vector_store %arg8[%c0_265, %c2_266, %c0_267, %c0_268], %257 {strides = array<i32>} : memref<1x4x256x1xf32, #tpu.memory_space<vmem>>, vector<1x1x256x1xf32>,
    %cst_269 = arith.constant 0.000000e+00 : f32
    %258 = vector.broadcast %cst_269 : f32 to vector<256x64xf32>
    %c1_270 = arith.constant 1 : index
    %c1_271 = arith.constant 1 : index
    %c0_272 = arith.constant 0 : index
    %259 = vector.load %arg11[%c1_270, %c1_271, %c0_272] : memref<18x18x64xf32, #tpu.memory_space<vmem>>, vector<16x16x64xf32>
    %260 = vector.shape_cast %259 : vector<16x16x64xf32> to vector<256x64xf32>
    %c3_273 = arith.constant 3 : index
    %c0_274 = arith.constant 0 : index
    %c0_275 = arith.constant 0 : index
    %c0_276 = arith.constant 0 : index
    %261 = vector.load %arg6[%c3_273, %c0_274, %c0_275, %c0_276] : memref<4x4x1x64xf32, #tpu.memory_space<vmem>>, vector<1x1x1x64xf32>
    %262 = vector.shape_cast %261 : vector<1x1x1x64xf32> to vector<1x64xf32>
    %263 = vector.broadcast %262 : vector<1x64xf32> to vector<256x64xf32>
    %264 = arith.mulf %260, %263 : vector<256x64xf32>
    %265 = arith.addf %258, %264 : vector<256x64xf32>
    %c1_277 = arith.constant 1 : index
    %c2_278 = arith.constant 2 : index
    %c0_279 = arith.constant 0 : index
    %266 = vector.load %arg11[%c1_277, %c2_278, %c0_279] : memref<18x18x64xf32, #tpu.memory_space<vmem>>, vector<16x16x64xf32>
    %267 = vector.shape_cast %266 : vector<16x16x64xf32> to vector<256x64xf32>
    %c3_280 = arith.constant 3 : index
    %c1_281 = arith.constant 1 : index
    %c0_282 = arith.constant 0 : index
    %c0_283 = arith.constant 0 : index
    %268 = vector.load %arg6[%c3_280, %c1_281, %c0_282, %c0_283] : memref<4x4x1x64xf32, #tpu.memory_space<vmem>>, vector<1x1x1x64xf32>
    %269 = vector.shape_cast %268 : vector<1x1x1x64xf32> to vector<1x64xf32>
    %270 = vector.broadcast %269 : vector<1x64xf32> to vector<256x64xf32>
    %271 = arith.mulf %267, %270 : vector<256x64xf32>
    %272 = arith.addf %265, %271 : vector<256x64xf32>
    %c2_284 = arith.constant 2 : index
    %c1_285 = arith.constant 1 : index
    %c0_286 = arith.constant 0 : index
    %273 = vector.load %arg11[%c2_284, %c1_285, %c0_286] : memref<18x18x64xf32, #tpu.memory_space<vmem>>, vector<16x16x64xf32>
    %274 = vector.shape_cast %273 : vector<16x16x64xf32> to vector<256x64xf32>
    %c3_287 = arith.constant 3 : index
    %c2_288 = arith.constant 2 : index
    %c0_289 = arith.constant 0 : index
    %c0_290 = arith.constant 0 : index
    %275 = vector.load %arg6[%c3_287, %c2_288, %c0_289, %c0_290] : memref<4x4x1x64xf32, #tpu.memory_space<vmem>>, vector<1x1x1x64xf32>
    %276 = vector.shape_cast %275 : vector<1x1x1x64xf32> to vector<1x64xf32>
    %277 = vector.broadcast %276 : vector<1x64xf32> to vector<256x64xf32>
    %278 = arith.mulf %274, %277 : vector<256x64xf32>
    %279 = arith.addf %272, %278 : vector<256x64xf32>
    %c2_291 = arith.constant 2 : index
    %c2_292 = arith.constant 2 : index
    %c0_293 = arith.constant 0 : index
    %280 = vector.load %arg11[%c2_291, %c2_292, %c0_293] : memref<18x18x64xf32, #tpu.memory_space<vmem>>, vector<16x16x64xf32>
    %281 = vector.shape_cast %280 : vector<16x16x64xf32> to vector<256x64xf32>
    %c3_294 = arith.constant 3 : index
    %c3_295 = arith.constant 3 : index
    %c0_296 = arith.constant 0 : index
    %c0_297 = arith.constant 0 : index
    %282 = vector.load %arg6[%c3_294, %c3_295, %c0_296, %c0_297] : memref<4x4x1x64xf32, #tpu.memory_space<vmem>>, vector<1x1x1x64xf32>
    %283 = vector.shape_cast %282 : vector<1x1x1x64xf32> to vector<1x64xf32>
    %284 = vector.broadcast %283 : vector<1x64xf32> to vector<256x64xf32>
    %285 = arith.mulf %281, %284 : vector<256x64xf32>
    %286 = arith.addf %279, %285 : vector<256x64xf32>
    %cst_298 = arith.constant dense<0.000000e+00> : vector<256xf32>
    %287 = vector.multi_reduction <add>, %286, %cst_298 [1] : vector<256x64xf32> to vector<256xf32>
    %288 = vector.shape_cast %287 : vector<256xf32> to vector<256x1xf32>
    %c0_299 = arith.constant 0 : index
    %c0_300 = arith.constant 0 : index
    %289 = vector.load %arg7[%c0_299, %c0_300] : memref<1x1xf32, #tpu.memory_space<vmem>>, vector<1x1xf32>
    %290 = vector.broadcast %289 : vector<1x1xf32> to vector<256x1xf32>
    %291 = arith.addf %288, %290 : vector<256x1xf32>
    %c0_301 = arith.constant 0 : index
    %c3_302 = arith.constant 3 : index
    %c0_303 = arith.constant 0 : index
    %c0_304 = arith.constant 0 : index
    %292 = vector.load %arg8[%c0_301, %c3_302, %c0_303, %c0_304] : memref<1x4x256x1xf32, #tpu.memory_space<vmem>>, vector<1x1x256x1xf32>
    %293 = vector.shape_cast %292 : vector<1x1x256x1xf32> to vector<256x1xf32>
    %294 = vector.shape_cast %291 : vector<256x1xf32> to vector<1x1x256x1xf32>
    tpu.vector_store %arg8[%c0_301, %c3_302, %c0_303, %c0_304], %294 {strides = array<i32>} : memref<1x4x256x1xf32, #tpu.memory_space<vmem>>, vector<1x1x256x1xf32>,
    return
  }
  func.func @transform_0(%arg0: i32) -> (i32, i32, i32, i32) {
    %c0_i32 = arith.constant 0 : i32
    %c0_i32_0 = arith.constant 0 : i32
    %c0_i32_1 = arith.constant 0 : i32
    %c0_i32_2 = arith.constant 0 : i32
    return %arg0, %c0_i32, %c0_i32_0, %c0_i32_1 : i32, i32, i32, i32
  }
  func.func @transform_1(%arg0: i32) -> (i32, i32, i32, i32) {
    %c0_i32 = arith.constant 0 : i32
    %c0_i32_0 = arith.constant 0 : i32
    %c0_i32_1 = arith.constant 0 : i32
    %c0_i32_2 = arith.constant 0 : i32
    %c0_i32_3 = arith.constant 0 : i32
    return %c0_i32, %c0_i32_0, %c0_i32_1, %c0_i32_2 : i32, i32, i32, i32
  }
  func.func @transform_2(%arg0: i32) -> (i32, i32) {
    %c0_i32 = arith.constant 0 : i32
    %c0_i32_0 = arith.constant 0 : i32
    %c0_i32_1 = arith.constant 0 : i32
    return %c0_i32, %c0_i32_0 : i32, i32
  }
  func.func @transform_3(%arg0: i32) -> (i32, i32, i32, i32) {
    %c0_i32 = arith.constant 0 : i32
    %c0_i32_0 = arith.constant 0 : i32
    %c0_i32_1 = arith.constant 0 : i32
    %c0_i32_2 = arith.constant 0 : i32
    %c0_i32_3 = arith.constant 0 : i32
    return %c0_i32, %c0_i32_0, %c0_i32_1, %c0_i32_2 : i32, i32, i32, i32
  }
  func.func @transform_4(%arg0: i32) -> (i32, i32) {
    %c0_i32 = arith.constant 0 : i32
    %c0_i32_0 = arith.constant 0 : i32
    %c0_i32_1 = arith.constant 0 : i32
    return %c0_i32, %c0_i32_0 : i32, i32
  }
  func.func @transform_5(%arg0: i32) -> (i32, i32, i32, i32) {
    %c0_i32 = arith.constant 0 : i32
    %c0_i32_0 = arith.constant 0 : i32
    %c0_i32_1 = arith.constant 0 : i32
    %c0_i32_2 = arith.constant 0 : i32
    %c0_i32_3 = arith.constant 0 : i32
    return %c0_i32, %c0_i32_0, %c0_i32_1, %c0_i32_2 : i32, i32, i32, i32
  }
  func.func @transform_6(%arg0: i32) -> (i32, i32) {
    %c0_i32 = arith.constant 0 : i32
    %c0_i32_0 = arith.constant 0 : i32
    %c0_i32_1 = arith.constant 0 : i32
    return %c0_i32, %c0_i32_0 : i32, i32
  }
  func.func @transform_7(%arg0: i32) -> (i32, i32, i32, i32) {
    %c0_i32 = arith.constant 0 : i32
    %c0_i32_0 = arith.constant 0 : i32
    %c0_i32_1 = arith.constant 0 : i32
    %c0_i32_2 = arith.constant 0 : i32
    return %arg0, %c0_i32, %c0_i32_0, %c0_i32_1 : i32, i32, i32, i32
  }
}

</mosaic_0001>

<bundles_post_ra>
// kernel: upsample_net_forward.1
= control target key start
LH: loop header
LB: loop body
LE: loop exit
PB: predicated region body
PF: predicated region fallthrough
CT: control target
= control target key end

     0   :  { %s8410_s26 = smov 0   ;;  %s12963_s0 = inlined_call_operand.vmem [shape: f32[2,16,16,1], index: 0, kind: input, shape index: {}]   ;;  %s12964_s1 = inlined_call_operand.vmem [shape: f32[3,3,1,32], index: 1, kind: input, shape index: {}]   ;;  %s12965_s2 = inlined_call_operand.vmem [shape: f32[1,32], index: 2, kind: input, shape index: {}]   ;;  %s12966_s3 = inlined_call_operand.vmem [shape: f32[3,3,32,64], index: 3, kind: input, shape index: {}]   ;;  %s12967_s4 = inlined_call_operand.vmem [shape: f32[1,64], index: 4, kind: input, shape index: {}]   ;;  %s12968_s5 = inlined_call_operand.vmem [shape: f32[4,4,1,64], index: 5, kind: input, shape index: {}]   ;;  %s12969_s6 = inlined_call_operand.<no memory space> [shape: f32[1,1], index: 6, kind: input, shape index: {}]   ;;  %s12970_s7 = inlined_call_operand.vmem [shape: f32[2,4,256,1], index: 7, kind: output, shape index: {}]  }
   0x1   :  { %v12_v0 = vstv %s12969_s6 }
   0x2   :  { %13 = vst [vmem:[#allocation5] sm:$0x1] %v12_v0 }
   0x3 LB: > { %s7769_s27 = sadd.s32 4294967295, %s8363_s26   ;;  %p7773_p0 = scmp.ge.s32.totalorder %s8363_s26, 1  ;;  %s8363_s26 = sphi %s8410_s26, %s19_s26  }
   0x4   : > { %p239_p1 = scmp.lt.s32.totalorder %s8363_s26, 3 }
   0x6   : > { %p240_p2 = pnand %p7773_p0, %p239_p1 }
   0x8   : > { %243 = sbr.rel (%p240_p2) target bundleno = 1979 (0x7bb), region = 48 }
   0xd   : > { %vm281_vm0 = vcmask 7168   ;;  %v8365_v1 = vmov 0   ;;  %v12971_v2 = vmov 0.0   ;;  %p271_p3 = scmp.lt.s32.totalorder %s7769_s27, 1  ;;  %vm284_vm1 = vcmask 1024  }
   0xe   : > { %8243 = vset.pattern.permute.xlu0 %v8365_v1  ;;  %282 = vst.msk [vmem:[#allocation2] sm:$0xff] %vm281_vm0, %v12971_v2  ;;  %8245 = vset.pattern.permute.xlu2 %v8365_v1  ;;  %vm2787_vm2 = vcmask 261120   ;;  %vm2790_vm3 = vcmask 254976   ;;  %vm5350_vm4 = vcmask 523264   ;;  %vm5353_vm5 = vcmask 517120  }
   0xf   : > { %283 = vst.msk [vmem:[#allocation2 + $0x8] sm:$0xff] %vm281_vm0, %v12971_v2  ;;  %8244 = vset.pattern.permute.xlu1 %v8365_v1  ;;  %s13576_s27 = smov (!%p271_p3, %s7769_s27), 1 }
  0x10   : > { %286 = vst.msk [vmem:[#allocation2 + $0x18] sm:$0xff] %vm281_vm0, %v12971_v2  ;;  %s8219_s6 = sshll.u32 %s13576_s27, 8  ;;  %s8220_s12 = sshll.u32 %s13576_s27, 10 }
  0x11   : > { %287 = vst.msk [vmem:[#allocation2 + $0x20] sm:$0xff] %vm281_vm0, %v12971_v2  ;;  %s8490_s30 = scalar_lea.vmem %s12963_s0, %s8219_s6  ;;  %s11514_s16 = scalar_lea.vmem %s12970_s7, %s8220_s12 }
  0x12   : > { %289 = vst.msk [vmem:[#allocation2 + $0x30] sm:$0xff] %vm281_vm0, %v12971_v2  ;;  %v339_v5 = vld [vmem:[%s8490_s30 + $0x10] sm:$0xff]  ;;  %v337_v6 = vld [vmem:[%s8490_s30] sm:$0xff]  ;;  %v340_v7 = vld [vmem:[%s8490_s30 + $0x18] sm:$0xff] }
  0x13   : > { %290 = vst.msk [vmem:[#allocation2 + $0x38] sm:$0xff] %vm281_vm0, %v12971_v2  ;;  %v338_v11 = vld [vmem:[%s8490_s30 + $0x8] sm:$0xff]  ;;  %v341_v12 = vld [vmem:[%s8490_s30 + $0x20] sm:$0xff]  ;;  %v343_v13 = vld [vmem:[%s8490_s30 + $0x30] sm:$0xff] }
  0x14   : > { %292 = vst.msk [vmem:[#allocation2 + $0x48] sm:$0xff] %vm281_vm0, %v12971_v2  ;;  %v342_v14 = vld [vmem:[%s8490_s30 + $0x28] sm:$0xff]  ;;  %v344_v15 = vld [vmem:[%s8490_s30 + $0x38] sm:$0xff]  ;;  %v345_v16 = vld [vmem:[%s8490_s30 + $0x40] sm:$0xff] }
  0x15   : > { %v402_v3 = vld [vmem:[#allocation2] sm:$0xff]  ;;  %293 = vst.msk [vmem:[#allocation2 + $0x50] sm:$0xff] %vm281_vm0, %v12971_v2  ;;  %v346_v17 = vld [vmem:[%s8490_s30 + $0x48] sm:$0xff]  ;;  %v347_v18 = vld [vmem:[%s8490_s30 + $0x50] sm:$0xff] }
  0x16   : > { %437 = vperm.xlu0 %8243, %v402_v3   ;;  %295 = vst.msk [vmem:[#allocation2 + $0x60] sm:$0xff] %vm281_vm0, %v12971_v2  ;;  %v403_v4 = vld [vmem:[#allocation2 + $0x8] sm:$0xff]  ;;  %v349_v19 = vld [vmem:[%s8490_s30 + $0x60] sm:$0xff]  ;;  %v348_v20 = vld [vmem:[%s8490_s30 + $0x58] sm:$0xff] }
  0x17   : > { %296 = vst.msk [vmem:[#allocation2 + $0x68] sm:$0xff] %vm281_vm0, %v12971_v2  ;;  %v350_v22 = vld [vmem:[%s8490_s30 + $0x68] sm:$0xff]  ;;  %v351_v24 = vld [vmem:[%s8490_s30 + $0x70] sm:$0xff]  ;;  %v352_v26 = vld [vmem:[%s8490_s30 + $0x78] sm:$0xff] }
  0x18   : > { %298 = vst.msk [vmem:[#allocation2 + $0x78] sm:$0xff] %vm281_vm0, %v12971_v2  ;;  %v353_v27 = vld [vmem:[%s8490_s30 + $0x80] sm:$0xff]  ;;  %v355_v28 = vld [vmem:[%s8490_s30 + $0x90] sm:$0xff]  ;;  %v354_v29 = vld [vmem:[%s8490_s30 + $0x88] sm:$0xff] }
  0x19   : > { %299 = vst.msk [vmem:[#allocation2 + $0x80] sm:$0xff] %vm281_vm0, %v12971_v2  ;;  %v356_v31 = vld [vmem:[%s8490_s30 + $0x98] sm:$0xff]  ;;  %v357_v34 = vld [vmem:[%s8490_s30 + $0xa0] sm:$0xff]  ;;  %v358_v35 = vld [vmem:[%s8490_s30 + $0xa8] sm:$0xff] }
  0x1a   : > { %301 = vst.msk [vmem:[#allocation2 + $0x90] sm:$0xff] %vm281_vm0, %v12971_v2  ;;  %v359_v36 = vld [vmem:[%s8490_s30 + $0xb0] sm:$0xff]  ;;  %v361_v40 = vld [vmem:[%s8490_s30 + $0xc0] sm:$0xff]  ;;  %v360_v41 = vld [vmem:[%s8490_s30 + $0xb8] sm:$0xff] }
  0x1b   : > { %302 = vst.msk [vmem:[#allocation2 + $0x98] sm:$0xff] %vm281_vm0, %v12971_v2  ;;  %v362_v42 = vld [vmem:[%s8490_s30 + $0xc8] sm:$0xff]  ;;  %v363_v46 = vld [vmem:[%s8490_s30 + $0xd0] sm:$0xff]  ;;  %v364_v47 = vld [vmem:[%s8490_s30 + $0xd8] sm:$0xff] }
  0x1c   : > { %304 = vst.msk [vmem:[#allocation2 + $0xa8] sm:$0xff] %vm281_vm0, %v12971_v2  ;;  %v365_v48 = vld [vmem:[%s8490_s30 + $0xe0] sm:$0xff]  ;;  %v366_v52 = vld [vmem:[%s8490_s30 + $0xe8] sm:$0xff] }
  0x1d   : > { %305 = vst.msk [vmem:[#allocation2 + $0xb0] sm:$0xff] %vm281_vm0, %v12971_v2  ;;  %v662_v0 = vld [vmem:[#allocation2 + $0x1] sm:$0xff] }
  0x1e   : > { %307 = vst.msk [vmem:[#allocation2 + $0xc0] sm:$0xff] %vm281_vm0, %v12971_v2  ;;  %442 = vperm.xlu0 %8243, %v403_v4  }
  0x1f   : > { %308 = vst.msk [vmem:[#allocation2 + $0xc8] sm:$0xff] %vm281_vm0, %v12971_v2 }
  0x20   : > { %310 = vst.msk [vmem:[#allocation2 + $0xd8] sm:$0xff] %vm281_vm0, %v12971_v2 }
  0x21   : > { %311 = vst.msk [vmem:[#allocation2 + $0xe0] sm:$0xff] %vm281_vm0, %v12971_v2 }
  0x22   : > { %313 = vst.msk [vmem:[#allocation2 + $0xf0] sm:$0xff] %vm281_vm0, %v12971_v2 }
  0x23   : > { %314 = vst.msk [vmem:[#allocation2 + $0xf8] sm:$0xff] %vm281_vm0, %v12971_v2 }
  0x24   : > { %316 = vst.msk [vmem:[#allocation2 + $0x108] sm:$0xff] %vm281_vm0, %v12971_v2 }
  0x25   : > { %317 = vst.msk [vmem:[#allocation2 + $0x110] sm:$0xff] %vm281_vm0, %v12971_v2 }
  0x26   : > { %319 = vst.msk [vmem:[#allocation2 + $0x120] sm:$0xff] %vm281_vm0, %v12971_v2 }
  0x27   : > { %320 = vst.msk [vmem:[#allocation2 + $0x128] sm:$0xff] %vm281_vm0, %v12971_v2 }
  0x28   : > { %322 = vst.msk [vmem:[#allocation2 + $0x138] sm:$0xff] %vm281_vm0, %v12971_v2 }
  0x29   : > { %323 = vst.msk [vmem:[#allocation2 + $0x140] sm:$0xff] %vm281_vm0, %v12971_v2 }
  0x2a   : > { %325 = vst.msk [vmem:[#allocation2 + $0x150] sm:$0xff] %vm281_vm0, %v12971_v2 }
  0x2b   : > { %326 = vst.msk [vmem:[#allocation2 + $0x158] sm:$0xff] %vm281_vm0, %v12971_v2 }
  0x2c   : > { %328 = vst.msk [vmem:[#allocation2 + $0x168] sm:$0xff] %vm281_vm0, %v12971_v2 }
  0x2d   : > { %329 = vst.msk [vmem:[#allocation2 + $0x170] sm:$0xff] %vm281_vm0, %v12971_v2 }
  0x2e   : > { %331 = vst.msk [vmem:[#allocation2 + $0x180] sm:$0xff] %vm281_vm0, %v12971_v2 }
  0x2f   : > { %332 = vst.msk [vmem:[#allocation2 + $0x188] sm:$0xff] %vm281_vm0, %v12971_v2 }
  0x30   : > { %334 = vst.msk [vmem:[#allocation2 + $0x198] sm:$0xff] %vm281_vm0, %v12971_v2 }
  0x31   : > { %335 = vst.msk [vmem:[#allocation2 + $0x1a0] sm:$0xff] %vm281_vm0, %v12971_v2 }
  0x32   : > { %372 = vst.msk [vmem:[#allocation2 + $0x31] sm:$0xff] %vm281_vm0, %v339_v5 }
  0x33   : > { %370 = vst.msk [vmem:[#allocation2 + $0x19] sm:$0xff] %vm281_vm0, %v337_v6 }
  0x34   : > { %291 = vst.msk [vmem:[#allocation2 + $0x40] sm:$0x3] %vm284_vm1, %v12971_v2 }
  0x35   : > { %373 = vst.msk [vmem:[#allocation2 + $0x39] sm:$0xff] %vm281_vm0, %v340_v7 }
  0x36   : > { %285 = vst.msk [vmem:[#allocation2 + $0x10] sm:$0x3] %vm284_vm1, %v12971_v2 }
  0x37   : > { %288 = vst.msk [vmem:[#allocation2 + $0x28] sm:$0x3] %vm284_vm1, %v12971_v2 }
  0x38   : > { %294 = vst.msk [vmem:[#allocation2 + $0x58] sm:$0x3] %vm284_vm1, %v12971_v2 }
  0x39   : > { %v8516_v8 = vld [vmem:[#allocation2 + $0x30] sm:$0xff]  ;;  %297 = vst.msk [vmem:[#allocation2 + $0x70] sm:$0x3] %vm284_vm1, %v12971_v2 }
  0x3a   : > { %457 = vperm.xlu2 %8245, %v8516_v8   ;;  %v8521_v9 = vld [vmem:[#allocation2 + $0x18] sm:$0xff]  ;;  %300 = vst.msk [vmem:[#allocation2 + $0x88] sm:$0x3] %vm284_vm1, %v12971_v2 }
  0x3b   : > { %447 = vperm.xlu1 %8244, %v8521_v9   ;;  %303 = vst.msk [vmem:[#allocation2 + $0xa0] sm:$0x3] %vm284_vm1, %v12971_v2  ;;  %v8693_v6 = vld [vmem:[#allocation2 + $0x19] sm:$0xff]  ;;  %v8695_v7 = vld [vmem:[#allocation2 + $0x31] sm:$0xff] }
  0x3c   : > { %306 = vst.msk [vmem:[#allocation2 + $0xb8] sm:$0x3] %vm284_vm1, %v12971_v2  ;;  %v8534_v10 = vld [vmem:[#allocation2 + $0x38] sm:$0xff] }
  0x3d   : > { %309 = vst.msk [vmem:[#allocation2 + $0xd0] sm:$0x3] %vm284_vm1, %v12971_v2  ;;  %v663_v3 = vld [vmem:[#allocation2 + $0x9] sm:$0xff] }
  0x3e   : > { %312 = vst.msk [vmem:[#allocation2 + $0xe8] sm:$0x3] %vm284_vm1, %v12971_v2 }
  0x3f   : > { %315 = vst.msk [vmem:[#allocation2 + $0x100] sm:$0x3] %vm284_vm1, %v12971_v2 }
  0x40   : > { %318 = vst.msk [vmem:[#allocation2 + $0x118] sm:$0x3] %vm284_vm1, %v12971_v2 }
  0x41   : > { %321 = vst.msk [vmem:[#allocation2 + $0x130] sm:$0x3] %vm284_vm1, %v12971_v2 }
  0x42   : > { %462 = vperm.xlu2 %8245, %v8534_v10   ;;  %324 = vst.msk [vmem:[#allocation2 + $0x148] sm:$0x3] %vm284_vm1, %v12971_v2 }
  0x43   : > { %327 = vst.msk [vmem:[#allocation2 + $0x160] sm:$0x3] %vm284_vm1, %v12971_v2 }
  0x44   : > { %330 = vst.msk [vmem:[#allocation2 + $0x178] sm:$0x3] %vm284_vm1, %v12971_v2 }
  0x45   : > { %333 = vst.msk [vmem:[#allocation2 + $0x190] sm:$0x3] %vm284_vm1, %v12971_v2 }
  0x46   : > { %336 = vst.msk [vmem:[#allocation2 + $0x1a8] sm:$0x3] %vm284_vm1, %v12971_v2 }
  0x47   : > { %371 = vst.msk [vmem:[#allocation2 + $0x21] sm:$0xff] %vm281_vm0, %v338_v11 }
  0x48   : > { %374 = vst.msk [vmem:[#allocation2 + $0x49] sm:$0xff] %vm281_vm0, %v341_v12 }
  0x49   : > { %376 = vst.msk [vmem:[#allocation2 + $0x61] sm:$0xff] %vm281_vm0, %v343_v13  ;;  %v8704_v13 = vld [vmem:[#allocation2 + $0x39] sm:$0xff] }
  0x4a   : > { %375 = vst.msk [vmem:[#allocation2 + $0x51] sm:$0xff] %vm281_vm0, %v342_v14 }
  0x4b   : > { %377 = vst.msk [vmem:[#allocation2 + $0x69] sm:$0xff] %vm281_vm0, %v344_v15 }
  0x4c   : > { %378 = vst.msk [vmem:[#allocation2 + $0x79] sm:$0xff] %vm281_vm0, %v345_v16 }
  0x4d   : > { %379 = vst.msk [vmem:[#allocation2 + $0x81] sm:$0xff] %vm281_vm0, %v346_v17 }
  0x4e   : > { %v8570_v21 = vld [vmem:[#allocation2 + $0x20] sm:$0xff]  ;;  %380 = vst.msk [vmem:[#allocation2 + $0x91] sm:$0xff] %vm281_vm0, %v347_v18 }
  0x4f   : > { %452 = vperm.xlu1 %8244, %v8570_v21   ;;  %v8575_v23 = vld [vmem:[#allocation2 + $0x48] sm:$0xff]  ;;  %382 = vst.msk [vmem:[#allocation2 + $0xa9] sm:$0xff] %vm281_vm0, %v349_v19 }
  0x50   : > { %467 = vperm.xlu0 %8243, %v8575_v23   ;;  %v8580_v25 = vld [vmem:[#allocation2 + $0x60] sm:$0xff]  ;;  %381 = vst.msk [vmem:[#allocation2 + $0x99] sm:$0xff] %vm281_vm0, %v348_v20  ;;  %v8697_v11 = vld [vmem:[#allocation2 + $0x49] sm:$0xff] }
  0x51   : > { %477 = vperm.xlu2 %8245, %v8580_v25   ;;  %383 = vst.msk [vmem:[#allocation2 + $0xb1] sm:$0xff] %vm281_vm0, %v350_v22  ;;  %v8591_v30 = vld [vmem:[#allocation2 + $0x50] sm:$0xff]  ;;  %v8687_v4 = vld [vmem:[#allocation2 + $0x21] sm:$0xff] }
  0x52   : > { %384 = vst.msk [vmem:[#allocation2 + $0xc1] sm:$0xff] %vm281_vm0, %v351_v24  ;;  %v8595_v32 = vld [vmem:[#allocation2 + $0x68] sm:$0xff]  ;;  %v8706_v14 = vld [vmem:[#allocation2 + $0x51] sm:$0xff] }
  0x53   : > { %385 = vst.msk [vmem:[#allocation2 + $0xc9] sm:$0xff] %vm281_vm0, %v352_v26  ;;  %v8611_v37 = vld [vmem:[#allocation2 + $0x78] sm:$0xff]  ;;  %v8708_v15 = vld [vmem:[#allocation2 + $0x69] sm:$0xff]  ;;  %v8715_v17 = vld [vmem:[#allocation2 + $0x61] sm:$0xff] }
  0x54   : > { %386 = vst.msk [vmem:[#allocation2 + $0xd9] sm:$0xff] %vm281_vm0, %v353_v27  ;;  %v8598_v33 = vld [vmem:[#allocation2 + $0x80] sm:$0xff] }
  0x55   : > { %388 = vst.msk [vmem:[#allocation2 + $0xf1] sm:$0xff] %vm281_vm0, %v355_v28  ;;  %v8613_v38 = vld [vmem:[#allocation2 + $0x90] sm:$0xff]  ;;  %v8717_v18 = vld [vmem:[#allocation2 + $0x79] sm:$0xff]  ;;  %v8728_v24 = vld [vmem:[#allocation2 + $0x81] sm:$0xff] }
  0x56   : > { %387 = vst.msk [vmem:[#allocation2 + $0xe1] sm:$0xff] %vm281_vm0, %v354_v29  ;;  %v8615_v39 = vld [vmem:[#allocation2 + $0xa8] sm:$0xff]  ;;  %v8721_v20 = vld [vmem:[#allocation2 + $0x91] sm:$0xff] }
  0x57   : > { %472 = vperm.xlu1 %8244, %v8591_v30   ;;  %389 = vst.msk [vmem:[#allocation2 + $0xf9] sm:$0xff] %vm281_vm0, %v356_v31  ;;  %v8626_v43 = vld [vmem:[#allocation2 + $0x98] sm:$0xff] }
  0x58   : > { %482 = vperm.xlu0 %8243, %v8595_v32   ;;  %390 = vst.msk [vmem:[#allocation2 + $0x109] sm:$0xff] %vm281_vm0, %v357_v34  ;;  %v8628_v44 = vld [vmem:[#allocation2 + $0xb0] sm:$0xff]  ;;  %v8730_v26 = vld [vmem:[#allocation2 + $0x99] sm:$0xff] }
  0x59   : > { %492 = vperm.xlu2 %8245, %v8598_v33   ;;  %391 = vst.msk [vmem:[#allocation2 + $0x111] sm:$0xff] %vm281_vm0, %v358_v35  ;;  %v8641_v49 = vld [vmem:[#allocation2 + $0xc0] sm:$0xff]  ;;  %v8732_v27 = vld [vmem:[#allocation2 + $0xb1] sm:$0xff]  ;;  %v8743_v34 = vld [vmem:[#allocation2 + $0xa9] sm:$0xff] }
  0x5a   : > { %392 = vst.msk [vmem:[#allocation2 + $0x121] sm:$0xff] %vm281_vm0, %v359_v36  ;;  %v8630_v45 = vld [vmem:[#allocation2 + $0xc8] sm:$0xff] }
  0x5b   : > { %394 = vst.msk [vmem:[#allocation2 + $0x139] sm:$0xff] %vm281_vm0, %v361_v40  ;;  %v8643_v50 = vld [vmem:[#allocation2 + $0xd8] sm:$0xff]  ;;  %v8745_v35 = vld [vmem:[#allocation2 + $0xc1] sm:$0xff] }
  0x5c   : > { %393 = vst.msk [vmem:[#allocation2 + $0x129] sm:$0xff] %vm281_vm0, %v360_v41  ;;  %v8645_v51 = vld [vmem:[#allocation2 + $0xf0] sm:$0xff]  ;;  %v8747_v36 = vld [vmem:[#allocation2 + $0xd9] sm:$0xff] }
  0x5d   : > { %395 = vst.msk [vmem:[#allocation2 + $0x141] sm:$0xff] %vm281_vm0, %v362_v42  ;;  %v8652_v53 = vld [vmem:[#allocation2 + $0xe0] sm:$0xff]  ;;  %v8773_v2 = vld [vmem:[#allocation2 + $0xf1] sm:$0xff] }
  0x5e   : > { %396 = vst.msk [vmem:[#allocation2 + $0x151] sm:$0xff] %vm281_vm0, %v363_v46  ;;  %v8654_v54 = vld [vmem:[#allocation2 + $0xf8] sm:$0xff]  ;;  %v8758_v46 = vld [vmem:[#allocation2 + $0xc9] sm:$0xff] }
  0x5f   : > { %487 = vperm.xlu1 %8244, %v8611_v37   ;;  %397 = vst.msk [vmem:[#allocation2 + $0x159] sm:$0xff] %vm281_vm0, %v364_v47  ;;  %v8661_v56 = vld [vmem:[#allocation2 + $0x108] sm:$0xff] }
  0x60   : > { %497 = vperm.xlu0 %8243, %v8613_v38   ;;  %398 = vst.msk [vmem:[#allocation2 + $0x169] sm:$0xff] %vm281_vm0, %v365_v48  ;;  %v8656_v55 = vld [vmem:[#allocation2 + $0x110] sm:$0xff]  ;;  %v8760_v47 = vld [vmem:[#allocation2 + $0xe1] sm:$0xff]  ;;  %v8762_v48 = vld [vmem:[#allocation2 + $0xf9] sm:$0xff] }
  0x61   : > { %507 = vperm.xlu2 %8245, %v8615_v39   ;;  %399 = vst.msk [vmem:[#allocation2 + $0x171] sm:$0xff] %vm281_vm0, %v366_v52  ;;  %v8663_v57 = vld [vmem:[#allocation2 + $0x120] sm:$0xff] }
  0x62   : > { %v8665_v58 = vld [vmem:[#allocation2 + $0x138] sm:$0xff] }
  0x63   : > { %v8670_v59 = vld [vmem:[#allocation2 + $0x128] sm:$0xff] }
  0x64   : > { %v8672_v60 = vld [vmem:[#allocation2 + $0x140] sm:$0xff] }
  0x65   : > { %v8679_v62 = vld [vmem:[#allocation2 + $0x150] sm:$0xff] }
  0x66   : > { %v8674_v61 = vld [vmem:[#allocation2 + $0x158] sm:$0xff] }
  0x67   : > { %502 = vperm.xlu1 %8244, %v8626_v43   ;;  %v8681_v63 = vld [vmem:[#allocation2 + $0x168] sm:$0xff] }
  0x68   : > { %512 = vperm.xlu0 %8243, %v8628_v44   ;;  %v8685_v1 = vld [vmem:[#allocation2 + $0x170] sm:$0xff] }
  0x69   : > { %522 = vperm.xlu2 %8245, %v8630_v45  }
  0x6f   : > { %517 = vperm.xlu1 %8244, %v8641_v49  }
  0x70   : > { %527 = vperm.xlu0 %8243, %v8643_v50  }
  0x71   : > { %537 = vperm.xlu2 %8245, %v8645_v51  }
  0x77   : > { %532 = vperm.xlu1 %8244, %v8652_v53  }
  0x78   : > { %542 = vperm.xlu0 %8243, %v8654_v54  }
  0x79   : > { %552 = vperm.xlu2 %8245, %v8656_v55  }
  0x7f   : > { %547 = vperm.xlu1 %8244, %v8661_v56  }
  0x80   : > { %557 = vperm.xlu0 %8243, %v8663_v57  }
  0x81   : > { %567 = vperm.xlu2 %8245, %v8665_v58  }
  0x87   : > { %562 = vperm.xlu1 %8244, %v8670_v59  }
  0x88   : > { %572 = vperm.xlu0 %8243, %v8672_v60   ;;  %v8719_v19 = vpop.permute.xlu0 %437 }
  0x89   : > { %582 = vperm.xlu2 %8245, %v8674_v61   ;;  %13022 = vst [vmem:[#allocation9_spill] sm:$0xff] %v8719_v19 }
  0x8f   : > { %577 = vperm.xlu1 %8244, %v8679_v62  }
  0x90   : > { %587 = vperm.xlu0 %8243, %v8681_v63   ;;  %v8738_v29 = vpop.permute.xlu0 %442 }
  0x91   : > { %698 = vperm.xlu2 %8245, %v662_v0   ;;  %13025 = vst [vmem:[#allocation12_spill] sm:$0xff] %v8738_v29  ;;  %v8788_v29 = vld [vmem:[#allocation2 + $0x111] sm:$0xff] }
  0x94   : > { %v8690_v5 = vpop.permute.xlu2 %457 }
  0x95   : > { %13019 = vst [vmem:[#allocation6_spill] sm:$0xff] %v8690_v5  ;;  %v8777_v5 = vld [vmem:[#allocation2 + $0x121] sm:$0xff] }
  0x97   : > { %592 = vperm.xlu1 %8244, %v8685_v1  }
  0x98   : > { %703 = vperm.xlu0 %8243, %v663_v3  }
  0x99   : > { %713 = vperm.xlu2 %8245, %v8687_v4  }
  0x9c   : > { %v8702_v12 = vpop.permute.xlu2 %462 }
  0x9d   : > { %13020 = vst [vmem:[#allocation7_spill] sm:$0xff] %v8702_v12  ;;  %v8775_v12 = vld [vmem:[#allocation2 + $0x109] sm:$0xff] }
  0x9f   : > { %708 = vperm.xlu1 %8244, %v8693_v6  }
  0xa0   : > { %718 = vperm.xlu0 %8243, %v8695_v7  }
  0xa1   : > { %728 = vperm.xlu2 %8245, %v8697_v11  }
  0xa7   : > { %723 = vperm.xlu1 %8244, %v8704_v13  }
  0xa8   : > { %733 = vperm.xlu0 %8243, %v8706_v14  }
  0xa9   : > { %743 = vperm.xlu2 %8245, %v8708_v15  }
  0xab   : > { %v8713_v16 = vpop.permute.xlu2 %477 }
  0xac   : > { %13021 = vst [vmem:[#allocation8_spill] sm:$0xff] %v8713_v16 }
  0xad   : > { %v8735_v28 = vpop.permute.xlu1 %447 }
  0xae   : > { %13024 = vst [vmem:[#allocation11_spill] sm:$0xff] %v8735_v28 }
  0xaf   : > { %738 = vperm.xlu1 %8244, %v8715_v17  }
  0xb0   : > { %748 = vperm.xlu0 %8243, %v8717_v18  }
  0xb1   : > { %758 = vperm.xlu2 %8245, %v8721_v20  }
  0xb3   : > { %v8726_v22 = vpop.permute.xlu2 %492 }
  0xb4   : > { %13023 = vst [vmem:[#allocation10_spill] sm:$0xff] %v8726_v22 }
  0xb7   : > { %753 = vperm.xlu1 %8244, %v8728_v24  }
  0xb8   : > { %763 = vperm.xlu0 %8243, %v8730_v26  }
  0xb9   : > { %773 = vperm.xlu2 %8245, %v8732_v27  }
  0xbb   : > { %v8741_v31 = vpop.permute.xlu2 %507 }
  0xbc   : > { %13026 = vst [vmem:[#allocation13_spill] sm:$0xff] %v8741_v31 }
  0xbf   : > { %768 = vperm.xlu1 %8244, %v8743_v34  }
  0xc0   : > { %778 = vperm.xlu0 %8243, %v8745_v35  }
  0xc1   : > { %v8751_v40 = vpop.permute.xlu1 %452  ;;  %788 = vperm.xlu2 %8245, %v8747_v36  }
  0xc2   : > { %13027 = vst [vmem:[#allocation14_spill] sm:$0xff] %v8751_v40  ;;  %v8754_v41 = vpop.permute.xlu0 %467 }
  0xc3   : > { %13028 = vst [vmem:[#allocation15_spill] sm:$0xff] %v8754_v41  ;;  %v8756_v42 = vpop.permute.xlu2 %522 }
  0xc4   : > { %13029 = vst [vmem:[#allocation16_spill] sm:$0xff] %v8756_v42  ;;  %v8807_v42 = vld [vmem:[#allocation2 + $0x169] sm:$0xff] }
  0xc5   : > { %13042 = vst [vmem:[#allocation29_spill] sm:$0xff] %v8807_v42 }
  0xc7   : > { %783 = vperm.xlu1 %8244, %v8758_v46  }
  0xc8   : > { %793 = vperm.xlu0 %8243, %v8760_v47  }
  0xc9   : > { %v8766_v52 = vpop.permute.xlu1 %472  ;;  %803 = vperm.xlu2 %8245, %v8762_v48  }
  0xca   : > { %13030 = vst [vmem:[#allocation17_spill] sm:$0xff] %v8766_v52  ;;  %v8769_v0 = vpop.permute.xlu0 %482  ;;  %v8805_v52 = vld [vmem:[#allocation2 + $0x151] sm:$0xff] }
  0xcb   : > { %13031 = vst [vmem:[#allocation18_spill] sm:$0xff] %v8769_v0  ;;  %v8771_v3 = vpop.permute.xlu2 %537  ;;  %v8792_v0 = vld [vmem:[#allocation2 + $0x141] sm:$0xff] }
  0xcc   : > { %13032 = vst [vmem:[#allocation19_spill] sm:$0xff] %v8771_v3  ;;  %v8790_v3 = vld [vmem:[#allocation2 + $0x129] sm:$0xff] }
  0xcd   : > { %13036 = vst [vmem:[#allocation23_spill] sm:$0xff] %v8790_v3 }
  0xce   : > { %13037 = vst [vmem:[#allocation24_spill] sm:$0xff] %v8792_v0 }
  0xcf   : > { %798 = vperm.xlu1 %8244, %v8773_v2   ;;  %13041 = vst [vmem:[#allocation28_spill] sm:$0xff] %v8805_v52 }
  0xd0   : > { %808 = vperm.xlu0 %8243, %v8775_v12  }
  0xd1   : > { %v8781_v40 = vpop.permute.xlu1 %487  ;;  %818 = vperm.xlu2 %8245, %v8777_v5  }
  0xd2   : > { %13033 = vst [vmem:[#allocation20_spill] sm:$0xff] %v8781_v40  ;;  %v8784_v22 = vpop.permute.xlu0 %497 }
  0xd3   : > { %13034 = vst [vmem:[#allocation21_spill] sm:$0xff] %v8784_v22  ;;  %v8786_v28 = vpop.permute.xlu2 %552  ;;  %v8803_v22 = vld [vmem:[#allocation2 + $0x139] sm:$0xff] }
  0xd4   : > { %13035 = vst [vmem:[#allocation22_spill] sm:$0xff] %v8786_v28  ;;  %v924_v28 = vld [vmem:[#allocation2 + $0xa] sm:$0xff] }
  0xd7   : > { %813 = vperm.xlu1 %8244, %v8788_v29  }
  0xd8   : > { %823 = vperm.xlu0 %8243, %v8790_v3  }
  0xd9   : > { %v8796_v19 = vpop.permute.xlu1 %502  ;;  %833 = vperm.xlu2 %8245, %v8792_v0  }
  0xda   : > { %13038 = vst [vmem:[#allocation25_spill] sm:$0xff] %v8796_v19  ;;  %v8799_v40 = vpop.permute.xlu0 %512 }
  0xdb   : > { %13039 = vst [vmem:[#allocation26_spill] sm:$0xff] %v8799_v40  ;;  %v8801_v16 = vpop.permute.xlu2 %567  ;;  %v8818_v40 = vld [vmem:[#allocation2 + $0x159] sm:$0xff] }
  0xdc   : > { %13040 = vst [vmem:[#allocation27_spill] sm:$0xff] %v8801_v16  ;;  %v8820_v16 = vld [vmem:[#allocation2 + $0x171] sm:$0xff] }
  0xdd   : > { %13046 = vst [vmem:[#allocation33_spill] sm:$0xff] %v8820_v16 }
  0xdf   : > { %828 = vperm.xlu1 %8244, %v8803_v22  }
  0xe0   : > { %838 = vperm.xlu0 %8243, %v8805_v52  }
  0xe1   : > { %v8811_v41 = vpop.permute.xlu1 %517  ;;  %848 = vperm.xlu2 %8245, %v8807_v42   ;;  %v923_v42 = vld [vmem:[#allocation2 + $0x2] sm:$0xff] }
  0xe2   : > { %13043 = vst [vmem:[#allocation30_spill] sm:$0xff] %v8811_v41  ;;  %v8814_v19 = vpop.permute.xlu0 %527 }
  0xe3   : > { %13044 = vst [vmem:[#allocation31_spill] sm:$0xff] %v8814_v19  ;;  %v8816_v31 = vpop.permute.xlu2 %582  ;;  %v8830_v19 = vld [vmem:[#allocation2 + $0x1a] sm:$0xff] }
  0xe4   : > { %13045 = vst [vmem:[#allocation32_spill] sm:$0xff] %v8816_v31  ;;  %v8832_v31 = vld [vmem:[#allocation2 + $0x32] sm:$0xff] }
  0xe5   : > { %13050 = vst [vmem:[#allocation37_spill] sm:$0xff] %v8830_v19 }
  0xe6   : > { %13051 = vst [vmem:[#allocation38_spill] sm:$0xff] %v8832_v31 }
  0xe7   : > { %843 = vperm.xlu1 %8244, %v8818_v40  }
  0xe8   : > { %853 = vperm.xlu0 %8243, %v8820_v16  }
  0xe9   : > { %v8824_v0 = vpop.permute.xlu1 %532  ;;  %964 = vperm.xlu2 %8245, %v924_v28   ;;  %v8842_v28 = vld [vmem:[#allocation2 + $0x22] sm:$0xff] }
  0xea   : > { %13047 = vst [vmem:[#allocation34_spill] sm:$0xff] %v8824_v0  ;;  %v8826_v52 = vpop.permute.xlu0 %542 }
  0xeb   : > { %13048 = vst [vmem:[#allocation35_spill] sm:$0xff] %v8826_v52  ;;  %v8828_v41 = vpop.permute.xlu2 %698  ;;  %v8844_v52 = vld [vmem:[#allocation2 + $0x3a] sm:$0xff] }
  0xec   : > { %13049 = vst [vmem:[#allocation36_spill] sm:$0xff] %v8828_v41  ;;  %v8846_v41 = vld [vmem:[#allocation2 + $0x52] sm:$0xff] }
  0xed   : > { %13055 = vst [vmem:[#allocation42_spill] sm:$0xff] %v8842_v28 }
  0xee   : > { %13056 = vst [vmem:[#allocation43_spill] sm:$0xff] %v8844_v52 }
  0xef   : > { %959 = vperm.xlu1 %8244, %v923_v42   ;;  %13057 = vst [vmem:[#allocation44_spill] sm:$0xff] %v8846_v41 }
  0xf0   : > { %969 = vperm.xlu0 %8243, %v8830_v19   ;;  %v8861_v19 = vld [vmem:[#allocation2 + $0x7a] sm:$0xff] }
  0xf1   : > { %v8835_v3 = vpop.permute.xlu1 %547  ;;  %979 = vperm.xlu2 %8245, %v8832_v31   ;;  %13063 = vst [vmem:[#allocation50_spill] sm:$0xff] %v8861_v19 }
  0xf2   : > { %13052 = vst [vmem:[#allocation39_spill] sm:$0xff] %v8835_v3  ;;  %v8838_v16 = vpop.permute.xlu0 %557 }
  0xf3   : > { %13053 = vst [vmem:[#allocation40_spill] sm:$0xff] %v8838_v16  ;;  %v8840_v0 = vpop.permute.xlu2 %713  ;;  %v8857_v16 = vld [vmem:[#allocation2 + $0x4a] sm:$0xff] }
  0xf4   : > { %13054 = vst [vmem:[#allocation41_spill] sm:$0xff] %v8840_v0  ;;  %v8859_v0 = vld [vmem:[#allocation2 + $0x62] sm:$0xff] }
  0xf5   : > { %13061 = vst [vmem:[#allocation48_spill] sm:$0xff] %v8857_v16 }
  0xf6   : > { %13062 = vst [vmem:[#allocation49_spill] sm:$0xff] %v8859_v0 }
  0xf7   : > { %974 = vperm.xlu1 %8244, %v8842_v28  }
  0xf8   : > { %984 = vperm.xlu0 %8243, %v8844_v52   ;;  %v8876_v52 = vld [vmem:[#allocation2 + $0x9a] sm:$0xff] }
  0xf9   : > { %v8850_v42 = vpop.permute.xlu1 %562  ;;  %994 = vperm.xlu2 %8245, %v8846_v41   ;;  %13069 = vst [vmem:[#allocation56_spill] sm:$0xff] %v8876_v52 }
  0xfa   : > { %13058 = vst [vmem:[#allocation45_spill] sm:$0xff] %v8850_v42  ;;  %v8853_v3 = vpop.permute.xlu0 %572 }
  0xfb   : > { %13059 = vst [vmem:[#allocation46_spill] sm:$0xff] %v8853_v3  ;;  %v8855_v31 = vpop.permute.xlu2 %728  ;;  %v8872_v3 = vld [vmem:[#allocation2 + $0x6a] sm:$0xff] }
  0xfc   : > { %13060 = vst [vmem:[#allocation47_spill] sm:$0xff] %v8855_v31  ;;  %v8874_v31 = vld [vmem:[#allocation2 + $0x82] sm:$0xff] }
  0xfd   : > { %13067 = vst [vmem:[#allocation54_spill] sm:$0xff] %v8872_v3 }
  0xfe   : > { %13068 = vst [vmem:[#allocation55_spill] sm:$0xff] %v8874_v31 }
  0xff   : > { %989 = vperm.xlu1 %8244, %v8857_v16  }
 0x100   : > { %999 = vperm.xlu0 %8243, %v8859_v0   ;;  %v8891_v0 = vld [vmem:[#allocation2 + $0xc2] sm:$0xff] }
 0x101   : > { %v8865_v28 = vpop.permute.xlu1 %577  ;;  %1009 = vperm.xlu2 %8245, %v8861_v19   ;;  %13075 = vst [vmem:[#allocation62_spill] sm:$0xff] %v8891_v0 }
 0x102   : > { %13064 = vst [vmem:[#allocation51_spill] sm:$0xff] %v8865_v28  ;;  %v8868_v42 = vpop.permute.xlu0 %587 }
 0x103   : > { %13065 = vst [vmem:[#allocation52_spill] sm:$0xff] %v8868_v42  ;;  %v8870_v41 = vpop.permute.xlu2 %743  ;;  %v8887_v42 = vld [vmem:[#allocation2 + $0x92] sm:$0xff] }
 0x104   : > { %13066 = vst [vmem:[#allocation53_spill] sm:$0xff] %v8870_v41  ;;  %v8889_v41 = vld [vmem:[#allocation2 + $0xaa] sm:$0xff] }
 0x105   : > { %13073 = vst [vmem:[#allocation60_spill] sm:$0xff] %v8887_v42 }
 0x106   : > { %13074 = vst [vmem:[#allocation61_spill] sm:$0xff] %v8889_v41 }
 0x107   : > { %1004 = vperm.xlu1 %8244, %v8872_v3  }
 0x108   : > { %1014 = vperm.xlu0 %8243, %v8874_v31   ;;  %v8906_v31 = vld [vmem:[#allocation2 + $0xe2] sm:$0xff] }
 0x109   : > { %v8880_v16 = vpop.permute.xlu1 %592  ;;  %1024 = vperm.xlu2 %8245, %v8876_v52   ;;  %13081 = vst [vmem:[#allocation68_spill] sm:$0xff] %v8906_v31 }
 0x10a   : > { %13070 = vst [vmem:[#allocation57_spill] sm:$0xff] %v8880_v16  ;;  %v8883_v28 = vpop.permute.xlu0 %703 }
 0x10b   : > { %13071 = vst [vmem:[#allocation58_spill] sm:$0xff] %v8883_v28  ;;  %v8885_v19 = vpop.permute.xlu2 %758  ;;  %v8902_v28 = vld [vmem:[#allocation2 + $0xb2] sm:$0xff] }
 0x10c   : > { %13072 = vst [vmem:[#allocation59_spill] sm:$0xff] %v8885_v19  ;;  %v8904_v19 = vld [vmem:[#allocation2 + $0xca] sm:$0xff] }
 0x10d   : > { %13079 = vst [vmem:[#allocation66_spill] sm:$0xff] %v8902_v28 }
 0x10e   : > { %13080 = vst [vmem:[#allocation67_spill] sm:$0xff] %v8904_v19 }
 0x10f   : > { %1019 = vperm.xlu1 %8244, %v8887_v42  }
 0x110   : > { %1029 = vperm.xlu0 %8243, %v8889_v41   ;;  %v8921_v41 = vld [vmem:[#allocation2 + $0x10a] sm:$0xff] }
 0x111   : > { %v8895_v3 = vpop.permute.xlu1 %708  ;;  %1039 = vperm.xlu2 %8245, %v8891_v0   ;;  %13087 = vst [vmem:[#allocation74_spill] sm:$0xff] %v8921_v41 }
 0x112   : > { %13076 = vst [vmem:[#allocation63_spill] sm:$0xff] %v8895_v3  ;;  %v8898_v16 = vpop.permute.xlu0 %718 }
 0x113   : > { %13077 = vst [vmem:[#allocation64_spill] sm:$0xff] %v8898_v16  ;;  %v8900_v52 = vpop.permute.xlu2 %773  ;;  %v8917_v16 = vld [vmem:[#allocation2 + $0xda] sm:$0xff] }
 0x114   : > { %13078 = vst [vmem:[#allocation65_spill] sm:$0xff] %v8900_v52  ;;  %v8919_v52 = vld [vmem:[#allocation2 + $0xf2] sm:$0xff] }
 0x115   : > { %13085 = vst [vmem:[#allocation72_spill] sm:$0xff] %v8917_v16 }
 0x116   : > { %13086 = vst [vmem:[#allocation73_spill] sm:$0xff] %v8919_v52 }
 0x117   : > { %1034 = vperm.xlu1 %8244, %v8902_v28  }
 0x118   : > { %1044 = vperm.xlu0 %8243, %v8904_v19   ;;  %v8936_v19 = vld [vmem:[#allocation2 + $0x12a] sm:$0xff] }
 0x119   : > { %v8910_v42 = vpop.permute.xlu1 %723  ;;  %1054 = vperm.xlu2 %8245, %v8906_v31   ;;  %13093 = vst [vmem:[#allocation80_spill] sm:$0xff] %v8936_v19 }
 0x11a   : > { %13082 = vst [vmem:[#allocation69_spill] sm:$0xff] %v8910_v42  ;;  %v8913_v3 = vpop.permute.xlu0 %733 }
 0x11b   : > { %13083 = vst [vmem:[#allocation70_spill] sm:$0xff] %v8913_v3  ;;  %v8915_v0 = vpop.permute.xlu2 %788  ;;  %v8932_v3 = vld [vmem:[#allocation2 + $0xfa] sm:$0xff] }
 0x11c   : > { %13084 = vst [vmem:[#allocation71_spill] sm:$0xff] %v8915_v0  ;;  %v8934_v0 = vld [vmem:[#allocation2 + $0x112] sm:$0xff] }
 0x11d   : > { %13091 = vst [vmem:[#allocation78_spill] sm:$0xff] %v8932_v3 }
 0x11e   : > { %13092 = vst [vmem:[#allocation79_spill] sm:$0xff] %v8934_v0 }
 0x11f   : > { %1049 = vperm.xlu1 %8244, %v8917_v16  }
 0x120   : > { %1059 = vperm.xlu0 %8243, %v8919_v52   ;;  %v8951_v52 = vld [vmem:[#allocation2 + $0x152] sm:$0xff] }
 0x121   : > { %v8925_v28 = vpop.permute.xlu1 %738  ;;  %1069 = vperm.xlu2 %8245, %v8921_v41   ;;  %13099 = vst [vmem:[#allocation86_spill] sm:$0xff] %v8951_v52 }
 0x122   : > { %13088 = vst [vmem:[#allocation75_spill] sm:$0xff] %v8925_v28  ;;  %v8928_v42 = vpop.permute.xlu0 %748 }
 0x123   : > { %13089 = vst [vmem:[#allocation76_spill] sm:$0xff] %v8928_v42  ;;  %v8930_v31 = vpop.permute.xlu2 %803  ;;  %v8947_v42 = vld [vmem:[#allocation2 + $0x122] sm:$0xff] }
 0x124   : > { %13090 = vst [vmem:[#allocation77_spill] sm:$0xff] %v8930_v31  ;;  %v8949_v31 = vld [vmem:[#allocation2 + $0x13a] sm:$0xff] }
 0x125   : > { %13097 = vst [vmem:[#allocation84_spill] sm:$0xff] %v8947_v42 }
 0x126   : > { %13098 = vst [vmem:[#allocation85_spill] sm:$0xff] %v8949_v31 }
 0x127   : > { %1064 = vperm.xlu1 %8244, %v8932_v3  }
 0x128   : > { %1074 = vperm.xlu0 %8243, %v8934_v0   ;;  %v8966_v0 = vld [vmem:[#allocation2 + $0x172] sm:$0xff] }
 0x129   : > { %v8940_v16 = vpop.permute.xlu1 %753  ;;  %1084 = vperm.xlu2 %8245, %v8936_v19  }
 0x12a   : > { %13094 = vst [vmem:[#allocation81_spill] sm:$0xff] %v8940_v16  ;;  %v8943_v28 = vpop.permute.xlu0 %763 }
 0x12b   : > { %13095 = vst [vmem:[#allocation82_spill] sm:$0xff] %v8943_v28  ;;  %v8945_v41 = vpop.permute.xlu2 %818  ;;  %v8962_v28 = vld [vmem:[#allocation2 + $0x142] sm:$0xff] }
 0x12c   : > { %13096 = vst [vmem:[#allocation83_spill] sm:$0xff] %v8945_v41  ;;  %v8964_v41 = vld [vmem:[#allocation2 + $0x15a] sm:$0xff] }
 0x12d   : > { %13103 = vst [vmem:[#allocation90_spill] sm:$0xff] %v8964_v41 }
 0x12f   : > { %1079 = vperm.xlu1 %8244, %v8947_v42  }
 0x130   : > { %1089 = vperm.xlu0 %8243, %v8949_v31  }
 0x131   : > { %v8955_v3 = vpop.permute.xlu1 %768  ;;  %1099 = vperm.xlu2 %8245, %v8951_v52  }
 0x132   : > { %13100 = vst [vmem:[#allocation87_spill] sm:$0xff] %v8955_v3  ;;  %v8958_v16 = vpop.permute.xlu0 %778 }
 0x133   : > { %13101 = vst [vmem:[#allocation88_spill] sm:$0xff] %v8958_v16  ;;  %v8960_v19 = vpop.permute.xlu2 %833  ;;  %v8977_v16 = vld [vmem:[#allocation2 + $0x16a] sm:$0xff] }
 0x134   : > { %13102 = vst [vmem:[#allocation89_spill] sm:$0xff] %v8960_v19 }
 0x137   : > { %1094 = vperm.xlu1 %8244, %v8962_v28  }
 0x138   : > { %1104 = vperm.xlu0 %8243, %v8964_v41  }
 0x139   : > { %v8970_v42 = vpop.permute.xlu1 %783  ;;  %1114 = vperm.xlu2 %8245, %v8966_v0  }
 0x13a   : > { %13104 = vst [vmem:[#allocation91_spill] sm:$0xff] %v8970_v42  ;;  %v8973_v3 = vpop.permute.xlu0 %793 }
 0x13b   : > { %13105 = vst [vmem:[#allocation92_spill] sm:$0xff] %v8973_v3  ;;  %v8975_v52 = vpop.permute.xlu2 %848 }
 0x13c   : > { %13106 = vst [vmem:[#allocation93_spill] sm:$0xff] %v8975_v52 }
 0x13f   : > { %1109 = vperm.xlu1 %8244, %v8977_v16  }
 0x140   : > { %1220 = vperm.xlu0 %8243, %v8521_v9  }
 0x141   : > { %v8981_v19 = vpop.permute.xlu1 %798  ;;  %1230 = vperm.xlu2 %8245, %v8516_v8  }
 0x142   : > { %13107 = vst [vmem:[#allocation94_spill] sm:$0xff] %v8981_v19  ;;  %v8984_v31 = vpop.permute.xlu0 %808  ;;  %v1973_v19 = vld [vmem:[#allocation2 + $0x68] sm:$0xff] }
 0x143   : > { %v8986_v41 = vpop.permute.xlu2 %964 }
 0x144   : > { %13108 = vst [vmem:[#allocation95_spill] sm:$0xff] %v8986_v41 }
 0x147   : > { %1225 = vperm.xlu1 %8244, %v8570_v21  }
 0x148   : > { %1235 = vperm.xlu0 %8243, %v8534_v10  }
 0x149   : > { %v8990_v3 = vpop.permute.xlu1 %813  ;;  %1245 = vperm.xlu2 %8245, %v8591_v30  }
 0x14a   : > { %v8993_v52 = vpop.permute.xlu0 %823 }
 0x14b   : > { %13109 = vst [vmem:[#allocation96_spill] sm:$0xff] %v8993_v52  ;;  %v8995_v42 = vpop.permute.xlu2 %979 }
 0x14c   : > { %13110 = vst [vmem:[#allocation97_spill] sm:$0xff] %v8995_v42  ;;  %v13159_v42 = vld [vmem:[#allocation42_spill] sm:$0xff] }
 0x14f   : > { %1240 = vperm.xlu1 %8244, %v8575_v23  }
 0x150   : > { %1250 = vperm.xlu0 %8243, %v8580_v25  }
 0x151   : > { %v8999_v8 = vpop.permute.xlu1 %828  ;;  %1260 = vperm.xlu2 %8245, %v8611_v37   ;;  %v367_v37 = vld [vmem:[%s8490_s30 + $0xf0] sm:$0xff] }
 0x152   : > { %13111 = vst [vmem:[#allocation98_spill] sm:$0xff] %v8999_v8  ;;  %v9002_v9 = vpop.permute.xlu0 %838 }
 0x153   : > { %13112 = vst [vmem:[#allocation99_spill] sm:$0xff] %v9002_v9  ;;  %v9004_v10 = vpop.permute.xlu2 %994  ;;  %v13174_v9 = vld [vmem:[#allocation60_spill] sm:$0xff] }
 0x154   : > { %400 = vst.msk [vmem:[#allocation2 + $0x181] sm:$0xff] %vm281_vm0, %v367_v37 }
 0x157   : > { %1255 = vperm.xlu1 %8244, %v8595_v32  }
 0x158   : > { %1265 = vperm.xlu0 %8243, %v8598_v33  }
 0x159   : > { %v9008_v21 = vpop.permute.xlu1 %843  ;;  %1275 = vperm.xlu2 %8245, %v8626_v43  }
 0x15a   : > { %13113 = vst [vmem:[#allocation100_spill] sm:$0xff] %v9008_v21  ;;  %v9011_v23 = vpop.permute.xlu0 %853  ;;  %v13163_v21 = vld [vmem:[#allocation38_spill] sm:$0xff] }
 0x15b   : > { %13114 = vst [vmem:[#allocation101_spill] sm:$0xff] %v9011_v23  ;;  %v9013_v25 = vpop.permute.xlu2 %1009 }
 0x15c   : > { %13115 = vst [vmem:[#allocation102_spill] sm:$0xff] %v9013_v25  ;;  %v1979_v25 = vld [vmem:[#allocation2 + $0xb0] sm:$0xff] }
 0x15f   : > { %1270 = vperm.xlu1 %8244, %v8613_v38  }
 0x160   : > { %1280 = vperm.xlu0 %8243, %v8615_v39  }
 0x161   : > { %v9017_v30 = vpop.permute.xlu1 %959  ;;  %1290 = vperm.xlu2 %8245, %v8641_v49   ;;  %v368_v49 = vld [vmem:[%s8490_s30 + $0xf8] sm:$0xff] }
 0x162   : > { %13116 = vst [vmem:[#allocation103_spill] sm:$0xff] %v9017_v30  ;;  %v9020_v32 = vpop.permute.xlu0 %969 }
 0x163   : > { %13117 = vst [vmem:[#allocation104_spill] sm:$0xff] %v9020_v32  ;;  %v9022_v33 = vpop.permute.xlu2 %1024 }
 0x164   : > { %13118 = vst [vmem:[#allocation105_spill] sm:$0xff] %v9022_v33 }
 0x165   : > { %401 = vst.msk [vmem:[#allocation2 + $0x189] sm:$0xff] %vm281_vm0, %v368_v49 }
 0x167   : > { %1285 = vperm.xlu1 %8244, %v8628_v44  }
 0x168   : > { %1295 = vperm.xlu0 %8243, %v8630_v45  }
 0x169   : > { %v9027_v43 = vpop.permute.xlu1 %974  ;;  %1305 = vperm.xlu2 %8245, %v8652_v53  }
 0x16a   : > { %13119 = vst [vmem:[#allocation106_spill] sm:$0xff] %v9027_v43  ;;  %v9031_v38 = vpop.permute.xlu0 %984 }
 0x16b   : > { %13120 = vst [vmem:[#allocation107_spill] sm:$0xff] %v9031_v38  ;;  %v9033_v39 = vpop.permute.xlu2 %1039 }
 0x16f   : > { %1300 = vperm.xlu1 %8244, %v8643_v50  }
 0x170   : > { %1310 = vperm.xlu0 %8243, %v8645_v51  }
 0x171   : > { %v9039_v44 = vpop.permute.xlu1 %989  ;;  %1320 = vperm.xlu2 %8245, %v8661_v56  }
 0x172   : > { %v9042_v45 = vpop.permute.xlu0 %999 }
 0x173   : > { %13121 = vst [vmem:[#allocation108_spill] sm:$0xff] %v9042_v45  ;;  %v9044_v53 = vpop.permute.xlu2 %1054 }
 0x174   : > { %13122 = vst [vmem:[#allocation109_spill] sm:$0xff] %v9044_v53  ;;  %v2512_v53 = vld [vmem:[#allocation2 + $0x13a] sm:$0xff] }
 0x177   : > { %1315 = vperm.xlu1 %8244, %v8654_v54  }
 0x178   : > { %1325 = vperm.xlu0 %8243, %v8656_v55  }
 0x179   : > { %v9048_v37 = vpop.permute.xlu1 %1004  ;;  %1335 = vperm.xlu2 %8245, %v8670_v59  }
 0x17a   : > { %13123 = vst [vmem:[#allocation110_spill] sm:$0xff] %v9048_v37  ;;  %v9051_v50 = vpop.permute.xlu0 %1014 }
 0x17b   : > { %13124 = vst [vmem:[#allocation111_spill] sm:$0xff] %v9051_v50  ;;  %v9053_v49 = vpop.permute.xlu2 %1069  ;;  %v13191_v50 = vld [vmem:[#allocation78_spill] sm:$0xff] }
 0x17f   : > { %1330 = vperm.xlu1 %8244, %v8663_v57  }
 0x180   : > { %1340 = vperm.xlu0 %8243, %v8665_v58   ;;  %v1214_v58 = vld [vmem:[#allocation2 + $0x180] sm:$0xff] }
 0x181   : > { %v9057_v51 = vpop.permute.xlu1 %1019  ;;  %1350 = vperm.xlu2 %8245, %v8679_v62  }
 0x182   : > { %13125 = vst [vmem:[#allocation112_spill] sm:$0xff] %v9057_v51  ;;  %v9060_v56 = vpop.permute.xlu0 %1029  ;;  %v13169_v51 = vld [vmem:[#allocation54_spill] sm:$0xff] }
 0x183   : > { %v9062_v54 = vpop.permute.xlu2 %1084 }
 0x184   : > { %13126 = vst [vmem:[#allocation113_spill] sm:$0xff] %v9062_v54 }
 0x187   : > { %1345 = vperm.xlu1 %8244, %v8672_v60  }
 0x188   : > { %1355 = vperm.xlu0 %8243, %v8674_v61   ;;  %v1215_v61 = vld [vmem:[#allocation2 + $0x188] sm:$0xff] }
 0x189   : > { %v9066_v55 = vpop.permute.xlu1 %1034  ;;  %1365 = vperm.xlu2 %8245, %v8685_v1  }
 0x18a   : > { %v9069_v59 = vpop.permute.xlu0 %1044 }
 0x18b   : > { %v9071_v57 = vpop.permute.xlu2 %1099 }
 0x18c   : > { %13127 = vst [vmem:[#allocation114_spill] sm:$0xff] %v9071_v57  ;;  %v13172_v57 = vld [vmem:[#allocation50_spill] sm:$0xff] }
 0x18f   : > { %1360 = vperm.xlu1 %8244, %v8681_v63  }
 0x190   : > { %1370 = vperm.xlu0 %8243, %v1214_v58  }
 0x191   : > { %v9074_v62 = vpop.permute.xlu1 %1049  ;;  %1481 = vperm.xlu2 %8245, %v8693_v6  }
 0x192   : > { %13128 = vst [vmem:[#allocation115_spill] sm:$0xff] %v9074_v62  ;;  %v9077_v23 = vpop.permute.xlu0 %1059 }
 0x193   : > { %13129 = vst [vmem:[#allocation116_spill] sm:$0xff] %v9077_v23  ;;  %v9079_v60 = vpop.permute.xlu2 %1114  ;;  %v1969_v23 = vld [vmem:[#allocation2 + $0x38] sm:$0xff] }
 0x194   : > { %13130 = vst [vmem:[#allocation117_spill] sm:$0xff] %v9079_v60  ;;  %v13149_v60 = vld [vmem:[#allocation24_spill] sm:$0xff] }
 0x197   : > { %1375 = vperm.xlu1 %8244, %v1215_v61  }
 0x198   : > { %1486 = vperm.xlu0 %8243, %v8687_v4  }
 0x199   : > { %v9082_v1 = vpop.permute.xlu1 %1064  ;;  %1496 = vperm.xlu2 %8245, %v8704_v13  }
 0x19a   : > { %13131 = vst [vmem:[#allocation118_spill] sm:$0xff] %v9082_v1  ;;  %v9085_v38 = vpop.permute.xlu0 %1074  ;;  %v13180_v1 = vld [vmem:[#allocation66_spill] sm:$0xff] }
 0x19b   : > { %v9087_v63 = vpop.permute.xlu2 %1230 }
 0x19c   : > { %13132 = vst [vmem:[#allocation119_spill] sm:$0xff] %v9087_v63 }
 0x19f   : > { %1491 = vperm.xlu1 %8244, %v8695_v7  }
 0x1a0   : > { %1501 = vperm.xlu0 %8243, %v8697_v11  }
 0x1a1   : > { %v9091_v6 = vpop.permute.xlu1 %1079  ;;  %1511 = vperm.xlu2 %8245, %v8715_v17  }
 0x1a2   : > { %v9094_v58 = vpop.permute.xlu0 %1089 }
 0x1a3   : > { %13133 = vst [vmem:[#allocation120_spill] sm:$0xff] %v9094_v58  ;;  %v9096_v61 = vpop.permute.xlu2 %1245  ;;  %v1988_v58 = vld [vmem:[#allocation2 + $0x120] sm:$0xff] }
 0x1a4   : > { %13134 = vst [vmem:[#allocation121_spill] sm:$0xff] %v9096_v61  ;;  %v13152_v61 = vld [vmem:[#allocation28_spill] sm:$0xff] }
 0x1a7   : > { %1506 = vperm.xlu1 %8244, %v8706_v14  }
 0x1a8   : > { %1516 = vperm.xlu0 %8243, %v8708_v15  }
 0x1a9   : > { %v9100_v4 = vpop.permute.xlu1 %1094  ;;  %1526 = vperm.xlu2 %8245, %v8728_v24  }
 0x1aa   : > { %13135 = vst [vmem:[#allocation122_spill] sm:$0xff] %v9100_v4  ;;  %v9103_v13 = vpop.permute.xlu0 %1104  ;;  %v13204_v4 = vld [vmem:[#allocation86_spill] sm:$0xff] }
 0x1ab   : > { %13136 = vst [vmem:[#allocation123_spill] sm:$0xff] %v9103_v13  ;;  %v9105_v7 = vpop.permute.xlu2 %1260 }
 0x1ac   : > { %13137 = vst [vmem:[#allocation124_spill] sm:$0xff] %v9105_v7 }
 0x1af   : > { %1521 = vperm.xlu1 %8244, %v8717_v18  }
 0x1b0   : > { %1531 = vperm.xlu0 %8243, %v8721_v20  }
 0x1b1   : > { %v9109_v11 = vpop.permute.xlu1 %1109  ;;  %1541 = vperm.xlu2 %8245, %v8743_v34  }
 0x1b2   : > { %13138 = vst [vmem:[#allocation125_spill] sm:$0xff] %v9109_v11  ;;  %v9112_v17 = vpop.permute.xlu0 %1220 }
 0x1b3   : > { %13139 = vst [vmem:[#allocation126_spill] sm:$0xff] %v9112_v17  ;;  %v9114_v14 = vpop.permute.xlu2 %1275  ;;  %v2253_v17 = vld [vmem:[#allocation2 + $0x151] sm:$0xff] }
 0x1b4   : > { %13140 = vst [vmem:[#allocation127_spill] sm:$0xff] %v9114_v14 }
 0x1b7   : > { %1536 = vperm.xlu1 %8244, %v8730_v26  }
 0x1b8   : > { %1546 = vperm.xlu0 %8243, %v8732_v27  }
 0x1b9   : > { %v9118_v15 = vpop.permute.xlu1 %1225  ;;  %1556 = vperm.xlu2 %8245, %v8758_v46  }
 0x1ba   : > { %13141 = vst [vmem:[#allocation128_spill] sm:$0xff] %v9118_v15  ;;  %v9121_v24 = vpop.permute.xlu0 %1235 }
 0x1bb   : > { %13142 = vst [vmem:[#allocation129_spill] sm:$0xff] %v9121_v24  ;;  %v9123_v18 = vpop.permute.xlu2 %1290  ;;  %v13167_v24 = vld [vmem:[#allocation44_spill] sm:$0xff] }
 0x1bf   : > { %1551 = vperm.xlu1 %8244, %v8745_v35  }
 0x1c0   : > { %1561 = vperm.xlu0 %8243, %v8747_v36  }
 0x1c1   : > { %v9127_v20 = vpop.permute.xlu1 %1240  ;;  %1571 = vperm.xlu2 %8245, %v8773_v2  }
 0x1c2   : > { %13143 = vst [vmem:[#allocation130_spill] sm:$0xff] %v9127_v20  ;;  %v9130_v34 = vpop.permute.xlu0 %1250 }
 0x1c3   : > { %v9132_v26 = vpop.permute.xlu2 %1305 }
 0x1c7   : > { %1566 = vperm.xlu1 %8244, %v8760_v47  }
 0x1c8   : > { %1576 = vperm.xlu0 %8243, %v8762_v48   ;;  %v13148_v48 = vld [vmem:[#allocation23_spill] sm:$0xff] }
 0x1c9   : > { %v9136_v27 = vpop.permute.xlu1 %1255  ;;  %1586 = vperm.xlu2 %8245, %v8788_v29  }
 0x1ca   : > { %v9139_v46 = vpop.permute.xlu0 %1265 }
 0x1cb   : > { %13144 = vst [vmem:[#allocation131_spill] sm:$0xff] %v9139_v46  ;;  %v9141_v35 = vpop.permute.xlu2 %1320 }
 0x1cc   : > { %13145 = vst [vmem:[#allocation132_spill] sm:$0xff] %v9141_v35  ;;  %v1968_v35 = vld [vmem:[#allocation2 + $0x30] sm:$0xff] }
 0x1cf   : > { %1581 = vperm.xlu1 %8244, %v8775_v12  }
 0x1d0   : > { %1591 = vperm.xlu0 %8243, %v8777_v5   ;;  %v1475_v5 = vld [vmem:[#allocation2 + $0x181] sm:$0xff] }
 0x1d1   : > { %v9145_v2 = vpop.permute.xlu1 %1270  ;;  %1601 = vperm.xlu2 %8245, %v8803_v22   ;;  %v13153_v22 = vld [vmem:[#allocation29_spill] sm:$0xff] }
 0x1d2   : > { %13146 = vst [vmem:[#allocation133_spill] sm:$0xff] %v9145_v2  ;;  %v9148_v36 = vpop.permute.xlu0 %1280  ;;  %v1974_v2 = vld [vmem:[#allocation2 + $0x78] sm:$0xff] }
 0x1d3   : > { %13147 = vst [vmem:[#allocation134_spill] sm:$0xff] %v9148_v36  ;;  %v9150_v47 = vpop.permute.xlu2 %1335  ;;  %v13164_v36 = vld [vmem:[#allocation48_spill] sm:$0xff] }
 0x1d7   : > { %1596 = vperm.xlu1 %8244, %v13148_v48  }
 0x1d8   : > { %1606 = vperm.xlu0 %8243, %v13149_v60   ;;  %v1476_v60 = vld [vmem:[#allocation2 + $0x189] sm:$0xff] }
 0x1d9   : > { %v9154_v29 = vpop.permute.xlu1 %1285  ;;  %1616 = vperm.xlu2 %8245, %v8818_v40  }
 0x1da   : > { %13150 = vst [vmem:[#allocation23_spill] sm:$0xff] %v9154_v29  ;;  %v9157_v11 = vpop.permute.xlu0 %1295  ;;  %v13157_v29 = vld [vmem:[#allocation33_spill] sm:$0xff] }
 0x1db   : > { %v9159_v12 = vpop.permute.xlu2 %1350 }
 0x1dc   : > { %13151 = vst [vmem:[#allocation24_spill] sm:$0xff] %v9159_v12 }
 0x1df   : > { %1611 = vperm.xlu1 %8244, %v13152_v61  }
 0x1e0   : > { %1621 = vperm.xlu0 %8243, %v13153_v22   ;;  %v13162_v22 = vld [vmem:[#allocation37_spill] sm:$0xff] }
 0x1e1   : > { %v9163_v20 = vpop.permute.xlu1 %1300  ;;  %1631 = vperm.xlu2 %8245, %v1475_v5  }
 0x1e2   : > { %13154 = vst [vmem:[#allocation28_spill] sm:$0xff] %v9163_v20  ;;  %v9165_v33 = vpop.permute.xlu0 %1310 }
 0x1e3   : > { %13155 = vst [vmem:[#allocation29_spill] sm:$0xff] %v9165_v33  ;;  %v9167_v48 = vpop.permute.xlu2 %1365  ;;  %v7788_v33 = vld [vmem:[%s12966_s3 + $0x30] sm:$0xff] }
 0x1e4   : > { %13156 = vst [vmem:[#allocation135_spill] sm:$0xff] %v9167_v48 }
 0x1e7   : > { %1626 = vperm.xlu1 %8244, %v13157_v29  }
 0x1e8   : > { %1636 = vperm.xlu0 %8243, %v1476_v60   ;;  %v13166_v60 = vld [vmem:[#allocation43_spill] sm:$0xff] }
 0x1e9   : > { %v9170_v40 = vpop.permute.xlu1 %1315  ;;  %1747 = vperm.xlu2 %8245, %v13159_v42  }
 0x1ea   : > { %13158 = vst [vmem:[#allocation33_spill] sm:$0xff] %v9170_v40  ;;  %v9173_v13 = vpop.permute.xlu0 %1325 }
 0x1eb   : > { %13160 = vst [vmem:[#allocation42_spill] sm:$0xff] %v9173_v13  ;;  %v9175_v61 = vpop.permute.xlu2 %1481  ;;  %v13178_v13 = vld [vmem:[#allocation56_spill] sm:$0xff] }
 0x1ec   : > { %13161 = vst [vmem:[#allocation136_spill] sm:$0xff] %v9175_v61  ;;  %v2513_v61 = vld [vmem:[#allocation2 + $0x142] sm:$0xff] }
 0x1ef   : > { %1742 = vperm.xlu1 %8244, %v13162_v22  }
 0x1f0   : > { %1752 = vperm.xlu0 %8243, %v13163_v21   ;;  %v13171_v21 = vld [vmem:[#allocation49_spill] sm:$0xff] }
 0x1f1   : > { %v9179_v5 = vpop.permute.xlu1 %1330  ;;  %1762 = vperm.xlu2 %8245, %v13164_v36  }
 0x1f2   : > { %v9182_v48 = vpop.permute.xlu0 %1340 }
 0x1f3   : > { %v9184_v29 = vpop.permute.xlu2 %1496 }
 0x1f4   : > { %13165 = vst [vmem:[#allocation37_spill] sm:$0xff] %v9184_v29 }
 0x1f7   : > { %1757 = vperm.xlu1 %8244, %v13166_v60  }
 0x1f8   : > { %1767 = vperm.xlu0 %8243, %v13167_v24   ;;  %v13177_v24 = vld [vmem:[#allocation55_spill] sm:$0xff] }
 0x1f9   : > { %v9188_v42 = vpop.permute.xlu1 %1345  ;;  %1777 = vperm.xlu2 %8245, %v13169_v51  }
 0x1fa   : > { %13168 = vst [vmem:[#allocation38_spill] sm:$0xff] %v9188_v42  ;;  %v9191_v43 = vpop.permute.xlu0 %1355  ;;  %v13251_v42 = vmov 0.0  }
 0x1fb   : > { %13170 = vst [vmem:[#allocation48_spill] sm:$0xff] %v9191_v43  ;;  %v9193_v22 = vpop.permute.xlu2 %1511 }
 0x1fc   : > { %2825 = vst.msk [vmem:[#allocation3 + $0x120] sm:$0xff] %vm2787_vm2, %v13251_v42 }
 0x1fd   : > { %2826 = vst.msk [vmem:[#allocation3 + $0x128] sm:$0xff] %vm2787_vm2, %v13251_v42 }
 0x1fe   : > { %2788 = vst.msk [vmem:[#allocation3] sm:$0xff] %vm2787_vm2, %v13251_v42 }
 0x1ff   : > { %1772 = vperm.xlu1 %8244, %v13171_v21   ;;  %2789 = vst.msk [vmem:[#allocation3 + $0x8] sm:$0xff] %vm2787_vm2, %v13251_v42 }
 0x200   : > { %1782 = vperm.xlu0 %8243, %v13172_v57   ;;  %v13183_v57 = vld [vmem:[#allocation61_spill] sm:$0xff]  ;;  %2792 = vst.msk [vmem:[#allocation3 + $0x18] sm:$0xff] %vm2787_vm2, %v13251_v42 }
 0x201   : > { %v9197_v36 = vpop.permute.xlu1 %1360  ;;  %1792 = vperm.xlu2 %8245, %v13174_v9   ;;  %2793 = vst.msk [vmem:[#allocation3 + $0x20] sm:$0xff] %vm2787_vm2, %v13251_v42 }
 0x202   : > { %13173 = vst [vmem:[#allocation43_spill] sm:$0xff] %v9197_v36  ;;  %v9200_v29 = vpop.permute.xlu0 %1370  ;;  %v13184_v36 = vld [vmem:[#allocation62_spill] sm:$0xff] }
 0x203   : > { %13175 = vst [vmem:[#allocation44_spill] sm:$0xff] %v9200_v29  ;;  %v9202_v60 = vpop.permute.xlu2 %1526  ;;  %v13186_v29 = vld [vmem:[#allocation72_spill] sm:$0xff] }
 0x204   : > { %13176 = vst [vmem:[#allocation54_spill] sm:$0xff] %v9202_v60 }
 0x205   : > { %2795 = vst.msk [vmem:[#allocation3 + $0x30] sm:$0xff] %vm2787_vm2, %v13251_v42 }
 0x206   : > { %2796 = vst.msk [vmem:[#allocation3 + $0x38] sm:$0xff] %vm2787_vm2, %v13251_v42 }
 0x207   : > { %1787 = vperm.xlu1 %8244, %v13177_v24   ;;  %2798 = vst.msk [vmem:[#allocation3 + $0x48] sm:$0xff] %vm2787_vm2, %v13251_v42 }
 0x208   : > { %1797 = vperm.xlu0 %8243, %v13178_v13   ;;  %v13188_v13 = vld [vmem:[#allocation67_spill] sm:$0xff]  ;;  %2799 = vst.msk [vmem:[#allocation3 + $0x50] sm:$0xff] %vm2787_vm2, %v13251_v42 }
 0x209   : > { %v9206_v51 = vpop.permute.xlu1 %1375  ;;  %1807 = vperm.xlu2 %8245, %v13180_v1   ;;  %2801 = vst.msk [vmem:[#allocation3 + $0x60] sm:$0xff] %vm2787_vm2, %v13251_v42 }
 0x20a   : > { %13179 = vst [vmem:[#allocation49_spill] sm:$0xff] %v9206_v51  ;;  %v9209_v14 = vpop.permute.xlu0 %1486  ;;  %v13189_v51 = vld [vmem:[#allocation68_spill] sm:$0xff] }
 0x20b   : > { %13181 = vst [vmem:[#allocation50_spill] sm:$0xff] %v9209_v14  ;;  %v9211_v21 = vpop.permute.xlu2 %1541 }
 0x20c   : > { %13182 = vst [vmem:[#allocation60_spill] sm:$0xff] %v9211_v21 }
 0x20d   : > { %2802 = vst.msk [vmem:[#allocation3 + $0x68] sm:$0xff] %vm2787_vm2, %v13251_v42 }
 0x20e   : > { %2804 = vst.msk [vmem:[#allocation3 + $0x78] sm:$0xff] %vm2787_vm2, %v13251_v42 }
 0x20f   : > { %1802 = vperm.xlu1 %8244, %v13183_v57   ;;  %2805 = vst.msk [vmem:[#allocation3 + $0x80] sm:$0xff] %vm2787_vm2, %v13251_v42 }
 0x210   : > { %1812 = vperm.xlu0 %8243, %v13184_v36   ;;  %v13193_v36 = vld [vmem:[#allocation73_spill] sm:$0xff]  ;;  %2807 = vst.msk [vmem:[#allocation3 + $0x90] sm:$0xff] %vm2787_vm2, %v13251_v42 }
 0x211   : > { %v9215_v9 = vpop.permute.xlu1 %1491  ;;  %1822 = vperm.xlu2 %8245, %v13186_v29   ;;  %2808 = vst.msk [vmem:[#allocation3 + $0x98] sm:$0xff] %vm2787_vm2, %v13251_v42 }
 0x212   : > { %13185 = vst [vmem:[#allocation55_spill] sm:$0xff] %v9215_v9  ;;  %v9218_v63 = vpop.permute.xlu0 %1501  ;;  %v13194_v9 = vld [vmem:[#allocation74_spill] sm:$0xff] }
 0x213   : > { %13187 = vst [vmem:[#allocation56_spill] sm:$0xff] %v9218_v63  ;;  %v9220_v24 = vpop.permute.xlu2 %1556  ;;  %v13196_v63 = vld [vmem:[#allocation84_spill] sm:$0xff] }
 0x214   : > { %2810 = vst.msk [vmem:[#allocation3 + $0xa8] sm:$0xff] %vm2787_vm2, %v13251_v42 }
 0x215   : > { %2811 = vst.msk [vmem:[#allocation3 + $0xb0] sm:$0xff] %vm2787_vm2, %v13251_v42 }
 0x216   : > { %2813 = vst.msk [vmem:[#allocation3 + $0xc0] sm:$0xff] %vm2787_vm2, %v13251_v42 }
 0x217   : > { %1817 = vperm.xlu1 %8244, %v13188_v13   ;;  %2814 = vst.msk [vmem:[#allocation3 + $0xc8] sm:$0xff] %vm2787_vm2, %v13251_v42 }
 0x218   : > { %1827 = vperm.xlu0 %8243, %v13189_v51   ;;  %v13199_v51 = vld [vmem:[#allocation79_spill] sm:$0xff]  ;;  %2816 = vst.msk [vmem:[#allocation3 + $0xd8] sm:$0xff] %vm2787_vm2, %v13251_v42 }
 0x219   : > { %v9224_v1 = vpop.permute.xlu1 %1506  ;;  %1837 = vperm.xlu2 %8245, %v13191_v50   ;;  %2817 = vst.msk [vmem:[#allocation3 + $0xe0] sm:$0xff] %vm2787_vm2, %v13251_v42 }
 0x21a   : > { %13190 = vst [vmem:[#allocation66_spill] sm:$0xff] %v9224_v1  ;;  %v9227_v21 = vpop.permute.xlu0 %1516  ;;  %v13200_v1 = vld [vmem:[#allocation80_spill] sm:$0xff] }
 0x21b   : > { %v9229_v57 = vpop.permute.xlu2 %1571  ;;  %2819 = vst.msk [vmem:[#allocation3 + $0xf0] sm:$0xff] %vm2787_vm2, %v13251_v42 }
 0x21c   : > { %13192 = vst [vmem:[#allocation61_spill] sm:$0xff] %v9229_v57  ;;  %v2231_v57 = vld [vmem:[#allocation2 + $0x49] sm:$0xff] }
 0x21d   : > { %2820 = vst.msk [vmem:[#allocation3 + $0xf8] sm:$0xff] %vm2787_vm2, %v13251_v42 }
 0x21e   : > { %2822 = vst.msk [vmem:[#allocation3 + $0x108] sm:$0xff] %vm2787_vm2, %v13251_v42 }
 0x21f   : > { %1832 = vperm.xlu1 %8244, %v13193_v36   ;;  %2823 = vst.msk [vmem:[#allocation3 + $0x110] sm:$0xff] %vm2787_vm2, %v13251_v42 }
 0x220   : > { %1842 = vperm.xlu0 %8243, %v13194_v9   ;;  %v13203_v9 = vld [vmem:[#allocation85_spill] sm:$0xff]  ;;  %2828 = vst.msk [vmem:[#allocation3 + $0x138] sm:$0xff] %vm2787_vm2, %v13251_v42 }
 0x221   : > { %v9233_v29 = vpop.permute.xlu1 %1521  ;;  %1852 = vperm.xlu2 %8245, %v13196_v63   ;;  %2829 = vst.msk [vmem:[#allocation3 + $0x140] sm:$0xff] %vm2787_vm2, %v13251_v42 }
 0x222   : > { %13195 = vst [vmem:[#allocation62_spill] sm:$0xff] %v9233_v29  ;;  %v9236_v32 = vpop.permute.xlu0 %1531  ;;  %v13257_v29 = vld [vmem:[#allocation39_spill] sm:$0xff] }
 0x223   : > { %13197 = vst [vmem:[#allocation72_spill] sm:$0xff] %v9236_v32  ;;  %v9238_v13 = vpop.permute.xlu2 %1586 }
 0x224   : > { %13198 = vst [vmem:[#allocation67_spill] sm:$0xff] %v9238_v13 }
 0x225   : > { %2831 = vst.msk [vmem:[#allocation3 + $0x150] sm:$0xff] %vm2787_vm2, %v13251_v42 }
 0x226   : > { %2832 = vst.msk [vmem:[#allocation3 + $0x158] sm:$0xff] %vm2787_vm2, %v13251_v42 }
 0x227   : > { %1847 = vperm.xlu1 %8244, %v13199_v51   ;;  %2834 = vst.msk [vmem:[#allocation3 + $0x168] sm:$0xff] %vm2787_vm2, %v13251_v42 }
 0x228   : > { %1857 = vperm.xlu0 %8243, %v13200_v1   ;;  %v1737_v1 = vld [vmem:[#allocation2 + $0x18a] sm:$0xff]  ;;  %2835 = vst.msk [vmem:[#allocation3 + $0x170] sm:$0xff] %vm2787_vm2, %v13251_v42 }
 0x229   : > { %v9242_v50 = vpop.permute.xlu1 %1536  ;;  %1867 = vperm.xlu2 %8245, %v8962_v28   ;;  %2837 = vst.msk [vmem:[#allocation3 + $0x180] sm:$0xff] %vm2787_vm2, %v13251_v42 }
 0x22a   : > { %13201 = vst [vmem:[#allocation68_spill] sm:$0xff] %v9242_v50  ;;  %v9245_v43 = vpop.permute.xlu0 %1546  ;;  %v13207_v50 = vld [vmem:[#allocation90_spill] sm:$0xff] }
 0x22b   : > { %13202 = vst [vmem:[#allocation78_spill] sm:$0xff] %v9245_v43  ;;  %v9247_v36 = vpop.permute.xlu2 %1601 }
 0x22c   : > { %2838 = vst.msk [vmem:[#allocation3 + $0x188] sm:$0xff] %vm2787_vm2, %v13251_v42 }
 0x22d   : > { %2840 = vst.msk [vmem:[#allocation3 + $0x198] sm:$0xff] %vm2787_vm2, %v13251_v42 }
 0x22e   : > { %2841 = vst.msk [vmem:[#allocation3 + $0x1a0] sm:$0xff] %vm2787_vm2, %v13251_v42 }
 0x22f   : > { %1862 = vperm.xlu1 %8244, %v13203_v9   ;;  %2827 = vst.msk [vmem:[#allocation3 + $0x130] sm:$0x3] %vm2790_vm3, %v13251_v42 }
 0x230   : > { %1872 = vperm.xlu0 %8243, %v13204_v4   ;;  %v9266_v4 = vld [vmem:[#allocation2 + $0x182] sm:$0xff]  ;;  %2791 = vst.msk [vmem:[#allocation3 + $0x10] sm:$0x3] %vm2790_vm3, %v13251_v42 }
 0x231   : > { %v9251_v63 = vpop.permute.xlu1 %1551  ;;  %1882 = vperm.xlu2 %8245, %v8977_v16   ;;  %v1970_v16 = vld [vmem:[#allocation2 + $0x48] sm:$0xff]  ;;  %2794 = vst.msk [vmem:[#allocation3 + $0x28] sm:$0x3] %vm2790_vm3, %v13251_v42 }
 0x232   : > { %v9254_v13 = vpop.permute.xlu0 %1561  ;;  %2797 = vst.msk [vmem:[#allocation3 + $0x40] sm:$0x3] %vm2790_vm3, %v13251_v42 }
 0x233   : > { %13205 = vst [vmem:[#allocation73_spill] sm:$0xff] %v9254_v13  ;;  %v9256_v51 = vpop.permute.xlu2 %1616  ;;  %v13262_v13 = vld [vmem:[#allocation15_spill] sm:$0xff] }
 0x234   : > { %13206 = vst [vmem:[#allocation74_spill] sm:$0xff] %v9256_v51 }
 0x235   : > { %2800 = vst.msk [vmem:[#allocation3 + $0x58] sm:$0x3] %vm2790_vm3, %v13251_v42 }
 0x236   : > { %2803 = vst.msk [vmem:[#allocation3 + $0x70] sm:$0x3] %vm2790_vm3, %v13251_v42 }
 0x237   : > { %1877 = vperm.xlu1 %8244, %v13207_v50   ;;  %2806 = vst.msk [vmem:[#allocation3 + $0x88] sm:$0x3] %vm2790_vm3, %v13251_v42 }
 0x238   : > { %1887 = vperm.xlu0 %8243, %v8966_v0   ;;  %2809 = vst.msk [vmem:[#allocation3 + $0xa0] sm:$0x3] %vm2790_vm3, %v13251_v42 }
 0x239   : > { %v9260_v28 = vpop.permute.xlu1 %1566  ;;  %1897 = vperm.xlu2 %8245, %v1737_v1   ;;  %v1971_v1 = vld [vmem:[#allocation2 + $0x50] sm:$0xff]  ;;  %2812 = vst.msk [vmem:[#allocation3 + $0xb8] sm:$0x3] %vm2790_vm3, %v13251_v42 }
 0x23a   : > { %v9262_v43 = vpop.permute.xlu0 %1576  ;;  %2815 = vst.msk [vmem:[#allocation3 + $0xd0] sm:$0x3] %vm2790_vm3, %v13251_v42 }
 0x23b   : > { %13208 = vst [vmem:[#allocation84_spill] sm:$0xff] %v9262_v43  ;;  %v9264_v9 = vpop.permute.xlu2 %1631  ;;  %v2251_v43 = vld [vmem:[#allocation2 + $0x139] sm:$0xff] }
 0x23c   : > { %13209 = vst [vmem:[#allocation79_spill] sm:$0xff] %v9264_v9 }
 0x23d   : > { %2818 = vst.msk [vmem:[#allocation3 + $0xe8] sm:$0x3] %vm2790_vm3, %v13251_v42 }
 0x23e   : > { %2821 = vst.msk [vmem:[#allocation3 + $0x100] sm:$0x3] %vm2790_vm3, %v13251_v42 }
 0x23f   : > { %1892 = vperm.xlu1 %8244, %v9266_v4   ;;  %2824 = vst.msk [vmem:[#allocation3 + $0x118] sm:$0x3] %vm2790_vm3, %v13251_v42 }
 0x240   : > { %2004 = vperm.xlu0 %8243, %v1968_v35   ;;  %v1972_v35 = vld [vmem:[#allocation2 + $0x60] sm:$0xff]  ;;  %2830 = vst.msk [vmem:[#allocation3 + $0x148] sm:$0x3] %vm2790_vm3, %v13251_v42 }
 0x241   : > { %v9269_v51 = vpop.permute.xlu1 %1581  ;;  %2014 = vperm.xlu2 %8245, %v1970_v16   ;;  %2833 = vst.msk [vmem:[#allocation3 + $0x160] sm:$0x3] %vm2790_vm3, %v13251_v42 }
 0x242   : > { %13210 = vst [vmem:[#allocation80_spill] sm:$0xff] %v9269_v51  ;;  %v9271_v50 = vpop.permute.xlu0 %1591  ;;  %v1976_v51 = vld [vmem:[#allocation2 + $0x90] sm:$0xff] }
 0x243   : > { %v9273_v0 = vpop.permute.xlu2 %1747  ;;  %2836 = vst.msk [vmem:[#allocation3 + $0x178] sm:$0x3] %vm2790_vm3, %v13251_v42 }
 0x244   : > { %13211 = vst [vmem:[#allocation85_spill] sm:$0xff] %v9273_v0 }
 0x245   : > { %2839 = vst.msk [vmem:[#allocation3 + $0x190] sm:$0x3] %vm2790_vm3, %v13251_v42 }
 0x246   : > { %2842 = vst.msk [vmem:[#allocation3 + $0x1a8] sm:$0x3] %vm2790_vm3, %v13251_v42 }
 0x247   : > { %2009 = vperm.xlu1 %8244, %v1969_v23   ;;  %v1975_v23 = vld [vmem:[#allocation2 + $0x80] sm:$0xff] }
 0x248   : > { %2019 = vperm.xlu0 %8243, %v1971_v1   ;;  %v1977_v1 = vld [vmem:[#allocation2 + $0x98] sm:$0xff] }
 0x249   : > { %v9275_v9 = vpop.permute.xlu1 %1596  ;;  %2029 = vperm.xlu2 %8245, %v1973_v19  }
 0x24a   : > { %v9277_v32 = vpop.permute.xlu0 %1606 }
 0x24b   : > { %13212 = vst [vmem:[#allocation86_spill] sm:$0xff] %v9277_v32  ;;  %v9279_v14 = vpop.permute.xlu2 %1762 }
 0x24c   : > { %13213 = vst [vmem:[#allocation90_spill] sm:$0xff] %v9279_v14 }
 0x24f   : > { %2024 = vperm.xlu1 %8244, %v1972_v35   ;;  %v1980_v35 = vld [vmem:[#allocation2 + $0xc0] sm:$0xff] }
 0x250   : > { %2034 = vperm.xlu0 %8243, %v1974_v2   ;;  %v1978_v2 = vld [vmem:[#allocation2 + $0xa8] sm:$0xff] }
 0x251   : > { %v9281_v16 = vpop.permute.xlu1 %1611  ;;  %2044 = vperm.xlu2 %8245, %v1976_v51  }
 0x252   : > { %13214 = vst [vmem:[#allocation137_spill] sm:$0xff] %v9281_v16  ;;  %v9283_v0 = vpop.permute.xlu0 %1621  ;;  %v1982_v16 = vld [vmem:[#allocation2 + $0xd8] sm:$0xff] }
 0x253   : > { %13215 = vst [vmem:[#allocation138_spill] sm:$0xff] %v9283_v0  ;;  %v9285_v15 = vpop.permute.xlu2 %1777 }
 0x257   : > { %2039 = vperm.xlu1 %8244, %v1975_v23   ;;  %v1981_v23 = vld [vmem:[#allocation2 + $0xc8] sm:$0xff] }
 0x258   : > { %2049 = vperm.xlu0 %8243, %v1977_v1   ;;  %v1983_v1 = vld [vmem:[#allocation2 + $0xe0] sm:$0xff] }
 0x259   : > { %v9287_v19 = vpop.permute.xlu1 %1626  ;;  %2059 = vperm.xlu2 %8245, %v1979_v25  }
 0x25a   : > { %13216 = vst [vmem:[#allocation139_spill] sm:$0xff] %v9287_v19  ;;  %v9289_v14 = vpop.permute.xlu0 %1636  ;;  %v1985_v19 = vld [vmem:[#allocation2 + $0xf8] sm:$0xff] }
 0x25b   : > { %13217 = vst [vmem:[#allocation140_spill] sm:$0xff] %v9289_v14  ;;  %v9291_v41 = vpop.permute.xlu2 %1792 }
 0x25c   : > { %13218 = vst [vmem:[#allocation141_spill] sm:$0xff] %v9291_v41 }
 0x25f   : > { %2054 = vperm.xlu1 %8244, %v1978_v2   ;;  %v1984_v2 = vld [vmem:[#allocation2 + $0xf0] sm:$0xff] }
 0x260   : > { %2064 = vperm.xlu0 %8243, %v1980_v35   ;;  %v1986_v35 = vld [vmem:[#allocation2 + $0x108] sm:$0xff] }
 0x261   : > { %v9293_v51 = vpop.permute.xlu1 %1742  ;;  %2074 = vperm.xlu2 %8245, %v1982_v16  }
 0x262   : > { %13219 = vst [vmem:[#allocation142_spill] sm:$0xff] %v9293_v51  ;;  %v9295_v0 = vpop.permute.xlu0 %1752 }
 0x263   : > { %13220 = vst [vmem:[#allocation143_spill] sm:$0xff] %v9295_v0  ;;  %v9297_v12 = vpop.permute.xlu2 %1807 }
 0x264   : > { %13221 = vst [vmem:[#allocation144_spill] sm:$0xff] %v9297_v12 }
 0x267   : > { %2069 = vperm.xlu1 %8244, %v1981_v23   ;;  %v1987_v23 = vld [vmem:[#allocation2 + $0x110] sm:$0xff] }
 0x268   : > { %2079 = vperm.xlu0 %8243, %v1983_v1   ;;  %v1989_v1 = vld [vmem:[#allocation2 + $0x128] sm:$0xff] }
 0x269   : > { %v9299_v25 = vpop.permute.xlu1 %1757  ;;  %2089 = vperm.xlu2 %8245, %v1985_v19  }
 0x26a   : > { %13222 = vst [vmem:[#allocation145_spill] sm:$0xff] %v9299_v25  ;;  %v9301_v14 = vpop.permute.xlu0 %1767  ;;  %v1991_v25 = vld [vmem:[#allocation2 + $0x140] sm:$0xff] }
 0x26b   : > { %13223 = vst [vmem:[#allocation146_spill] sm:$0xff] %v9301_v14  ;;  %v9303_v41 = vpop.permute.xlu2 %1822 }
 0x26c   : > { %13224 = vst [vmem:[#allocation147_spill] sm:$0xff] %v9303_v41 }
 0x26f   : > { %2084 = vperm.xlu1 %8244, %v1984_v2   ;;  %v1990_v2 = vld [vmem:[#allocation2 + $0x138] sm:$0xff] }
 0x270   : > { %2094 = vperm.xlu0 %8243, %v1986_v35   ;;  %v1992_v35 = vld [vmem:[#allocation2 + $0x150] sm:$0xff] }
 0x271   : > { %v9305_v16 = vpop.permute.xlu1 %1772  ;;  %2104 = vperm.xlu2 %8245, %v1988_v58  }
 0x272   : > { %v9307_v12 = vpop.permute.xlu0 %1782 }
 0x273   : > { %13225 = vst [vmem:[#allocation148_spill] sm:$0xff] %v9307_v12  ;;  %v9309_v0 = vpop.permute.xlu2 %1837  ;;  %v2509_v12 = vld [vmem:[#allocation2 + $0x112] sm:$0xff] }
 0x274   : > { %13226 = vst [vmem:[#allocation149_spill] sm:$0xff] %v9309_v0 }
 0x277   : > { %2099 = vperm.xlu1 %8244, %v1987_v23   ;;  %v2243_v23 = vld [vmem:[#allocation2 + $0xd9] sm:$0xff] }
 0x278   : > { %2109 = vperm.xlu0 %8243, %v1989_v1   ;;  %v2504_v1 = vld [vmem:[#allocation2 + $0xda] sm:$0xff] }
 0x279   : > { %v9311_v19 = vpop.permute.xlu1 %1787  ;;  %2119 = vperm.xlu2 %8245, %v1991_v25  }
 0x27a   : > { %13227 = vst [vmem:[#allocation150_spill] sm:$0xff] %v9311_v19  ;;  %v9313_v14 = vpop.permute.xlu0 %1797 }
 0x27b   : > { %13228 = vst [vmem:[#allocation151_spill] sm:$0xff] %v9313_v14  ;;  %v9315_v8 = vpop.permute.xlu2 %1852 }
 0x27f   : > { %2114 = vperm.xlu1 %8244, %v1990_v2   ;;  %v2235_v2 = vld [vmem:[#allocation2 + $0x79] sm:$0xff] }
 0x280   : > { %2124 = vperm.xlu0 %8243, %v1992_v35   ;;  %v2496_v35 = vld [vmem:[#allocation2 + $0x7a] sm:$0xff] }
 0x281   : > { %v9317_v58 = vpop.permute.xlu1 %1802  ;;  %2375 = vperm.xlu2 %8245, %v2251_v43  }
 0x282   : > { %13229 = vst [vmem:[#allocation152_spill] sm:$0xff] %v9317_v58  ;;  %v9319_v0 = vpop.permute.xlu0 %1812  ;;  %v2252_v58 = vld [vmem:[#allocation2 + $0x141] sm:$0xff] }
 0x283   : > { %v9321_v40 = vpop.permute.xlu2 %1867 }
 0x284   : > { %13230 = vst [vmem:[#allocation153_spill] sm:$0xff] %v9321_v40  ;;  %v2246_v40 = vld [vmem:[#allocation2 + $0xf9] sm:$0xff] }
 0x287   : > { %2335 = vperm.xlu1 %8244, %v2243_v23   ;;  %v2244_v23 = vld [vmem:[#allocation2 + $0xe1] sm:$0xff] }
 0x288   : > { %2596 = vperm.xlu0 %8243, %v2504_v1   ;;  %v2505_v1 = vld [vmem:[#allocation2 + $0xe2] sm:$0xff] }
 0x289   : > { %v9323_v25 = vpop.permute.xlu1 %1817  ;;  %2636 = vperm.xlu2 %8245, %v2512_v53  }
 0x28a   : > { %v9325_v14 = vpop.permute.xlu0 %1827 }
 0x28b   : > { %v9327_v19 = vpop.permute.xlu2 %1882 }
 0x28c   : > { %13231 = vst [vmem:[#allocation154_spill] sm:$0xff] %v9327_v19 }
 0x28f   : > { %2295 = vperm.xlu1 %8244, %v2235_v2   ;;  %v2236_v2 = vld [vmem:[#allocation2 + $0x81] sm:$0xff] }
 0x290   : > { %2556 = vperm.xlu0 %8243, %v2496_v35   ;;  %v2497_v35 = vld [vmem:[#allocation2 + $0x82] sm:$0xff] }
 0x291   : > { %v9329_v43 = vpop.permute.xlu1 %1832  ;;  %2380 = vperm.xlu2 %8245, %v2252_v58  }
 0x292   : > { %13232 = vst [vmem:[#allocation155_spill] sm:$0xff] %v9329_v43  ;;  %v9331_v51 = vpop.permute.xlu0 %1842  ;;  %v1995_v43 = vld [vmem:[#allocation2 + $0x170] sm:$0xff] }
 0x293   : > { %13233 = vst [vmem:[#allocation156_spill] sm:$0xff] %v9331_v51  ;;  %v9333_v60 = vpop.permute.xlu2 %1897 }
 0x294   : > { %13234 = vst [vmem:[#allocation157_spill] sm:$0xff] %v9333_v60 }
 0x297   : > { %2340 = vperm.xlu1 %8244, %v2244_v23   ;;  %v2245_v23 = vld [vmem:[#allocation2 + $0xf1] sm:$0xff] }
 0x298   : > { %2601 = vperm.xlu0 %8243, %v2505_v1   ;;  %v2506_v1 = vld [vmem:[#allocation2 + $0xf2] sm:$0xff] }
 0x299   : > { %v9335_v53 = vpop.permute.xlu1 %1847  ;;  %2641 = vperm.xlu2 %8245, %v2513_v61  }
 0x29a   : > { %13235 = vst [vmem:[#allocation158_spill] sm:$0xff] %v9335_v53  ;;  %v9337_v19 = vpop.permute.xlu0 %1857  ;;  %v2514_v53 = vld [vmem:[#allocation2 + $0x152] sm:$0xff] }
 0x29b   : > { %v9339_v46 = vpop.permute.xlu2 %2014 }
 0x29c   : > { %13236 = vst [vmem:[#allocation159_spill] sm:$0xff] %v9339_v46 }
 0x29f   : > { %2300 = vperm.xlu1 %8244, %v2236_v2   ;;  %v2237_v2 = vld [vmem:[#allocation2 + $0x91] sm:$0xff] }
 0x2a0   : > { %2561 = vperm.xlu0 %8243, %v2497_v35   ;;  %v2498_v35 = vld [vmem:[#allocation2 + $0x92] sm:$0xff] }
 0x2a1   : > { %v9341_v58 = vpop.permute.xlu1 %1862  ;;  %2385 = vperm.xlu2 %8245, %v2253_v17  }
 0x2a2   : > { %v9343_v60 = vpop.permute.xlu0 %1872 }
 0x2a3   : > { %13237 = vst [vmem:[#allocation160_spill] sm:$0xff] %v9343_v60  ;;  %v9345_v51 = vpop.permute.xlu2 %2029 }
 0x2a4   : > { %13238 = vst [vmem:[#allocation161_spill] sm:$0xff] %v9345_v51 }
 0x2a7   : > { %2345 = vperm.xlu1 %8244, %v2245_v23   ;;  %v1993_v23 = vld [vmem:[#allocation2 + $0x158] sm:$0xff] }
 0x2a8   : > { %2606 = vperm.xlu0 %8243, %v2506_v1   ;;  %v2229_v1 = vld [vmem:[#allocation2 + $0x31] sm:$0xff] }
 0x2a9   : > { %v9347_v61 = vpop.permute.xlu1 %1877  ;;  %2646 = vperm.xlu2 %8245, %v2514_v53  }
 0x2aa   : > { %13239 = vst [vmem:[#allocation162_spill] sm:$0xff] %v9347_v61  ;;  %v9349_v46 = vpop.permute.xlu0 %1887  ;;  %v2507_v61 = vld [vmem:[#allocation2 + $0xfa] sm:$0xff] }
 0x2ab   : > { %13240 = vst [vmem:[#allocation163_spill] sm:$0xff] %v9349_v46  ;;  %v9351_v37 = vpop.permute.xlu2 %2044 }
 0x2ac   : > { %13241 = vst [vmem:[#allocation164_spill] sm:$0xff] %v9351_v37 }
 0x2af   : > { %2305 = vperm.xlu1 %8244, %v2237_v2   ;;  %v2254_v2 = vld [vmem:[#allocation2 + $0x159] sm:$0xff] }
 0x2b0   : > { %2566 = vperm.xlu0 %8243, %v2498_v35   ;;  %v2238_v35 = vld [vmem:[#allocation2 + $0x99] sm:$0xff] }
 0x2b1   : > { %v9353_v17 = vpop.permute.xlu1 %1892  ;;  %2350 = vperm.xlu2 %8245, %v2246_v40  }
 0x2b2   : > { %13242 = vst [vmem:[#allocation165_spill] sm:$0xff] %v9353_v17  ;;  %v9355_v51 = vpop.permute.xlu0 %2004  ;;  %v2515_v17 = vld [vmem:[#allocation2 + $0x15a] sm:$0xff] }
 0x2b3   : > { %13243 = vst [vmem:[#allocation166_spill] sm:$0xff] %v9355_v51  ;;  %v9357_v60 = vpop.permute.xlu2 %2059 }
 0x2b4   : > { %13244 = vst [vmem:[#allocation167_spill] sm:$0xff] %v9357_v60 }
 0x2b7   : > { %2129 = vperm.xlu1 %8244, %v1993_v23   ;;  %v2490_v23 = vld [vmem:[#allocation2 + $0x32] sm:$0xff] }
 0x2b8   : > { %2265 = vperm.xlu0 %8243, %v2229_v1   ;;  %v2499_v1 = vld [vmem:[#allocation2 + $0x9a] sm:$0xff] }
 0x2b9   : > { %v9359_v53 = vpop.permute.xlu1 %2009  ;;  %2611 = vperm.xlu2 %8245, %v2507_v61  }
 0x2ba   : > { %13245 = vst [vmem:[#allocation168_spill] sm:$0xff] %v9359_v53  ;;  %v9361_v46 = vpop.permute.xlu0 %2019  ;;  %v2247_v53 = vld [vmem:[#allocation2 + $0x109] sm:$0xff] }
 0x2bb   : > { %13246 = vst [vmem:[#allocation169_spill] sm:$0xff] %v9361_v46  ;;  %v9363_v30 = vpop.permute.xlu2 %2074 }
 0x2bf   : > { %2390 = vperm.xlu1 %8244, %v2254_v2   ;;  %v1994_v2 = vld [vmem:[#allocation2 + $0x168] sm:$0xff] }
 0x2c0   : > { %2310 = vperm.xlu0 %8243, %v2238_v35   ;;  %v2230_v35 = vld [vmem:[#allocation2 + $0x39] sm:$0xff] }
 0x2c1   : > { %v9365_v40 = vpop.permute.xlu1 %2024  ;;  %2651 = vperm.xlu2 %8245, %v2515_v17  }
 0x2c2   : > { %13247 = vst [vmem:[#allocation170_spill] sm:$0xff] %v9365_v40  ;;  %v9367_v60 = vpop.permute.xlu0 %2034  ;;  %v2508_v40 = vld [vmem:[#allocation2 + $0x10a] sm:$0xff] }
 0x2c3   : > { %v9369_v51 = vpop.permute.xlu2 %2089 }
 0x2c7   : > { %2526 = vperm.xlu1 %8244, %v2490_v23  }
 0x2c8   : > { %2571 = vperm.xlu0 %8243, %v2499_v1   ;;  %v2255_v1 = vld [vmem:[#allocation2 + $0x169] sm:$0xff] }
 0x2c9   : > { %v9371_v61 = vpop.permute.xlu1 %2039  ;;  %2355 = vperm.xlu2 %8245, %v2247_v53  }
 0x2ca   : > { %v9373_v46 = vpop.permute.xlu0 %2049 }
 0x2cb   : > { %13248 = vst [vmem:[#allocation171_spill] sm:$0xff] %v9373_v46  ;;  %v9375_v32 = vpop.permute.xlu2 %2104 }
 0x2cc   : > { %13249 = vst [vmem:[#allocation172_spill] sm:$0xff] %v9375_v32 }
 0x2cf   : > { %2134 = vperm.xlu1 %8244, %v1994_v2   ;;  %v2239_v2 = vld [vmem:[#allocation2 + $0xa9] sm:$0xff] }
 0x2d0   : > { %2270 = vperm.xlu0 %8243, %v2230_v35  }
 0x2d1   : > { %v9377_v17 = vpop.permute.xlu1 %2054  ;;  %2616 = vperm.xlu2 %8245, %v2508_v40   ;;  %v2516_v40 = vld [vmem:[#allocation2 + $0x16a] sm:$0xff] }
 0x2d2   : > { %13250 = vst [vmem:[#allocation173_spill] sm:$0xff] %v9377_v17  ;;  %v9381_v23 = vpop.permute.xlu0 %2064  ;;  %v9428_v17 = vld [vmem:[%s12964_s1 + $0x1] ss:$0 sm:$0xff] }
 0x2d3   : > { %13252 = vst [vmem:[#allocation174_spill] sm:$0xff] %v9381_v23  ;;  %v9385_v53 = vpop.permute.xlu2 %2119  ;;  %v882_v54 = vmul.f32 %v9428_v17, %v8990_v3  ;;  %v881_v52 = vmul.f32 %v9428_v17, %v8984_v31  ;;  %v13256_v3 = vld [vmem:[#allocation22_spill] sm:$0xff]  ;;  %v9469_v31 = vld [vmem:[%s12964_s1 + $0x3] ss:$0 sm:$0xff] }
 0x2d7   : > { %2395 = vperm.xlu1 %8244, %v2255_v1   ;;  %v2491_v1 = vld [vmem:[#allocation2 + $0x3a] sm:$0xff] }
 0x2d8   : > { %2315 = vperm.xlu0 %8243, %v2239_v2   ;;  %v2500_v2 = vld [vmem:[#allocation2 + $0xaa] sm:$0xff] }
 0x2d9   : > { %v9399_v35 = vpop.permute.xlu1 %2069  ;;  %2656 = vperm.xlu2 %8245, %v2516_v40   ;;  %v2248_v40 = vld [vmem:[#allocation2 + $0x111] sm:$0xff] }
 0x2da   : > { %13253 = vst [vmem:[#allocation175_spill] sm:$0xff] %v9399_v35  ;;  %v9403_v23 = vpop.permute.xlu0 %2079 }
 0x2db   : > { %v9407_v32 = vpop.permute.xlu2 %2375 }
 0x2df   : > { %2531 = vperm.xlu1 %8244, %v2491_v1  }
 0x2e0   : > { %2576 = vperm.xlu0 %8243, %v2500_v2   ;;  %v7789_v2 = vld [vmem:[%s12966_s3 + $0x38] sm:$0xff] }
 0x2e1   : > { %v9421_v35 = vpop.permute.xlu1 %2084  ;;  %2360 = vperm.xlu2 %8245, %v2248_v40   ;;  %v9444_v40 = vld [vmem:[%s12964_s1] ss:$0 sm:$0xff]  ;;  %8223 = vmatpush.msra.mxu3 %v7789_v2 }
 0x2e2   : > { %13254 = vst [vmem:[#allocation176_spill] sm:$0xff] %v9421_v35  ;;  %v9430_v46 = vpop.permute.xlu0 %2094  ;;  %8222 = vmatpush.msra.mxu2 %v7789_v2  ;;  %8221 = vmatpush.msra.mxu1 %v7789_v2  ;;  %v621_v37 = vmul.f32 %v9444_v40, %v13256_v3  ;;  %v1404_v35 = vmul.f32 %v9469_v31, %v9150_v47 }
 0x2e3   : > { %13255 = vst [vmem:[#allocation177_spill] sm:$0xff] %v9430_v46  ;;  %v9434_v1 = vpop.permute.xlu2 %2636  ;;  %v9449_v46 = vld [vmem:[%s12964_s1 + $0x2] ss:$0 sm:$0xff]  ;;  %3057 = vmatpush.msra.mxu0 %v7789_v2  ;;  %8226 = vmatpush.msra.mxu3 %v7788_v33  ;;  %v620_v2 = vmul.f32 %v9444_v40, %v13257_v29  ;;  %v9487_v29 = vld [vmem:[%s12964_s1 + $0x4] ss:$0 sm:$0xff]  ;;  %v1403_v47 = vmul.f32 %v9469_v31, %v9179_v5 }
 0x2e4   : > { %v1143_v62 = vmul.f32 %v9449_v46, %v9085_v38  ;;  %8225 = vmatpush.msra.mxu2 %v7788_v33  ;;  %v1142_v3 = vmul.f32 %v9449_v46, %v9053_v49  ;;  %v7787_v38 = vld [vmem:[%s12966_s3 + $0x28] sm:$0xff]  ;;  %8224 = vmatpush.msra.mxu1 %v7788_v33  ;;  %v914_v7 = vadd.f32 %v882_v54, %v621_v37  ;;  %v7786_v37 = vld [vmem:[%s12966_s3 + $0x20] sm:$0xff] }
 0x2e5   : > { %8229 = vmatpush.msra.mxu3 %v7787_v38  ;;  %v913_v49 = vadd.f32 %v881_v52, %v620_v2  ;;  %v1665_v52 = vmul.f32 %v9487_v29, %v9275_v9  ;;  %3058 = vmatpush.msra.mxu0 %v7788_v33  ;;  %v1664_v5 = vmul.f32 %v9487_v29, %v9271_v50  ;;  %v2240_v50 = vld [vmem:[#allocation2 + $0xb1] sm:$0xff] }
 0x2e6   : > { %8228 = vmatpush.msra.mxu2 %v7787_v38  ;;  %v1175_v54 = vadd.f32 %v1143_v62, %v914_v7  ;;  %8227 = vmatpush.msra.mxu1 %v7787_v38 }
 0x2e7   : > { %2139 = vperm.xlu1 %8244, %v1995_v43   ;;  %8232 = vmatpush.msra.mxu3 %v7786_v37  ;;  %v1174_v2 = vadd.f32 %v1142_v3, %v913_v49  ;;  %v13260_v3 = vld [vmem:[#allocation13_spill] sm:$0xff] }
 0x2e8   : > { %2275 = vperm.xlu0 %8243, %v2231_v57   ;;  %v9503_v57 = vld [vmem:[%s12964_s1 + $0x5] ss:$0 sm:$0xff]  ;;  %8231 = vmatpush.msra.mxu2 %v7786_v37  ;;  %v1436_v7 = vadd.f32 %v1404_v35, %v1175_v54  ;;  %v612_v33 = vmul.f32 %v9444_v40, %v13260_v3  ;;  %v13261_v35 = vld [vmem:[#allocation87_spill] sm:$0xff]  ;;  %v9537_v3 = vld [vmem:[%s12964_s1 + $0x7] ss:$0 sm:$0xff] }
 0x2e9   : > { %v9491_v43 = vpop.permute.xlu1 %2099  ;;  %2621 = vperm.xlu2 %8245, %v2509_v12   ;;  %v1926_v9 = vmul.f32 %v9503_v57, %v9337_v19  ;;  %8230 = vmatpush.msra.mxu1 %v7786_v37  ;;  %v873_v49 = vmul.f32 %v9428_v17, %v13261_v35  ;;  %v1435_v19 = vadd.f32 %v1403_v47, %v1174_v2  ;;  %v2517_v35 = vld [vmem:[#allocation2 + $0x172] sm:$0xff] }
 0x2ea   : > { %13258 = vst [vmem:[#allocation22_spill] sm:$0xff] %v9491_v43  ;;  %v9507_v12 = vpop.permute.xlu0 %2109  ;;  %v2256_v43 = vld [vmem:[#allocation2 + $0x171] sm:$0xff]  ;;  %3059 = vmatpush.msra.mxu0 %v7787_v38  ;;  %v1697_v54 = vadd.f32 %v1665_v52, %v1436_v7  ;;  %v1925_v45 = vmul.f32 %v9503_v57, %v9315_v8  ;;  %v604_v38 = vmul.f32 %v9444_v40, %v13262_v13  ;;  %v13263_v47 = vld [vmem:[#allocation47_spill] sm:$0xff] }
 0x2eb   : > { %13259 = vst [vmem:[#allocation39_spill] sm:$0xff] %v9507_v12  ;;  %v2381_v62 = vpop.permute.xlu2 %2380  ;;  %v9520_v12 = vld [vmem:[%s12964_s1 + $0x6] ss:$0 sm:$0xff]  ;;  %v865_v52 = vmul.f32 %v9428_v17, %v13263_v47  ;;  %v1134_v8 = vmul.f32 %v9449_v46, %v9060_v56  ;;  %v13264_v13 = vld [vmem:[#allocation83_spill] sm:$0xff]  ;;  %v905_v47 = vadd.f32 %v873_v49, %v612_v33  ;;  %v1395_v56 = vmul.f32 %v9469_v31, %v9123_v18 }
 0x2ec   : > { %v2188_v41 = vmul.f32 %v9520_v12, %v9385_v53  ;;  %3060 = vmatpush.msra.mxu0 %v7786_v37  ;;  %v1696_v53 = vadd.f32 %v1664_v5, %v1435_v19  ;;  %v1958_v2 = vadd.f32 %v1926_v9, %v1697_v54  ;;  %v2449_v7 = vmul.f32 %v9537_v3, %v2381_v62  ;;  %v9561_v62 = vld [vmem:[%s12964_s1 + $0x8] ss:$0 sm:$0xff] }
 0x2ed   : > { %v883_v20 = vmul.f32 %v9428_v17, %v13264_v13  ;;  %v13265_v18 = vld [vmem:[#allocation40_spill] sm:$0xff]  ;;  %v1166_v19 = vadd.f32 %v1134_v8, %v905_v47  ;;  %v2448_v54 = vmul.f32 %v9537_v3, %v9407_v32  ;;  %v1917_v8 = vmul.f32 %v9503_v57, %v9319_v0  ;;  %v2501_v32 = vld [vmem:[#allocation2 + $0xb2] sm:$0xff] }
 0x2ee   : > { %v1957_v37 = vadd.f32 %v1925_v45, %v1696_v53  ;;  %v2220_v5 = vadd.f32 %v2188_v41, %v1958_v2  ;;  %v622_v49 = vmul.f32 %v9444_v40, %v13265_v18  ;;  %v1656_v41 = vmul.f32 %v9487_v29, %v9251_v63  ;;  %v2492_v2 = vld [vmem:[#allocation2 + $0x4a] sm:$0xff] }
 0x2ef   : > { %2400 = vperm.xlu1 %8244, %v2256_v43   ;;  %v1144_v63 = vmul.f32 %v9449_v46, %v9091_v6  ;;  %v2709_v47 = vmul.f32 %v9561_v62, %v9434_v1  ;;  %v2249_v6 = vld [vmem:[#allocation2 + $0x121] sm:$0xff]  ;;  %v1387_v0 = vmul.f32 %v9469_v31, %v9130_v34  ;;  %v1405_v1 = vmul.f32 %v9469_v31, %v9182_v48 }
 0x2f0   : > { %2320 = vperm.xlu0 %8243, %v2240_v50   ;;  %v897_v50 = vadd.f32 %v865_v52, %v604_v38  ;;  %v1126_v38 = vmul.f32 %v9449_v46, %v9039_v44  ;;  %v1427_v52 = vadd.f32 %v1395_v56, %v1166_v19  ;;  %v1648_v19 = vmul.f32 %v9487_v29, %v9193_v22 }
 0x2f1   : > { %v2115_v43 = vpop.permute.xlu1 %2114  ;;  %2661 = vperm.xlu2 %8245, %v2517_v35   ;;  %v2481_v35 = vadd.f32 %v2449_v7, %v2220_v5  ;;  %v915_v7 = vadd.f32 %v883_v20, %v622_v49  ;;  %v2179_v20 = vmul.f32 %v9520_v12, %v9363_v30  ;;  %v1666_v48 = vmul.f32 %v9487_v29, %v9247_v36 }
 0x2f2   : > { %v2187_v9 = vmul.f32 %v9520_v12, %v2115_v43  ;;  %v9566_v33 = vpop.permute.xlu0 %2124  ;;  %v9592_v43 = vld [vmem:[%s12965_s2] ss:$0 sm:$0xff]  ;;  %v1688_v56 = vadd.f32 %v1656_v41, %v1427_v52  ;;  %v1158_v18 = vadd.f32 %v1126_v38, %v897_v50  ;;  %v1927_v52 = vmul.f32 %v9503_v57, %v9341_v58 }
 0x2f3   : > { %v2642_v45 = vpop.permute.xlu2 %2641  ;;  %v1176_v34 = vadd.f32 %v1144_v63, %v915_v7  ;;  %v1909_v63 = vmul.f32 %v9503_v57, %v9305_v16  ;;  %v2171_v58 = vmul.f32 %v9520_v12, %v9367_v60 }
 0x2f4   : > { %v2219_v53 = vadd.f32 %v2187_v9, %v1957_v37  ;;  %v2710_v13 = vmul.f32 %v9561_v62, %v2642_v45  ;;  %v1949_v49 = vadd.f32 %v1917_v8, %v1688_v56  ;;  %v1419_v36 = vadd.f32 %v1387_v0, %v1158_v18  ;;  %v1996_v8 = vld [vmem:[#allocation2 + $0x180] sm:$0xff] }
 0x2f5   : > { %v1437_v38 = vadd.f32 %v1405_v1, %v1176_v34  ;;  %v2189_v56 = vmul.f32 %v9520_v12, %v9566_v33  ;;  %v13270_v34 = vld [vmem:[#allocation70_spill] sm:$0xff] }
 0x2f6   : > { %v2480_v44 = vadd.f32 %v2448_v54, %v2219_v53  ;;  %v2742_v37 = vadd.f32 %v2710_v13, %v2481_v35  ;;  %v13266_v54 = vld [vmem:[#allocation16_spill] sm:$0xff]  ;;  %v13267_v53 = vld [vmem:[#allocation65_spill] sm:$0xff]  ;;  %v2211_v13 = vadd.f32 %v2179_v20, %v1949_v49  ;;  %v1680_v16 = vadd.f32 %v1648_v19, %v1419_v36 }
 0x2f7   : > { %2536 = vperm.xlu1 %8244, %v2492_v2   ;;  %v9618_v35 = vmul.f32 %v9444_v40, %v13266_v54  ;;  %v874_v2 = vmul.f32 %v9428_v17, %v13267_v53  ;;  %v1698_v0 = vadd.f32 %v1666_v48, %v1437_v38  ;;  %v2510_v20 = vld [vmem:[#allocation2 + $0x122] sm:$0xff]  ;;  %v866_v49 = vmul.f32 %v9428_v17, %v13270_v34  ;;  %v13271_v53 = vld [vmem:[#allocation91_spill] sm:$0xff] }
 0x2f8   : > { %v2741_v5 = vadd.f32 %v2709_v47, %v2480_v44  ;;  %v2778_v9 = vadd.f32 %v9592_v43, %v2742_v37  ;;  %2581 = vperm.xlu0 %8243, %v2501_v32   ;;  %v13268_v32 = vld [vmem:[#allocation26_spill] sm:$0xff]  ;;  %v1135_v47 = vmul.f32 %v9449_v46, %v9066_v55  ;;  %v13269_v55 = vld [vmem:[#allocation17_spill] sm:$0xff]  ;;  %v1941_v18 = vadd.f32 %v1909_v63, %v1680_v16 }
 0x2f9   : > { %v2336_v30 = vpop.permute.xlu1 %2335  ;;  %2365 = vperm.xlu2 %8245, %v2249_v6   ;;  %v613_v7 = vmul.f32 %v9444_v40, %v13268_v32  ;;  %v2232_v6 = vld [vmem:[#allocation2 + $0x51] sm:$0xff]  ;;  %v605_v1 = vmul.f32 %v9444_v40, %v13269_v55  ;;  %v1959_v60 = vadd.f32 %v1927_v52, %v1698_v0  ;;  %v1657_v48 = vmul.f32 %v9487_v29, %v9220_v24 }
 0x2fa   : > { %v2777_v41 = vadd.f32 %v9592_v43, %v2741_v5  ;;  %2867 = vst.msk [vmem:[#allocation3 + $0x129] sm:$0xff] %vm2787_vm2, %v2778_v9  ;;  %v2440_v45 = vmul.f32 %v9537_v3, %v2336_v30  ;;  %v2597_v50 = vpop.permute.xlu0 %2596  ;;  %v1396_v9 = vmul.f32 %v9469_v31, %v9157_v11  ;;  %v2180_v16 = vmul.f32 %v9520_v12, %v9403_v23 }
 0x2fb   : > { %v2386_v22 = vpop.permute.xlu2 %2385  ;;  %v2701_v37 = vmul.f32 %v9561_v62, %v2597_v50  ;;  %v906_v5 = vadd.f32 %v874_v2, %v613_v7  ;;  %v876_v2 = vmul.f32 %v9428_v17, %v13271_v53  ;;  %v898_v7 = vadd.f32 %v866_v49, %v605_v1 }
 0x2fc   : > { %2866 = vst.msk [vmem:[#allocation3 + $0x121] sm:$0xff] %vm2787_vm2, %v2777_v41  ;;  %v2472_v44 = vadd.f32 %v2440_v45, %v2211_v13  ;;  %v2450_v33 = vmul.f32 %v9537_v3, %v2386_v22  ;;  %v2203_v41 = vadd.f32 %v2171_v58, %v1941_v18  ;;  %v2221_v45 = vadd.f32 %v2189_v56, %v1959_v60 }
 0x2fd   : > { %v1167_v30 = vadd.f32 %v1135_v47, %v906_v5  ;;  %v1918_v22 = vmul.f32 %v9503_v57, %v9323_v25  ;;  %v1127_v25 = vmul.f32 %v9449_v46, %v9004_v10  ;;  %v1137_v47 = vmul.f32 %v9449_v46, %v9069_v59 }
 0x2fe   : > { %v2733_v11 = vadd.f32 %v2701_v37, %v2472_v44  ;;  %v2482_v63 = vadd.f32 %v2450_v33, %v2221_v45  ;;  %v2241_v37 = vld [vmem:[#allocation2 + $0xc1] sm:$0xff]  ;;  %v908_v10 = vadd.f32 %v876_v2, %v9618_v35  ;;  %v1398_v59 = vmul.f32 %v9469_v31, %v9132_v26  ;;  %v13273_v45 = vld [vmem:[#allocation30_spill] sm:$0xff] }
 0x2ff   : > { %2144 = vperm.xlu1 %8244, %v1996_v8   ;;  %v1428_v13 = vadd.f32 %v1396_v9, %v1167_v30  ;;  %v2257_v8 = vld [vmem:[#allocation2 + $0x181] sm:$0xff]  ;;  %v1388_v56 = vmul.f32 %v9469_v31, %v9136_v27  ;;  %v1159_v35 = vadd.f32 %v1127_v25, %v898_v7  ;;  %v1649_v26 = vmul.f32 %v9487_v29, %v9227_v21 }
 0x300   : > { %2280 = vperm.xlu0 %8243, %v2232_v6   ;;  %v2769_v44 = vadd.f32 %v9592_v43, %v2733_v11  ;;  %v1169_v1 = vadd.f32 %v1137_v47, %v908_v10  ;;  %v1659_v5 = vmul.f32 %v9487_v29, %v9260_v28  ;;  %v13272_v33 = vld [vmem:[#allocation88_spill] sm:$0xff]  ;;  %v1910_v28 = vmul.f32 %v9503_v57, %v9285_v15  ;;  %v13276_v10 = vld [vmem:[#allocation75_spill] sm:$0xff] }
 0x301   : > { %v2296_v19 = vpop.permute.xlu1 %2295  ;;  %2626 = vperm.xlu2 %8245, %v2510_v20   ;;  %v1689_v6 = vadd.f32 %v1657_v48, %v1428_v13  ;;  %v875_v34 = vmul.f32 %v9428_v17, %v13272_v33  ;;  %v1420_v49 = vadd.f32 %v1388_v56, %v1159_v35  ;;  %v2937_v30 = vld [vmem:[#allocation3 + $0x129] sm:$0xff]  ;;  %v2502_v2 = vld [vmem:[#allocation2 + $0xc2] sm:$0xff]  ;;  %v2172_v15 = vmul.f32 %v9520_v12, %v9371_v61 }
 0x302   : > { %v2432_v50 = vmul.f32 %v9537_v3, %v2296_v19  ;;  %v2557_v54 = vpop.permute.xlu0 %2556  ;;  %2858 = vst.msk [vmem:[#allocation3 + $0xc1] sm:$0xff] %vm2787_vm2, %v2769_v44  ;;  %v1430_v11 = vadd.f32 %v1398_v59, %v1169_v1  ;;  %v1920_v19 = vmul.f32 %v9503_v57, %v9325_v14  ;;  %v867_v59 = vmul.f32 %v9428_v17, %v13276_v10  ;;  %v1997_v1 = vld [vmem:[#allocation2 + $0x188] sm:$0xff] }
 0x303   : > { %v2693_v24 = vmul.f32 %v9561_v62, %v2557_v54  ;;  %v2936_v36 = vld [vmem:[#allocation3 + $0x121] sm:$0xff]  ;;  %v2647_v38 = vpop.permute.xlu2 %2646  ;;  %v1950_v20 = vadd.f32 %v1918_v22, %v1689_v6  ;;  %v1136_v54 = vmul.f32 %v9449_v46, %v9033_v39  ;;  %v1681_v53 = vadd.f32 %v1649_v26, %v1420_v49 }
 0x304   : > { %v2464_v52 = vadd.f32 %v2432_v50, %v2203_v41  ;;  %7814 = vmatmul.msk.f32.vlgmr.msra.gmra.mxu3 %vm2787_vm2, %v2936_v36  ;;  %v2711_v32 = vmul.f32 %v9561_v62, %v2647_v38  ;;  %v2493_v41 = vld [vmem:[#allocation2 + $0x52] sm:$0xff]  ;;  %v614_v50 = vmul.f32 %v9444_v40, %v13273_v45  ;;  %v1691_v13 = vadd.f32 %v1659_v5, %v1430_v11  ;;  %v13274_v38 = vld [vmem:[#allocation28_spill] sm:$0xff] }
 0x305   : > { %v2212_v9 = vadd.f32 %v2180_v16, %v1950_v20  ;;  %v2182_v22 = vmul.f32 %v9520_v12, %v9369_v51  ;;  %v13275_v51 = vld [vmem:[#allocation73_spill] sm:$0xff] }
 0x306   : > { %v2725_v0 = vadd.f32 %v2693_v24, %v2464_v52  ;;  %v2743_v58 = vadd.f32 %v2711_v32, %v2482_v63  ;;  %v2250_v24 = vld [vmem:[#allocation2 + $0x129] sm:$0xff]  ;;  %v907_v36 = vadd.f32 %v875_v34, %v614_v50  ;;  %v1397_v63 = vmul.f32 %v9469_v31, %v13274_v38  ;;  %v2233_v34 = vld [vmem:[#allocation2 + $0x61] sm:$0xff]  ;;  %v2912_v38 = vld [vmem:[#allocation3 + $0x1] sm:$0xff] }
 0x307   : > { %2405 = vperm.xlu1 %8244, %v2257_v8   ;;  %v1942_v52 = vadd.f32 %v1910_v28, %v1681_v53  ;;  %v1952_v8 = vadd.f32 %v1920_v19, %v1691_v13  ;;  %v1658_v47 = vmul.f32 %v9487_v29, %v13275_v51  ;;  %v2511_v28 = vld [vmem:[#allocation2 + $0x12a] sm:$0xff]  ;;  %7790 = vmatmul.msk.f32.vlgmr.msra.gmra.mxu0 %vm2787_vm2, %v2912_v38 }
 0x308   : > { %v2761_v23 = vadd.f32 %v9592_v43, %v2725_v0  ;;  %v2779_v55 = vadd.f32 %v9592_v43, %v2743_v58  ;;  %2325 = vperm.xlu0 %8243, %v2241_v37   ;;  %v1168_v25 = vadd.f32 %v1136_v54, %v907_v36 }
 0x309   : > { %v2341_v27 = vpop.permute.xlu1 %2340  ;;  %2666 = vperm.xlu2 %8245, %v9266_v4   ;;  %v2928_v32 = vld [vmem:[#allocation3 + $0xc1] sm:$0xff]  ;;  %v2214_v37 = vadd.f32 %v2182_v22, %v1952_v8  ;;  %v2204_v6 = vadd.f32 %v2172_v15, %v1942_v52 }
 0x30a   : > { %2850 = vst.msk [vmem:[#allocation3 + $0x61] sm:$0xff] %vm2787_vm2, %v2761_v23  ;;  %v2441_v18 = vmul.f32 %v9537_v3, %v2341_v27  ;;  %v2602_v60 = vpop.permute.xlu0 %2601  ;;  %7806 = vmatmul.msk.f32.vlgmr.msra.gmra.mxu2 %vm2787_vm2, %v2928_v32  ;;  %v1429_v56 = vadd.f32 %v1397_v63, %v1168_v25  ;;  %v13282_v22 = vld [vmem:[#allocation62_spill] sm:$0xff]  ;;  %v13283_v63 = vld [vmem:[#allocation71_spill] sm:$0xff] }
 0x30b   : > { %2868 = vst.msk [vmem:[#allocation3 + $0x139] sm:$0xff] %vm2787_vm2, %v2779_v55  ;;  %v2702_v21 = vmul.f32 %v9561_v62, %v2602_v60  ;;  %v2351_v4 = vpop.permute.xlu2 %2350  ;;  %v13277_v55 = vld [vmem:[#allocation147_spill] sm:$0xff]  ;;  %v13279_v60 = vld [vmem:[#allocation108_spill] sm:$0xff]  ;;  %v1650_v15 = vmul.f32 %v9487_v29, %v13282_v22  ;;  %v877_v52 = vmul.f32 %v9428_v17, %v13283_v63  ;;  %v13295_v63 = vld [vmem:[#allocation38_spill] sm:$0xff] }
 0x30c   : > { %v2473_v48 = vadd.f32 %v2441_v18, %v2212_v9  ;;  %7815 = vmatmul.msk.f32.gmra.mxu3 %vm2787_vm2, %v2937_v30  ;;  %v2443_v7 = vmul.f32 %v9537_v3, %v2351_v4  ;;  %v1919_v35 = vmul.f32 %v9503_v57, %v13277_v55  ;;  %v13278_v9 = vld [vmem:[#allocation8_spill] sm:$0xff]  ;;  %v1128_v33 = vmul.f32 %v9449_v46, %v13279_v60 }
 0x30d   : > { %v606_v18 = vmul.f32 %v9444_v40, %v13278_v9  ;;  %v1690_v49 = vadd.f32 %v1658_v47, %v1429_v56  ;;  %v2258_v47 = vld [vmem:[#allocation2 + $0x189] sm:$0xff] }
 0x30e   : > { %v2734_v14 = vadd.f32 %v2702_v21, %v2473_v48  ;;  %v2475_v26 = vadd.f32 %v2443_v7, %v2214_v37  ;;  %v13280_v21 = vld [vmem:[#allocation176_spill] sm:$0xff]  ;;  %v13286_v37 = vld [vmem:[#allocation115_spill] sm:$0xff]  ;;  %v2519_v56 = vld [vmem:[#allocation2 + $0x18a] sm:$0xff] }
 0x30f   : > { %2541 = vperm.xlu1 %8244, %v2493_v41   ;;  %v2181_v30 = vmul.f32 %v9520_v12, %v13280_v21  ;;  %v899_v19 = vadd.f32 %v867_v59, %v606_v18  ;;  %v13281_v48 = vld [vmem:[#allocation124_spill] sm:$0xff]  ;;  %v1951_v45 = vadd.f32 %v1919_v35, %v1690_v49  ;;  %v13289_v9 = vld [vmem:[#allocation61_spill] sm:$0xff]  ;;  %v2913_v49 = vld [vmem:[#allocation3 + $0x9] sm:$0xff] }
 0x310   : > { %v2770_v39 = vadd.f32 %v9592_v43, %v2734_v14  ;;  %2586 = vperm.xlu0 %8243, %v2502_v2   ;;  %v1389_v41 = vmul.f32 %v9469_v31, %v13281_v48  ;;  %v13284_v7 = vld [vmem:[#allocation148_spill] sm:$0xff]  ;;  %v1660_v18 = vmul.f32 %v9487_v29, %v13289_v9  ;;  %7791 = vmatmul.msk.f32.gmra.mxu0 %vm2787_vm2, %v2913_v49 }
 0x311   : > { %v2301_v61 = vpop.permute.xlu1 %2300  ;;  %v2920_v44 = vld [vmem:[#allocation3 + $0x61] sm:$0xff]  ;;  %2370 = vperm.xlu2 %8245, %v2250_v24   ;;  %v1160_v53 = vadd.f32 %v1128_v33, %v899_v19  ;;  %v2213_v14 = vadd.f32 %v2181_v30, %v1951_v45  ;;  %v1911_v25 = vmul.f32 %v9503_v57, %v13284_v7  ;;  %v13290_v21 = vld [vmem:[#allocation96_spill] sm:$0xff]  ;;  %v13291_v19 = vld [vmem:[#allocation155_spill] sm:$0xff] }
 0x312   : > { %2859 = vst.msk [vmem:[#allocation3 + $0xc9] sm:$0xff] %vm2787_vm2, %v2770_v39  ;;  %v2433_v16 = vmul.f32 %v9537_v3, %v2301_v61  ;;  %7798 = vmatmul.msk.f32.vlgmr.msra.gmra.mxu1 %vm2787_vm2, %v2920_v44  ;;  %v2562_v0 = vpop.permute.xlu0 %2561  ;;  %v2938_v58 = vld [vmem:[#allocation3 + $0x139] sm:$0xff]  ;;  %v13285_v61 = vld [vmem:[#allocation31_spill] sm:$0xff]  ;;  %v884_v30 = vmul.f32 %v9428_v17, %v13290_v21  ;;  %v1921_v48 = vmul.f32 %v9503_v57, %v13291_v19  ;;  %v13304_v21 = vld [vmem:[#allocation126_spill] sm:$0xff] }
 0x313   : > { %v2694_v20 = vmul.f32 %v9561_v62, %v2562_v0  ;;  %v2612_v23 = vpop.permute.xlu2 %2611  ;;  %v1421_v39 = vadd.f32 %v1389_v41, %v1160_v53  ;;  %v616_v44 = vmul.f32 %v9444_v40, %v13285_v61  ;;  %v2494_v45 = vld [vmem:[#allocation2 + $0x62] sm:$0xff]  ;;  %v2503_v53 = vld [vmem:[#allocation2 + $0xca] sm:$0xff] }
 0x314   : > { %v2465_v27 = vadd.f32 %v2433_v16, %v2204_v6  ;;  %7816 = vmatmul.msk.f32.gmra.mxu3 %vm2787_vm2, %v2938_v58  ;;  %v2704_v5 = vmul.f32 %v9561_v62, %v2612_v23  ;;  %v1138_v6 = vmul.f32 %v9449_v46, %v13286_v37  ;;  %v2242_v16 = vld [vmem:[#allocation2 + $0xc9] sm:$0xff]  ;;  %v13287_v58 = vld [vmem:[#allocation164_spill] sm:$0xff]  ;;  %v13297_v37 = vld [vmem:[#allocation86_spill] sm:$0xff] }
 0x315   : > { %v1682_v0 = vadd.f32 %v1650_v15, %v1421_v39  ;;  %v2173_v10 = vmul.f32 %v9520_v12, %v13287_v58  ;;  %v13288_v23 = vld [vmem:[#allocation29_spill] sm:$0xff] }
 0x316   : > { %v2726_v4 = vadd.f32 %v2694_v20, %v2465_v27  ;;  %v2736_v11 = vadd.f32 %v2704_v5, %v2475_v26  ;;  %v909_v20 = vadd.f32 %v877_v52, %v616_v44  ;;  %v1399_v55 = vmul.f32 %v9469_v31, %v13288_v23  ;;  %v13294_v15 = vld [vmem:[#allocation177_spill] sm:$0xff] }
 0x317   : > { %2149 = vperm.xlu1 %8244, %v1997_v1   ;;  %v1943_v35 = vadd.f32 %v1911_v25, %v1682_v0  ;;  %v1406_v52 = vmul.f32 %v9469_v31, %v13295_v63  ;;  %v13296_v25 = vld [vmem:[#allocation36_spill] sm:$0xff]  ;;  %v13298_v58 = vld [vmem:[#allocation9_spill] sm:$0xff] }
 0x318   : > { %v2762_v50 = vadd.f32 %v9592_v43, %v2726_v4  ;;  %v2772_v54 = vadd.f32 %v9592_v43, %v2736_v11  ;;  %2285 = vperm.xlu0 %8243, %v2233_v34   ;;  %v1170_v27 = vadd.f32 %v1138_v6, %v909_v20  ;;  %v1667_v6 = vmul.f32 %v9487_v29, %v13297_v37  ;;  %v13300_v20 = vld [vmem:[#allocation103_spill] sm:$0xff]  ;;  %v13310_v37 = vld [vmem:[#allocation150_spill] sm:$0xff] }
 0x319   : > { %v2346_v2 = vpop.permute.xlu1 %2345  ;;  %v2929_v13 = vld [vmem:[#allocation3 + $0xc9] sm:$0xff]  ;;  %2631 = vperm.xlu2 %8245, %v2511_v28   ;;  %v2205_v60 = vadd.f32 %v2173_v10, %v1943_v35  ;;  %v598_v10 = vmul.f32 %v9444_v40, %v13298_v58  ;;  %v1120_v23 = vmul.f32 %v9449_v46, %v13300_v20 }
 0x31a   : > { %2851 = vst.msk [vmem:[#allocation3 + $0x69] sm:$0xff] %vm2787_vm2, %v2762_v50  ;;  %v2442_v24 = vmul.f32 %v9537_v3, %v2346_v2  ;;  %7807 = vmatmul.msk.f32.gmra.mxu2 %vm2787_vm2, %v2929_v13  ;;  %v2607_v36 = vpop.permute.xlu0 %2606  ;;  %v1431_v28 = vadd.f32 %v1399_v55, %v1170_v27  ;;  %v13292_v50 = vld [vmem:[#allocation45_spill] sm:$0xff] }
 0x31b   : > { %2861 = vst.msk [vmem:[#allocation3 + $0xe1] sm:$0xff] %vm2787_vm2, %v2772_v54  ;;  %v2703_v8 = vmul.f32 %v9561_v62, %v2607_v36  ;;  %v9754_v32 = vpop.permute.xlu2 %2651  ;;  %v623_v54 = vmul.f32 %v9444_v40, %v13292_v50  ;;  %v13293_v2 = vld [vmem:[#allocation113_spill] sm:$0xff]  ;;  %v13305_v50 = vld [vmem:[#allocation131_spill] sm:$0xff] }
 0x31c   : > { %v2474_v51 = vadd.f32 %v2442_v24, %v2213_v14  ;;  %v1145_v13 = vmul.f32 %v9449_v46, %v13293_v2  ;;  %v1692_v22 = vadd.f32 %v1660_v18, %v1431_v28  ;;  %v2183_v14 = vmul.f32 %v9520_v12, %v13294_v15  ;;  %v2495_v36 = vld [vmem:[#allocation2 + $0x6a] sm:$0xff] }
 0x31d   : > { %v916_v38 = vadd.f32 %v884_v30, %v623_v54  ;;  %v13302_v18 = vld [vmem:[#allocation18_spill] sm:$0xff]  ;;  %v1381_v30 = vmul.f32 %v9469_v31, %v13304_v21  ;;  %v1390_v54 = vmul.f32 %v9469_v31, %v13305_v50 }
 0x31e   : > { %v2735_v59 = vadd.f32 %v2703_v8, %v2474_v51  ;;  %v1953_v8 = vadd.f32 %v1921_v48, %v1692_v22  ;;  %v859_v51 = vmul.f32 %v9428_v17, %v13296_v25  ;;  %v2520_v48 = vld [vmem:[#allocation2 + $0x19a] sm:$0xff] }
 0x31f   : > { %2410 = vperm.xlu1 %8244, %v2258_v47   ;;  %v1177_v44 = vadd.f32 %v1145_v13, %v916_v38 }
 0x320   : > { %v2771_v26 = vadd.f32 %v9592_v43, %v2735_v59  ;;  %2330 = vperm.xlu0 %8243, %v2242_v16   ;;  %v2215_v16 = vadd.f32 %v2183_v14, %v1953_v8  ;;  %v13299_v59 = vld [vmem:[#allocation53_spill] sm:$0xff]  ;;  %v13308_v8 = vld [vmem:[#allocation142_spill] sm:$0xff] }
 0x321   : > { %v2306_v1 = vpop.permute.xlu1 %2305  ;;  %v2921_v5 = vld [vmem:[#allocation3 + $0x69] sm:$0xff]  ;;  %2671 = vperm.xlu2 %8245, %v2519_v56   ;;  %v868_v56 = vmul.f32 %v9428_v17, %v13299_v59  ;;  %v1438_v35 = vadd.f32 %v1406_v52, %v1177_v44 }
 0x322   : > { %2860 = vst.msk [vmem:[#allocation3 + $0xd9] sm:$0xff] %vm2787_vm2, %v2771_v26  ;;  %v2434_v33 = vmul.f32 %v9537_v3, %v2306_v1  ;;  %7799 = vmatmul.msk.f32.gmra.mxu1 %vm2787_vm2, %v2921_v5  ;;  %v2567_v34 = vpop.permute.xlu0 %2566  ;;  %v13301_v26 = vld [vmem:[#allocation153_spill] sm:$0xff]  ;;  %v2931_v52 = vld [vmem:[#allocation3 + $0xe1] sm:$0xff] }
 0x323   : > { %v2695_v4 = vmul.f32 %v9561_v62, %v2567_v34  ;;  %v2356_v11 = vpop.permute.xlu2 %2355  ;;  %v1928_v27 = vmul.f32 %v9503_v57, %v13301_v26  ;;  %v2234_v5 = vld [vmem:[#allocation2 + $0x69] sm:$0xff]  ;;  %v13303_v34 = vld [vmem:[#allocation110_spill] sm:$0xff] }
 0x324   : > { %v2466_v41 = vadd.f32 %v2434_v33, %v2205_v60  ;;  %v2444_v7 = vmul.f32 %v9537_v3, %v2356_v11  ;;  %v607_v60 = vmul.f32 %v9444_v40, %v13302_v18  ;;  %v891_v33 = vadd.f32 %v859_v51, %v598_v10  ;;  %v13311_v10 = vld [vmem:[#allocation166_spill] sm:$0xff]  ;;  %v13313_v26 = vld [vmem:[#allocation109_spill] sm:$0xff]  ;;  %v1999_v18 = vld [vmem:[#allocation2 + $0x1a0] sm:$0xff] }
 0x325   : > { %v1129_v49 = vmul.f32 %v9449_v46, %v13303_v34  ;;  %v1699_v11 = vadd.f32 %v1667_v6, %v1438_v35  ;;  %v1912_v6 = vmul.f32 %v9503_v57, %v13310_v37  ;;  %v2165_v59 = vmul.f32 %v9520_v12, %v13311_v10  ;;  %v13321_v37 = vld [vmem:[#allocation22_spill] sm:$0xff] }
 0x326   : > { %v2727_v24 = vadd.f32 %v2695_v4, %v2466_v41  ;;  %v2476_v1 = vadd.f32 %v2444_v7, %v2215_v16  ;;  %v1998_v4 = vld [vmem:[#allocation2 + $0x198] sm:$0xff]  ;;  %v900_v41 = vadd.f32 %v868_v56, %v607_v60  ;;  %v2712_v56 = vmul.f32 %v9561_v62, %v9754_v32 }
 0x327   : > { %2546 = vperm.xlu1 %8244, %v2494_v45   ;;  %v1152_v45 = vadd.f32 %v1120_v23, %v891_v33  ;;  %v1960_v13 = vadd.f32 %v1928_v27, %v1699_v11  ;;  %v2259_v23 = vld [vmem:[#allocation2 + $0x199] sm:$0xff]  ;;  %v1139_v27 = vmul.f32 %v9449_v46, %v13313_v26 }
 0x328   : > { %v2763_v39 = vadd.f32 %v9592_v43, %v2727_v24  ;;  %2591 = vperm.xlu0 %8243, %v2503_v53   ;;  %v13306_v53 = vld [vmem:[#allocation136_spill] sm:$0xff]  ;;  %v1161_v15 = vadd.f32 %v1129_v49, %v900_v41  ;;  %v13307_v24 = vld [vmem:[#allocation54_spill] sm:$0xff] }
 0x329   : > { %v2130_v47 = vpop.permute.xlu1 %2129  ;;  %v2930_v61 = vld [vmem:[#allocation3 + $0xd9] sm:$0xff]  ;;  %2551 = vperm.xlu2 %8245, %v2495_v36   ;;  %v1642_v2 = vmul.f32 %v9487_v29, %v13306_v53  ;;  %v1413_v14 = vadd.f32 %v1381_v30, %v1152_v45  ;;  %v1651_v36 = vmul.f32 %v9487_v29, %v13307_v24  ;;  %v13317_v24 = vld [vmem:[#allocation98_spill] sm:$0xff] }
 0x32a   : > { %2852 = vst.msk [vmem:[#allocation3 + $0x79] sm:$0xff] %vm2787_vm2, %v2763_v39  ;;  %7808 = vmatmul.msk.f32.gmra.mxu2 %vm2787_vm2, %v2930_v61  ;;  %v2266_v0 = vpop.permute.xlu0 %2265  ;;  %v2190_v28 = vmul.f32 %v9520_v12, %v2130_v47  ;;  %v1903_v39 = vmul.f32 %v9503_v57, %v13308_v8  ;;  %v13309_v47 = vld [vmem:[#allocation92_spill] sm:$0xff]  ;;  %v1422_v44 = vadd.f32 %v1390_v54, %v1161_v15 }
 0x32b   : > { %v2617_v55 = vpop.permute.xlu2 %2616  ;;  %v878_v61 = vmul.f32 %v9428_v17, %v13309_v47  ;;  %v1674_v58 = vadd.f32 %v1642_v2, %v1413_v14  ;;  %v2426_v33 = vmul.f32 %v9537_v3, %v2266_v0  ;;  %v2521_v49 = vld [vmem:[#allocation2 + $0x1a2] sm:$0xff] }
 0x32c   : > { %v2705_v9 = vmul.f32 %v9561_v62, %v2617_v55  ;;  %v2222_v7 = vadd.f32 %v2190_v28, %v1960_v13  ;;  %v13312_v55 = vld [vmem:[#allocation34_spill] sm:$0xff]  ;;  %v13316_v0 = vld [vmem:[#allocation84_spill] sm:$0xff] }
 0x32d   : > { %v617_v35 = vmul.f32 %v9444_v40, %v13312_v55  ;;  %v1935_v60 = vadd.f32 %v1903_v39, %v1674_v58  ;;  %v1661_v54 = vmul.f32 %v9487_v29, %v13316_v0  ;;  %v2260_v39 = vld [vmem:[#allocation2 + $0x1a1] sm:$0xff] }
 0x32e   : > { %v2737_v19 = vadd.f32 %v2705_v9, %v2476_v1  ;;  %v1683_v1 = vadd.f32 %v1651_v36, %v1422_v44  ;;  %v885_v36 = vmul.f32 %v9428_v17, %v13317_v24  ;;  %v13320_v47 = vld [vmem:[#allocation120_spill] sm:$0xff] }
 0x32f   : > { %2290 = vperm.xlu1 %8244, %v2234_v5   ;;  %v13314_v5 = vld [vmem:[#allocation171_spill] sm:$0xff]  ;;  %v910_v21 = vadd.f32 %v878_v61, %v617_v35  ;;  %v2197_v28 = vadd.f32 %v2165_v59, %v1935_v60  ;;  %v1146_v61 = vmul.f32 %v9449_v46, %v13320_v47  ;;  %v13323_v35 = vld [vmem:[#allocation58_spill] sm:$0xff] }
 0x330   : > { %v2773_v22 = vadd.f32 %v9592_v43, %v2737_v19  ;;  %2154 = vperm.xlu0 %8243, %v1998_v4   ;;  %v2174_v9 = vmul.f32 %v9520_v12, %v13314_v5  ;;  %v1944_v32 = vadd.f32 %v1912_v6, %v1683_v1  ;;  %v13315_v4 = vld [vmem:[#allocation33_spill] sm:$0xff]  ;;  %v2184_v6 = vmul.f32 %v9520_v12, %v13321_v37 }
 0x331   : > { %v2391_v38 = vpop.permute.xlu1 %2390  ;;  %v2922_v63 = vld [vmem:[#allocation3 + $0x79] sm:$0xff]  ;;  %2676 = vperm.xlu2 %8245, %v2520_v48   ;;  %v1400_v11 = vmul.f32 %v9469_v31, %v13315_v4  ;;  %v1171_v48 = vadd.f32 %v1139_v27, %v910_v21  ;;  %v2458_v53 = vadd.f32 %v2426_v33, %v2197_v28  ;;  %v860_v26 = vmul.f32 %v9428_v17, %v13323_v35  ;;  %v13326_v21 = vld [vmem:[#allocation76_spill] sm:$0xff] }
 0x332   : > { %2862 = vst.msk [vmem:[#allocation3 + $0xf1] sm:$0xff] %vm2787_vm2, %v2773_v22  ;;  %v2451_v25 = vmul.f32 %v9537_v3, %v2391_v38  ;;  %7800 = vmatmul.msk.f32.gmra.mxu1 %vm2787_vm2, %v2922_v63  ;;  %7809 = vmatmul.msk.f32.gmra.mxu2 %vm2787_vm2, %v2931_v52  ;;  %v2311_v51 = vpop.permute.xlu0 %2310  ;;  %v2206_v41 = vadd.f32 %v2174_v9, %v1944_v32  ;;  %v13318_v63 = vld [vmem:[#allocation149_spill] sm:$0xff] }
 0x333   : > { %v9828_v16 = vpop.permute.xlu2 %2656  ;;  %v2435_v30 = vmul.f32 %v9537_v3, %v2311_v51  ;;  %v1432_v38 = vadd.f32 %v1400_v11, %v1171_v48  ;;  %v1922_v52 = vmul.f32 %v9503_v57, %v13318_v63  ;;  %v13324_v9 = vld [vmem:[#allocation137_spill] sm:$0xff]  ;;  %v869_v32 = vmul.f32 %v9428_v17, %v13326_v21 }
 0x334   : > { %v2483_v20 = vadd.f32 %v2451_v25, %v2222_v7  ;;  %v13319_v7 = vld [vmem:[#allocation27_spill] sm:$0xff] }
 0x335   : > { %v2467_v22 = vadd.f32 %v2435_v30, %v2206_v41  ;;  %v624_v25 = vmul.f32 %v9444_v40, %v13319_v7  ;;  %v1693_v44 = vadd.f32 %v1661_v54, %v1432_v38  ;;  %v13327_v30 = vld [vmem:[#allocation95_spill] sm:$0xff] }
 0x336   : > { %v2744_v34 = vadd.f32 %v2712_v56, %v2483_v20  ;;  %v13322_v56 = vld [vmem:[#allocation24_spill] sm:$0xff]  ;;  %v1121_v4 = vmul.f32 %v9449_v46, %v13327_v30  ;;  %v13341_v30 = vld [vmem:[#allocation173_spill] sm:$0xff] }
 0x337   : > { %2415 = vperm.xlu1 %8244, %v2259_v23   ;;  %v917_v59 = vadd.f32 %v885_v36, %v624_v25  ;;  %v1407_v20 = vmul.f32 %v9469_v31, %v13322_v56  ;;  %v1954_v23 = vadd.f32 %v1922_v52, %v1693_v44  ;;  %v13332_v36 = vld [vmem:[#allocation133_spill] sm:$0xff] }
 0x338   : > { %v2780_v19 = vadd.f32 %v9592_v43, %v2744_v34  ;;  %2159 = vperm.xlu0 %8243, %v1999_v18   ;;  %v1668_v18 = vmul.f32 %v9487_v29, %v13324_v9  ;;  %v13325_v34 = vld [vmem:[#allocation12_spill] sm:$0xff]  ;;  %v1391_v38 = vmul.f32 %v9469_v31, %v13332_v36  ;;  %v13335_v44 = vld [vmem:[#allocation85_spill] sm:$0xff] }
 0x339   : > { %v2527_v45 = vpop.permute.xlu1 %2526  ;;  %2681 = vperm.xlu2 %8245, %v2521_v49   ;;  %v2932_v50 = vld [vmem:[#allocation3 + $0xf1] sm:$0xff]  ;;  %v1178_v5 = vadd.f32 %v1146_v61, %v917_v59  ;;  %v2216_v60 = vadd.f32 %v2184_v6, %v1954_v23  ;;  %v599_v49 = vmul.f32 %v9444_v40, %v13325_v34  ;;  %v1904_v37 = vmul.f32 %v9503_v57, %v13335_v44  ;;  %v13337_v23 = vld [vmem:[#allocation141_spill] sm:$0xff] }
 0x33a   : > { %2869 = vst.msk [vmem:[#allocation3 + $0x141] sm:$0xff] %vm2787_vm2, %v2780_v19  ;;  %v2687_v2 = vmul.f32 %v9561_v62, %v2527_v45  ;;  %v2572_v13 = vpop.permute.xlu0 %2571  ;;  %7810 = vmatmul.msk.f32.gmra.mxu2 %vm2787_vm2, %v2932_v50  ;;  %v13328_v19 = vld [vmem:[#allocation160_spill] sm:$0xff] }
 0x33b   : > { %v2696_v15 = vmul.f32 %v9561_v62, %v2572_v13  ;;  %v2361_v14 = vpop.permute.xlu2 %2360  ;;  %v1439_v28 = vadd.f32 %v1407_v20, %v1178_v5  ;;  %v1929_v48 = vmul.f32 %v9503_v57, %v13328_v19  ;;  %v13329_v50 = vld [vmem:[#allocation20_spill] sm:$0xff]  ;;  %v892_v54 = vadd.f32 %v860_v26, %v599_v49 }
 0x33c   : > { %v2719_v8 = vadd.f32 %v2687_v2, %v2458_v53  ;;  %v2445_v55 = vmul.f32 %v9537_v3, %v2361_v14  ;;  %v608_v0 = vmul.f32 %v9444_v40, %v13329_v50  ;;  %v13330_v53 = vld [vmem:[#allocation102_spill] sm:$0xff]  ;;  %v13331_v13 = vld [vmem:[#allocation128_spill] sm:$0xff]  ;;  %v2713_v5 = vmul.f32 %v9561_v62, %v9828_v16 }
 0x33d   : > { %v2728_v51 = vadd.f32 %v2696_v15, %v2467_v22  ;;  %v1130_v2 = vmul.f32 %v9449_v46, %v13330_v53  ;;  %v1382_v17 = vmul.f32 %v9469_v31, %v13331_v13  ;;  %v1700_v22 = vadd.f32 %v1668_v18, %v1439_v28  ;;  %v9911_v59 = vld [vmem:[%s12964_s1 + $0x1] ss:$0 sm:$0xff]  ;;  %v9926_v18 = vld [vmem:[%s12964_s1] ss:$0 sm:$0xff] }
 0x33e   : > { %v2755_v58 = vadd.f32 %v9592_v43, %v2719_v8  ;;  %v2477_v41 = vadd.f32 %v2445_v55, %v2216_v60  ;;  %v901_v24 = vadd.f32 %v869_v32, %v608_v0  ;;  %v1153_v52 = vadd.f32 %v1121_v4, %v892_v54  ;;  %v13333_v8 = vld [vmem:[#allocation50_spill] sm:$0xff]  ;;  %v13339_v60 = vld [vmem:[#allocation19_spill] sm:$0xff]  ;;  %v13340_v49 = vld [vmem:[#allocation116_spill] sm:$0xff] }
 0x33f   : > { %v2764_v10 = vadd.f32 %v9592_v43, %v2728_v51  ;;  %2420 = vperm.xlu1 %8244, %v2260_v39   ;;  %v1643_v40 = vmul.f32 %v9487_v29, %v13333_v8  ;;  %v1961_v39 = vadd.f32 %v1929_v48, %v1700_v22  ;;  %v13334_v51 = vld [vmem:[#allocation72_spill] sm:$0xff]  ;;  %v1913_v55 = vmul.f32 %v9503_v57, %v13337_v23  ;;  %v7857_v22 = vld [vmem:[%s12966_s3 + $0x58] sm:$0xff] }
 0x340   : > { %2844 = vst.msk [vmem:[#allocation3 + $0x19] sm:$0xff] %vm2787_vm2, %v2755_v58  ;;  %v1162_v25 = vadd.f32 %v1130_v2, %v901_v24  ;;  %v1652_v47 = vmul.f32 %v9487_v29, %v13334_v51  ;;  %v1414_v31 = vadd.f32 %v1382_v17, %v1153_v52  ;;  %v13336_v29 = vld [vmem:[#allocation94_spill] sm:$0xff]  ;;  %v618_v34 = vmul.f32 %v9926_v18, %v13339_v60  ;;  %v9933_v57 = vld [vmem:[%s12964_s1 + $0x2] ss:$0 sm:$0xff] }
 0x341   : > { %2853 = vst.msk [vmem:[#allocation3 + $0x81] sm:$0xff] %vm2787_vm2, %v2764_v10  ;;  %v2135_v27 = vpop.permute.xlu1 %2134  ;;  %v2939_v1 = vld [vmem:[#allocation3 + $0x141] sm:$0xff]  ;;  %v879_v56 = vmul.f32 %v9911_v59, %v13336_v29  ;;  %v1140_v21 = vmul.f32 %v9933_v57, %v13340_v49  ;;  %v2175_v16 = vmul.f32 %v9520_v12, %v13341_v30  ;;  %v13342_v50 = vld [vmem:[#allocation132_spill] sm:$0xff]  ;;  %3512 = vmatpush.msrb.mxu2 %v7857_v22 }
 0x342   : > { %7817 = vmatmul.msk.f32.gmra.mxu3 %vm2787_vm2, %v2939_v1  ;;  %v2271_v33 = vpop.permute.xlu0 %2270  ;;  %v2191_v15 = vmul.f32 %v9520_v12, %v2135_v27  ;;  %v1423_v20 = vadd.f32 %v1391_v38, %v1162_v25  ;;  %v1675_v26 = vadd.f32 %v1643_v40, %v1414_v31  ;;  %v13338_v27 = vld [vmem:[#allocation168_spill] sm:$0xff]  ;;  %v2911_v29 = vld [vmem:[%s12966_s3 + $0x18] sm:$0xff] }
 0x343   : > { %v2622_v11 = vpop.permute.xlu2 %2621  ;;  %v2166_v1 = vmul.f32 %v9520_v12, %v13338_v27  ;;  %v911_v19 = vadd.f32 %v879_v56, %v618_v34  ;;  %v13347_v56 = vld [vmem:[#allocation122_spill] sm:$0xff]  ;;  %3266 = vmatpush.msrb.mxu1 %v2911_v29 }
 0x344   : > { %v2706_v45 = vmul.f32 %v9561_v62, %v2622_v11  ;;  %v2223_v6 = vadd.f32 %v2191_v15, %v1961_v39  ;;  %v1684_v32 = vadd.f32 %v1652_v47, %v1423_v20  ;;  %v1936_v4 = vadd.f32 %v1904_v37, %v1675_v26  ;;  %v9955_v15 = vld [vmem:[%s12964_s1 + $0x4] ss:$0 sm:$0xff]  ;;  %v9968_v47 = vld [vmem:[%s12964_s1 + $0x5] ss:$0 sm:$0xff]  ;;  %v7893_v37 = vld [vmem:[%s12966_s3 + $0x78] sm:$0xff] }
 0x345   : > { %v2427_v11 = vmul.f32 %v9537_v3, %v2271_v33  ;;  %v1172_v2 = vadd.f32 %v1140_v21, %v911_v19  ;;  %3790 = vmatpush.msrb.mxu3 %v7893_v37  ;;  %v1147_v20 = vmul.f32 %v9933_v57, %v13347_v56  ;;  %v13350_v21 = vld [vmem:[#allocation63_spill] sm:$0xff] }
 0x346   : > { %v2738_v14 = vadd.f32 %v2706_v45, %v2477_v41  ;;  %v1945_v48 = vadd.f32 %v1913_v55, %v1684_v32  ;;  %v9944_v45 = vld [vmem:[%s12964_s1 + $0x3] ss:$0 sm:$0xff]  ;;  %v2198_v54 = vadd.f32 %v2166_v1, %v1936_v4  ;;  %v861_v32 = vmul.f32 %v9911_v59, %v13350_v21  ;;  %v13351_v4 = vld [vmem:[#allocation74_spill] sm:$0xff] }
 0x347   : > { %v9891_v63 = vld [vmem:[#allocation3 + $0x19] sm:$0xff]  ;;  %v1401_v0 = vmul.f32 %v9944_v45, %v13342_v50  ;;  %v13348_v55 = vld [vmem:[#allocation172_spill] sm:$0xff] }
 0x348   : > { %7792 = vmatmul.msk.f32.gmra.mxu0 %vm2787_vm2, %v9891_v63  ;;  %v2774_v46 = vadd.f32 %v9592_v43, %v2738_v14  ;;  %v9898_v7 = vld [vmem:[#allocation3 + $0x81] sm:$0xff]  ;;  %v2207_v13 = vadd.f32 %v2175_v16, %v1945_v48  ;;  %v13343_v14 = vld [vmem:[#allocation80_spill] sm:$0xff]  ;;  %v2459_v36 = vadd.f32 %v2427_v11, %v2198_v54  ;;  %v2185_v26 = vmul.f32 %v9520_v12, %v13348_v55  ;;  %v13352_v48 = vld [vmem:[#allocation11_spill] sm:$0xff] }
 0x349   : > { %v2396_v61 = vpop.permute.xlu1 %2395  ;;  %7801 = vmatmul.msk.f32.gmra.mxu1 %vm2787_vm2, %v9898_v7  ;;  %v1662_v24 = vmul.f32 %v9955_v15, %v13343_v14  ;;  %v1433_v51 = vadd.f32 %v1401_v0, %v1172_v2  ;;  %v1669_v11 = vmul.f32 %v9955_v15, %v13351_v4  ;;  %v13353_v50 = vld [vmem:[#allocation81_spill] sm:$0xff]  ;;  %v13354_v0 = vld [vmem:[#allocation104_spill] sm:$0xff]  ;;  %v13356_v14 = vld [vmem:[#allocation10_spill] sm:$0xff] }
 0x34a   : > { %2863 = vst.msk [vmem:[#allocation3 + $0xf9] sm:$0xff] %vm2787_vm2, %v2774_v46  ;;  %v2452_v58 = vmul.f32 %v9537_v3, %v2396_v61  ;;  %v2316_v10 = vpop.permute.xlu0 %2315  ;;  %v13344_v46 = vld [vmem:[#allocation89_spill] sm:$0xff]  ;;  %v13345_v61 = vld [vmem:[#allocation156_spill] sm:$0xff]  ;;  %v1122_v54 = vmul.f32 %v9933_v57, %v13354_v0 }
 0x34b   : > { %v9917_v35 = vpop.permute.xlu2 %2661  ;;  %v2436_v41 = vmul.f32 %v9537_v3, %v2316_v10  ;;  %v886_v25 = vmul.f32 %v9911_v59, %v13344_v46  ;;  %v1923_v31 = vmul.f32 %v9968_v47, %v13345_v61  ;;  %v1694_v23 = vadd.f32 %v1662_v24, %v1433_v51  ;;  %v10014_v46 = vld [vmem:[%s12964_s1 + $0x6] ss:$0 sm:$0xff]  ;;  %v13359_v61 = vld [vmem:[#allocation127_spill] sm:$0xff]  ;;  %v7856_v21 = vld [vmem:[%s12966_s3 + $0x50] sm:$0xff] }
 0x34c   : > { %v2484_v9 = vadd.f32 %v2452_v58, %v2223_v6  ;;  %v13346_v6 = vld [vmem:[#allocation46_spill] sm:$0xff]  ;;  %v609_v24 = vmul.f32 %v9926_v18, %v13356_v14  ;;  %3513 = vmatpush.msrb.mxu2 %v7856_v21 }
 0x34d   : > { %v2468_v8 = vadd.f32 %v2436_v41, %v2207_v13  ;;  %v625_v58 = vmul.f32 %v9926_v18, %v13346_v6  ;;  %v1955_v34 = vadd.f32 %v1923_v31, %v1694_v23  ;;  %v600_v41 = vmul.f32 %v9926_v18, %v13352_v48  ;;  %v13355_v13 = vld [vmem:[#allocation162_spill] sm:$0xff]  ;;  %v13360_v6 = vld [vmem:[#allocation55_spill] sm:$0xff]  ;;  %v13361_v23 = vld [vmem:[#allocation68_spill] sm:$0xff] }
 0x34e   : > { %v2745_v28 = vadd.f32 %v2713_v5, %v2484_v9  ;;  %v13349_v9 = vld [vmem:[#allocation48_spill] sm:$0xff]  ;;  %v1392_v31 = vmul.f32 %v9944_v45, %v13359_v61  ;;  %v1653_v55 = vmul.f32 %v9955_v15, %v13361_v23  ;;  %v13365_v48 = vld [vmem:[#allocation159_spill] sm:$0xff]  ;;  %v7928_v21 = vld [vmem:[%s12966_s3 + $0x90] sm:$0xff] }
 0x34f   : > { %v918_v5 = vadd.f32 %v886_v25, %v625_v58  ;;  %v1408_v60 = vmul.f32 %v9944_v45, %v13349_v9  ;;  %v1644_v58 = vmul.f32 %v9955_v15, %v13360_v6  ;;  %v2910_v6 = vld [vmem:[%s12966_s3 + $0x10] sm:$0xff] }
 0x350   : > { %v2781_v53 = vadd.f32 %v9592_v43, %v2745_v28  ;;  %v2217_v28 = vadd.f32 %v2185_v26, %v1955_v34  ;;  %3267 = vmatpush.msrb.mxu1 %v2910_v6 }
 0x351   : > { %v2532_v17 = vpop.permute.xlu1 %2531  ;;  %v2933_v33 = vld [vmem:[#allocation3 + $0xf9] sm:$0xff]  ;;  %v1179_v16 = vadd.f32 %v1147_v20, %v918_v5 }
 0x352   : > { %2870 = vst.msk [vmem:[#allocation3 + $0x151] sm:$0xff] %vm2787_vm2, %v2781_v53  ;;  %v2688_v38 = vmul.f32 %v9561_v62, %v2532_v17  ;;  %v2577_v52 = vpop.permute.xlu0 %2576  ;;  %7811 = vmatmul.msk.f32.gmra.mxu2 %vm2787_vm2, %v2933_v33  ;;  %v1930_v17 = vmul.f32 %v9968_v47, %v13355_v13 }
 0x353   : > { %v2697_v40 = vmul.f32 %v9561_v62, %v2577_v52  ;;  %v2366_v39 = vpop.permute.xlu2 %2365  ;;  %v1440_v2 = vadd.f32 %v1408_v60, %v1179_v16  ;;  %v13364_v16 = vld [vmem:[#allocation151_spill] sm:$0xff] }
 0x354   : > { %v2720_v44 = vadd.f32 %v2688_v38, %v2459_v36  ;;  %v2446_v49 = vmul.f32 %v9537_v3, %v2366_v39  ;;  %v870_v3 = vmul.f32 %v9911_v59, %v13353_v50  ;;  %v893_v36 = vadd.f32 %v861_v32, %v600_v41  ;;  %v13357_v38 = vld [vmem:[#allocation111_spill] sm:$0xff]  ;;  %v13363_v32 = vld [vmem:[#allocation77_spill] sm:$0xff]  ;;  %v10058_v50 = vld [vmem:[%s12964_s1 + $0x8] ss:$0 sm:$0xff] }
 0x355   : > { %v2729_v10 = vadd.f32 %v2697_v40, %v2468_v8  ;;  %v1131_v52 = vmul.f32 %v9933_v57, %v13357_v38  ;;  %v13358_v8 = vld [vmem:[#allocation119_spill] sm:$0xff]  ;;  %v1701_v39 = vadd.f32 %v1669_v11, %v1440_v2  ;;  %v1914_v4 = vmul.f32 %v9968_v47, %v13364_v16  ;;  %v13367_v2 = vld [vmem:[#allocation118_spill] sm:$0xff] }
 0x356   : > { %v2756_v27 = vadd.f32 %v9592_v43, %v2720_v44  ;;  %v2478_v33 = vadd.f32 %v2446_v49, %v2217_v28  ;;  %v1383_v40 = vmul.f32 %v9944_v45, %v13358_v8  ;;  %v1154_v37 = vadd.f32 %v1122_v54, %v893_v36  ;;  %v7929_v49 = vld [vmem:[%s12966_s3 + $0x98] sm:$0xff] }
 0x357   : > { %v2765_v1 = vadd.f32 %v9592_v43, %v2729_v10  ;;  %v1962_v10 = vadd.f32 %v1930_v17, %v1701_v39  ;;  %4068 = vmatpush.msrb.mxu0 %v7929_v49  ;;  %v2167_v41 = vmul.f32 %v10014_v46, %v13365_v48  ;;  %v13366_v54 = vld [vmem:[#allocation35_spill] sm:$0xff]  ;;  %v1141_v13 = vmul.f32 %v9933_v57, %v13367_v2  ;;  %v13374_v16 = vld [vmem:[#allocation114_spill] sm:$0xff] }
 0x358   : > { %2845 = vst.msk [vmem:[#allocation3 + $0x21] sm:$0xff] %vm2787_vm2, %v2756_v27  ;;  %v1415_v27 = vadd.f32 %v1383_v40, %v1154_v37  ;;  %v13375_v48 = vld [vmem:[#allocation39_spill] sm:$0xff] }
 0x359   : > { %2854 = vst.msk [vmem:[#allocation3 + $0x91] sm:$0xff] %vm2787_vm2, %v2765_v1  ;;  %v2140_v12 = vpop.permute.xlu1 %2139  ;;  %v2940_v30 = vld [vmem:[#allocation3 + $0x151] sm:$0xff]  ;;  %v13362_v1 = vld [vmem:[#allocation143_spill] sm:$0xff]  ;;  %4069 = vmatpush.msrb.mxu0 %v7928_v21 }
 0x35a   : > { %7818 = vmatmul.msk.f32.gmra.mxu3 %vm2787_vm2, %v2940_v30  ;;  %v2276_v19 = vpop.permute.xlu0 %2275  ;;  %v2192_v25 = vmul.f32 %v10014_v46, %v2140_v12  ;;  %v1905_v5 = vmul.f32 %v9968_v47, %v13362_v1  ;;  %v880_v12 = vmul.f32 %v9911_v59, %v13363_v32  ;;  %v1676_v28 = vadd.f32 %v1644_v58, %v1415_v27  ;;  %v13370_v58 = vld [vmem:[#allocation67_spill] sm:$0xff] }
 0x35b   : > { %v2627_v53 = vpop.permute.xlu2 %2626  ;;  %v13371_v1 = vld [vmem:[#allocation99_spill] sm:$0xff] }
 0x35c   : > { %v2707_v22 = vmul.f32 %v9561_v62, %v2627_v53  ;;  %v902_v62 = vadd.f32 %v870_v3, %v609_v24  ;;  %v2224_v9 = vadd.f32 %v2192_v25, %v1962_v10  ;;  %v2714_v3 = vmul.f32 %v10058_v50, %v9917_v35  ;;  %v13369_v35 = vld [vmem:[#allocation42_spill] sm:$0xff]  ;;  %v10075_v25 = vld [vmem:[%s12965_s2] ss:$0 sm:$0xff] }
 0x35d   : > { %v619_v53 = vmul.f32 %v9926_v18, %v13366_v54  ;;  %v1937_v14 = vadd.f32 %v1905_v5, %v1676_v28  ;;  %v1402_v40 = vmul.f32 %v9944_v45, %v13369_v35  ;;  %v1663_v10 = vmul.f32 %v9955_v15, %v13370_v58  ;;  %v13373_v32 = vld [vmem:[#allocation51_spill] sm:$0xff]  ;;  %v13382_v58 = vld [vmem:[#allocation154_spill] sm:$0xff] }
 0x35e   : > { %v2739_v51 = vadd.f32 %v2707_v22, %v2478_v33  ;;  %v1163_v20 = vadd.f32 %v1131_v52, %v902_v62  ;;  %v13368_v33 = vld [vmem:[#allocation167_spill] sm:$0xff]  ;;  %v887_v5 = vmul.f32 %v9911_v59, %v13371_v1  ;;  %v13384_v1 = vld [vmem:[#allocation112_spill] sm:$0xff] }
 0x35f   : > { %v10019_v44 = vld [vmem:[#allocation3 + $0x21] sm:$0xff]  ;;  %v2176_v22 = vmul.f32 %v10014_v46, %v13368_v33  ;;  %v912_v38 = vadd.f32 %v880_v12, %v619_v53  ;;  %v2199_v39 = vadd.f32 %v2167_v41, %v1937_v14  ;;  %v626_v12 = vmul.f32 %v9926_v18, %v13373_v32  ;;  %v13376_v53 = vld [vmem:[#allocation43_spill] sm:$0xff]  ;;  %v13377_v33 = vld [vmem:[#allocation41_spill] sm:$0xff] }
 0x360   : > { %7793 = vmatmul.msk.f32.gmra.mxu0 %vm2787_vm2, %v10019_v44  ;;  %v2775_v29 = vadd.f32 %v9592_v43, %v2739_v51  ;;  %v10026_v56 = vld [vmem:[#allocation3 + $0x91] sm:$0xff]  ;;  %v1424_v30 = vadd.f32 %v1392_v31, %v1163_v20  ;;  %v2186_v41 = vmul.f32 %v10014_v46, %v13375_v48  ;;  %v1409_v2 = vmul.f32 %v9944_v45, %v13376_v53 }
 0x361   : > { %v2401_v26 = vpop.permute.xlu1 %2400  ;;  %7802 = vmatmul.msk.f32.gmra.mxu1 %vm2787_vm2, %v10026_v56  ;;  %v10038_v43 = vld [vmem:[%s12964_s1 + $0x7] ss:$0 sm:$0xff]  ;;  %v1173_v62 = vadd.f32 %v1141_v13, %v912_v38  ;;  %v919_v54 = vadd.f32 %v887_v5, %v626_v12  ;;  %v13378_v38 = vld [vmem:[#allocation138_spill] sm:$0xff]  ;;  %v1132_v5 = vmul.f32 %v9933_v57, %v13384_v1  ;;  %v7927_v1 = vld [vmem:[%s12966_s3 + $0x88] sm:$0xff] }
 0x362   : > { %2864 = vst.msk [vmem:[#allocation3 + $0x109] sm:$0xff] %vm2787_vm2, %v2775_v29  ;;  %v2453_v60 = vmul.f32 %v10038_v43, %v2401_v26  ;;  %v2321_v34 = vpop.permute.xlu0 %2320  ;;  %v1685_v17 = vadd.f32 %v1653_v55, %v1424_v30  ;;  %v2428_v24 = vmul.f32 %v10038_v43, %v2276_v19  ;;  %v7892_v19 = vld [vmem:[%s12966_s3 + $0x70] sm:$0xff]  ;;  %v13388_v53 = vld [vmem:[#allocation60_spill] sm:$0xff]  ;;  %4070 = vmatpush.msrb.mxu0 %v7927_v1 }
 0x363   : > { %v10051_v11 = vpop.permute.xlu2 %2666  ;;  %v2437_v8 = vmul.f32 %v10038_v43, %v2321_v34  ;;  %3791 = vmatpush.msrb.mxu3 %v7892_v19  ;;  %v13386_v12 = vld [vmem:[#allocation134_spill] sm:$0xff] }
 0x364   : > { %v2485_v0 = vadd.f32 %v2453_v60, %v2224_v9  ;;  %v1946_v52 = vadd.f32 %v1914_v4, %v1685_v17  ;;  %v2460_v29 = vadd.f32 %v2428_v24, %v2199_v39  ;;  %v1434_v9 = vadd.f32 %v1402_v40, %v1173_v62  ;;  %v13372_v60 = vld [vmem:[#allocation158_spill] sm:$0xff] }
 0x365   : > { %v1924_v34 = vmul.f32 %v9968_v47, %v13372_v60  ;;  %v1148_v4 = vmul.f32 %v9933_v57, %v13374_v16  ;;  %v13379_v40 = vld [vmem:[#allocation14_spill] sm:$0xff] }
 0x366   : > { %v2746_v36 = vadd.f32 %v2714_v3, %v2485_v0  ;;  %v2208_v61 = vadd.f32 %v2176_v22, %v1946_v52  ;;  %v1695_v28 = vadd.f32 %v1663_v10, %v1434_v9  ;;  %v862_v22 = vmul.f32 %v9911_v59, %v13377_v33  ;;  %v13381_v62 = vld [vmem:[#allocation106_spill] sm:$0xff]  ;;  %v13385_v9 = vld [vmem:[#allocation129_spill] sm:$0xff] }
 0x367   : > { %v1670_v52 = vmul.f32 %v9955_v15, %v13378_v38  ;;  %v601_v39 = vmul.f32 %v9926_v18, %v13379_v40  ;;  %v1931_v10 = vmul.f32 %v9968_v47, %v13382_v58  ;;  %v1384_v60 = vmul.f32 %v9944_v45, %v13385_v9  ;;  %v13389_v33 = vld [vmem:[#allocation145_spill] sm:$0xff]  ;;  %v13390_v40 = vld [vmem:[#allocation152_spill] sm:$0xff]  ;;  %v13405_v1 = vld [vmem:[#allocation130_spill] sm:$0xff] }
 0x368   : > { %v2782_v51 = vadd.f32 %v10075_v25, %v2746_v36  ;;  %v2469_v55 = vadd.f32 %v2437_v8, %v2208_v61  ;;  %v1956_v13 = vadd.f32 %v1924_v34, %v1695_v28  ;;  %v1180_v36 = vadd.f32 %v1148_v4, %v919_v54  ;;  %v13387_v28 = vld [vmem:[#allocation37_spill] sm:$0xff] }
 0x369   : > { %v2537_v31 = vpop.permute.xlu1 %2536  ;;  %v2934_v37 = vld [vmem:[#allocation3 + $0x109] sm:$0xff]  ;;  %v1123_v61 = vmul.f32 %v9933_v57, %v13381_v62  ;;  %v1645_v48 = vmul.f32 %v9955_v15, %v13387_v28  ;;  %v7891_v38 = vld [vmem:[%s12966_s3 + $0x68] sm:$0xff] }
 0x36a   : > { %2871 = vst.msk [vmem:[#allocation3 + $0x159] sm:$0xff] %vm2787_vm2, %v2782_v51  ;;  %v2689_v20 = vmul.f32 %v10058_v50, %v2537_v31  ;;  %v2582_v23 = vpop.permute.xlu0 %2581  ;;  %7812 = vmatmul.msk.f32.gmra.mxu2 %vm2787_vm2, %v2934_v37  ;;  %v2218_v8 = vadd.f32 %v2186_v41, %v1956_v13  ;;  %v13380_v51 = vld [vmem:[#allocation59_spill] sm:$0xff]  ;;  %v7855_v37 = vld [vmem:[%s12966_s3 + $0x48] sm:$0xff]  ;;  %v1441_v6 = vadd.f32 %v1409_v2, %v1180_v36 }
 0x36b   : > { %v2698_v26 = vmul.f32 %v10058_v50, %v2582_v23  ;;  %v2371_v27 = vpop.permute.xlu2 %2370  ;;  %v871_v19 = vmul.f32 %v9911_v59, %v13380_v51  ;;  %3514 = vmatpush.msrb.mxu2 %v7855_v37  ;;  %v7854_v23 = vld [vmem:[%s12966_s3 + $0x40] sm:$0xff]  ;;  %v1654_v2 = vmul.f32 %v9955_v15, %v13388_v53  ;;  %3792 = vmatpush.msrb.mxu3 %v7891_v38 }
 0x36c   : > { %v2721_v49 = vadd.f32 %v2689_v20, %v2460_v29  ;;  %v2447_v17 = vmul.f32 %v10038_v43, %v2371_v27  ;;  %v894_v27 = vadd.f32 %v862_v22, %v601_v39  ;;  %v1702_v34 = vadd.f32 %v1670_v52, %v1441_v6  ;;  %v2909_v52 = vld [vmem:[%s12966_s3 + $0x8] sm:$0xff]  ;;  %v13392_v6 = vld [vmem:[#allocation174_spill] sm:$0xff] }
 0x36d   : > { %v2730_v30 = vadd.f32 %v2698_v26, %v2469_v55  ;;  %v13383_v55 = vld [vmem:[#allocation21_spill] sm:$0xff]  ;;  %3515 = vmatpush.msrb.mxu2 %v7854_v23  ;;  %v1906_v22 = vmul.f32 %v9968_v47, %v13389_v33  ;;  %v1915_v39 = vmul.f32 %v9968_v47, %v13390_v40  ;;  %3268 = vmatpush.msrb.mxu1 %v2909_v52  ;;  %v13394_v28 = vld [vmem:[#allocation32_spill] sm:$0xff]  ;;  %v13398_v52 = vld [vmem:[#allocation139_spill] sm:$0xff] }
 0x36e   : > { %v2757_v3 = vadd.f32 %v10075_v25, %v2721_v49  ;;  %v2479_v29 = vadd.f32 %v2447_v17, %v2218_v8  ;;  %v610_v26 = vmul.f32 %v9926_v18, %v13383_v55  ;;  %v1155_v4 = vadd.f32 %v1123_v61, %v894_v27 }
 0x36f   : > { %v2766_v0 = vadd.f32 %v10075_v25, %v2730_v30  ;;  %v1393_v30 = vmul.f32 %v9944_v45, %v13386_v12  ;;  %v1963_v41 = vadd.f32 %v1931_v10, %v1702_v34  ;;  %v2715_v61 = vmul.f32 %v10058_v50, %v10051_v11 }
 0x370   : > { %2846 = vst.msk [vmem:[#allocation3 + $0x31] sm:$0xff] %vm2787_vm2, %v2757_v3  ;;  %v903_v32 = vadd.f32 %v871_v19, %v610_v26  ;;  %v1416_v17 = vadd.f32 %v1384_v60, %v1155_v4  ;;  %v13391_v19 = vld [vmem:[#allocation169_spill] sm:$0xff]  ;;  %v2177_v58 = vmul.f32 %v10014_v46, %v13392_v6 }
 0x371   : > { %2855 = vst.msk [vmem:[#allocation3 + $0x99] sm:$0xff] %vm2787_vm2, %v2766_v0  ;;  %v2145_v14 = vpop.permute.xlu1 %2144  ;;  %v2941_v24 = vld [vmem:[#allocation3 + $0x159] sm:$0xff]  ;;  %v2168_v62 = vmul.f32 %v10014_v46, %v13391_v19  ;;  %v13399_v19 = vld [vmem:[#allocation82_spill] sm:$0xff] }
 0x372   : > { %7819 = vmatmul.msk.f32.gmra.mxu3 %vm2787_vm2, %v2941_v24  ;;  %v2281_v35 = vpop.permute.xlu0 %2280  ;;  %v2193_v49 = vmul.f32 %v10014_v46, %v2145_v14  ;;  %v1164_v54 = vadd.f32 %v1132_v5, %v903_v32  ;;  %v1677_v51 = vadd.f32 %v1645_v48, %v1416_v17  ;;  %v13393_v32 = vld [vmem:[#allocation100_spill] sm:$0xff]  ;;  %v627_v48 = vmul.f32 %v9926_v18, %v13394_v28  ;;  %v13396_v17 = vld [vmem:[#allocation135_spill] sm:$0xff] }
 0x373   : > { %v2632_v31 = vpop.permute.xlu2 %2631  ;;  %v888_v12 = vmul.f32 %v9911_v59, %v13393_v32  ;;  %v1410_v33 = vmul.f32 %v9944_v45, %v13396_v17  ;;  %v3368_v32 = vld [vmem:[#allocation3 + $0xa] sm:$0xff]  ;;  %v13409_v17 = vld [vmem:[#allocation90_spill] sm:$0xff] }
 0x374   : > { %v2708_v20 = vmul.f32 %v10058_v50, %v2632_v31  ;;  %v2225_v14 = vadd.f32 %v2193_v49, %v1963_v41  ;;  %v1425_v8 = vadd.f32 %v1393_v30, %v1164_v54  ;;  %v1938_v10 = vadd.f32 %v1906_v22, %v1677_v51  ;;  %v13395_v41 = vld [vmem:[#allocation123_spill] sm:$0xff] }
 0x375   : > { %v2908_v51 = vld [vmem:[%s12966_s3] sm:$0xff] }
 0x376   : > { %v2740_v21 = vadd.f32 %v2708_v20, %v2479_v29  ;;  %v1686_v37 = vadd.f32 %v1654_v2, %v1425_v8  ;;  %v2429_v29 = vmul.f32 %v10038_v43, %v2281_v35  ;;  %v2200_v26 = vadd.f32 %v2168_v62, %v1938_v10  ;;  %v3367_v2 = vld [vmem:[#allocation3 + $0x2] sm:$0xff]  ;;  %3269 = vmatpush.msrb.mxu1 %v2908_v51 }
 0x377   : > { %v10139_v16 = vld [vmem:[#allocation3 + $0x31] sm:$0xff]  ;;  %v1671_v8 = vmul.f32 %v9955_v15, %v13398_v52  ;;  %v872_v62 = vmul.f32 %v9911_v59, %v13399_v19  ;;  %v13402_v10 = vld [vmem:[#allocation163_spill] sm:$0xff] }
 0x378   : > { %7794 = vmatmul.msk.f32.gmra.mxu0 %vm2787_vm2, %v10139_v16  ;;  %v2776_v3 = vadd.f32 %v10075_v25, %v2740_v21  ;;  %v10146_v0 = vld [vmem:[#allocation3 + $0x99] sm:$0xff]  ;;  %v1947_v23 = vadd.f32 %v1915_v39, %v1686_v37  ;;  %v2461_v60 = vadd.f32 %v2429_v29, %v2200_v26  ;;  %v7890_v39 = vld [vmem:[%s12966_s3 + $0x60] sm:$0xff]  ;;  %v1932_v29 = vmul.f32 %v9968_v47, %v13402_v10  ;;  %v8001_v52 = vld [vmem:[%s12966_s3 + $0xd8] sm:$0xff] }
 0x379   : > { %v2406_v13 = vpop.permute.xlu1 %2405  ;;  %7803 = vmatmul.msk.f32.gmra.mxu1 %vm2787_vm2, %v10146_v0  ;;  %3793 = vmatpush.msrb.mxu3 %v7890_v39  ;;  %v13401_v37 = vld [vmem:[#allocation97_spill] sm:$0xff]  ;;  %v13411_v19 = vld [vmem:[#allocation144_spill] sm:$0xff]  ;;  %v13413_v10 = vld [vmem:[#allocation7_spill] sm:$0xff] }
 0x37a   : > { %2865 = vst.msk [vmem:[#allocation3 + $0x111] sm:$0xff] %vm2787_vm2, %v2776_v3  ;;  %v2454_v24 = vmul.f32 %v10038_v43, %v2406_v13  ;;  %v2326_v36 = vpop.permute.xlu0 %2325  ;;  %v2209_v11 = vadd.f32 %v2177_v58, %v1947_v23  ;;  %v1149_v3 = vmul.f32 %v9933_v57, %v13395_v41  ;;  %v920_v13 = vadd.f32 %v888_v12, %v627_v48 }
 0x37b   : > { %v2438_v55 = vmul.f32 %v10038_v43, %v2326_v36  ;;  %v1124_v6 = vmul.f32 %v9933_v57, %v13401_v37  ;;  %4625 = vmatpush.msra.mxu2 %v8001_v52  ;;  %v8073_v52 = vld [vmem:[%s12966_s3 + $0x118] sm:$0xff] }
 0x37c   : > { %v2486_v31 = vadd.f32 %v2454_v24, %v2225_v14  ;;  %v13397_v24 = vld [vmem:[#allocation64_spill] sm:$0xff]  ;;  %v1181_v38 = vadd.f32 %v1149_v3, %v920_v13  ;;  %v13408_v3 = vld [vmem:[#allocation78_spill] sm:$0xff] }
 0x37d   : > { %v2470_v49 = vadd.f32 %v2438_v55, %v2209_v11  ;;  %v863_v36 = vmul.f32 %v9911_v59, %v13397_v24  ;;  %v13404_v55 = vld [vmem:[#allocation105_spill] sm:$0xff]  ;;  %v1385_v11 = vmul.f32 %v9944_v45, %v13405_v1 }
 0x37e   : > { %v2747_v20 = vadd.f32 %v2715_v61, %v2486_v31  ;;  %v13400_v61 = vld [vmem:[#allocation6_spill] sm:$0xff]  ;;  %v1442_v58 = vadd.f32 %v1410_v33, %v1181_v38  ;;  %v1133_v26 = vmul.f32 %v9933_v57, %v13404_v55  ;;  %v1907_v33 = vmul.f32 %v9968_v47, %v13409_v17  ;;  %v7926_v38 = vld [vmem:[%s12966_s3 + $0x80] sm:$0xff] }
 0x37f   : > { %v602_v31 = vmul.f32 %v9926_v18, %v13400_v61  ;;  %4071 = vmatpush.msrb.mxu0 %v7926_v38  ;;  %v8037_v17 = vld [vmem:[%s12966_s3 + $0xf8] sm:$0xff] }
 0x380   : > { %v2783_v27 = vadd.f32 %v10075_v25, %v2747_v20  ;;  %v13403_v20 = vld [vmem:[#allocation25_spill] sm:$0xff]  ;;  %4903 = vmatpush.msra.mxu3 %v8037_v17 }
 0x381   : > { %v2542_v5 = vpop.permute.xlu1 %2541  ;;  %v10176_v9 = vld [vmem:[#allocation3 + $0x111] sm:$0xff]  ;;  %v611_v23 = vmul.f32 %v9926_v18, %v13403_v20  ;;  %v13414_v20 = vld [vmem:[#allocation107_spill] sm:$0xff]  ;;  %5181 = vmatpush.msra.mxu0 %v8073_v52  ;;  %v13427_v17 = vld [vmem:[#allocation57_spill] sm:$0xff] }
 0x382   : > { %2872 = vst.msk [vmem:[#allocation3 + $0x169] sm:$0xff] %vm2787_vm2, %v2783_v27  ;;  %v2690_v35 = vmul.f32 %v10058_v50, %v2542_v5  ;;  %v2587_v34 = vpop.permute.xlu0 %2586  ;;  %7813 = vmatmul.msk.f32.gmra.mxu2 %vm2787_vm2, %v10176_v9  ;;  %v895_v27 = vadd.f32 %v863_v36, %v602_v31  ;;  %v1703_v5 = vadd.f32 %v1671_v8, %v1442_v58  ;;  %v13410_v8 = vld [vmem:[#allocation69_spill] sm:$0xff]  ;;  %v13412_v31 = vld [vmem:[#allocation170_spill] sm:$0xff] }
 0x383   : > { %v2699_v21 = vmul.f32 %v10058_v50, %v2587_v34  ;;  %v13406_v34 = vld [vmem:[#allocation23_spill] sm:$0xff]  ;;  %v864_v39 = vmul.f32 %v9911_v59, %v13410_v8  ;;  %v2169_v37 = vmul.f32 %v10014_v46, %v13412_v31  ;;  %v13421_v31 = vld [vmem:[#allocation125_spill] sm:$0xff] }
 0x384   : > { %v2722_v30 = vadd.f32 %v2690_v35, %v2461_v60  ;;  %v904_v35 = vadd.f32 %v872_v62, %v611_v23  ;;  %v1156_v12 = vadd.f32 %v1124_v6, %v895_v27  ;;  %v1964_v28 = vadd.f32 %v1932_v29, %v1703_v5 }
 0x385   : > { %v2731_v4 = vadd.f32 %v2699_v21, %v2470_v49  ;;  %v1394_v49 = vmul.f32 %v9944_v45, %v13406_v34  ;;  %v1916_v62 = vmul.f32 %v9968_v47, %v13411_v19  ;;  %v603_v29 = vmul.f32 %v9926_v18, %v13413_v10 }
 0x386   : > { %v2758_v54 = vadd.f32 %v10075_v25, %v2722_v30  ;;  %v13407_v30 = vld [vmem:[#allocation56_spill] sm:$0xff]  ;;  %v1165_v41 = vadd.f32 %v1133_v26, %v904_v35  ;;  %v1417_v13 = vadd.f32 %v1385_v11, %v1156_v12  ;;  %v1125_v23 = vmul.f32 %v9933_v57, %v13414_v20  ;;  %v13415_v26 = vld [vmem:[#allocation175_spill] sm:$0xff] }
 0x387   : > { %v2767_v53 = vadd.f32 %v10075_v25, %v2731_v4  ;;  %v1646_v4 = vmul.f32 %v9955_v15, %v13407_v30  ;;  %v2178_v27 = vmul.f32 %v10014_v46, %v13415_v26 }
 0x388   : > { %2847 = vst.msk [vmem:[#allocation3 + $0x39] sm:$0xff] %vm2787_vm2, %v2758_v54  ;;  %v1655_v54 = vmul.f32 %v9955_v15, %v13408_v3  ;;  %v1426_v51 = vadd.f32 %v1394_v49, %v1165_v41  ;;  %v13416_v49 = vld [vmem:[#allocation121_spill] sm:$0xff] }
 0x389   : > { %2856 = vst.msk [vmem:[#allocation3 + $0xa9] sm:$0xff] %vm2787_vm2, %v2767_v53  ;;  %v2150_v22 = vpop.permute.xlu1 %2149  ;;  %v10195_v14 = vld [vmem:[#allocation3 + $0x169] sm:$0xff]  ;;  %v2672_v53 = vpop.permute.xlu2 %2671  ;;  %v1678_v61 = vadd.f32 %v1646_v4, %v1417_v13  ;;  %v10267_v3 = vld [vmem:[#allocation3 + $0x1a] sm:$0xff] }
 0x38a   : > { %7820 = vmatmul.msk.f32.gmra.mxu3 %vm2787_vm2, %v10195_v14  ;;  %v2286_v40 = vpop.permute.xlu0 %2285  ;;  %7858 = vmatmul.msk.f32.vlgmr.msrb.gmra.mxu2 %vm2787_vm2, %v3367_v2  ;;  %v2194_v60 = vmul.f32 %v10014_v46, %v2150_v22  ;;  %v2716_v6 = vmul.f32 %v10058_v50, %v2672_v53  ;;  %v1687_v55 = vadd.f32 %v1655_v54, %v1426_v51  ;;  %v13417_v54 = vld [vmem:[#allocation66_spill] sm:$0xff] }
 0x38b   : > { %v1939_v1 = vadd.f32 %v1907_v33, %v1678_v61  ;;  %v2430_v11 = vmul.f32 %v10038_v43, %v2286_v40  ;;  %v1647_v53 = vmul.f32 %v9955_v15, %v13417_v54  ;;  %v7965_v33 = vld [vmem:[%s12966_s3 + $0xb8] sm:$0xff] }
 0x38c   : > { %v2226_v22 = vadd.f32 %v2194_v60, %v1964_v28  ;;  %v896_v60 = vadd.f32 %v864_v39, %v603_v29  ;;  %v1948_v35 = vadd.f32 %v1916_v62, %v1687_v55  ;;  %4346 = vmatpush.msra.mxu1 %v7965_v33  ;;  %v13419_v39 = vld [vmem:[#allocation146_spill] sm:$0xff]  ;;  %v13420_v62 = vld [vmem:[#allocation52_spill] sm:$0xff]  ;;  %v13422_v29 = vld [vmem:[#allocation161_spill] sm:$0xff]  ;;  %v629_v33 = vmul.f32 %v9926_v18, %v13427_v17 }
 0x38d   : > { %v2201_v12 = vadd.f32 %v2169_v37, %v1939_v1  ;;  %v1908_v51 = vmul.f32 %v9968_v47, %v13419_v39  ;;  %v628_v61 = vmul.f32 %v9926_v18, %v13420_v62  ;;  %v1150_v37 = vmul.f32 %v9933_v57, %v13421_v31 }
 0x38e   : > { %v1157_v4 = vadd.f32 %v1125_v23, %v896_v60  ;;  %v2210_v28 = vadd.f32 %v2178_v27, %v1948_v35  ;;  %v2170_v20 = vmul.f32 %v10014_v46, %v13422_v29  ;;  %v13423_v27 = vld [vmem:[#allocation44_spill] sm:$0xff] }
 0x38f   : > { %v10227_v21 = vld [vmem:[#allocation3 + $0x39] sm:$0xff]  ;;  %v2462_v40 = vadd.f32 %v2430_v11, %v2201_v12  ;;  %v1411_v1 = vmul.f32 %v9944_v45, %v13423_v27 }
 0x390   : > { %7795 = vmatmul.msk.f32.gmra.mxu0 %vm2787_vm2, %v10227_v21  ;;  %v10233_v48 = vld [vmem:[#allocation3 + $0xa9] sm:$0xff] }
 0x391   : > { %v2411_v2 = vpop.permute.xlu1 %2410  ;;  %7804 = vmatmul.msk.f32.gmra.mxu1 %vm2787_vm2, %v10233_v48 }
 0x392   : > { %v2455_v24 = vmul.f32 %v10038_v43, %v2411_v2  ;;  %v2331_v36 = vpop.permute.xlu0 %2330  ;;  %7859 = vmatmul.msk.f32.gmra.mxu2 %vm2787_vm2, %v3368_v32  ;;  %v1386_v32 = vmul.f32 %v9944_v45, %v13416_v49  ;;  %v13424_v49 = vld [vmem:[#allocation79_spill] sm:$0xff] }
 0x393   : > { %v2439_v34 = vmul.f32 %v10038_v43, %v2331_v36 }
 0x394   : > { %v2487_v58 = vadd.f32 %v2455_v24, %v2226_v22  ;;  %v13418_v22 = vld [vmem:[#allocation93_spill] sm:$0xff]  ;;  %v1418_v8 = vadd.f32 %v1386_v32, %v1157_v4  ;;  %v1672_v32 = vmul.f32 %v9955_v15, %v13424_v49 }
 0x395   : > { %v889_v24 = vmul.f32 %v9911_v59, %v13418_v22  ;;  %v2471_v36 = vadd.f32 %v2439_v34, %v2210_v28  ;;  %v10303_v34 = vld [vmem:[#allocation3 + $0x22] sm:$0xff]  ;;  %v13425_v28 = vld [vmem:[#allocation101_spill] sm:$0xff] }
 0x396   : > { %v2748_v5 = vadd.f32 %v2716_v6, %v2487_v58  ;;  %v2552_v6 = vpop.permute.xlu2 %2551  ;;  %v1679_v10 = vadd.f32 %v1647_v53, %v1418_v8  ;;  %v13426_v53 = vld [vmem:[#allocation165_spill] sm:$0xff] }
 0x397   : > { %v921_v55 = vadd.f32 %v889_v24, %v628_v61  ;;  %v13428_v22 = vld [vmem:[#allocation117_spill] sm:$0xff] }
 0x398   : > { %v2784_v30 = vadd.f32 %v10075_v25, %v2748_v5  ;;  %v1940_v11 = vadd.f32 %v1908_v51, %v1679_v10  ;;  %v1151_v24 = vmul.f32 %v9933_v57, %v13428_v22  ;;  %v13429_v51 = vld [vmem:[#allocation49_spill] sm:$0xff]  ;;  %v10393_v22 = vpop.f32.mrf.mxu2 }
 0x399   : > { %v2547_v41 = vpop.permute.xlu1 %2546  ;;  %v1182_v5 = vadd.f32 %v1150_v37, %v921_v55  ;;  %v3645_v37 = vld [vmem:[#allocation3 + $0x18] sm:$0xff] }
 0x39a   : > { %2873 = vst.msk [vmem:[#allocation3 + $0x171] sm:$0xff] %vm2787_vm2, %v2784_v30  ;;  %v2691_v2 = vmul.f32 %v10058_v50, %v2547_v41  ;;  %v2592_v13 = vpop.permute.xlu0 %2591  ;;  %7860 = vmatmul.msk.f32.gmra.mxu2 %vm2787_vm2, %v10267_v3  ;;  %v2202_v12 = vadd.f32 %v2170_v20, %v1940_v11  ;;  %v890_v41 = vmul.f32 %v9911_v59, %v13425_v28  ;;  %v13431_v55 = vld [vmem:[#allocation157_spill] sm:$0xff] }
 0x39b   : > { %v2700_v38 = vmul.f32 %v10058_v50, %v2592_v13  ;;  %v1443_v54 = vadd.f32 %v1411_v1, %v1182_v5  ;;  %v3646_v28 = vld [vmem:[#allocation3 + $0x20] sm:$0xff] }
 0x39c   : > { %v2723_v19 = vadd.f32 %v2691_v2, %v2462_v40  ;;  %v1933_v40 = vmul.f32 %v9968_v47, %v13426_v53  ;;  %v2692_v2 = vmul.f32 %v10058_v50, %v2552_v6  ;;  %v922_v8 = vadd.f32 %v890_v41, %v629_v33  ;;  %v10333_v6 = vld [vmem:[#allocation3 + $0x32] sm:$0xff]  ;;  %v10391_v33 = vld [vmem:[#allocation3 + $0x62] sm:$0xff] }
 0x39d   : > { %v2732_v58 = vadd.f32 %v2700_v38, %v2471_v36  ;;  %v1704_v36 = vadd.f32 %v1672_v32, %v1443_v54 }
 0x39e   : > { %v2759_v23 = vadd.f32 %v10075_v25, %v2723_v19  ;;  %v2677_v39 = vpop.permute.xlu2 %2676  ;;  %v1412_v19 = vmul.f32 %v9944_v45, %v13429_v51  ;;  %v1183_v57 = vadd.f32 %v1151_v24, %v922_v8  ;;  %v10428_v8 = vld [vmem:[#allocation3 + $0x7a] sm:$0xff] }
 0x39f   : > { %v2768_v26 = vadd.f32 %v10075_v25, %v2732_v58  ;;  %v1965_v62 = vadd.f32 %v1933_v40, %v1704_v36  ;;  %v13430_v58 = vld [vmem:[#allocation140_spill] sm:$0xff]  ;;  %v2717_v27 = vmul.f32 %v10058_v50, %v2677_v39  ;;  %v8036_v36 = vld [vmem:[%s12966_s3 + $0xf0] sm:$0xff]  ;;  %13433 = vst [vmem:[#allocation87_spill] sm:$0xff] %v10428_v8 }
 0x3a0   : > { %2848 = vst.msk [vmem:[#allocation3 + $0x49] sm:$0xff] %vm2787_vm2, %v2759_v23  ;;  %v1673_v10 = vmul.f32 %v9955_v15, %v13430_v58  ;;  %v1444_v23 = vadd.f32 %v1412_v19, %v1183_v57  ;;  %4904 = vmatpush.msra.mxu3 %v8036_v36  ;;  %v8072_v39 = vld [vmem:[%s12966_s3 + $0x110] sm:$0xff]  ;;  %v10439_v19 = vld [vmem:[#allocation3 + $0x68] sm:$0xff]  ;;  %v10453_v57 = vld [vmem:[#allocation3 + $0x78] sm:$0xff] }
 0x3a1   : > { %2857 = vst.msk [vmem:[#allocation3 + $0xb1] sm:$0xff] %vm2787_vm2, %v2768_v26  ;;  %v2291_v60 = vpop.permute.xlu1 %2290  ;;  %v10301_v35 = vld [vmem:[#allocation3 + $0x171] sm:$0xff]  ;;  %v1934_v26 = vmul.f32 %v9968_v47, %v13431_v55  ;;  %5182 = vmatpush.msra.mxu0 %v8072_v39  ;;  %v10474_v55 = vpop.f32.mrf.mxu0 }
 0x3a2   : > { %v2431_v30 = vmul.f32 %v10038_v43, %v2291_v60  ;;  %7821 = vmatmul.msk.f32.gmra.mxu3 %vm2787_vm2, %v10301_v35  ;;  %v2155_v4 = vpop.permute.xlu0 %2154  ;;  %7861 = vmatmul.msk.f32.gmra.mxu2 %vm2787_vm2, %v10303_v34  ;;  %v1705_v11 = vadd.f32 %v1673_v10, %v1444_v23  ;;  %v2876_v60 = vld [vmem:[#allocation3] sm:$0xff]  ;;  %v3379_v58 = vld [vmem:[#allocation3 + $0x92] sm:$0xff] }
 0x3a3   : > { %v2195_v52 = vmul.f32 %v10014_v46, %v2155_v4  ;;  %v10472_v23 = vld [vmem:[#allocation3 + $0x9a] sm:$0xff] }
 0x3a4   : > { %v2463_v13 = vadd.f32 %v2431_v30, %v2202_v12  ;;  %v1966_v49 = vadd.f32 %v1934_v26, %v1705_v11  ;;  %13436 = vst [vmem:[#allocation83_spill] sm:$0xff] %v10472_v23  ;;  %v10486_v11 = vld [vmem:[#allocation3 + $0x90] sm:$0xff]  ;;  %v7999_v39 = vld [vmem:[%s12966_s3 + $0xc8] sm:$0xff] }
 0x3a5   : > { %v2227_v45 = vadd.f32 %v2195_v52, %v1965_v62  ;;  %v10416_v52 = vpop.f32.mrf.mxu2  ;;  %v10445_v62 = vld [vmem:[#allocation3 + $0x82] sm:$0xff] }
 0x3a6   : > { %v2724_v38 = vadd.f32 %v2692_v2, %v2463_v13  ;;  %v2682_v12 = vpop.permute.xlu2 %2681  ;;  %v2877_v2 = vld [vmem:[#allocation3 + $0x8] sm:$0xff]  ;;  %13434 = vst [vmem:[#allocation15_spill] sm:$0xff] %v10445_v62 }
 0x3a7   : > { %v10322_v59 = vld [vmem:[#allocation3 + $0x49] sm:$0xff]  ;;  %v2718_v54 = vmul.f32 %v10058_v50, %v2682_v12  ;;  %v10374_v50 = vld [vmem:[#allocation3 + $0x38] sm:$0xff] }
 0x3a8   : > { %v2760_v61 = vadd.f32 %v10075_v25, %v2724_v38  ;;  %7796 = vmatmul.msk.f32.gmra.mxu0 %vm2787_vm2, %v10322_v59  ;;  %v10329_v18 = vld [vmem:[#allocation3 + $0xb1] sm:$0xff]  ;;  %v7964_v38 = vld [vmem:[%s12966_s3 + $0xb0] sm:$0xff] }
 0x3a9   : > { %v2416_v31 = vpop.permute.xlu1 %2415  ;;  %7805 = vmatmul.msk.f32.gmra.mxu1 %vm2787_vm2, %v10329_v18 }
 0x3aa   : > { %2849 = vst.msk [vmem:[#allocation3 + $0x51] sm:$0xff] %vm2787_vm2, %v2760_v61  ;;  %v2456_v29 = vmul.f32 %v10038_v43, %v2416_v31  ;;  %7894 = vmatmul.msk.f32.vlgmr.msrb.gmra.mxu3 %vm2787_vm2, %v3645_v37  ;;  %7862 = vmatmul.msk.f32.gmra.mxu2 %vm2787_vm2, %v10333_v6  ;;  %v2160_v20 = vpop.permute.xlu0 %2159  ;;  %v10455_v31 = vpop.f32.mrf.mxu3 }
 0x3ab   : > { %v2196_v5 = vmul.f32 %v10014_v46, %v2160_v20  ;;  %v10355_v46 = vld [vmem:[#allocation3 + $0x3a] sm:$0xff]  ;;  %4347 = vmatpush.msra.mxu1 %v7964_v38  ;;  %13435 = vst [vmem:[#allocation47_spill] sm:$0xff] %v10455_v31  ;;  %v8288_v20 = vld [vmem:[#allocation3 + $0x69] sm:$0xff] }
 0x3ac   : > { %v2488_v1 = vadd.f32 %v2456_v29, %v2227_v45  ;;  %v10463_v45 = vpop.f32.mrf.mxu1  ;;  %v10467_v29 = vld [vmem:[#allocation3 + $0x80] sm:$0xff]  ;;  %v10534_v38 = vld [vmem:[#allocation3 + $0xb0] sm:$0xff] }
 0x3ad   : > { %v2228_v47 = vadd.f32 %v2196_v5, %v1966_v49  ;;  %v10433_v51 = vpop.f32.mrf.mxu2  ;;  %v3381_v5 = vld [vmem:[#allocation3 + $0xaa] sm:$0xff]  ;;  %v10494_v49 = vpop.f32.mrf.mxu0  ;;  %13442 = vst [vmem:[#allocation70_spill] sm:$0xff] %v10534_v38 }
 0x3ae   : > { %v2749_v15 = vadd.f32 %v2717_v27, %v2488_v1 }
 0x3b0   : > { %v2785_v32 = vadd.f32 %v10075_v25, %v2749_v15  ;;  %v8289_v15 = vld [vmem:[#allocation3 + $0x79] sm:$0xff] }
 0x3b1   : > { %v2421_v30 = vpop.permute.xlu1 %2420  ;;  %v10347_v4 = vld [vmem:[#allocation3 + $0x51] sm:$0xff]  ;;  %7822 = vmatmul.msk.f32.vlgmr.msrb.gmra.mxu1 %vm2787_vm2, %v2876_v60 }
 0x3b2   : > { %2874 = vst.msk [vmem:[#allocation3 + $0x181] sm:$0xff] %vm2787_vm2, %v2785_v32  ;;  %v2457_v41 = vmul.f32 %v10038_v43, %v2421_v30  ;;  %7797 = vmatmul.msk.f32.gmra.mxu0 %vm2787_vm2, %v10347_v4  ;;  %7895 = vmatmul.msk.f32.gmra.mxu3 %vm2787_vm2, %v3646_v28  ;;  %v10362_v43 = vld [vmem:[#allocation3 + $0x30] sm:$0xff]  ;;  %v10478_v26 = vpop.f32.mrf.mxu3  ;;  %v10502_v30 = vld [vmem:[#allocation3 + $0x98] sm:$0xff] }
 0x3b3   : > { %7863 = vmatmul.msk.f32.gmra.mxu2 %vm2787_vm2, %v10355_v46  ;;  %v10369_v17 = vld [vmem:[#allocation3 + $0x4a] sm:$0xff]  ;;  %13437 = vst [vmem:[#allocation40_spill] sm:$0xff] %v10478_v26 }
 0x3b4   : > { %v2489_v53 = vadd.f32 %v2457_v41, %v2228_v47  ;;  %v10402_v24 = vld [vmem:[#allocation3 + $0x50] sm:$0xff]  ;;  %v10482_v1 = vpop.f32.mrf.mxu1 }
 0x3b5   : > { %v10449_v61 = vpop.f32.mrf.mxu2 }
 0x3b6   : > { %v2750_v40 = vadd.f32 %v2718_v54, %v2489_v53 }
 0x3b8   : > { %v2786_v13 = vadd.f32 %v10075_v25, %v2750_v40  ;;  %v10380_v25 = vld [vmem:[#allocation3 + $0x52] sm:$0xff]  ;;  %v10519_v40 = vld [vmem:[#allocation3 + $0xa8] sm:$0xff] }
 0x3b9   : > { %7823 = vmatmul.msk.f32.gmra.mxu1 %vm2787_vm2, %v2877_v2 }
 0x3ba   : > { %2875 = vst.msk [vmem:[#allocation3 + $0x189] sm:$0xff] %vm2787_vm2, %v2786_v13  ;;  %7896 = vmatmul.msk.f32.gmra.mxu3 %vm2787_vm2, %v10362_v43  ;;  %7930 = vmatmul.msk.f32.vlgmr.msrb.gmra.mxu0 %vm2787_vm2, %v9891_v63  ;;  %v10385_v63 = vld [vmem:[#allocation3 + $0x48] sm:$0xff]  ;;  %v10492_v60 = vpop.f32.mrf.mxu3 }
 0x3bb   : > { %7864 = vmatmul.msk.f32.gmra.mxu2 %vm2787_vm2, %v10369_v17  ;;  %13438 = vst [vmem:[#allocation16_spill] sm:$0xff] %v10492_v60 }
 0x3bc   : > { %v10498_v12 = vpop.f32.mrf.mxu1 }
 0x3bd   : > { %v10461_v10 = vpop.f32.mrf.mxu2 }
 0x3c1   : > { %7824 = vmatmul.msk.f32.gmra.mxu1 %vm2787_vm2, %v3645_v37  ;;  %v8287_v37 = vld [vmem:[#allocation3 + $0x61] sm:$0xff] }
 0x3c2   : > { %7897 = vmatmul.msk.f32.gmra.mxu3 %vm2787_vm2, %v10374_v50  ;;  %7931 = vmatmul.msk.f32.gmra.mxu0 %vm2787_vm2, %v10019_v44  ;;  %v8000_v44 = vld [vmem:[%s12966_s3 + $0xd0] sm:$0xff] }
 0x3c3   : > { %7865 = vmatmul.msk.f32.gmra.mxu2 %vm2787_vm2, %v10380_v25 }
 0x3c4   : > { %4626 = vmatpush.msra.mxu2 %v8000_v44 }
 0x3c5   : > { %v10509_v47 = vpop.f32.mrf.mxu3  ;;  %v10515_v53 = vpop.f32.mrf.mxu0 }
 0x3c6   : > { %13439 = vst [vmem:[#allocation65_spill] sm:$0xff] %v10509_v47  ;;  %v10513_v54 = vpop.f32.mrf.mxu1  ;;  %4627 = vmatpush.msra.mxu2 %v7999_v39  ;;  %v8071_v39 = vld [vmem:[%s12966_s3 + $0x108] sm:$0xff] }
 0x3c7   : > { %5183 = vmatpush.msra.mxu0 %v8071_v39  ;;  %v10591_v47 = vld [vmem:[#allocation3 + $0xd8] sm:$0xff] }
 0x3c9   : > { %7825 = vmatmul.msk.f32.gmra.mxu1 %vm2787_vm2, %v3646_v28  ;;  %v3382_v28 = vld [vmem:[#allocation3 + $0xb2] sm:$0xff] }
 0x3ca   : > { %7898 = vmatmul.msk.f32.gmra.mxu3 %vm2787_vm2, %v10385_v63  ;;  %7932 = vmatmul.msk.f32.gmra.mxu0 %vm2787_vm2, %v10139_v16  ;;  %v10408_v16 = vld [vmem:[#allocation3 + $0x6a] sm:$0xff] }
 0x3cb   : > { %7866 = vmatmul.msk.f32.gmra.mxu2 %vm2787_vm2, %v10391_v33  ;;  %13432 = vst [vmem:[#allocation13_spill] sm:$0xff] %v10408_v16 }
 0x3d1   : > { %7826 = vmatmul.msk.f32.gmra.mxu1 %vm2787_vm2, %v10362_v43 }
 0x3d2   : > { %7899 = vmatmul.msk.f32.gmra.mxu3 %vm2787_vm2, %v10402_v24  ;;  %7933 = vmatmul.msk.f32.gmra.mxu0 %vm2787_vm2, %v10227_v21  ;;  %v10422_v21 = vld [vmem:[#allocation3 + $0x60] sm:$0xff] }
 0x3d3   : > { %7867 = vmatmul.msk.f32.gmra.mxu2 %vm2787_vm2, %v10408_v16  ;;  %v10623_v16 = vld [vmem:[#allocation3 + $0xf0] sm:$0xff] }
 0x3d4   : > { %13452 = vst [vmem:[#allocation176_spill] sm:$0xff] %v10623_v16 }
 0x3d5   : > { %v10480_v27 = vpop.f32.mrf.mxu2 }
 0x3d9   : > { %7827 = vmatmul.msk.f32.gmra.mxu1 %vm2787_vm2, %v10374_v50 }
 0x3da   : > { %7900 = vmatmul.msk.f32.gmra.mxu3 %vm2787_vm2, %v10422_v21  ;;  %7934 = vmatmul.msk.f32.gmra.mxu0 %vm2787_vm2, %v10322_v59 }
 0x3db   : > { %7868 = vmatmul.msk.f32.gmra.mxu2 %vm2787_vm2, %v10428_v8  ;;  %v10605_v8 = vld [vmem:[#allocation3 + $0xe0] sm:$0xff] }
 0x3dc   : > { %13448 = vst [vmem:[#allocation75_spill] sm:$0xff] %v10605_v8 }
 0x3dd   : > { %v10526_v2 = vpop.f32.mrf.mxu3  ;;  %v10530_v36 = vpop.f32.mrf.mxu0 }
 0x3de   : > { %13441 = vst [vmem:[#allocation17_spill] sm:$0xff] %v10526_v2  ;;  %v10528_v13 = vpop.f32.mrf.mxu1 }
 0x3e1   : > { %7828 = vmatmul.msk.f32.gmra.mxu1 %vm2787_vm2, %v10385_v63 }
 0x3e2   : > { %7901 = vmatmul.msk.f32.gmra.mxu3 %vm2787_vm2, %v10439_v19  ;;  %7935 = vmatmul.msk.f32.gmra.mxu0 %vm2787_vm2, %v10347_v4 }
 0x3e3   : > { %7869 = vmatmul.msk.f32.gmra.mxu2 %vm2787_vm2, %v10445_v62 }
 0x3e9   : > { %7829 = vmatmul.msk.f32.gmra.mxu1 %vm2787_vm2, %v10402_v24 }
 0x3ea   : > { %7902 = vmatmul.msk.f32.gmra.mxu3 %vm2787_vm2, %v10453_v57  ;;  %7936 = vmatmul.msk.f32.gmra.mxu0 %vm2787_vm2, %v8287_v37  ;;  %v8035_v37 = vld [vmem:[%s12966_s3 + $0xe8] sm:$0xff] }
 0x3eb   : > { %7870 = vmatmul.msk.f32.gmra.mxu2 %vm2787_vm2, %v3379_v58  ;;  %v7963_v58 = vld [vmem:[%s12966_s3 + $0xa8] sm:$0xff]  ;;  %4905 = vmatpush.msra.mxu3 %v8035_v37 }
 0x3ec   : > { %4348 = vmatpush.msra.mxu1 %v7963_v58 }
 0x3ed   : > { %v10496_v32 = vpop.f32.mrf.mxu2 }
 0x3f1   : > { %7830 = vmatmul.msk.f32.gmra.mxu1 %vm2787_vm2, %v10422_v21 }
 0x3f2   : > { %7903 = vmatmul.msk.f32.gmra.mxu3 %vm2787_vm2, %v10467_v29  ;;  %7937 = vmatmul.msk.f32.gmra.mxu0 %vm2787_vm2, %v8288_v20 }
 0x3f3   : > { %7871 = vmatmul.msk.f32.gmra.mxu2 %vm2787_vm2, %v10472_v23  ;;  %v10593_v23 = vld [vmem:[#allocation3 + $0xc1] sm:$0xff] }
 0x3f4   : > { %13447 = vst [vmem:[#allocation73_spill] sm:$0xff] %v10593_v23 }
 0x3f5   : > { %v10550_v20 = vpop.f32.mrf.mxu3 }
 0x3f6   : > { %13443 = vst [vmem:[#allocation91_spill] sm:$0xff] %v10550_v20  ;;  %v10576_v20 = vld [vmem:[#allocation3 + $0xc8] sm:$0xff] }
 0x3f9   : > { %7831 = vmatmul.msk.f32.gmra.mxu1 %vm2787_vm2, %v10439_v19 }
 0x3fa   : > { %7904 = vmatmul.msk.f32.gmra.mxu3 %vm2787_vm2, %v10486_v11  ;;  %7938 = vmatmul.msk.f32.gmra.mxu0 %vm2787_vm2, %v8289_v15  ;;  %v10552_v15 = vpop.f32.mrf.mxu1 }
 0x3fb   : > { %7872 = vmatmul.msk.f32.gmra.mxu2 %vm2787_vm2, %v3381_v5 }
 0x401   : > { %7832 = vmatmul.msk.f32.gmra.mxu1 %vm2787_vm2, %v10453_v57 }
 0x402   : > { %7905 = vmatmul.msk.f32.gmra.mxu3 %vm2787_vm2, %v10502_v30  ;;  %7939 = vmatmul.msk.f32.gmra.mxu0 %vm2787_vm2, %v9898_v7  ;;  %v3383_v7 = vld [vmem:[#allocation3 + $0xc2] sm:$0xff] }
 0x403   : > { %7873 = vmatmul.msk.f32.gmra.mxu2 %vm2787_vm2, %v3382_v28  ;;  %v10558_v28 = vld [vmem:[#allocation3 + $0xc0] sm:$0xff] }
 0x404   : > { %13444 = vst [vmem:[#allocation88_spill] sm:$0xff] %v10558_v28 }
 0x405   : > { %v10511_v41 = vpop.f32.mrf.mxu2 }
 0x406   : > { %13440 = vst [vmem:[#allocation26_spill] sm:$0xff] %v10511_v41  ;;  %v10607_v41 = vld [vmem:[#allocation3 + $0xc9] sm:$0xff] }
 0x407   : > { %13449 = vst [vmem:[#allocation147_spill] sm:$0xff] %v10607_v41 }
 0x409   : > { %7833 = vmatmul.msk.f32.gmra.mxu1 %vm2787_vm2, %v10467_v29 }
 0x40a   : > { %7906 = vmatmul.msk.f32.gmra.mxu3 %vm2787_vm2, %v10519_v40  ;;  %7940 = vmatmul.msk.f32.gmra.mxu0 %vm2787_vm2, %v10026_v56  ;;  %v3384_v56 = vld [vmem:[#allocation3 + $0xca] sm:$0xff] }
 0x40b   : > { %7874 = vmatmul.msk.f32.gmra.mxu2 %vm2787_vm2, %v3383_v7  ;;  %v3385_v7 = vld [vmem:[#allocation3 + $0xda] sm:$0xff] }
 0x40d   : > { %v3517_v44 = vpop.f32.mrf.mxu2 }
 0x40e   : > { %v10570_v37 = vpop.f32.mrf.mxu1 }
 0x411   : > { %7834 = vmatmul.msk.f32.gmra.mxu1 %vm2787_vm2, %v10486_v11 }
 0x412   : > { %7907 = vmatmul.msk.f32.gmra.mxu3 %vm2787_vm2, %v10534_v38  ;;  %7941 = vmatmul.msk.f32.gmra.mxu0 %vm2787_vm2, %v10146_v0  ;;  %v10554_v0 = vpop.f32.mrf.mxu0 }
 0x413   : > { %7875 = vmatmul.msk.f32.gmra.mxu2 %vm2787_vm2, %v3384_v56  ;;  %v10568_v56 = vpop.f32.mrf.mxu3 }
 0x414   : > { %13445 = vst [vmem:[#allocation30_spill] sm:$0xff] %v10568_v56 }
 0x415   : > { %v3520_v5 = vpop.f32.mrf.mxu2 }
 0x419   : > { %7835 = vmatmul.msk.f32.gmra.mxu1 %vm2787_vm2, %v10502_v30 }
 0x41a   : > { %7908 = vmatmul.msk.f32.gmra.mxu3 %vm2787_vm2, %v10558_v28  ;;  %7942 = vmatmul.msk.f32.gmra.mxu0 %vm2787_vm2, %v10233_v48  ;;  %v10572_v42 = vpop.f32.mrf.mxu0  ;;  %v3386_v48 = vld [vmem:[#allocation3 + $0xe2] sm:$0xff] }
 0x41b   : > { %7876 = vmatmul.msk.f32.gmra.mxu2 %vm2787_vm2, %v3385_v7 }
 0x41d   : > { %v3523_v58 = vpop.f32.mrf.mxu2 }
 0x421   : > { %7836 = vmatmul.msk.f32.gmra.mxu1 %vm2787_vm2, %v10519_v40 }
 0x422   : > { %7909 = vmatmul.msk.f32.gmra.mxu3 %vm2787_vm2, %v10576_v20  ;;  %7943 = vmatmul.msk.f32.gmra.mxu0 %vm2787_vm2, %v10329_v18  ;;  %v3387_v18 = vld [vmem:[#allocation3 + $0xf2] sm:$0xff] }
 0x423   : > { %7877 = vmatmul.msk.f32.gmra.mxu2 %vm2787_vm2, %v3386_v48 }
 0x425   : > { %v10583_v7 = vpop.f32.mrf.mxu3  ;;  %v3526_v56 = vpop.f32.mrf.mxu2 }
 0x426   : > { %13446 = vst [vmem:[#allocation28_spill] sm:$0xff] %v10583_v7  ;;  %v10585_v39 = vpop.f32.mrf.mxu1  ;;  %v10587_v2 = vpop.f32.mrf.mxu0 }
 0x429   : > { %7837 = vmatmul.msk.f32.gmra.mxu1 %vm2787_vm2, %v10534_v38 }
 0x42a   : > { %7910 = vmatmul.msk.f32.gmra.mxu3 %vm2787_vm2, %v10591_v47  ;;  %7944 = vmatmul.msk.f32.gmra.mxu0 %vm2787_vm2, %v10593_v23 }
 0x42b   : > { %7878 = vmatmul.msk.f32.gmra.mxu2 %vm2787_vm2, %v3387_v18  ;;  %v3388_v18 = vld [vmem:[#allocation3 + $0xfa] sm:$0xff] }
 0x42d   : > { %v3795_v48 = vpop.f32.mrf.mxu3  ;;  %v3529_v60 = vpop.f32.mrf.mxu2 }
 0x42e   : > { %v3271_v7 = vpop.f32.mrf.mxu1 }
 0x42f   : > { %v10600_v26 = vpop.f32.mrf.mxu0  ;;  %v3272_v62 = vadd.f32 %v3271_v7, %v10474_v55 }
 0x431   : > { %v3613_v31 = vadd.f32 %v3517_v44, %v3272_v62  ;;  %7838 = vmatmul.msk.f32.gmra.mxu1 %vm2787_vm2, %v10558_v28 }
 0x432   : > { %7911 = vmatmul.msk.f32.gmra.mxu3 %vm2787_vm2, %v10605_v8  ;;  %7945 = vmatmul.msk.f32.gmra.mxu0 %vm2787_vm2, %v10607_v41  ;;  %v10638_v41 = vld [vmem:[#allocation3 + $0xf8] sm:$0xff] }
 0x433   : > { %v10613_v23 = vadd.f32 %v3795_v48, %v3613_v31  ;;  %7879 = vmatmul.msk.f32.gmra.mxu2 %vm2787_vm2, %v3388_v18  ;;  %v8290_v31 = vld [vmem:[#allocation3 + $0xd9] sm:$0xff]  ;;  %v3389_v48 = vld [vmem:[#allocation3 + $0x10a] sm:$0xff] }
 0x435   : > { %13450 = vst [vmem:[#allocation8_spill] sm:$0xff] %v10613_v23  ;;  %v3798_v55 = vpop.f32.mrf.mxu3 }
 0x436   : > { %v3274_v62 = vpop.f32.mrf.mxu1  ;;  %v10616_v44 = vpop.f32.mrf.mxu2 }
 0x437   : > { %v3275_v7 = vadd.f32 %v3274_v62, %v10494_v49  ;;  %v10619_v28 = vpop.f32.mrf.mxu0 }
 0x438   : > { %13451 = vst [vmem:[#allocation108_spill] sm:$0xff] %v10619_v28 }
 0x439   : > { %v3614_v38 = vadd.f32 %v3520_v5, %v3275_v7  ;;  %7839 = vmatmul.msk.f32.gmra.mxu1 %vm2787_vm2, %v10576_v20 }
 0x43a   : > { %7912 = vmatmul.msk.f32.gmra.mxu3 %vm2787_vm2, %v10623_v16  ;;  %7946 = vmatmul.msk.f32.gmra.mxu0 %vm2787_vm2, %v8290_v31 }
 0x43b   : > { %v10628_v18 = vadd.f32 %v3798_v55, %v3614_v38  ;;  %7880 = vmatmul.msk.f32.gmra.mxu2 %vm2787_vm2, %v3389_v48  ;;  %v8291_v38 = vld [vmem:[#allocation3 + $0xe1] sm:$0xff]  ;;  %v3390_v55 = vld [vmem:[#allocation3 + $0x112] sm:$0xff] }
 0x43d   : > { %13453 = vst [vmem:[#allocation124_spill] sm:$0xff] %v10628_v18  ;;  %v3801_v49 = vpop.f32.mrf.mxu3  ;;  %v10653_v18 = vld [vmem:[#allocation3 + $0x108] sm:$0xff] }
 0x43e   : > { %v3277_v62 = vpop.f32.mrf.mxu1  ;;  %v10631_v28 = vpop.f32.mrf.mxu2 }
 0x43f   : > { %v3278_v5 = vadd.f32 %v3277_v62, %v10515_v53  ;;  %v10634_v7 = vpop.f32.mrf.mxu0 }
 0x440   : > { %13454 = vst [vmem:[#allocation62_spill] sm:$0xff] %v10634_v7 }
 0x441   : > { %v3615_v23 = vadd.f32 %v3523_v58, %v3278_v5  ;;  %7840 = vmatmul.msk.f32.gmra.mxu1 %vm2787_vm2, %v10591_v47 }
 0x442   : > { %7913 = vmatmul.msk.f32.gmra.mxu3 %vm2787_vm2, %v10638_v41  ;;  %7947 = vmatmul.msk.f32.gmra.mxu0 %vm2787_vm2, %v8291_v38 }
 0x443   : > { %v10643_v31 = vadd.f32 %v3801_v49, %v3615_v23  ;;  %7881 = vmatmul.msk.f32.gmra.mxu2 %vm2787_vm2, %v3390_v55  ;;  %v8292_v23 = vld [vmem:[#allocation3 + $0xf1] sm:$0xff]  ;;  %v3391_v49 = vld [vmem:[#allocation3 + $0x122] sm:$0xff] }
 0x445   : > { %13455 = vst [vmem:[#allocation71_spill] sm:$0xff] %v10643_v31  ;;  %v3804_v53 = vpop.f32.mrf.mxu3  ;;  %v10668_v31 = vld [vmem:[#allocation3 + $0x110] sm:$0xff] }
 0x446   : > { %v3280_v48 = vpop.f32.mrf.mxu1  ;;  %v10646_v62 = vpop.f32.mrf.mxu2 }
 0x447   : > { %v3281_v58 = vadd.f32 %v3280_v48, %v10530_v36  ;;  %v10649_v5 = vpop.f32.mrf.mxu0 }
 0x448   : > { %13456 = vst [vmem:[#allocation148_spill] sm:$0xff] %v10649_v5 }
 0x449   : > { %v3616_v7 = vadd.f32 %v3526_v56, %v3281_v58  ;;  %7841 = vmatmul.msk.f32.gmra.mxu1 %vm2787_vm2, %v10605_v8  ;;  %v10691_v8 = vld [vmem:[#allocation3 + $0x120] sm:$0xff] }
 0x44a   : > { %7914 = vmatmul.msk.f32.gmra.mxu3 %vm2787_vm2, %v10653_v18  ;;  %7948 = vmatmul.msk.f32.gmra.mxu0 %vm2787_vm2, %v8292_v23  ;;  %v3392_v23 = vld [vmem:[#allocation3 + $0x12a] sm:$0xff] }
 0x44b   : > { %v10658_v38 = vadd.f32 %v3804_v53, %v3616_v7  ;;  %7882 = vmatmul.msk.f32.gmra.mxu2 %vm2787_vm2, %v3391_v49  ;;  %v7998_v7 = vld [vmem:[%s12966_s3 + $0xc0] sm:$0xff]  ;;  %v8293_v53 = vld [vmem:[#allocation3 + $0xf9] sm:$0xff] }
 0x44c   : > { %4628 = vmatpush.msra.mxu2 %v7998_v7 }
 0x44d   : > { %13457 = vst [vmem:[#allocation31_spill] sm:$0xff] %v10658_v38  ;;  %v3807_v36 = vpop.f32.mrf.mxu3 }
 0x44e   : > { %v3283_v55 = vpop.f32.mrf.mxu1  ;;  %v10661_v48 = vpop.f32.mrf.mxu2 }
 0x44f   : > { %v3284_v56 = vadd.f32 %v3283_v55, %v10554_v0  ;;  %v10664_v58 = vpop.f32.mrf.mxu0  ;;  %v7962_v0 = vld [vmem:[%s12966_s3 + $0xa0] sm:$0xff] }
 0x450   : > { %13458 = vst [vmem:[#allocation115_spill] sm:$0xff] %v10664_v58  ;;  %4349 = vmatpush.msra.mxu1 %v7962_v0 }
 0x451   : > { %v3617_v5 = vadd.f32 %v3529_v60, %v3284_v56  ;;  %7842 = vmatmul.msk.f32.gmra.mxu1 %vm2787_vm2, %v10623_v16  ;;  %v8034_v60 = vld [vmem:[%s12966_s3 + $0xe0] sm:$0xff] }
 0x452   : > { %7915 = vmatmul.msk.f32.gmra.mxu3 %vm2787_vm2, %v10668_v31  ;;  %7949 = vmatmul.msk.f32.gmra.mxu0 %vm2787_vm2, %v8293_v53 }
 0x453   : > { %v10682_v49 = vadd.f32 %v3807_v36, %v3617_v5  ;;  %7883 = vmatmul.msk.f32.gmra.mxu2 %vm2787_vm2, %v3392_v23  ;;  %4906 = vmatpush.msra.mxu3 %v8034_v60  ;;  %v8294_v5 = vld [vmem:[#allocation3 + $0x109] sm:$0xff]  ;;  %v3393_v36 = vld [vmem:[#allocation3 + $0x13a] sm:$0xff] }
 0x455   : > { %v3810_v55 = vpop.f32.mrf.mxu3 }
 0x456   : > { %v3286_v56 = vpop.f32.mrf.mxu1  ;;  %v3544_v58 = vpop.f32.mrf.mxu2 }
 0x457   : > { %v3287_v53 = vadd.f32 %v3286_v56, %v10572_v42  ;;  %v10686_v38 = vpop.f32.mrf.mxu0  ;;  %v8070_v42 = vld [vmem:[%s12966_s3 + $0x100] sm:$0xff] }
 0x458   : > { %5184 = vmatpush.msra.mxu0 %v8070_v42 }
 0x459   : > { %v3618_v16 = vadd.f32 %v10616_v44, %v3287_v53  ;;  %7843 = vmatmul.msk.f32.gmra.mxu1 %vm2787_vm2, %v10638_v41 }
 0x45a   : > { %7916 = vmatmul.msk.f32.gmra.mxu3 %vm2787_vm2, %v10691_v8  ;;  %7950 = vmatmul.msk.f32.gmra.mxu0 %vm2787_vm2, %v8294_v5  ;;  %v10708_v5 = vld [vmem:[#allocation3 + $0x128] sm:$0xff] }
 0x45b   : > { %v10699_v7 = vadd.f32 %v3810_v55, %v3618_v16  ;;  %7884 = vmatmul.msk.f32.gmra.mxu2 %vm2787_vm2, %v3393_v36  ;;  %v3394_v16 = vld [vmem:[#allocation3 + $0x142] sm:$0xff] }
 0x45d   : > { %13459 = vst [vmem:[#allocation164_spill] sm:$0xff] %v10699_v7  ;;  %v3813_v44 = vpop.f32.mrf.mxu3  ;;  %v3947_v7 = vld [vmem:[#allocation3 + $0x139] sm:$0xff] }
 0x45e   : > { %v3289_v23 = vpop.f32.mrf.mxu1  ;;  %v3547_v60 = vpop.f32.mrf.mxu2 }
 0x45f   : > { %v3290_v0 = vadd.f32 %v3289_v23, %v10587_v2  ;;  %v10703_v56 = vpop.f32.mrf.mxu0 }
 0x460   : > { %13460 = vst [vmem:[#allocation29_spill] sm:$0xff] %v10703_v56  ;;  %v10723_v56 = vld [vmem:[#allocation3 + $0x138] sm:$0xff] }
 0x461   : > { %v3619_v53 = vadd.f32 %v10631_v28, %v3290_v0  ;;  %7844 = vmatmul.msk.f32.gmra.mxu1 %vm2787_vm2, %v10653_v18 }
 0x462   : > { %7917 = vmatmul.msk.f32.gmra.mxu3 %vm2787_vm2, %v10708_v5  ;;  %7951 = vmatmul.msk.f32.gmra.mxu0 %vm2787_vm2, %v10176_v9  ;;  %v3945_v9 = vld [vmem:[#allocation3 + $0x121] sm:$0xff] }
 0x463   : > { %v10714_v55 = vadd.f32 %v3813_v44, %v3619_v53  ;;  %7885 = vmatmul.msk.f32.gmra.mxu2 %vm2787_vm2, %v3394_v16  ;;  %v3395_v44 = vld [vmem:[#allocation3 + $0x152] sm:$0xff] }
 0x465   : > { %13461 = vst [vmem:[#allocation61_spill] sm:$0xff] %v10714_v55  ;;  %v3816_v2 = vpop.f32.mrf.mxu3  ;;  %v10737_v55 = vld [vmem:[#allocation3 + $0x140] sm:$0xff] }
 0x466   : > { %v3292_v36 = vpop.f32.mrf.mxu1  ;;  %v3550_v42 = vpop.f32.mrf.mxu2 }
 0x467   : > { %v3293_v28 = vadd.f32 %v3292_v36, %v10600_v26  ;;  %v10718_v23 = vpop.f32.mrf.mxu0 }
 0x468   : > { %13462 = vst [vmem:[#allocation96_spill] sm:$0xff] %v10718_v23 }
 0x469   : > { %v3620_v0 = vadd.f32 %v10646_v62, %v3293_v28  ;;  %7845 = vmatmul.msk.f32.gmra.mxu1 %vm2787_vm2, %v10668_v31 }
 0x46a   : > { %7918 = vmatmul.msk.f32.gmra.mxu3 %vm2787_vm2, %v10723_v56  ;;  %7952 = vmatmul.msk.f32.gmra.mxu0 %vm2787_vm2, %v3945_v9  ;;  %v3946_v9 = vld [vmem:[#allocation3 + $0x129] sm:$0xff] }
 0x46b   : > { %v10728_v53 = vadd.f32 %v3816_v2, %v3620_v0  ;;  %7886 = vmatmul.msk.f32.gmra.mxu2 %vm2787_vm2, %v3395_v44  ;;  %v3396_v2 = vld [vmem:[#allocation3 + $0x15a] sm:$0xff] }
 0x46d   : > { %13463 = vst [vmem:[#allocation155_spill] sm:$0xff] %v10728_v53  ;;  %v3819_v26 = vpop.f32.mrf.mxu3  ;;  %v3671_v53 = vld [vmem:[#allocation3 + $0x150] sm:$0xff] }
 0x46e   : > { %v3295_v16 = vpop.f32.mrf.mxu1  ;;  %v3553_v36 = vpop.f32.mrf.mxu2 }
 0x46f   : > { %v3296_v62 = vadd.f32 %v3295_v16, %v10463_v45  ;;  %v10732_v28 = vpop.f32.mrf.mxu0 }
 0x470   : > { %13464 = vst [vmem:[#allocation45_spill] sm:$0xff] %v10732_v28 }
 0x471   : > { %v3621_v23 = vadd.f32 %v10661_v48, %v3296_v62  ;;  %7846 = vmatmul.msk.f32.gmra.mxu1 %vm2787_vm2, %v10691_v8 }
 0x472   : > { %7919 = vmatmul.msk.f32.gmra.mxu3 %vm2787_vm2, %v10737_v55  ;;  %7953 = vmatmul.msk.f32.gmra.mxu0 %vm2787_vm2, %v3946_v9 }
 0x473   : > { %v10742_v0 = vadd.f32 %v3819_v26, %v3621_v23  ;;  %7887 = vmatmul.msk.f32.gmra.mxu2 %vm2787_vm2, %v3396_v2  ;;  %v3397_v23 = vld [vmem:[#allocation3 + $0x16a] sm:$0xff] }
 0x475   : > { %13465 = vst [vmem:[#allocation113_spill] sm:$0xff] %v10742_v0  ;;  %v3822_v45 = vpop.f32.mrf.mxu3  ;;  %v3948_v0 = vld [vmem:[#allocation3 + $0x141] sm:$0xff] }
 0x476   : > { %v3298_v44 = vpop.f32.mrf.mxu1  ;;  %v3556_v16 = vpop.f32.mrf.mxu2 }
 0x477   : > { %v3299_v48 = vadd.f32 %v3298_v44, %v10482_v1  ;;  %v10746_v62 = vpop.f32.mrf.mxu0 }
 0x478   : > { %13466 = vst [vmem:[#allocation177_spill] sm:$0xff] %v10746_v62  ;;  %v3672_v62 = vld [vmem:[#allocation3 + $0x158] sm:$0xff] }
 0x479   : > { %v3622_v28 = vadd.f32 %v3544_v58, %v3299_v48  ;;  %7847 = vmatmul.msk.f32.gmra.mxu1 %vm2787_vm2, %v10708_v5 }
 0x47a   : > { %7920 = vmatmul.msk.f32.gmra.mxu3 %vm2787_vm2, %v3671_v53  ;;  %7954 = vmatmul.msk.f32.gmra.mxu0 %vm2787_vm2, %v3947_v7  ;;  %v3398_v7 = vld [vmem:[#allocation3 + $0x172] sm:$0xff] }
 0x47b   : > { %v10752_v26 = vadd.f32 %v3822_v45, %v3622_v28  ;;  %7888 = vmatmul.msk.f32.gmra.mxu2 %vm2787_vm2, %v3397_v23 }
 0x47d   : > { %13467 = vst [vmem:[#allocation38_spill] sm:$0xff] %v10752_v26  ;;  %v3825_v9 = vpop.f32.mrf.mxu3  ;;  %v3949_v26 = vld [vmem:[#allocation3 + $0x151] sm:$0xff] }
 0x47e   : > { %v3301_v2 = vpop.f32.mrf.mxu1  ;;  %v3559_v1 = vpop.f32.mrf.mxu2 }
 0x47f   : > { %v3302_v44 = vadd.f32 %v3301_v2, %v10498_v12  ;;  %v10756_v58 = vpop.f32.mrf.mxu0 }
 0x480   : > { %13468 = vst [vmem:[#allocation36_spill] sm:$0xff] %v10756_v58  ;;  %v3673_v58 = vld [vmem:[#allocation3 + $0x168] sm:$0xff] }
 0x481   : > { %v3623_v48 = vadd.f32 %v3547_v60, %v3302_v44  ;;  %7848 = vmatmul.msk.f32.gmra.mxu1 %vm2787_vm2, %v10723_v56 }
 0x482   : > { %7921 = vmatmul.msk.f32.gmra.mxu3 %vm2787_vm2, %v3672_v62  ;;  %7955 = vmatmul.msk.f32.gmra.mxu0 %vm2787_vm2, %v3948_v0 }
 0x483   : > { %v10762_v28 = vadd.f32 %v3825_v9, %v3623_v48  ;;  %7889 = vmatmul.msk.f32.gmra.mxu2 %vm2787_vm2, %v3398_v7 }
 0x485   : > { %v3828_v45 = vpop.f32.mrf.mxu3 }
 0x486   : > { %v3304_v23 = vpop.f32.mrf.mxu1  ;;  %v3562_v12 = vpop.f32.mrf.mxu2 }
 0x487   : > { %v3305_v2 = vadd.f32 %v3304_v23, %v10513_v54  ;;  %v10766_v60 = vpop.f32.mrf.mxu0 }
 0x488   : > { %13469 = vst [vmem:[#allocation86_spill] sm:$0xff] %v10766_v60  ;;  %v3950_v60 = vld [vmem:[#allocation3 + $0x159] sm:$0xff] }
 0x489   : > { %v3624_v44 = vadd.f32 %v3550_v42, %v3305_v2  ;;  %7849 = vmatmul.msk.f32.gmra.mxu1 %vm2787_vm2, %v10737_v55  ;;  %v3674_v2 = vld [vmem:[#allocation3 + $0x170] sm:$0xff] }
 0x48a   : > { %7922 = vmatmul.msk.f32.gmra.mxu3 %vm2787_vm2, %v3673_v58  ;;  %7956 = vmatmul.msk.f32.gmra.mxu0 %vm2787_vm2, %v3949_v26 }
 0x48b   : > { %v10772_v0 = vadd.f32 %v3828_v45, %v3624_v44  ;;  %8002 = vmatmul.msk.f32.vlgmr.msra.gmra.mxu2 %vm2787_vm2, %v10362_v43 }
 0x48d   : > { %v3831_v9 = vpop.f32.mrf.mxu3 }
 0x48e   : > { %v3307_v48 = vpop.f32.mrf.mxu1  ;;  %v3565_v54 = vpop.f32.mrf.mxu2 }
 0x48f   : > { %v3308_v7 = vadd.f32 %v3307_v48, %v10528_v13  ;;  %v10777_v42 = vpop.f32.mrf.mxu0 }
 0x491   : > { %v3625_v23 = vadd.f32 %v3553_v36, %v3308_v7  ;;  %7850 = vmatmul.msk.f32.gmra.mxu1 %vm2787_vm2, %v3671_v53  ;;  %v3675_v53 = vld [vmem:[#allocation3 + $0x180] sm:$0xff] }
 0x492   : > { %7923 = vmatmul.msk.f32.gmra.mxu3 %vm2787_vm2, %v3674_v2  ;;  %7957 = vmatmul.msk.f32.gmra.mxu0 %vm2787_vm2, %v3950_v60 }
 0x493   : > { %v10782_v26 = vadd.f32 %v3831_v9, %v3625_v23  ;;  %8003 = vmatmul.msk.f32.gmra.mxu2 %vm2787_vm2, %v10374_v50 }
 0x495   : > { %v3834_v43 = vpop.f32.mrf.mxu3 }
 0x496   : > { %v3310_v45 = vpop.f32.mrf.mxu1  ;;  %v3568_v44 = vpop.f32.mrf.mxu2 }
 0x497   : > { %v3311_v13 = vadd.f32 %v3310_v45, %v10552_v15  ;;  %v10787_v48 = vpop.f32.mrf.mxu0 }
 0x499   : > { %v3626_v36 = vadd.f32 %v3556_v16, %v3311_v13  ;;  %7851 = vmatmul.msk.f32.gmra.mxu1 %vm2787_vm2, %v3672_v62  ;;  %v3676_v62 = vld [vmem:[#allocation3 + $0x188] sm:$0xff] }
 0x49a   : > { %7924 = vmatmul.msk.f32.gmra.mxu3 %vm2787_vm2, %v3675_v53  ;;  %7958 = vmatmul.msk.f32.gmra.mxu0 %vm2787_vm2, %v10195_v14 }
 0x49b   : > { %v10793_v60 = vadd.f32 %v3834_v43, %v3626_v36  ;;  %8004 = vmatmul.msk.f32.gmra.mxu2 %vm2787_vm2, %v10385_v63  ;;  %v4758_v36 = vld [vmem:[#allocation3 + $0x31] sm:$0xff] }
 0x49d   : > { %v3837_v50 = vpop.f32.mrf.mxu3 }
 0x49e   : > { %v3313_v9 = vpop.f32.mrf.mxu1  ;;  %v3571_v7 = vpop.f32.mrf.mxu2 }
 0x49f   : > { %v3314_v15 = vadd.f32 %v3313_v9, %v10570_v37  ;;  %v10798_v23 = vpop.f32.mrf.mxu0 }
 0x4a1   : > { %v3627_v16 = vadd.f32 %v3559_v1, %v3314_v15  ;;  %7852 = vmatmul.msk.f32.gmra.mxu1 %vm2787_vm2, %v3673_v58  ;;  %v3953_v58 = vld [vmem:[#allocation3 + $0x181] sm:$0xff]  ;;  %v4759_v15 = vld [vmem:[#allocation3 + $0x39] sm:$0xff] }
 0x4a2   : > { %7925 = vmatmul.msk.f32.gmra.mxu3 %vm2787_vm2, %v3676_v62  ;;  %7959 = vmatmul.msk.f32.gmra.mxu0 %vm2787_vm2, %v10301_v35 }
 0x4a3   : > { %v10804_v14 = vadd.f32 %v3837_v50, %v3627_v16  ;;  %8005 = vmatmul.msk.f32.gmra.mxu2 %vm2787_vm2, %v10402_v24 }
 0x4a5   : > { %v3840_v63 = vpop.f32.mrf.mxu3 }
 0x4a6   : > { %v3316_v43 = vpop.f32.mrf.mxu1  ;;  %v3574_v45 = vpop.f32.mrf.mxu2 }
 0x4a7   : > { %v3317_v37 = vadd.f32 %v3316_v43, %v10585_v39  ;;  %v10809_v13 = vpop.f32.mrf.mxu0 }
 0x4a9   : > { %v3628_v1 = vadd.f32 %v3562_v12, %v3317_v37  ;;  %7853 = vmatmul.msk.f32.gmra.mxu1 %vm2787_vm2, %v3674_v2  ;;  %v3954_v2 = vld [vmem:[#allocation3 + $0x189] sm:$0xff] }
 0x4aa   : > { %7960 = vmatmul.msk.f32.gmra.mxu0 %vm2787_vm2, %v3953_v58  ;;  %8038 = vmatmul.msk.f32.vlgmr.msra.gmra.mxu3 %vm2787_vm2, %v4758_v36 }
 0x4ab   : > { %v10814_v35 = vadd.f32 %v3840_v63, %v3628_v1  ;;  %8006 = vmatmul.msk.f32.gmra.mxu2 %vm2787_vm2, %v10422_v21 }
 0x4ad   : > { %v3843_v24 = vpop.f32.mrf.mxu3 }
 0x4ae   : > { %v3319_v53 = vpop.f32.mrf.mxu1  ;;  %v3577_v50 = vpop.f32.mrf.mxu2 }
 0x4af   : > { %v3320_v39 = vadd.f32 %v3319_v53, %v10393_v22  ;;  %v10819_v9 = vpop.f32.mrf.mxu0 }
 0x4b1   : > { %v3629_v12 = vadd.f32 %v3565_v54, %v3320_v39  ;;  %7966 = vmatmul.msk.f32.vlgmr.msra.gmra.mxu1 %vm2787_vm2, %v10267_v3 }
 0x4b2   : > { %7961 = vmatmul.msk.f32.gmra.mxu0 %vm2787_vm2, %v3954_v2  ;;  %8039 = vmatmul.msk.f32.gmra.mxu3 %vm2787_vm2, %v4759_v15 }
 0x4b3   : > { %v10825_v16 = vadd.f32 %v3843_v24, %v3629_v12  ;;  %8007 = vmatmul.msk.f32.gmra.mxu2 %vm2787_vm2, %v10439_v19 }
 0x4b5   : > { %v3846_v21 = vpop.f32.mrf.mxu3 }
 0x4b6   : > { %v3322_v62 = vpop.f32.mrf.mxu1  ;;  %v3580_v22 = vpop.f32.mrf.mxu2 }
 0x4b7   : > { %v3323_v63 = vadd.f32 %v3322_v62, %v10416_v52  ;;  %v10830_v54 = vpop.f32.mrf.mxu0 }
 0x4b9   : > { %v3630_v43 = vadd.f32 %v3568_v44, %v3323_v63  ;;  %7967 = vmatmul.msk.f32.gmra.mxu1 %vm2787_vm2, %v10303_v34 }
 0x4ba   : > { %8040 = vmatmul.msk.f32.gmra.mxu3 %vm2787_vm2, %v10322_v59  ;;  %8074 = vmatmul.msk.f32.vlgmr.msra.gmra.mxu0 %vm2787_vm2, %v10333_v6 }
 0x4bb   : > { %v10838_v3 = vadd.f32 %v3846_v21, %v3630_v43  ;;  %8008 = vmatmul.msk.f32.gmra.mxu2 %vm2787_vm2, %v10453_v57 }
 0x4bd   : > { %v3849_v19 = vpop.f32.mrf.mxu3 }
 0x4be   : > { %v3325_v37 = vpop.f32.mrf.mxu1  ;;  %v3583_v52 = vpop.f32.mrf.mxu2 }
 0x4bf   : > { %v3326_v1 = vadd.f32 %v3325_v37, %v10433_v51  ;;  %v10843_v44 = vpop.f32.mrf.mxu0 }
 0x4c1   : > { %v3631_v58 = vadd.f32 %v3571_v7, %v3326_v1  ;;  %7968 = vmatmul.msk.f32.gmra.mxu1 %vm2787_vm2, %v10333_v6  ;;  %v4762_v6 = vld [vmem:[#allocation3 + $0x61] sm:$0xff]  ;;  %v13472_v1 = vld [vmem:[#allocation13_spill] sm:$0xff] }
 0x4c2   : > { %8041 = vmatmul.msk.f32.gmra.mxu3 %vm2787_vm2, %v10347_v4  ;;  %8075 = vmatmul.msk.f32.gmra.mxu0 %vm2787_vm2, %v10355_v46 }
 0x4c3   : > { %v10851_v34 = vadd.f32 %v3849_v19, %v3631_v58  ;;  %8009 = vmatmul.msk.f32.gmra.mxu2 %vm2787_vm2, %v10467_v29 }
 0x4c5   : > { %v3852_v59 = vpop.f32.mrf.mxu3 }
 0x4c6   : > { %v3328_v57 = vpop.f32.mrf.mxu1  ;;  %v3586_v51 = vpop.f32.mrf.mxu2 }
 0x4c7   : > { %v3329_v36 = vadd.f32 %v3328_v57, %v10449_v61  ;;  %v10856_v7 = vpop.f32.mrf.mxu0 }
 0x4c9   : > { %v3632_v24 = vadd.f32 %v3574_v45, %v3329_v36  ;;  %7969 = vmatmul.msk.f32.gmra.mxu1 %vm2787_vm2, %v10355_v46  ;;  %v4763_v46 = vld [vmem:[#allocation3 + $0x69] sm:$0xff]  ;;  %v13475_v36 = vld [vmem:[#allocation26_spill] sm:$0xff] }
 0x4ca   : > { %8042 = vmatmul.msk.f32.gmra.mxu3 %vm2787_vm2, %v4762_v6  ;;  %8076 = vmatmul.msk.f32.gmra.mxu0 %vm2787_vm2, %v10369_v17 }
 0x4cb   : > { %v10863_v4 = vadd.f32 %v3852_v59, %v3632_v24  ;;  %8010 = vmatmul.msk.f32.gmra.mxu2 %vm2787_vm2, %v10486_v11 }
 0x4cd   : > { %v3855_v29 = vpop.f32.mrf.mxu3 }
 0x4ce   : > { %v3331_v53 = vpop.f32.mrf.mxu1  ;;  %v3589_v61 = vpop.f32.mrf.mxu2 }
 0x4cf   : > { %v3332_v39 = vadd.f32 %v3331_v53, %v10461_v10  ;;  %v10868_v45 = vpop.f32.mrf.mxu0 }
 0x4d1   : > { %v3633_v12 = vadd.f32 %v3577_v50, %v3332_v39  ;;  %7970 = vmatmul.msk.f32.gmra.mxu1 %vm2787_vm2, %v10369_v17  ;;  %v4764_v17 = vld [vmem:[#allocation3 + $0x79] sm:$0xff]  ;;  %v13479_v39 = vld [vmem:[#allocation88_spill] sm:$0xff] }
 0x4d2   : > { %8043 = vmatmul.msk.f32.gmra.mxu3 %vm2787_vm2, %v4763_v46  ;;  %8077 = vmatmul.msk.f32.gmra.mxu0 %vm2787_vm2, %v10380_v25 }
 0x4d3   : > { %v10875_v2 = vadd.f32 %v3855_v29, %v3633_v12  ;;  %8011 = vmatmul.msk.f32.gmra.mxu2 %vm2787_vm2, %v10502_v30  ;;  %v13477_v29 = vld [vmem:[#allocation87_spill] sm:$0xff] }
 0x4d5   : > { %v3858_v11 = vpop.f32.mrf.mxu3 }
 0x4d6   : > { %v3334_v15 = vpop.f32.mrf.mxu1  ;;  %v3592_v10 = vpop.f32.mrf.mxu2 }
 0x4d7   : > { %v3335_v21 = vadd.f32 %v3334_v15, %v10480_v27  ;;  %v10880_v50 = vpop.f32.mrf.mxu0  ;;  %v13480_v15 = vld [vmem:[#allocation47_spill] sm:$0xff] }
 0x4d9   : > { %v3634_v62 = vadd.f32 %v3580_v22, %v3335_v21  ;;  %7971 = vmatmul.msk.f32.gmra.mxu1 %vm2787_vm2, %v10380_v25  ;;  %v4765_v25 = vld [vmem:[#allocation3 + $0x81] sm:$0xff] }
 0x4da   : > { %8044 = vmatmul.msk.f32.gmra.mxu3 %vm2787_vm2, %v4764_v17  ;;  %8078 = vmatmul.msk.f32.gmra.mxu0 %vm2787_vm2, %v10391_v33  ;;  %v4767_v17 = vld [vmem:[#allocation3 + $0x99] sm:$0xff] }
 0x4db   : > { %v10887_v63 = vadd.f32 %v3858_v11, %v3634_v62  ;;  %8012 = vmatmul.msk.f32.gmra.mxu2 %vm2787_vm2, %v10519_v40  ;;  %v13474_v40 = vld [vmem:[#allocation70_spill] sm:$0xff] }
 0x4dd   : > { %13470 = vst [vmem:[#allocation9_spill] sm:$0xff] %v10887_v63  ;;  %v3861_v30 = vpop.f32.mrf.mxu3 }
 0x4de   : > { %v3337_v43 = vpop.f32.mrf.mxu1  ;;  %v3595_v27 = vpop.f32.mrf.mxu2 }
 0x4df   : > { %v3338_v19 = vadd.f32 %v3337_v43, %v10496_v32  ;;  %v10892_v22 = vpop.f32.mrf.mxu0 }
 0x4e0   : > { %13471 = vst [vmem:[#allocation53_spill] sm:$0xff] %v10892_v22 }
 0x4e1   : > { %v3635_v37 = vadd.f32 %v3583_v52, %v3338_v19  ;;  %7972 = vmatmul.msk.f32.gmra.mxu1 %vm2787_vm2, %v10391_v33  ;;  %v4766_v33 = vld [vmem:[#allocation3 + $0x91] sm:$0xff] }
 0x4e2   : > { %8045 = vmatmul.msk.f32.gmra.mxu3 %vm2787_vm2, %v4765_v25  ;;  %8079 = vmatmul.msk.f32.gmra.mxu0 %vm2787_vm2, %v13472_v1 }
 0x4e3   : > { %v10899_v58 = vadd.f32 %v3861_v30, %v3635_v37  ;;  %8013 = vmatmul.msk.f32.gmra.mxu2 %vm2787_vm2, %v13474_v40  ;;  %v13482_v30 = vld [vmem:[#allocation15_spill] sm:$0xff] }
 0x4e5   : > { %13473 = vst [vmem:[#allocation103_spill] sm:$0xff] %v10899_v58  ;;  %v3864_v59 = vpop.f32.mrf.mxu3 }
 0x4e6   : > { %v3340_v57 = vpop.f32.mrf.mxu1  ;;  %v3598_v32 = vpop.f32.mrf.mxu2 }
 0x4e7   : > { %v3341_v24 = vadd.f32 %v3340_v57, %v13475_v36  ;;  %v10904_v52 = vpop.f32.mrf.mxu0  ;;  %v4768_v36 = vld [vmem:[#allocation3 + $0xa9] sm:$0xff] }
 0x4e8   : > { %13476 = vst [vmem:[#allocation153_spill] sm:$0xff] %v10904_v52 }
 0x4e9   : > { %v3636_v6 = vadd.f32 %v3586_v51, %v3341_v24  ;;  %7973 = vmatmul.msk.f32.gmra.mxu1 %vm2787_vm2, %v13472_v1  ;;  %v13484_v1 = vld [vmem:[#allocation40_spill] sm:$0xff] }
 0x4ea   : > { %8046 = vmatmul.msk.f32.gmra.mxu3 %vm2787_vm2, %v4766_v33  ;;  %8080 = vmatmul.msk.f32.gmra.mxu0 %vm2787_vm2, %v13477_v29  ;;  %v5044_v24 = vld [vmem:[#allocation3 + $0x92] sm:$0xff] }
 0x4eb   : > { %v10911_v53 = vadd.f32 %v3864_v59, %v3636_v6  ;;  %8014 = vmatmul.msk.f32.gmra.mxu2 %vm2787_vm2, %v13479_v39  ;;  %v4210_v59 = vld [vmem:[#allocation3 + $0x82] sm:$0xff]  ;;  %v13487_v39 = vld [vmem:[#allocation16_spill] sm:$0xff] }
 0x4ed   : > { %13478 = vst [vmem:[#allocation18_spill] sm:$0xff] %v10911_v53  ;;  %v3867_v12 = vpop.f32.mrf.mxu3 }
 0x4ee   : > { %v3343_v46 = vpop.f32.mrf.mxu1  ;;  %v3601_v11 = vpop.f32.mrf.mxu2 }
 0x4ef   : > { %v3344_v21 = vadd.f32 %v3343_v46, %v13480_v15  ;;  %v10916_v51 = vpop.f32.mrf.mxu0  ;;  %v4769_v15 = vld [vmem:[#allocation3 + $0xb1] sm:$0xff] }
 0x4f0   : > { %13481 = vst [vmem:[#allocation110_spill] sm:$0xff] %v10916_v51 }
 0x4f1   : > { %v3637_v62 = vadd.f32 %v3589_v61, %v3344_v21  ;;  %7974 = vmatmul.msk.f32.gmra.mxu1 %vm2787_vm2, %v13477_v29  ;;  %v13489_v21 = vld [vmem:[#allocation83_spill] sm:$0xff] }
 0x4f2   : > { %8047 = vmatmul.msk.f32.gmra.mxu3 %vm2787_vm2, %v4767_v17  ;;  %8081 = vmatmul.msk.f32.gmra.mxu0 %vm2787_vm2, %v13482_v30  ;;  %v13491_v17 = vld [vmem:[#allocation75_spill] sm:$0xff] }
 0x4f3   : > { %v10923_v43 = vadd.f32 %v3867_v12, %v3637_v62  ;;  %8015 = vmatmul.msk.f32.gmra.mxu2 %vm2787_vm2, %v10576_v20 }
 0x4f5   : > { %13483 = vst [vmem:[#allocation126_spill] sm:$0xff] %v10923_v43  ;;  %v3870_v19 = vpop.f32.mrf.mxu3 }
 0x4f6   : > { %v3346_v37 = vpop.f32.mrf.mxu1  ;;  %v3604_v25 = vpop.f32.mrf.mxu2 }
 0x4f7   : > { %v3347_v40 = vadd.f32 %v3346_v37, %v13484_v1  ;;  %v10928_v61 = vpop.f32.mrf.mxu0  ;;  %v13492_v37 = vld [vmem:[#allocation65_spill] sm:$0xff] }
 0x4f8   : > { %13485 = vst [vmem:[#allocation131_spill] sm:$0xff] %v10928_v61 }
 0x4f9   : > { %v3638_v57 = vadd.f32 %v3592_v10, %v3347_v40  ;;  %7975 = vmatmul.msk.f32.gmra.mxu1 %vm2787_vm2, %v4210_v59  ;;  %v4212_v40 = vld [vmem:[#allocation3 + $0x9a] sm:$0xff] }
 0x4fa   : > { %8048 = vmatmul.msk.f32.gmra.mxu3 %vm2787_vm2, %v4768_v36  ;;  %8082 = vmatmul.msk.f32.gmra.mxu0 %vm2787_vm2, %v5044_v24  ;;  %v13494_v36 = vld [vmem:[#allocation73_spill] sm:$0xff] }
 0x4fb   : > { %v10933_v6 = vadd.f32 %v3870_v19, %v3638_v57  ;;  %8016 = vmatmul.msk.f32.gmra.mxu2 %vm2787_vm2, %v10591_v47  ;;  %v5046_v57 = vld [vmem:[#allocation3 + $0xaa] sm:$0xff] }
 0x4fd   : > { %13486 = vst [vmem:[#allocation136_spill] sm:$0xff] %v10933_v6  ;;  %v3873_v20 = vpop.f32.mrf.mxu3 }
 0x4fe   : > { %v3349_v33 = vpop.f32.mrf.mxu1  ;;  %v3607_v29 = vpop.f32.mrf.mxu2 }
 0x4ff   : > { %v3350_v12 = vadd.f32 %v3349_v33, %v13487_v39  ;;  %v10938_v46 = vpop.f32.mrf.mxu0 }
 0x500   : > { %13488 = vst [vmem:[#allocation54_spill] sm:$0xff] %v10938_v46 }
 0x501   : > { %v3639_v10 = vadd.f32 %v3595_v27, %v3350_v12  ;;  %7976 = vmatmul.msk.f32.gmra.mxu1 %vm2787_vm2, %v5044_v24 }
 0x502   : > { %8049 = vmatmul.msk.f32.gmra.mxu3 %vm2787_vm2, %v4769_v15  ;;  %8083 = vmatmul.msk.f32.gmra.mxu0 %vm2787_vm2, %v13489_v21 }
 0x503   : > { %v10944_v62 = vadd.f32 %v3873_v20, %v3639_v10  ;;  %8017 = vmatmul.msk.f32.gmra.mxu2 %vm2787_vm2, %v13491_v17  ;;  %v13496_v20 = vld [vmem:[#allocation176_spill] sm:$0xff]  ;;  %v13497_v10 = vld [vmem:[#allocation17_spill] sm:$0xff] }
 0x504   : > { %v5047_v17 = vld [vmem:[#allocation3 + $0xb2] sm:$0xff] }
 0x505   : > { %13490 = vst [vmem:[#allocation142_spill] sm:$0xff] %v10944_v62  ;;  %v3876_v47 = vpop.f32.mrf.mxu3 }
 0x506   : > { %v3352_v30 = vpop.f32.mrf.mxu1  ;;  %v10948_v19 = vpop.f32.mrf.mxu2 }
 0x507   : > { %v3353_v1 = vadd.f32 %v3352_v30, %v13492_v37  ;;  %v10951_v27 = vpop.f32.mrf.mxu0  ;;  %v13499_v30 = vld [vmem:[#allocation147_spill] sm:$0xff] }
 0x508   : > { %13493 = vst [vmem:[#allocation92_spill] sm:$0xff] %v10951_v27 }
 0x509   : > { %v3640_v59 = vadd.f32 %v3598_v32, %v3353_v1  ;;  %7977 = vmatmul.msk.f32.gmra.mxu1 %vm2787_vm2, %v4212_v40 }
 0x50a   : > { %8050 = vmatmul.msk.f32.gmra.mxu3 %vm2787_vm2, %v13494_v36  ;;  %8084 = vmatmul.msk.f32.gmra.mxu0 %vm2787_vm2, %v5046_v57 }
 0x50b   : > { %v10957_v24 = vadd.f32 %v3876_v47, %v3640_v59  ;;  %8018 = vmatmul.msk.f32.gmra.mxu2 %vm2787_vm2, %v13496_v20  ;;  %v13501_v59 = vld [vmem:[#allocation91_spill] sm:$0xff]  ;;  %v4772_v20 = vld [vmem:[#allocation3 + $0xd9] sm:$0xff] }
 0x50d   : > { %13495 = vst [vmem:[#allocation150_spill] sm:$0xff] %v10957_v24  ;;  %v3879_v33 = vpop.f32.mrf.mxu3 }
 0x50e   : > { %v3355_v39 = vpop.f32.mrf.mxu1  ;;  %v10961_v12 = vpop.f32.mrf.mxu2 }
 0x50f   : > { %v3356_v15 = vadd.f32 %v3355_v39, %v13497_v10  ;;  %v10964_v32 = vpop.f32.mrf.mxu0  ;;  %v5048_v39 = vld [vmem:[#allocation3 + $0xc2] sm:$0xff] }
 0x510   : > { %13498 = vst [vmem:[#allocation166_spill] sm:$0xff] %v10964_v32 }
 0x511   : > { %v3641_v21 = vadd.f32 %v3601_v11, %v3356_v15  ;;  %7978 = vmatmul.msk.f32.gmra.mxu1 %vm2787_vm2, %v5046_v57 }
 0x512   : > { %8051 = vmatmul.msk.f32.gmra.mxu3 %vm2787_vm2, %v13499_v30  ;;  %8085 = vmatmul.msk.f32.gmra.mxu0 %vm2787_vm2, %v5047_v17 }
 0x513   : > { %v10970_v47 = vadd.f32 %v3879_v33, %v3641_v21  ;;  %8019 = vmatmul.msk.f32.gmra.mxu2 %vm2787_vm2, %v10638_v41  ;;  %v13504_v41 = vmov 0.0   ;;  %v13505_v21 = vld [vmem:[#allocation30_spill] sm:$0xff] }
 0x514   : > { %5355 = vst.msk [vmem:[#allocation4 + $0x18] sm:$0xff] %vm5350_vm4, %v13504_v41 }
 0x515   : > { %13500 = vst [vmem:[#allocation34_spill] sm:$0xff] %v10970_v47  ;;  %v3882_v37 = vpop.f32.mrf.mxu3 }
 0x516   : > { %v3358_v1 = vpop.f32.mrf.mxu1  ;;  %v10974_v40 = vpop.f32.mrf.mxu2  ;;  %5356 = vst.msk [vmem:[#allocation4 + $0x20] sm:$0xff] %vm5350_vm4, %v13504_v41 }
 0x517   : > { %v3359_v36 = vadd.f32 %v3358_v1, %v13501_v59  ;;  %v10977_v11 = vpop.f32.mrf.mxu0  ;;  %5351 = vst.msk [vmem:[#allocation4] sm:$0xff] %vm5350_vm4, %v13504_v41  ;;  %v5049_v1 = vld [vmem:[#allocation3 + $0xca] sm:$0xff] }
 0x518   : > { %13502 = vst [vmem:[#allocation109_spill] sm:$0xff] %v10977_v11 }
 0x519   : > { %v3642_v57 = vadd.f32 %v3604_v25, %v3359_v36  ;;  %7979 = vmatmul.msk.f32.gmra.mxu1 %vm2787_vm2, %v5047_v17  ;;  %5352 = vst.msk [vmem:[#allocation4 + $0x8] sm:$0xff] %vm5350_vm4, %v13504_v41 }
 0x51a   : > { %8052 = vmatmul.msk.f32.gmra.mxu3 %vm2787_vm2, %v4772_v20  ;;  %8086 = vmatmul.msk.f32.gmra.mxu0 %vm2787_vm2, %v5048_v39  ;;  %5358 = vst.msk [vmem:[#allocation4 + $0x30] sm:$0xff] %vm5350_vm4, %v13504_v41  ;;  %v13508_v20 = vld [vmem:[#allocation28_spill] sm:$0xff] }
 0x51b   : > { %v10982_v33 = vadd.f32 %v3882_v37, %v3642_v57  ;;  %8020 = vmatmul.msk.f32.gmra.mxu2 %vm2787_vm2, %v10653_v18  ;;  %5359 = vst.msk [vmem:[#allocation4 + $0x38] sm:$0xff] %vm5350_vm4, %v13504_v41  ;;  %v4773_v37 = vld [vmem:[#allocation3 + $0xe1] sm:$0xff] }
 0x51c   : > { %5361 = vst.msk [vmem:[#allocation4 + $0x48] sm:$0xff] %vm5350_vm4, %v13504_v41 }
 0x51d   : > { %13503 = vst [vmem:[#allocation171_spill] sm:$0xff] %v10982_v33  ;;  %v3885_v25 = vpop.f32.mrf.mxu3 }
 0x51e   : > { %v3361_v10 = vpop.f32.mrf.mxu1  ;;  %v10992_v15 = vpop.f32.mrf.mxu2  ;;  %5362 = vst.msk [vmem:[#allocation4 + $0x50] sm:$0xff] %vm5350_vm4, %v13504_v41 }
 0x51f   : > { %v3362_v17 = vadd.f32 %v3361_v10, %v13505_v21  ;;  %v10997_v30 = vpop.f32.mrf.mxu0  ;;  %5364 = vst.msk [vmem:[#allocation4 + $0x60] sm:$0xff] %vm5350_vm4, %v13504_v41  ;;  %v4774_v10 = vld [vmem:[#allocation3 + $0xf1] sm:$0xff]  ;;  %v5050_v21 = vld [vmem:[#allocation3 + $0xda] sm:$0xff] }
 0x520   : > { %13506 = vst [vmem:[#allocation33_spill] sm:$0xff] %v10997_v30 }
 0x521   : > { %v3643_v18 = vadd.f32 %v3607_v29, %v3362_v17  ;;  %7980 = vmatmul.msk.f32.gmra.mxu1 %vm2787_vm2, %v5048_v39  ;;  %5365 = vst.msk [vmem:[#allocation4 + $0x68] sm:$0xff] %vm5350_vm4, %v13504_v41 }
 0x522   : > { %8053 = vmatmul.msk.f32.gmra.mxu3 %vm2787_vm2, %v4773_v37  ;;  %8087 = vmatmul.msk.f32.gmra.mxu0 %vm2787_vm2, %v5049_v1  ;;  %5367 = vst.msk [vmem:[#allocation4 + $0x78] sm:$0xff] %vm5350_vm4, %v13504_v41 }
 0x523   : > { %v11010_v59 = vadd.f32 %v3885_v25, %v3643_v18  ;;  %8021 = vmatmul.msk.f32.gmra.mxu2 %vm2787_vm2, %v10668_v31  ;;  %5368 = vst.msk [vmem:[#allocation4 + $0x80] sm:$0xff] %vm5350_vm4, %v13504_v41  ;;  %v13512_v18 = vld [vmem:[#allocation108_spill] sm:$0xff] }
 0x524   : > { %5370 = vst.msk [vmem:[#allocation4 + $0x90] sm:$0xff] %vm5350_vm4, %v13504_v41 }
 0x525   : > { %13507 = vst [vmem:[#allocation84_spill] sm:$0xff] %v11010_v59  ;;  %v3888_v29 = vpop.f32.mrf.mxu3  ;;  %v13517_v59 = vld [vmem:[#allocation148_spill] sm:$0xff] }
 0x526   : > { %v3364_v36 = vpop.f32.mrf.mxu1  ;;  %v11020_v57 = vpop.f32.mrf.mxu2  ;;  %5371 = vst.msk [vmem:[#allocation4 + $0x98] sm:$0xff] %vm5350_vm4, %v13504_v41 }
 0x527   : > { %v3365_v39 = vadd.f32 %v3364_v36, %v13508_v20  ;;  %v11025_v25 = vpop.f32.mrf.mxu0  ;;  %5373 = vst.msk [vmem:[#allocation4 + $0xa8] sm:$0xff] %vm5350_vm4, %v13504_v41 }
 0x528   : > { %13509 = vst [vmem:[#allocation98_spill] sm:$0xff] %v11025_v25  ;;  %v13516_v25 = vld [vmem:[#allocation71_spill] sm:$0xff] }
 0x529   : > { %v3644_v31 = vadd.f32 %v10948_v19, %v3365_v39  ;;  %7981 = vmatmul.msk.f32.gmra.mxu1 %vm2787_vm2, %v5049_v1  ;;  %5374 = vst.msk [vmem:[#allocation4 + $0xb0] sm:$0xff] %vm5350_vm4, %v13504_v41  ;;  %v13511_v19 = vld [vmem:[#allocation8_spill] sm:$0xff]  ;;  %v4775_v39 = vld [vmem:[#allocation3 + $0xf9] sm:$0xff]  ;;  %v4171_v30 = vadd.f32 %v13517_v59, %v13516_v25 }
 0x52a   : > { %8054 = vmatmul.msk.f32.gmra.mxu3 %vm2787_vm2, %v4774_v10  ;;  %8088 = vmatmul.msk.f32.gmra.mxu0 %vm2787_vm2, %v5050_v21  ;;  %5376 = vst.msk [vmem:[#allocation4 + $0xc0] sm:$0xff] %vm5350_vm4, %v13504_v41  ;;  %v4169_v37 = vadd.f32 %v13512_v18, %v13511_v19  ;;  %v13515_v19 = vld [vmem:[#allocation62_spill] sm:$0xff]  ;;  %v4777_v59 = vld [vmem:[#allocation3 + $0x111] sm:$0xff] }
 0x52b   : > { %v11039_v17 = vadd.f32 %v3888_v29, %v3644_v31  ;;  %8022 = vmatmul.msk.f32.gmra.mxu2 %vm2787_vm2, %v10691_v8  ;;  %5377 = vst.msk [vmem:[#allocation4 + $0xc8] sm:$0xff] %vm5350_vm4, %v13504_v41  ;;  %v5051_v31 = vld [vmem:[#allocation3 + $0xe2] sm:$0xff]  ;;  %v5053_v25 = vld [vmem:[#allocation3 + $0xfa] sm:$0xff] }
 0x52c   : > { %5379 = vst.msk [vmem:[#allocation4 + $0xd8] sm:$0xff] %vm5350_vm4, %v13504_v41 }
 0x52d   : > { %13510 = vst [vmem:[#allocation149_spill] sm:$0xff] %v11039_v17  ;;  %v4908_v1 = vpop.f32.mrf.mxu3 }
 0x52e   : > { %v4351_v36 = vpop.f32.mrf.mxu1  ;;  %v11051_v20 = vpop.f32.mrf.mxu2  ;;  %5380 = vst.msk [vmem:[#allocation4 + $0xe0] sm:$0xff] %vm5350_vm4, %v13504_v41 }
 0x52f   : > { %v11055_v8 = vpop.f32.mrf.mxu0  ;;  %v4447_v29 = vadd.f32 %v4351_v36, %v4169_v37  ;;  %5382 = vst.msk [vmem:[#allocation4 + $0xf0] sm:$0xff] %vm5350_vm4, %v13504_v41 }
 0x530   : > { %13513 = vst [vmem:[#allocation27_spill] sm:$0xff] %v11055_v8 }
 0x531   : > { %5383 = vst.msk [vmem:[#allocation4 + $0xf8] sm:$0xff] %vm5350_vm4, %v13504_v41  ;;  %7982 = vmatmul.msk.f32.gmra.mxu1 %vm2787_vm2, %v5050_v21  ;;  %v4726_v10 = vadd.f32 %v10961_v12, %v4447_v29  ;;  %v13514_v21 = vld [vmem:[#allocation124_spill] sm:$0xff]  ;;  %v11082_v29 = vld [vmem:[%s12967_s4] ss:$0 sm:$0xff] }
 0x532   : > { %5385 = vst.msk [vmem:[#allocation4 + $0x108] sm:$0xff] %vm5350_vm4, %v13504_v41  ;;  %8055 = vmatmul.msk.f32.gmra.mxu3 %vm2787_vm2, %v4775_v39  ;;  %8089 = vmatmul.msk.f32.gmra.mxu0 %vm2787_vm2, %v5051_v31  ;;  %v4170_v18 = vadd.f32 %v13515_v19, %v13514_v21 }
 0x533   : > { %5386 = vst.msk [vmem:[#allocation4 + $0x110] sm:$0xff] %vm5350_vm4, %v13504_v41  ;;  %8023 = vmatmul.msk.f32.gmra.mxu2 %vm2787_vm2, %v10708_v5  ;;  %v5004_v36 = vadd.f32 %v4908_v1, %v4726_v10  ;;  %v4776_v1 = vld [vmem:[#allocation3 + $0x109] sm:$0xff]  ;;  %v5052_v10 = vld [vmem:[#allocation3 + $0xf2] sm:$0xff] }
 0x534   : > { %5388 = vst.msk [vmem:[#allocation4 + $0x120] sm:$0xff] %vm5350_vm4, %v13504_v41 }
 0x535   : > { %5389 = vst.msk [vmem:[#allocation4 + $0x128] sm:$0xff] %vm5350_vm4, %v13504_v41  ;;  %v4911_v12 = vpop.f32.mrf.mxu3 }
 0x536   : > { %5391 = vst.msk [vmem:[#allocation4 + $0x138] sm:$0xff] %vm5350_vm4, %v13504_v41  ;;  %v4354_v37 = vpop.f32.mrf.mxu1  ;;  %v11086_v5 = vpop.f32.mrf.mxu2 }
 0x537   : > { %5392 = vst.msk [vmem:[#allocation4 + $0x140] sm:$0xff] %vm5350_vm4, %v13504_v41  ;;  %v4448_v39 = vadd.f32 %v4354_v37, %v4170_v18  ;;  %v5186_v8 = vpop.f32.mrf.mxu0  ;;  %v5539_v18 = vld [vmem:[#allocation4 + $0x1] sm:$0xff] }
 0x538   : > { %5394 = vst.msk [vmem:[#allocation4 + $0x150] sm:$0xff] %vm5350_vm4, %v13504_v41  ;;  %v5282_v21 = vadd.f32 %v5186_v8, %v5004_v36  ;;  %v11104_v8 = vld [vmem:[%s12968_s5] ss:$0 sm:$0xff] }
 0x539   : > { %5395 = vst.msk [vmem:[#allocation4 + $0x158] sm:$0xff] %vm5350_vm4, %v13504_v41  ;;  %7983 = vmatmul.msk.f32.gmra.mxu1 %vm2787_vm2, %v5051_v31  ;;  %v4727_v19 = vadd.f32 %v10974_v40, %v4448_v39  ;;  %v11109_v31 = vld [vmem:[%s12968_s5 + $0x1] ss:$0 sm:$0xff] }
 0x53a   : > { %5397 = vst.msk [vmem:[#allocation4 + $0x168] sm:$0xff] %vm5350_vm4, %v13504_v41  ;;  %v5318_v17 = vadd.f32 %v11082_v29, %v5282_v21  ;;  %8056 = vmatmul.msk.f32.gmra.mxu3 %vm2787_vm2, %v4776_v1  ;;  %8090 = vmatmul.msk.f32.gmra.mxu0 %vm2787_vm2, %v5052_v10  ;;  %v5439_v40 = vld [vmem:[#allocation4] sm:$0xff] }
 0x53b   : > { %5398 = vst.msk [vmem:[#allocation4 + $0x170] sm:$0xff] %vm5350_vm4, %v13504_v41  ;;  %8024 = vmatmul.msk.f32.gmra.mxu2 %vm2787_vm2, %v10723_v56  ;;  %v5005_v39 = vadd.f32 %v4911_v12, %v4727_v19  ;;  %v5475_v1 = vmul.f32 %v11104_v8, %v5439_v40  ;;  %v5576_v56 = vmul.f32 %v11109_v31, %v5539_v18  ;;  %v11133_v12 = vld [vmem:[%s12968_s5 + $0x2] ss:$0 sm:$0xff] }
 0x53c   : > { %5400 = vst.msk [vmem:[#allocation4 + $0x180] sm:$0xff] %vm5350_vm4, %v13504_v41 }
 0x53d   : > { %5407 = vst.msk [vmem:[#allocation4 + $0x19] sm:$0xff] %vm5350_vm4, %v5318_v17  ;;  %v4914_v37 = vpop.f32.mrf.mxu3  ;;  %v5608_v18 = vadd.f32 %v5576_v56, %v5475_v1  ;;  %v13518_v1 = vld [vmem:[#allocation31_spill] sm:$0xff] }
 0x53e   : > { %5401 = vst.msk [vmem:[#allocation4 + $0x188] sm:$0xff] %vm5350_vm4, %v13504_v41  ;;  %v4357_v36 = vpop.f32.mrf.mxu1  ;;  %v11120_v21 = vpop.f32.mrf.mxu2  ;;  %v13519_v56 = vld [vmem:[#allocation115_spill] sm:$0xff] }
 0x53f   : > { %5403 = vst.msk [vmem:[#allocation4 + $0x198] sm:$0xff] %vm5350_vm4, %v13504_v41  ;;  %v5189_v17 = vpop.f32.mrf.mxu0  ;;  %v4449_v19 = vadd.f32 %v4357_v36, %v4171_v30  ;;  %v11146_v30 = vld [vmem:[%s12968_s5 + $0x3] ss:$0 sm:$0xff] }
 0x540   : > { %5404 = vst.msk [vmem:[#allocation4 + $0x1a0] sm:$0xff] %vm5350_vm4, %v13504_v41  ;;  %v5283_v33 = vadd.f32 %v5189_v17, %v5005_v39  ;;  %v5440_v39 = vld [vmem:[#allocation4 + $0x8] sm:$0xff]  ;;  %v4172_v17 = vadd.f32 %v13519_v56, %v13518_v1 }
 0x541   : > { %5357 = vst.msk [vmem:[#allocation4 + $0x28] sm:$0x3] %vm5353_vm5, %v13504_v41  ;;  %7984 = vmatmul.msk.f32.gmra.mxu1 %vm2787_vm2, %v5052_v10 }
 0x542   : > { %5354 = vst.msk [vmem:[#allocation4 + $0x10] sm:$0x3] %vm5353_vm5, %v13504_v41  ;;  %v5319_v40 = vadd.f32 %v11082_v29, %v5283_v33  ;;  %8057 = vmatmul.msk.f32.gmra.mxu3 %vm2787_vm2, %v4777_v59  ;;  %8091 = vmatmul.msk.f32.gmra.mxu0 %vm2787_vm2, %v5053_v25  ;;  %v4728_v59 = vadd.f32 %v10992_v15, %v4449_v19 }
 0x543   : > { %5360 = vst.msk [vmem:[#allocation4 + $0x40] sm:$0x3] %vm5353_vm5, %v13504_v41  ;;  %8025 = vmatmul.msk.f32.gmra.mxu2 %vm2787_vm2, %v10737_v55  ;;  %v5476_v15 = vmul.f32 %v11104_v8, %v5440_v39 }
 0x544   : > { %5363 = vst.msk [vmem:[#allocation4 + $0x58] sm:$0x3] %vm5353_vm5, %v13504_v41  ;;  %v11152_v33 = vld [vmem:[#allocation4 + $0x18] sm:$0xff]  ;;  %v5006_v27 = vadd.f32 %v4914_v37, %v4728_v59 }
 0x545   : > { %v11154_v10 = vld [vmem:[#allocation4 + $0x19] sm:$0xff]  ;;  %5408 = vst.msk [vmem:[#allocation4 + $0x21] sm:$0xff] %vm5350_vm4, %v5319_v40  ;;  %v5677_v36 = vmul.f32 %v11133_v12, %v11152_v33  ;;  %v4917_v11 = vpop.f32.mrf.mxu3 }
 0x546   : > { %5366 = vst.msk [vmem:[#allocation4 + $0x70] sm:$0x3] %vm5353_vm5, %v13504_v41  ;;  %v4360_v55 = vpop.f32.mrf.mxu1  ;;  %v11166_v47 = vpop.f32.mrf.mxu2  ;;  %v5778_v32 = vmul.f32 %v11146_v30, %v11154_v10 }
 0x547   : > { %5369 = vst.msk [vmem:[#allocation4 + $0x88] sm:$0x3] %vm5353_vm5, %v13504_v41  ;;  %v5709_v40 = vadd.f32 %v5677_v36, %v5608_v18  ;;  %v4450_v1 = vadd.f32 %v4360_v55, %v4172_v17  ;;  %v5192_v56 = vpop.f32.mrf.mxu0  ;;  %v4778_v18 = vld [vmem:[#allocation3 + $0x121] sm:$0xff]  ;;  %v5054_v36 = vld [vmem:[#allocation3 + $0x10a] sm:$0xff]  ;;  %v4173_v55 = vadd.f32 %v10686_v38, %v10682_v49 }
 0x548   : > { %5372 = vst.msk [vmem:[#allocation4 + $0xa0] sm:$0x3] %vm5353_vm5, %v13504_v41  ;;  %v4504_v17 = vld [vmem:[#allocation3 + $0x150] sm:$0xff]  ;;  %v5284_v37 = vadd.f32 %v5192_v56, %v5006_v27 }
 0x549   : > { %5375 = vst.msk [vmem:[#allocation4 + $0xb8] sm:$0x3] %vm5353_vm5, %v13504_v41  ;;  %v5810_v19 = vadd.f32 %v5778_v32, %v5709_v40  ;;  %v5540_v24 = vld [vmem:[#allocation4 + $0x9] sm:$0xff]  ;;  %7985 = vmatmul.msk.f32.gmra.mxu1 %vm2787_vm2, %v5053_v25  ;;  %v4729_v39 = vadd.f32 %v11020_v57, %v4450_v1 }
 0x54a   : > { %5378 = vst.msk [vmem:[#allocation4 + $0xd0] sm:$0x3] %vm5353_vm5, %v13504_v41  ;;  %v5577_v62 = vmul.f32 %v11109_v31, %v5540_v24  ;;  %8058 = vmatmul.msk.f32.gmra.mxu3 %vm2787_vm2, %v4778_v18  ;;  %8092 = vmatmul.msk.f32.gmra.mxu0 %vm2787_vm2, %v5054_v36 }
 0x54b   : > { %5381 = vst.msk [vmem:[#allocation4 + $0xe8] sm:$0x3] %vm5353_vm5, %v13504_v41  ;;  %v5842_v32 = vsel %vm5350_vm4, %v5810_v19, 0.0  ;;  %8026 = vmatmul.msk.f32.gmra.mxu2 %vm2787_vm2, %v4504_v17  ;;  %v5007_v1 = vadd.f32 %v4917_v11, %v4729_v39  ;;  %v5320_v19 = vadd.f32 %v11082_v29, %v5284_v37  ;;  %v4779_v11 = vld [vmem:[#allocation3 + $0x129] sm:$0xff]  ;;  %v5055_v39 = vld [vmem:[#allocation3 + $0x112] sm:$0xff] }
 0x54c   : > { %5384 = vst.msk [vmem:[#allocation4 + $0x100] sm:$0x3] %vm5353_vm5, %v13504_v41  ;;  %5843 = vadd.xlane.f32.xlu0 %v5842_v32  ;;  %v5609_v24 = vadd.f32 %v5577_v62, %v5476_v15  ;;  %v5641_v25 = vld [vmem:[#allocation4 + $0x20] sm:$0xff] }
 0x54d   : > { %v5742_v59 = vld [vmem:[#allocation4 + $0x21] sm:$0xff]  ;;  %5387 = vst.msk [vmem:[#allocation4 + $0x118] sm:$0x3] %vm5353_vm5, %v13504_v41  ;;  %v5678_v57 = vmul.f32 %v11133_v12, %v5641_v25  ;;  %v4920_v40 = vpop.f32.mrf.mxu3 }
 0x54e   : > { %5390 = vst.msk [vmem:[#allocation4 + $0x130] sm:$0x3] %vm5353_vm5, %v13504_v41  ;;  %v4363_v27 = vpop.f32.mrf.mxu1  ;;  %v11197_v62 = vpop.f32.mrf.mxu2  ;;  %v5779_v15 = vmul.f32 %v11146_v30, %v5742_v59 }
 0x54f   : > { %5393 = vst.msk [vmem:[#allocation4 + $0x148] sm:$0x3] %vm5353_vm5, %v13504_v41  ;;  %v5710_v56 = vadd.f32 %v5678_v57, %v5609_v24  ;;  %v4451_v38 = vadd.f32 %v4363_v27, %v4173_v55  ;;  %v5195_v49 = vpop.f32.mrf.mxu0  ;;  %v4505_v57 = vld [vmem:[#allocation3 + $0x158] sm:$0xff] }
 0x550   : > { %5396 = vst.msk [vmem:[#allocation4 + $0x160] sm:$0x3] %vm5353_vm5, %v13504_v41  ;;  %v5285_v18 = vadd.f32 %v5195_v49, %v5007_v1  ;;  %v5477_v49 = vmul.f32 %v11104_v8, %v11152_v33 }
 0x551   : > { %5399 = vst.msk [vmem:[#allocation4 + $0x178] sm:$0x3] %vm5353_vm5, %v13504_v41  ;;  %v5811_v32 = vadd.f32 %v5779_v15, %v5710_v56  ;;  %7986 = vmatmul.msk.f32.gmra.mxu1 %vm2787_vm2, %v5054_v36  ;;  %v4730_v17 = vadd.f32 %v11051_v20, %v4451_v38  ;;  %v13520_v36 = vld [vmem:[#allocation164_spill] sm:$0xff] }
 0x552   : > { %5402 = vst.msk [vmem:[#allocation4 + $0x190] sm:$0x3] %vm5353_vm5, %v13504_v41  ;;  %v5321_v37 = vadd.f32 %v11082_v29, %v5285_v18  ;;  %8059 = vmatmul.msk.f32.gmra.mxu3 %vm2787_vm2, %v4779_v11  ;;  %8093 = vmatmul.msk.f32.gmra.mxu0 %vm2787_vm2, %v5055_v39  ;;  %v5056_v11 = vld [vmem:[#allocation3 + $0x122] sm:$0xff] }
 0x553   : > { %5405 = vst.msk [vmem:[#allocation4 + $0x1a8] sm:$0x3] %vm5353_vm5, %v13504_v41  ;;  %v5845_v24 = vsel %vm5350_vm4, %v5811_v32, 0.0  ;;  %8027 = vmatmul.msk.f32.gmra.mxu2 %vm2787_vm2, %v4505_v57  ;;  %v13521_v41 = vld [vmem:[#allocation29_spill] sm:$0xff]  ;;  %v5008_v1 = vadd.f32 %v4920_v40, %v4730_v17 }
 0x554   : > { %5409 = vst.msk [vmem:[#allocation4 + $0x31] sm:$0xff] %vm5350_vm4, %v5320_v19  ;;  %5846 = vadd.xlane.f32.xlu1 %v5845_v24  ;;  %v4174_v55 = vadd.f32 %v13521_v41, %v13520_v36  ;;  %v5578_v19 = vmul.f32 %v11109_v31, %v11154_v10  ;;  %v4780_v32 = vld [vmem:[#allocation3 + $0x139] sm:$0xff]  ;;  %v5579_v24 = vmul.f32 %v11109_v31, %v5742_v59  ;;  %v4506_v10 = vld [vmem:[#allocation3 + $0x168] sm:$0xff] }
 0x555   : > { %5410 = vst.msk [vmem:[#allocation4 + $0x39] sm:$0xff] %vm5350_vm4, %v5321_v37  ;;  %v4923_v20 = vpop.f32.mrf.mxu3  ;;  %v5478_v37 = vmul.f32 %v11104_v8, %v5641_v25  ;;  %v13522_v59 = vld [vmem:[#allocation61_spill] sm:$0xff] }
 0x556   : > { %v4366_v27 = vpop.f32.mrf.mxu1  ;;  %v11220_v56 = vpop.f32.mrf.mxu2  ;;  %v5610_v36 = vadd.f32 %v5578_v19, %v5477_v49  ;;  %v11243_v49 = vld [vmem:[%s12968_s5 + $0x8] ss:$0 sm:$0xff] }
 0x557   : > { %v4452_v15 = vadd.f32 %v4366_v27, %v4174_v55  ;;  %v5198_v38 = vpop.f32.mrf.mxu0  ;;  %v13523_v55 = vld [vmem:[#allocation96_spill] sm:$0xff] }
 0x558   : > { %v5286_v18 = vadd.f32 %v5198_v38, %v5008_v1  ;;  %v4175_v27 = vadd.f32 %v13523_v55, %v13522_v59  ;;  %v11250_v59 = vld [vmem:[%s12968_s5 + $0x9] ss:$0 sm:$0xff] }
 0x559   : > { %7987 = vmatmul.msk.f32.gmra.mxu1 %vm2787_vm2, %v5055_v39  ;;  %v4731_v40 = vadd.f32 %v11086_v5, %v4452_v15  ;;  %v6576_v5 = vld [vmem:[#allocation4 + $0x20] sm:$0xff] }
 0x55a   : > { %v5322_v17 = vadd.f32 %v11082_v29, %v5286_v18  ;;  %8060 = vmatmul.msk.f32.gmra.mxu3 %vm2787_vm2, %v4780_v32  ;;  %8094 = vmatmul.msk.f32.gmra.mxu0 %vm2787_vm2, %v5056_v11  ;;  %v5611_v18 = vadd.f32 %v5579_v24, %v5478_v37  ;;  %v6009_v32 = vld [vmem:[#allocation4 + $0x21] sm:$0xff]  ;;  %v6613_v24 = vmul.f32 %v11243_v49, %v6576_v5 }
 0x55b   : > { %v5642_v33 = vld [vmem:[#allocation4 + $0x30] sm:$0xff]  ;;  %8028 = vmatmul.msk.f32.gmra.mxu2 %vm2787_vm2, %v4506_v10  ;;  %v5009_v10 = vadd.f32 %v4923_v20, %v4731_v40  ;;  %v6714_v20 = vmul.f32 %v11250_v59, %v6009_v32  ;;  %v4507_v5 = vld [vmem:[#allocation3 + $0x170] sm:$0xff] }
 0x55c   : > { %v5743_v57 = vld [vmem:[#allocation4 + $0x31] sm:$0xff]  ;;  %v5679_v39 = vmul.f32 %v11133_v12, %v5642_v33  ;;  %5411 = vst.msk [vmem:[#allocation4 + $0x49] sm:$0xff] %vm5350_vm4, %v5322_v17  ;;  %v5744_v46 = vld [vmem:[#allocation4 + $0x39] sm:$0xff]  ;;  %v5479_v61 = vmul.f32 %v11104_v8, %v5642_v33 }
 0x55d   : > { %v5643_v41 = vld [vmem:[#allocation4 + $0x38] sm:$0xff]  ;;  %v5780_v15 = vmul.f32 %v11146_v30, %v5743_v57  ;;  %v4926_v38 = vpop.f32.mrf.mxu3  ;;  %v5580_v43 = vmul.f32 %v11109_v31, %v5743_v57 }
 0x55e   : > { %v5680_v25 = vmul.f32 %v11133_v12, %v5643_v41  ;;  %v5711_v1 = vadd.f32 %v5679_v39, %v5610_v36  ;;  %v4369_v19 = vpop.f32.mrf.mxu1  ;;  %v11245_v17 = vpop.f32.mrf.mxu2  ;;  %v6779_v40 = vld [vmem:[#allocation4 + $0x38] sm:$0xff]  ;;  %v5480_v58 = vmul.f32 %v11104_v8, %v5643_v41 }
 0x55f   : > { %v4453_v39 = vadd.f32 %v4369_v19, %v4175_v27  ;;  %v5201_v55 = vpop.f32.mrf.mxu0  ;;  %v5781_v27 = vmul.f32 %v11146_v30, %v5744_v46  ;;  %v5057_v57 = vld [vmem:[#allocation3 + $0x12a] sm:$0xff]  ;;  %v5612_v19 = vadd.f32 %v5580_v43, %v5479_v61 }
 0x560   : > { %v5812_v36 = vadd.f32 %v5780_v15, %v5711_v1  ;;  %v5712_v37 = vadd.f32 %v5680_v25, %v5611_v18  ;;  %v5287_v6 = vadd.f32 %v5201_v55, %v5009_v10  ;;  %v4781_v1 = vld [vmem:[#allocation3 + $0x141] sm:$0xff]  ;;  %v11263_v25 = vld [vmem:[%s12968_s5 + $0xa] ss:$0 sm:$0xff]  ;;  %v6211_v18 = vld [vmem:[#allocation4 + $0x39] sm:$0xff] }
 0x561   : > { %v4732_v53 = vadd.f32 %v11120_v21, %v4453_v39  ;;  %7988 = vmatmul.msk.f32.gmra.mxu1 %vm2787_vm2, %v5056_v11  ;;  %v6816_v32 = vmul.f32 %v11263_v25, %v6779_v40  ;;  %v11275_v10 = vld [vmem:[%s12968_s5 + $0xb] ss:$0 sm:$0xff] }
 0x562   : > { %v5848_v51 = vsel %vm5350_vm4, %v5812_v36, 0.0  ;;  %v5323_v33 = vadd.f32 %v11082_v29, %v5287_v6  ;;  %8061 = vmatmul.msk.f32.gmra.mxu3 %vm2787_vm2, %v4781_v1  ;;  %8095 = vmatmul.msk.f32.gmra.mxu0 %vm2787_vm2, %v5057_v57  ;;  %v5813_v21 = vadd.f32 %v5781_v27, %v5712_v37  ;;  %v6746_v6 = vadd.f32 %v6714_v20, %v6613_v24  ;;  %v13524_v36 = vld [vmem:[#allocation155_spill] sm:$0xff]  ;;  %v13525_v39 = vld [vmem:[#allocation45_spill] sm:$0xff] }
 0x563   : > { %5849 = vadd.xlane.f32.xlu2 %v5848_v51  ;;  %8029 = vmatmul.msk.f32.gmra.mxu2 %vm2787_vm2, %v4507_v5  ;;  %v5644_v11 = vld [vmem:[#allocation4 + $0x48] sm:$0xff]  ;;  %v4176_v55 = vadd.f32 %v13525_v39, %v13524_v36  ;;  %v5010_v1 = vadd.f32 %v4926_v38, %v4732_v53  ;;  %v6917_v61 = vmul.f32 %v11275_v10, %v6211_v18  ;;  %v6010_v53 = vld [vmem:[#allocation4 + $0x31] sm:$0xff] }
 0x564   : > { %v5745_v15 = vld [vmem:[#allocation4 + $0x49] sm:$0xff]  ;;  %5412 = vst.msk [vmem:[#allocation4 + $0x51] sm:$0xff] %vm5350_vm4, %v5323_v33  ;;  %v5681_v51 = vmul.f32 %v11133_v12, %v5644_v11  ;;  %v6848_v43 = vadd.f32 %v6816_v32, %v6746_v6  ;;  %v5851_v24 = vsel %vm5350_vm4, %v5813_v21, 0.0  ;;  %v5581_v36 = vmul.f32 %v11109_v31, %v5744_v46 }
 0x565   : > { %v4929_v37 = vpop.f32.mrf.mxu3  ;;  %v5782_v33 = vmul.f32 %v11146_v30, %v5745_v15  ;;  %v6577_v39 = vld [vmem:[#allocation4 + $0x30] sm:$0xff]  ;;  %v6579_v41 = vld [vmem:[#allocation4 + $0x48] sm:$0xff] }
 0x566   : > { %v4372_v27 = vpop.f32.mrf.mxu1  ;;  %v11279_v5 = vpop.f32.mrf.mxu2  ;;  %v5713_v40 = vadd.f32 %v5681_v51, %v5612_v19  ;;  %v11286_v38 = vadd.f32 %v6917_v61, %v6848_v43  ;;  %v4782_v19 = vld [vmem:[#allocation3 + $0x151] sm:$0xff]  ;;  %v5058_v32 = vld [vmem:[#allocation3 + $0x13a] sm:$0xff] }
 0x567   : > { %v4454_v20 = vadd.f32 %v4372_v27, %v4176_v55  ;;  %v5204_v52 = vpop.f32.mrf.mxu0  ;;  %v4508_v46 = vld [vmem:[#allocation3 + $0x180] sm:$0xff]  ;;  %v6715_v55 = vmul.f32 %v11250_v59, %v6010_v53 }
 0x568   : > { %v5288_v22 = vadd.f32 %v5204_v52, %v5010_v1  ;;  %v5814_v63 = vadd.f32 %v5782_v33, %v5713_v40  ;;  %13526 = vst [vmem:[#allocation120_spill] sm:$0xff] %v11286_v38  ;;  %v13527_v1 = vld [vmem:[#allocation113_spill] sm:$0xff]  ;;  %v6817_v33 = vmul.f32 %v11263_v25, %v6579_v41 }
 0x569   : > { %7989 = vmatmul.msk.f32.gmra.mxu1 %vm2787_vm2, %v5057_v57  ;;  %v4733_v18 = vadd.f32 %v11166_v47, %v4454_v20  ;;  %v6614_v57 = vmul.f32 %v11243_v49, %v6577_v39  ;;  %v6012_v39 = vld [vmem:[#allocation4 + $0x49] sm:$0xff] }
 0x56a   : > { %v5324_v21 = vadd.f32 %v11082_v29, %v5288_v22  ;;  %8062 = vmatmul.msk.f32.gmra.mxu3 %vm2787_vm2, %v4782_v19  ;;  %v5854_v52 = vsel %vm5350_vm4, %v5814_v63, 0.0  ;;  %8096 = vmatmul.msk.f32.gmra.mxu0 %vm2787_vm2, %v5058_v32  ;;  %v5613_v22 = vadd.f32 %v5581_v36, %v5480_v58  ;;  %v13528_v63 = vld [vmem:[#allocation177_spill] sm:$0xff] }
 0x56b   : > { %5852 = vadd.xlane.f32.xlu2 %v5851_v24  ;;  %5855 = vadd.xlane.f32.xlu0 %v5854_v52  ;;  %v5645_v51 = vld [vmem:[#allocation4 + $0x50] sm:$0xff]  ;;  %v4177_v27 = vadd.f32 %v13528_v63, %v13527_v1  ;;  %v5011_v61 = vadd.f32 %v4929_v37, %v4733_v18  ;;  %v6747_v52 = vadd.f32 %v6715_v55, %v6614_v57 }
 0x56c   : > { %v5746_v6 = vld [vmem:[#allocation4 + $0x51] sm:$0xff]  ;;  %5413 = vst.msk [vmem:[#allocation4 + $0x61] sm:$0xff] %vm5350_vm4, %v5324_v21  ;;  %8030 = vmatmul.msk.f32.gmra.mxu2 %vm2787_vm2, %v4508_v46  ;;  %v5682_v47 = vmul.f32 %v11133_v12, %v5645_v51  ;;  %v5481_v46 = vmul.f32 %v11104_v8, %v5644_v11  ;;  %v5582_v1 = vmul.f32 %v11109_v31, %v5745_v15  ;;  %v4783_v63 = vld [vmem:[#allocation3 + $0x159] sm:$0xff] }
 0x56d   : > { %v4932_v40 = vpop.f32.mrf.mxu3  ;;  %v5783_v53 = vmul.f32 %v11146_v30, %v5746_v6  ;;  %v6616_v37 = vmul.f32 %v11243_v49, %v6579_v41  ;;  %v6717_v18 = vmul.f32 %v11250_v59, %v6012_v39  ;;  %v5059_v55 = vld [vmem:[#allocation3 + $0x142] sm:$0xff] }
 0x56e   : > { %v4375_v43 = vpop.f32.mrf.mxu1  ;;  %v11302_v24 = vpop.f32.mrf.mxu2  ;;  %v5714_v20 = vadd.f32 %v5682_v47, %v5613_v22  ;;  %v6849_v22 = vadd.f32 %v6817_v33, %v6747_v52  ;;  %v6918_v47 = vmul.f32 %v11275_v10, %v6012_v39  ;;  %v4509_v15 = vld [vmem:[#allocation3 + $0x188] sm:$0xff]  ;;  %v13531_v39 = vld [vmem:[#allocation36_spill] sm:$0xff] }
 0x56f   : > { %v4455_v19 = vadd.f32 %v4375_v43, %v4177_v27  ;;  %v5207_v21 = vpop.f32.mrf.mxu0  ;;  %v6749_v52 = vadd.f32 %v6717_v18, %v6616_v37  ;;  %v5583_v37 = vmul.f32 %v11109_v31, %v5746_v6  ;;  %v4784_v18 = vld [vmem:[#allocation3 + $0x169] sm:$0xff] }
 0x570   : > { %v5289_v58 = vadd.f32 %v5207_v21, %v5011_v61  ;;  %v5815_v36 = vadd.f32 %v5783_v53, %v5714_v20  ;;  %v11316_v43 = vadd.f32 %v6918_v47, %v6849_v22  ;;  %v13530_v53 = vld [vmem:[#allocation38_spill] sm:$0xff] }
 0x571   : > { %7990 = vmatmul.msk.f32.gmra.mxu1 %vm2787_vm2, %v5058_v32  ;;  %v4734_v27 = vadd.f32 %v11197_v62, %v4455_v19  ;;  %v5614_v62 = vadd.f32 %v5582_v1, %v5481_v46  ;;  %v4178_v19 = vadd.f32 %v13531_v39, %v13530_v53  ;;  %v5482_v53 = vmul.f32 %v11104_v8, %v5645_v51  ;;  %v6013_v39 = vld [vmem:[#allocation4 + $0x51] sm:$0xff] }
 0x572   : > { %v5325_v57 = vadd.f32 %v11082_v29, %v5289_v58  ;;  %8063 = vmatmul.msk.f32.gmra.mxu3 %vm2787_vm2, %v4783_v63  ;;  %v5857_v11 = vsel %vm5350_vm4, %v5815_v36, 0.0  ;;  %8097 = vmatmul.msk.f32.gmra.mxu0 %vm2787_vm2, %v5059_v55  ;;  %13529 = vst [vmem:[#allocation22_spill] sm:$0xff] %v11316_v43 }
 0x573   : > { %5858 = vadd.xlane.f32.xlu1 %v5857_v11  ;;  %v5646_v32 = vld [vmem:[#allocation4 + $0x60] sm:$0xff]  ;;  %v5012_v63 = vadd.f32 %v4932_v40, %v4734_v27  ;;  %v5615_v6 = vadd.f32 %v5583_v37, %v5482_v53  ;;  %v6718_v53 = vmul.f32 %v11250_v59, %v6013_v39 }
 0x574   : > { %v5747_v41 = vld [vmem:[#allocation4 + $0x61] sm:$0xff]  ;;  %5414 = vst.msk [vmem:[#allocation4 + $0x69] sm:$0xff] %vm5350_vm4, %v5325_v57  ;;  %8031 = vmatmul.msk.f32.gmra.mxu2 %vm2787_vm2, %v4509_v15  ;;  %v5683_v33 = vmul.f32 %v11133_v12, %v5646_v32 }
 0x575   : > { %v6214_v61 = vld [vmem:[#allocation4 + $0x61] sm:$0xff]  ;;  %v4935_v21 = vpop.f32.mrf.mxu3  ;;  %v5784_v57 = vmul.f32 %v11146_v30, %v5747_v41 }
 0x576   : > { %v6782_v20 = vld [vmem:[#allocation4 + $0x60] sm:$0xff]  ;;  %v4378_v36 = vpop.f32.mrf.mxu1  ;;  %v11324_v22 = vpop.f32.mrf.mxu2  ;;  %v5715_v47 = vadd.f32 %v5683_v33, %v5614_v62  ;;  %v6920_v15 = vmul.f32 %v11275_v10, %v6214_v61 }
 0x577   : > { %v6819_v58 = vmul.f32 %v11263_v25, %v6782_v20  ;;  %v4456_v11 = vadd.f32 %v4378_v36, %v4178_v19  ;;  %v5210_v46 = vpop.f32.mrf.mxu0  ;;  %v5060_v33 = vld [vmem:[#allocation3 + $0x152] sm:$0xff]  ;;  %v6580_v19 = vld [vmem:[#allocation4 + $0x50] sm:$0xff] }
 0x578   : > { %v5290_v43 = vadd.f32 %v5210_v46, %v5012_v63  ;;  %v5816_v38 = vadd.f32 %v5784_v57, %v5715_v47 }
 0x579   : > { %v6851_v1 = vadd.f32 %v6819_v58, %v6749_v52  ;;  %7991 = vmatmul.msk.f32.gmra.mxu1 %vm2787_vm2, %v5059_v55  ;;  %v4735_v27 = vadd.f32 %v11220_v56, %v4456_v11  ;;  %v13532_v56 = vld [vmem:[#allocation86_spill] sm:$0xff]  ;;  %v4510_v58 = vld [vmem:[#allocation3 + $0x198] sm:$0xff] }
 0x57a   : > { %v5326_v62 = vadd.f32 %v11082_v29, %v5290_v43  ;;  %8064 = vmatmul.msk.f32.gmra.mxu3 %vm2787_vm2, %v4784_v18  ;;  %v5860_v61 = vsel %vm5350_vm4, %v5816_v38, 0.0  ;;  %8098 = vmatmul.msk.f32.gmra.mxu0 %vm2787_vm2, %v5060_v33  ;;  %v4179_v43 = vadd.f32 %v13532_v56, %v10762_v28  ;;  %v5483_v18 = vmul.f32 %v11104_v8, %v5646_v32 }
 0x57b   : > { %v11331_v40 = vadd.f32 %v6920_v15, %v6851_v1  ;;  %5861 = vadd.xlane.f32.xlu2 %v5860_v61  ;;  %v5647_v51 = vld [vmem:[#allocation4 + $0x68] sm:$0xff]  ;;  %v5013_v63 = vadd.f32 %v4935_v21, %v4735_v27  ;;  %v6617_v15 = vmul.f32 %v11243_v49, %v6580_v19  ;;  %v5584_v21 = vmul.f32 %v11109_v31, %v5747_v41 }
 0x57c   : > { %v5748_v20 = vld [vmem:[#allocation4 + $0x69] sm:$0xff]  ;;  %5415 = vst.msk [vmem:[#allocation4 + $0x79] sm:$0xff] %vm5350_vm4, %v5326_v62  ;;  %v5684_v55 = vmul.f32 %v11133_v12, %v5647_v51  ;;  %8032 = vmatmul.msk.f32.gmra.mxu2 %vm2787_vm2, %v4510_v58  ;;  %v4785_v27 = vld [vmem:[#allocation3 + $0x171] sm:$0xff] }
 0x57d   : > { %v4938_v52 = vpop.f32.mrf.mxu3  ;;  %v5785_v47 = vmul.f32 %v11146_v30, %v5748_v20  ;;  %v6582_v1 = vld [vmem:[#allocation4 + $0x68] sm:$0xff]  ;;  %v6750_v56 = vadd.f32 %v6718_v53, %v6617_v15 }
 0x57e   : > { %v4381_v36 = vpop.f32.mrf.mxu1  ;;  %v5716_v38 = vadd.f32 %v5684_v55, %v5615_v6  ;;  %v11344_v46 = vpop.f32.mrf.mxu2  ;;  %v5061_v6 = vld [vmem:[#allocation3 + $0x15a] sm:$0xff]  ;;  %v6820_v39 = vmul.f32 %v11263_v25, %v6582_v1 }
 0x57f   : > { %v4457_v57 = vadd.f32 %v4381_v36, %v4179_v43  ;;  %v5213_v11 = vpop.f32.mrf.mxu0  ;;  %v6015_v19 = vld [vmem:[#allocation4 + $0x69] sm:$0xff]  ;;  %v4180_v43 = vadd.f32 %v10777_v42, %v10772_v0  ;;  %v5484_v0 = vmul.f32 %v11104_v8, %v5647_v51  ;;  %v5585_v42 = vmul.f32 %v11109_v31, %v5748_v20 }
 0x580   : > { %v5291_v37 = vadd.f32 %v5213_v11, %v5013_v63  ;;  %v5817_v28 = vadd.f32 %v5785_v47, %v5716_v38  ;;  %v4511_v36 = vld [vmem:[#allocation3 + $0x1a0] sm:$0xff]  ;;  %v6852_v63 = vadd.f32 %v6820_v39, %v6750_v56  ;;  %v6921_v38 = vmul.f32 %v11275_v10, %v6015_v19 }
 0x581   : > { %7992 = vmatmul.msk.f32.gmra.mxu1 %vm2787_vm2, %v5060_v33  ;;  %v4736_v62 = vadd.f32 %v11245_v17, %v4457_v57  ;;  %v5616_v33 = vadd.f32 %v5584_v21, %v5483_v18  ;;  %v6619_v20 = vmul.f32 %v11243_v49, %v6582_v1 }
 0x582   : > { %v5327_v61 = vadd.f32 %v11082_v29, %v5291_v37  ;;  %8065 = vmatmul.msk.f32.gmra.mxu3 %vm2787_vm2, %v4785_v27  ;;  %v5863_v55 = vsel %vm5350_vm4, %v5817_v28, 0.0  ;;  %8099 = vmatmul.msk.f32.gmra.mxu0 %vm2787_vm2, %v5061_v6  ;;  %v11364_v28 = vadd.f32 %v6921_v38, %v6852_v63  ;;  %v4786_v27 = vld [vmem:[#allocation3 + $0x181] sm:$0xff] }
 0x583   : > { %5864 = vadd.xlane.f32.xlu0 %v5863_v55  ;;  %v5648_v32 = vld [vmem:[#allocation4 + $0x78] sm:$0xff]  ;;  %v5014_v57 = vadd.f32 %v4938_v52, %v4736_v62 }
 0x584   : > { %v5749_v41 = vld [vmem:[#allocation4 + $0x79] sm:$0xff]  ;;  %5416 = vst.msk [vmem:[#allocation4 + $0x81] sm:$0xff] %vm5350_vm4, %v5327_v61  ;;  %v5685_v17 = vmul.f32 %v11133_v12, %v5648_v32  ;;  %8033 = vmatmul.msk.f32.gmra.mxu2 %vm2787_vm2, %v4511_v36 }
 0x585   : > { %v4941_v58 = vpop.f32.mrf.mxu3  ;;  %v5786_v37 = vmul.f32 %v11146_v30, %v5749_v41  ;;  %v5062_v55 = vld [vmem:[#allocation3 + $0x16a] sm:$0xff] }
 0x586   : > { %v4384_v47 = vpop.f32.mrf.mxu1  ;;  %v5717_v11 = vadd.f32 %v5685_v17, %v5616_v33  ;;  %v11369_v61 = vpop.f32.mrf.mxu2  ;;  %v5617_v33 = vadd.f32 %v5585_v42, %v5484_v0  ;;  %v4181_v17 = vadd.f32 %v10787_v48, %v10782_v26  ;;  %v5586_v0 = vmul.f32 %v11109_v31, %v5749_v41  ;;  %v4787_v26 = vld [vmem:[#allocation3 + $0x189] sm:$0xff] }
 0x587   : > { %v4458_v15 = vadd.f32 %v4384_v47, %v4180_v43  ;;  %v5216_v53 = vpop.f32.mrf.mxu0 }
 0x588   : > { %v5292_v18 = vadd.f32 %v5216_v53, %v5014_v57  ;;  %v5818_v21 = vadd.f32 %v5786_v37, %v5717_v11 }
 0x589   : > { %7993 = vmatmul.msk.f32.gmra.mxu1 %vm2787_vm2, %v5061_v6  ;;  %v4737_v52 = vadd.f32 %v11279_v5, %v4458_v15  ;;  %v6720_v6 = vmul.f32 %v11250_v59, %v6015_v19 }
 0x58a   : > { %v5328_v62 = vadd.f32 %v11082_v29, %v5292_v18  ;;  %8066 = vmatmul.msk.f32.gmra.mxu3 %vm2787_vm2, %v4786_v27  ;;  %v5866_v39 = vsel %vm5350_vm4, %v5818_v21, 0.0  ;;  %8100 = vmatmul.msk.f32.gmra.mxu0 %vm2787_vm2, %v5062_v55  ;;  %v5485_v21 = vmul.f32 %v11104_v8, %v5648_v32 }
 0x58b   : > { %5867 = vadd.xlane.f32.xlu1 %v5866_v39  ;;  %v5649_v51 = vld [vmem:[#allocation4 + $0x80] sm:$0xff]  ;;  %v5015_v38 = vadd.f32 %v4941_v58, %v4737_v52  ;;  %v6752_v15 = vadd.f32 %v6720_v6, %v6619_v20  ;;  %v6583_v39 = vld [vmem:[#allocation4 + $0x78] sm:$0xff] }
 0x58c   : > { %v5750_v56 = vld [vmem:[#allocation4 + $0x81] sm:$0xff]  ;;  %5417 = vst.msk [vmem:[#allocation4 + $0x91] sm:$0xff] %vm5350_vm4, %v5328_v62  ;;  %v5686_v5 = vmul.f32 %v11133_v12, %v5649_v51  ;;  %v6016_v20 = vld [vmem:[#allocation4 + $0x79] sm:$0xff] }
 0x58d   : > { %v4944_v43 = vpop.f32.mrf.mxu3  ;;  %v6785_v36 = vld [vmem:[#allocation4 + $0x80] sm:$0xff]  ;;  %v5787_v57 = vmul.f32 %v11146_v30, %v5750_v56 }
 0x58e   : > { %v4387_v63 = vpop.f32.mrf.mxu1  ;;  %v5718_v47 = vadd.f32 %v5686_v5, %v5617_v33  ;;  %v6217_v11 = vld [vmem:[#allocation4 + $0x81] sm:$0xff]  ;;  %v6822_v19 = vmul.f32 %v11263_v25, %v6785_v36  ;;  %v11393_v32 = vpop.f32.mrf.mxu2  ;;  %v4182_v5 = vadd.f32 %v10798_v23, %v10793_v60  ;;  %v6620_v36 = vmul.f32 %v11243_v49, %v6583_v39 }
 0x58f   : > { %v4459_v37 = vadd.f32 %v4387_v63, %v4181_v17  ;;  %v5219_v1 = vpop.f32.mrf.mxu0  ;;  %v6923_v58 = vmul.f32 %v11275_v10, %v6217_v11  ;;  %v5063_v52 = vld [vmem:[#allocation3 + $0x172] sm:$0xff]  ;;  %v6721_v11 = vmul.f32 %v11250_v59, %v6016_v20 }
 0x590   : > { %v5293_v53 = vadd.f32 %v5219_v1, %v5015_v38  ;;  %v5819_v18 = vadd.f32 %v5787_v57, %v5718_v47  ;;  %v6854_v48 = vadd.f32 %v6822_v19, %v6752_v15  ;;  %v4788_v15 = vld [vmem:[#allocation3 + $0x199] sm:$0xff] }
 0x591   : > { %7994 = vmatmul.msk.f32.gmra.mxu1 %vm2787_vm2, %v5062_v55  ;;  %v4738_v42 = vadd.f32 %v11302_v24, %v4459_v37  ;;  %v5618_v24 = vadd.f32 %v5586_v0, %v5485_v21  ;;  %v5587_v21 = vmul.f32 %v11109_v31, %v5750_v56 }
 0x592   : > { %v5329_v27 = vadd.f32 %v11082_v29, %v5293_v53  ;;  %8067 = vmatmul.msk.f32.gmra.mxu3 %vm2787_vm2, %v4787_v26  ;;  %v5869_v62 = vsel %vm5350_vm4, %v5819_v18, 0.0  ;;  %8101 = vmatmul.msk.f32.gmra.mxu0 %vm2787_vm2, %v5063_v52  ;;  %v11395_v6 = vadd.f32 %v6923_v58, %v6854_v48  ;;  %v5486_v18 = vmul.f32 %v11104_v8, %v5649_v51  ;;  %v5064_v26 = vld [vmem:[#allocation3 + $0x182] sm:$0xff] }
 0x593   : > { %5870 = vadd.xlane.f32.xlu2 %v5869_v62  ;;  %v5650_v41 = vld [vmem:[#allocation4 + $0x90] sm:$0xff]  ;;  %v5016_v38 = vadd.f32 %v4944_v43, %v4738_v42  ;;  %v6753_v58 = vadd.f32 %v6721_v11, %v6620_v36  ;;  %v4183_v62 = vadd.f32 %v10809_v13, %v10804_v14 }
 0x594   : > { %v5751_v55 = vld [vmem:[#allocation4 + $0x91] sm:$0xff]  ;;  %5418 = vst.msk [vmem:[#allocation4 + $0x99] sm:$0xff] %vm5350_vm4, %v5329_v27  ;;  %v5687_v33 = vmul.f32 %v11133_v12, %v5650_v41  ;;  %v5619_v27 = vadd.f32 %v5587_v21, %v5486_v18  ;;  %v5487_v11 = vmul.f32 %v11104_v8, %v5650_v41 }
 0x595   : > { %v4947_v17 = vpop.f32.mrf.mxu3  ;;  %v5788_v57 = vmul.f32 %v11146_v30, %v5751_v55  ;;  %v6585_v60 = vld [vmem:[#allocation4 + $0x90] sm:$0xff] }
 0x596   : > { %v4390_v63 = vpop.f32.mrf.mxu1  ;;  %v5719_v47 = vadd.f32 %v5687_v33, %v5618_v24  ;;  %v6823_v23 = vmul.f32 %v11263_v25, %v6585_v60  ;;  %v6018_v42 = vld [vmem:[#allocation4 + $0x91] sm:$0xff]  ;;  %v11417_v39 = vpop.f32.mrf.mxu2 }
 0x597   : > { %v4460_v37 = vadd.f32 %v4390_v63, %v4182_v5  ;;  %v5222_v1 = vpop.f32.mrf.mxu0  ;;  %v6924_v63 = vmul.f32 %v11275_v10, %v6018_v42 }
 0x598   : > { %v5294_v19 = vadd.f32 %v5222_v1, %v5016_v38  ;;  %v5820_v53 = vadd.f32 %v5788_v57, %v5719_v47  ;;  %v4789_v57 = vld [vmem:[#allocation3 + $0x1a1] sm:$0xff] }
 0x599   : > { %7995 = vmatmul.msk.f32.gmra.mxu1 %vm2787_vm2, %v5063_v52  ;;  %v4739_v43 = vadd.f32 %v11324_v22, %v4460_v37  ;;  %v6855_v22 = vadd.f32 %v6823_v23, %v6753_v58 }
 0x59a   : > { %v5330_v0 = vadd.f32 %v11082_v29, %v5294_v19  ;;  %v5872_v48 = vsel %vm5350_vm4, %v5820_v53, 0.0  ;;  %8068 = vmatmul.msk.f32.gmra.mxu3 %vm2787_vm2, %v4788_v15  ;;  %8102 = vmatmul.msk.f32.gmra.mxu0 %vm2787_vm2, %v5064_v26  ;;  %v5588_v15 = vmul.f32 %v11109_v31, %v5751_v55  ;;  %v5065_v19 = vld [vmem:[#allocation3 + $0x18a] sm:$0xff] }
 0x59b   : > { %5873 = vadd.xlane.f32.xlu0 %v5872_v48  ;;  %v5651_v51 = vld [vmem:[#allocation4 + $0x98] sm:$0xff]  ;;  %v5017_v33 = vadd.f32 %v4947_v17, %v4739_v43  ;;  %v11423_v14 = vadd.f32 %v6924_v63, %v6855_v22  ;;  %v6622_v43 = vmul.f32 %v11243_v49, %v6585_v60 }
 0x59c   : > { %v5752_v56 = vld [vmem:[#allocation4 + $0x99] sm:$0xff]  ;;  %5419 = vst.msk [vmem:[#allocation4 + $0xa9] sm:$0xff] %vm5350_vm4, %v5330_v0  ;;  %v5688_v52 = vmul.f32 %v11133_v12, %v5651_v51  ;;  %v5620_v55 = vadd.f32 %v5588_v15, %v5487_v11 }
 0x59d   : > { %v4950_v20 = vpop.f32.mrf.mxu3  ;;  %v5789_v36 = vmul.f32 %v11146_v30, %v5752_v56  ;;  %v6586_v15 = vld [vmem:[#allocation4 + $0x98] sm:$0xff] }
 0x59e   : > { %v4393_v24 = vpop.f32.mrf.mxu1  ;;  %v5720_v5 = vadd.f32 %v5688_v52, %v5619_v27  ;;  %v6723_v27 = vmul.f32 %v11250_v59, %v6018_v42  ;;  %v11438_v52 = vpop.f32.mrf.mxu2 }
 0x59f   : > { %v4461_v38 = vadd.f32 %v4393_v24, %v4183_v62  ;;  %v5225_v47 = vpop.f32.mrf.mxu0 }
 0x5a0   : > { %v5295_v37 = vadd.f32 %v5225_v47, %v5017_v33  ;;  %v5821_v1 = vadd.f32 %v5789_v36, %v5720_v5  ;;  %v5066_v33 = vld [vmem:[#allocation3 + $0x19a] sm:$0xff]  ;;  %v5488_v36 = vmul.f32 %v11104_v8, %v5651_v51 }
 0x5a1   : > { %7996 = vmatmul.msk.f32.gmra.mxu1 %vm2787_vm2, %v5064_v26  ;;  %v4740_v13 = vadd.f32 %v11344_v46, %v4461_v38  ;;  %v4184_v46 = vadd.f32 %v10819_v9, %v10814_v35  ;;  %v5589_v35 = vmul.f32 %v11109_v31, %v5752_v56  ;;  %v6755_v38 = vadd.f32 %v6723_v27, %v6622_v43 }
 0x5a2   : > { %v5331_v17 = vadd.f32 %v11082_v29, %v5295_v37  ;;  %v5875_v53 = vsel %vm5350_vm4, %v5821_v1, 0.0  ;;  %8069 = vmatmul.msk.f32.gmra.mxu3 %vm2787_vm2, %v4789_v57  ;;  %8103 = vmatmul.msk.f32.gmra.mxu0 %vm2787_vm2, %v5065_v19  ;;  %v6019_v37 = vld [vmem:[#allocation4 + $0x99] sm:$0xff] }
 0x5a3   : > { %5876 = vadd.xlane.f32.xlu1 %v5875_v53  ;;  %v5652_v41 = vld [vmem:[#allocation4 + $0xa8] sm:$0xff]  ;;  %v5018_v26 = vadd.f32 %v4950_v20, %v4740_v13  ;;  %v5621_v56 = vadd.f32 %v5589_v35, %v5488_v36 }
 0x5a4   : > { %v5753_v18 = vld [vmem:[#allocation4 + $0xa9] sm:$0xff]  ;;  %5420 = vst.msk [vmem:[#allocation4 + $0xb1] sm:$0xff] %vm5350_vm4, %v5331_v17  ;;  %v5689_v21 = vmul.f32 %v11133_v12, %v5652_v41  ;;  %v5489_v43 = vmul.f32 %v11104_v8, %v5652_v41  ;;  %v11466_v8 = vld [vmem:[%s12967_s4] ss:$0 sm:$0xff] }
 0x5a5   : > { %v4953_v23 = vpop.f32.mrf.mxu3  ;;  %v5790_v58 = vmul.f32 %v11146_v30, %v5753_v18  ;;  %v6788_v9 = vld [vmem:[#allocation4 + $0xa8] sm:$0xff] }
 0x5a6   : > { %v4396_v0 = vpop.f32.mrf.mxu1  ;;  %v5721_v48 = vadd.f32 %v5689_v21, %v5620_v55  ;;  %v6825_v60 = vmul.f32 %v11263_v25, %v6788_v9  ;;  %v6220_v51 = vld [vmem:[#allocation4 + $0xa9] sm:$0xff]  ;;  %v4186_v9 = vadd.f32 %v10843_v44, %v10838_v3  ;;  %v11483_v3 = vld [vmem:[%s12968_s5] ss:$0 sm:$0xff] }
 0x5a7   : > { %v4462_v22 = vadd.f32 %v4396_v0, %v4184_v46  ;;  %v5228_v62 = vpop.f32.mrf.mxu0  ;;  %v6926_v55 = vmul.f32 %v11275_v10, %v6220_v51  ;;  %v6623_v0 = vmul.f32 %v11243_v49, %v6586_v15 }
 0x5a8   : > { %v5296_v24 = vadd.f32 %v5228_v62, %v5018_v26  ;;  %v5822_v5 = vadd.f32 %v5790_v58, %v5721_v48  ;;  %v6857_v1 = vadd.f32 %v6825_v60, %v6755_v38  ;;  %v6724_v26 = vmul.f32 %v11250_v59, %v6019_v37  ;;  %v5067_v58 = vld [vmem:[#allocation3 + $0x1a2] sm:$0xff] }
 0x5a9   : > { %7997 = vmatmul.msk.f32.gmra.mxu1 %vm2787_vm2, %v5065_v19  ;;  %v4741_v20 = vadd.f32 %v11369_v61, %v4462_v22  ;;  %v11460_v22 = vpop.f32.mrf.mxu2 }
 0x5aa   : > { %v5332_v42 = vadd.f32 %v11082_v29, %v5296_v24  ;;  %v5878_v63 = vsel %vm5350_vm4, %v5822_v5, 0.0  ;;  %8104 = vmatmul.msk.f32.gmra.mxu0 %vm2787_vm2, %v5066_v33  ;;  %v4185_v29 = vadd.f32 %v10830_v54, %v10825_v16  ;;  %v5590_v16 = vmul.f32 %v11109_v31, %v5753_v18 }
 0x5ab   : > { %5879 = vadd.xlane.f32.xlu2 %v5878_v63  ;;  %v5653_v47 = vld [vmem:[#allocation4 + $0xb0] sm:$0xff]  ;;  %v5019_v17 = vadd.f32 %v4953_v23, %v4741_v20  ;;  %v11458_v54 = vadd.f32 %v6926_v55, %v6857_v1  ;;  %v6756_v5 = vadd.f32 %v6724_v26, %v6623_v0 }
 0x5ac   : > { %v5754_v57 = vld [vmem:[#allocation4 + $0xb1] sm:$0xff]  ;;  %5421 = vst.msk [vmem:[#allocation4 + $0xc1] sm:$0xff] %vm5350_vm4, %v5332_v42  ;;  %v5690_v11 = vmul.f32 %v11133_v12, %v5653_v47  ;;  %v5490_v44 = vmul.f32 %v11483_v3, %v5653_v47 }
 0x5ad   : > { %v4956_v61 = vpop.f32.mrf.mxu3  ;;  %v5791_v53 = vmul.f32 %v11146_v30, %v5754_v57  ;;  %v6588_v23 = vld [vmem:[#allocation4 + $0xb0] sm:$0xff] }
 0x5ae   : > { %v4399_v13 = vpop.f32.mrf.mxu1  ;;  %v5722_v19 = vadd.f32 %v5690_v11, %v5621_v56  ;;  %v6021_v33 = vld [vmem:[#allocation4 + $0xb1] sm:$0xff]  ;;  %v6826_v36 = vmul.f32 %v11263_v25, %v6588_v23  ;;  %v6625_v0 = vmul.f32 %v11243_v49, %v6588_v23 }
 0x5af   : > { %v4463_v21 = vadd.f32 %v4399_v13, %v4185_v29  ;;  %v5231_v46 = vpop.f32.mrf.mxu0  ;;  %v6927_v42 = vmul.f32 %v11275_v10, %v6021_v33  ;;  %v6726_v26 = vmul.f32 %v11250_v59, %v6021_v33 }
 0x5b0   : > { %v5297_v48 = vadd.f32 %v5231_v46, %v5019_v17  ;;  %v5823_v27 = vadd.f32 %v5791_v53, %v5722_v19  ;;  %v6858_v20 = vadd.f32 %v6826_v36, %v6756_v5  ;;  %v11498_v53 = vld [vmem:[#allocation5] ss:$0 sm:$0xff]  ;;  %v4187_v46 = vadd.f32 %v10856_v7, %v10851_v34 }
 0x5b1   : > { %v4742_v62 = vadd.f32 %v11393_v32, %v4463_v21  ;;  %v5622_v32 = vadd.f32 %v5590_v16, %v5489_v43  ;;  %v11496_v19 = vpop.f32.mrf.mxu2 }
 0x5b2   : > { %v5333_v41 = vadd.f32 %v11466_v8, %v5297_v48  ;;  %v5881_v24 = vsel %vm5350_vm4, %v5823_v27, 0.0  ;;  %8105 = vmatmul.msk.f32.gmra.mxu0 %vm2787_vm2, %v5067_v58  ;;  %v11478_v1 = vadd.f32 %v6927_v42, %v6858_v20 }
 0x5b3   : > { %5882 = vadd.xlane.f32.xlu0 %v5881_v24  ;;  %v5654_v31 = vld [vmem:[#allocation4 + $0xc0] sm:$0xff]  ;;  %v5020_v38 = vadd.f32 %v4956_v61, %v4742_v62 }
 0x5b4   : > { %v5755_v18 = vld [vmem:[#allocation4 + $0xc1] sm:$0xff]  ;;  %5422 = vst.msk [vmem:[#allocation4 + $0xc9] sm:$0xff] %vm5350_vm4, %v5333_v41  ;;  %v5691_v35 = vmul.f32 %v11133_v12, %v5654_v31  ;;  %v5491_v5 = vmul.f32 %v11483_v3, %v5654_v31 }
 0x5b5   : > { %v4959_v60 = vpop.f32.mrf.mxu3  ;;  %v5792_v56 = vmul.f32 %v11146_v30, %v5755_v18  ;;  %v11489_v12 = vld [vmem:[%s12968_s5 + $0x1] ss:$0 sm:$0xff]  ;;  %v11519_v62 = vld [vmem:[%s12968_s5 + $0x3] ss:$0 sm:$0xff] }
 0x5b6   : > { %v4402_v63 = vpop.f32.mrf.mxu1  ;;  %v5723_v51 = vadd.f32 %v5691_v35, %v5622_v32  ;;  %v5591_v30 = vmul.f32 %v11489_v12, %v5754_v57  ;;  %v11504_v57 = vld [vmem:[%s12968_s5 + $0x2] ss:$0 sm:$0xff]  ;;  %v5592_v36 = vmul.f32 %v11489_v12, %v5755_v18 }
 0x5b7   : > { %v4464_v11 = vadd.f32 %v4402_v63, %v4186_v9  ;;  %v5234_v37 = vpop.f32.mrf.mxu0  ;;  %v6758_v9 = vadd.f32 %v6726_v26, %v6625_v0  ;;  %v6022_v31 = vld [vmem:[#allocation4 + $0xc1] sm:$0xff] }
 0x5b8   : > { %v5298_v15 = vadd.f32 %v5234_v37, %v5020_v38  ;;  %v5824_v29 = vadd.f32 %v5792_v56, %v5723_v51  ;;  %v5623_v21 = vadd.f32 %v5591_v30, %v5490_v44  ;;  %v6589_v38 = vld [vmem:[#allocation4 + $0xc0] sm:$0xff]  ;;  %v5624_v37 = vadd.f32 %v5592_v36, %v5491_v5 }
 0x5b9   : > { %v4743_v61 = vadd.f32 %v11417_v39, %v4464_v11  ;;  %v6727_v0 = vmul.f32 %v11250_v59, %v6022_v31 }
 0x5ba   : > { %v5334_v13 = vadd.f32 %v11466_v8, %v5298_v15  ;;  %v5884_v17 = vsel %vm5350_vm4, %v5824_v29, 0.0  ;;  %v11536_v29 = vpop.f32.mrf.mxu2 }
 0x5bb   : > { %5885 = vadd.xlane.f32.xlu1 %v5884_v17  ;;  %v5655_v47 = vld [vmem:[#allocation4 + $0xc8] sm:$0xff]  ;;  %v5021_v27 = vadd.f32 %v4959_v60, %v4743_v61  ;;  %v6626_v61 = vmul.f32 %v11243_v49, %v6589_v38 }
 0x5bc   : > { %v5756_v55 = vld [vmem:[#allocation4 + $0xc9] sm:$0xff]  ;;  %5423 = vst.msk [vmem:[#allocation4 + $0xd9] sm:$0xff] %vm5350_vm4, %v5334_v13  ;;  %v5692_v39 = vmul.f32 %v11504_v57, %v5655_v47 }
 0x5bd   : > { %v4962_v43 = vpop.f32.mrf.mxu3  ;;  %v5793_v34 = vmul.f32 %v11519_v62, %v5756_v55  ;;  %v6223_v32 = vld [vmem:[#allocation4 + $0xc9] sm:$0xff] }
 0x5be   : > { %v4405_v58 = vpop.f32.mrf.mxu1  ;;  %v5724_v16 = vadd.f32 %v5692_v39, %v5623_v21  ;;  %v6791_v35 = vld [vmem:[#allocation4 + $0xc8] sm:$0xff]  ;;  %v6929_v18 = vmul.f32 %v11275_v10, %v6223_v32 }
 0x5bf   : > { %v5844_v48 = vpop.xlane.xlu0 %5843  ;;  %v4465_v23 = vadd.f32 %v4405_v58, %v4187_v46  ;;  %v5237_v41 = vpop.f32.mrf.mxu0  ;;  %v6828_v60 = vmul.f32 %v11263_v25, %v6791_v35  ;;  %v4189_v35 = vadd.f32 %v10880_v50, %v10875_v2 }
 0x5c0   : > { %v5942_v7 = vadd.f32 %v11498_v53, %v5844_v48  ;;  %v5299_v24 = vadd.f32 %v5237_v41, %v5021_v27  ;;  %v5825_v33 = vadd.f32 %v5793_v34, %v5724_v16  ;;  %v5492_v27 = vmul.f32 %v11483_v3, %v5655_v47 }
 0x5c1   : > { %v4744_v20 = vadd.f32 %v11438_v52, %v4465_v23  ;;  %v6860_v11 = vadd.f32 %v6828_v60, %v6758_v9  ;;  %v4188_v52 = vadd.f32 %v10868_v45, %v10863_v4  ;;  %v5593_v16 = vmul.f32 %v11489_v12, %v5756_v55 }
 0x5c2   : > { %5974 = vst.msk [vmem:[%s11514_s16] sm:$0xff] %vm281_vm0, %v5942_v7  ;;  %v5335_v42 = vadd.f32 %v11466_v8, %v5299_v24  ;;  %v5887_v63 = vsel %vm5350_vm4, %v5825_v33, 0.0  ;;  %v6759_v24 = vadd.f32 %v6727_v0, %v6626_v61  ;;  %v11558_v38 = vpop.f32.mrf.mxu2 }
 0x5c3   : > { %5888 = vadd.xlane.f32.xlu2 %v5887_v63  ;;  %v5656_v51 = vld [vmem:[#allocation4 + $0xd8] sm:$0xff]  ;;  %v11538_v30 = vadd.f32 %v6929_v18, %v6860_v11  ;;  %v5022_v21 = vadd.f32 %v4962_v43, %v4744_v20  ;;  %v5625_v47 = vadd.f32 %v5593_v16, %v5492_v27 }
 0x5c4   : > { %v5757_v56 = vld [vmem:[#allocation4 + $0xd9] sm:$0xff]  ;;  %5424 = vst.msk [vmem:[#allocation4 + $0xe1] sm:$0xff] %vm5350_vm4, %v5335_v42  ;;  %v5693_v15 = vmul.f32 %v11504_v57, %v5656_v51  ;;  %v5493_v18 = vmul.f32 %v11483_v3, %v5656_v51 }
 0x5c5   : > { %v4965_v44 = vpop.f32.mrf.mxu3  ;;  %v5794_v46 = vmul.f32 %v11519_v62, %v5757_v56  ;;  %v6591_v34 = vld [vmem:[#allocation4 + $0xd8] sm:$0xff] }
 0x5c6   : > { %v4408_v17 = vpop.f32.mrf.mxu1  ;;  %v5725_v39 = vadd.f32 %v5693_v15, %v5624_v37  ;;  %v6829_v43 = vmul.f32 %v11263_v25, %v6591_v34  ;;  %v6024_v36 = vld [vmem:[#allocation4 + $0xd9] sm:$0xff] }
 0x5c7   : > { %v5847_v13 = vpop.xlane.xlu1 %5846  ;;  %v4466_v48 = vadd.f32 %v4408_v17, %v4188_v52  ;;  %v5240_v4 = vpop.f32.mrf.mxu0  ;;  %v6930_v63 = vmul.f32 %v11275_v10, %v6024_v36  ;;  %v5594_v52 = vmul.f32 %v11489_v12, %v5757_v56 }
 0x5c8   : > { %v5943_v26 = vadd.f32 %v11498_v53, %v5847_v13  ;;  %v5300_v45 = vadd.f32 %v5240_v4, %v5022_v21  ;;  %v5826_v58 = vadd.f32 %v5794_v46, %v5725_v39  ;;  %v6861_v32 = vadd.f32 %v6829_v43, %v6759_v24  ;;  %v13534_v39 = vld [vmem:[#allocation9_spill] sm:$0xff] }
 0x5c9   : > { %v4745_v7 = vadd.f32 %v11460_v22, %v4466_v48  ;;  %v5626_v21 = vadd.f32 %v5594_v52, %v5493_v18  ;;  %v13535_v46 = vld [vmem:[#allocation53_spill] sm:$0xff]  ;;  %v6729_v48 = vmul.f32 %v11250_v59, %v6024_v36 }
 0x5ca   : > { %5975 = vst.msk [vmem:[%s11514_s16 + $0x8] sm:$0xff] %vm281_vm0, %v5943_v26  ;;  %v5336_v23 = vadd.f32 %v11466_v8, %v5300_v45  ;;  %v5890_v41 = vsel %vm5350_vm4, %v5826_v58, 0.0  ;;  %v11562_v61 = vadd.f32 %v6930_v63, %v6861_v32  ;;  %v4190_v56 = vadd.f32 %v13535_v46, %v13534_v39  ;;  %v13536_v63 = vld [vmem:[#allocation103_spill] sm:$0xff] }
 0x5cb   : > { %5891 = vadd.xlane.f32.xlu0 %v5890_v41  ;;  %v5657_v33 = vld [vmem:[#allocation4 + $0xe0] sm:$0xff]  ;;  %v5023_v60 = vadd.f32 %v4965_v44, %v4745_v7 }
 0x5cc   : > { %v5758_v5 = vld [vmem:[#allocation4 + $0xe1] sm:$0xff]  ;;  %5425 = vst.msk [vmem:[#allocation4 + $0xf1] sm:$0xff] %vm5350_vm4, %v5336_v23  ;;  %v5694_v55 = vmul.f32 %v11504_v57, %v5657_v33  ;;  %v5494_v24 = vmul.f32 %v11483_v3, %v5657_v33 }
 0x5cd   : > { %v4968_v9 = vpop.f32.mrf.mxu3  ;;  %v5795_v42 = vmul.f32 %v11519_v62, %v5758_v5  ;;  %13533 = vst [vmem:[#allocation24_spill] sm:$0xff] %v11562_v61 }
 0x5ce   : > { %v4411_v22 = vpop.f32.mrf.mxu1  ;;  %v5726_v20 = vadd.f32 %v5694_v55, %v5625_v47  ;;  %v5595_v47 = vmul.f32 %v11489_v12, %v5758_v5 }
 0x5cf   : > { %v4467_v31 = vadd.f32 %v4411_v22, %v4189_v35  ;;  %v5243_v11 = vpop.f32.mrf.mxu0  ;;  %v6592_v35 = vld [vmem:[#allocation4 + $0xe0] sm:$0xff] }
 0x5d0   : > { %v5301_v37 = vadd.f32 %v5243_v11, %v5023_v60  ;;  %v5827_v15 = vadd.f32 %v5795_v42, %v5726_v20  ;;  %v5627_v5 = vadd.f32 %v5595_v47, %v5494_v24  ;;  %v6025_v20 = vld [vmem:[#allocation4 + $0xe1] sm:$0xff] }
 0x5d1   : > { %v4746_v2 = vadd.f32 %v11496_v19, %v4467_v31  ;;  %v6628_v19 = vmul.f32 %v11243_v49, %v6591_v34  ;;  %v11579_v34 = vpop.f32.mrf.mxu2  ;;  %v13537_v31 = vld [vmem:[#allocation153_spill] sm:$0xff] }
 0x5d2   : > { %v5337_v50 = vadd.f32 %v11466_v8, %v5301_v37  ;;  %v5893_v44 = vsel %vm5350_vm4, %v5827_v15, 0.0  ;;  %v4191_v11 = vadd.f32 %v13537_v31, %v13536_v63  ;;  %v11597_v37 = vld [vmem:[%s12968_s5 + $0x8] ss:$0 sm:$0xff] }
 0x5d3   : > { %5894 = vadd.xlane.f32.xlu1 %v5893_v44  ;;  %v5658_v13 = vld [vmem:[#allocation4 + $0xf0] sm:$0xff]  ;;  %v5024_v58 = vadd.f32 %v4968_v9, %v4746_v2  ;;  %v6761_v32 = vadd.f32 %v6729_v48, %v6628_v19  ;;  %v6629_v15 = vmul.f32 %v11597_v37, %v6592_v35 }
 0x5d4   : > { %v5759_v17 = vld [vmem:[#allocation4 + $0xf1] sm:$0xff]  ;;  %5426 = vst.msk [vmem:[#allocation4 + $0xf9] sm:$0xff] %vm5350_vm4, %v5337_v50  ;;  %v5695_v51 = vmul.f32 %v11504_v57, %v5658_v13 }
 0x5d5   : > { %v4971_v26 = vpop.f32.mrf.mxu3  ;;  %v5796_v16 = vmul.f32 %v11519_v62, %v5759_v17  ;;  %v6794_v49 = vld [vmem:[#allocation4 + $0xf0] sm:$0xff] }
 0x5d6   : > { %v5850_v0 = vpop.xlane.xlu2 %5849  ;;  %v4414_v45 = vpop.f32.mrf.mxu1  ;;  %v5727_v27 = vadd.f32 %v5695_v51, %v5626_v21  ;;  %v6831_v59 = vmul.f32 %v11263_v25, %v6794_v49  ;;  %v6226_v33 = vld [vmem:[#allocation4 + $0xf1] sm:$0xff] }
 0x5d7   : > { %v5944_v4 = vadd.f32 %v11498_v53, %v5850_v0  ;;  %v4468_v43 = vadd.f32 %v4414_v45, %v4190_v56  ;;  %v5246_v7 = vpop.f32.mrf.mxu0  ;;  %v6932_v51 = vmul.f32 %v11275_v10, %v6226_v33  ;;  %v11608_v0 = vld [vmem:[%s12968_s5 + $0x9] ss:$0 sm:$0xff]  ;;  %v5495_v45 = vmul.f32 %v11483_v3, %v5658_v13  ;;  %v11625_v13 = vld [vmem:[%s12968_s5 + $0xa] ss:$0 sm:$0xff] }
 0x5d8   : > { %v5302_v23 = vadd.f32 %v5246_v7, %v5024_v58  ;;  %v5828_v41 = vadd.f32 %v5796_v16, %v5727_v27  ;;  %v6863_v42 = vadd.f32 %v6831_v59, %v6761_v32  ;;  %v6730_v19 = vmul.f32 %v11608_v0, %v6025_v20  ;;  %v13540_v32 = vld [vmem:[#allocation110_spill] sm:$0xff] }
 0x5d9   : > { %5976 = vst.msk [vmem:[%s11514_s16 + $0x10] sm:$0xff] %vm281_vm0, %v5944_v4  ;;  %v4747_v9 = vadd.f32 %v11536_v29, %v4468_v43  ;;  %v5596_v58 = vmul.f32 %v11489_v12, %v5759_v17  ;;  %v4702_v43 = vpop.f32.mrf.mxu2 }
 0x5da   : > { %v5338_v36 = vadd.f32 %v11466_v8, %v5302_v23  ;;  %v5896_v55 = vsel %vm5350_vm4, %v5828_v41, 0.0  ;;  %v11615_v10 = vadd.f32 %v6932_v51, %v6863_v42  ;;  %v11636_v42 = vld [vmem:[%s12968_s5 + $0xb] ss:$0 sm:$0xff] }
 0x5db   : > { %5897 = vadd.xlane.f32.xlu2 %v5896_v55  ;;  %v11585_v22 = vld [vmem:[#allocation4 + $0xf8] sm:$0xff]  ;;  %v5025_v56 = vadd.f32 %v4971_v26, %v4747_v9  ;;  %v5628_v49 = vadd.f32 %v5596_v58, %v5495_v45 }
 0x5dc   : > { %v11587_v60 = vld [vmem:[#allocation4 + $0xf9] sm:$0xff]  ;;  %5427 = vst.msk [vmem:[#allocation4 + $0x109] sm:$0xff] %vm5350_vm4, %v5338_v36  ;;  %v5696_v25 = vmul.f32 %v11504_v57, %v11585_v22  ;;  %v6762_v36 = vadd.f32 %v6730_v19, %v6629_v15  ;;  %v13539_v55 = vld [vmem:[#allocation18_spill] sm:$0xff] }
 0x5dd   : > { %v4974_v29 = vpop.f32.mrf.mxu3  ;;  %v5797_v21 = vmul.f32 %v11519_v62, %v11587_v60  ;;  %13538 = vst [vmem:[#allocation58_spill] sm:$0xff] %v11615_v10  ;;  %v6594_v27 = vld [vmem:[#allocation4 + $0xf8] sm:$0xff] }
 0x5de   : > { %v5853_v18 = vpop.xlane.xlu2 %5852  ;;  %v5856_v2 = vpop.xlane.xlu0 %5855  ;;  %v5728_v44 = vadd.f32 %v5696_v25, %v5627_v5  ;;  %v6027_v47 = vld [vmem:[#allocation4 + $0xf9] sm:$0xff]  ;;  %v6832_v17 = vmul.f32 %v11625_v13, %v6594_v27  ;;  %v13542_v19 = vld [vmem:[#allocation126_spill] sm:$0xff] }
 0x5df   : > { %v5945_v52 = vadd.f32 %v11498_v53, %v5853_v18  ;;  %v4417_v50 = vpop.f32.mrf.mxu1  ;;  %v5946_v39 = vadd.f32 %v11498_v53, %v5856_v2  ;;  %v5249_v48 = vpop.f32.mrf.mxu0  ;;  %v6933_v63 = vmul.f32 %v11636_v42, %v6027_v47 }
 0x5e0   : > { %v4469_v46 = vadd.f32 %v4417_v50, %v4191_v11  ;;  %v5829_v4 = vadd.f32 %v5797_v21, %v5728_v44  ;;  %v5303_v26 = vadd.f32 %v5249_v48, %v5025_v56  ;;  %v6864_v20 = vadd.f32 %v6832_v17, %v6762_v36  ;;  %v13543_v48 = vld [vmem:[#allocation131_spill] sm:$0xff] }
 0x5e1   : > { %5977 = vst.msk [vmem:[%s11514_s16 + $0x18] sm:$0xff] %vm281_vm0, %v5945_v52  ;;  %v5496_v44 = vmul.f32 %v11483_v3, %v11585_v22  ;;  %v5597_v21 = vmul.f32 %v11489_v12, %v11587_v60  ;;  %v4705_v45 = vpop.f32.mrf.mxu2 }
 0x5e2   : > { %5978 = vst.msk [vmem:[%s11514_s16 + $0x20] sm:$0xff] %vm281_vm0, %v5946_v39  ;;  %v5899_v16 = vsel %vm5350_vm4, %v5829_v4, 0.0  ;;  %v4748_v7 = vadd.f32 %v11558_v38, %v4469_v46  ;;  %v5339_v23 = vadd.f32 %v11466_v8, %v5303_v26  ;;  %v4192_v38 = vadd.f32 %v13540_v32, %v13539_v55 }
 0x5e3   : > { %5900 = vadd.xlane.f32.xlu0 %v5899_v16  ;;  %v5660_v41 = vld [vmem:[#allocation4 + $0x108] sm:$0xff]  ;;  %v11640_v2 = vadd.f32 %v6933_v63, %v6864_v20  ;;  %v4193_v4 = vadd.f32 %v13543_v48, %v13542_v19  ;;  %v5629_v58 = vadd.f32 %v5597_v21, %v5496_v44 }
 0x5e4   : > { %v5761_v24 = vld [vmem:[#allocation4 + $0x109] sm:$0xff]  ;;  %v5697_v59 = vmul.f32 %v11504_v57, %v5660_v41  ;;  %5428 = vst.msk [vmem:[#allocation4 + $0x111] sm:$0xff] %vm5350_vm4, %v5339_v23  ;;  %v5026_v18 = vadd.f32 %v4974_v29, %v4748_v7  ;;  %v6631_v7 = vmul.f32 %v11597_v37, %v6594_v27  ;;  %v6732_v23 = vmul.f32 %v11608_v0, %v6027_v47 }
 0x5e5   : > { %v4977_v35 = vpop.f32.mrf.mxu3  ;;  %v5798_v25 = vmul.f32 %v11519_v62, %v5761_v24  ;;  %13541 = vst [vmem:[#allocation137_spill] sm:$0xff] %v11640_v2  ;;  %v6028_v21 = vld [vmem:[#allocation4 + $0x109] sm:$0xff] }
 0x5e6   : > { %v5859_v9 = vpop.xlane.xlu1 %5858  ;;  %v5729_v5 = vadd.f32 %v5697_v59, %v5628_v49 }
 0x5e7   : > { %v4420_v33 = vpop.f32.mrf.mxu1  ;;  %v5947_v31 = vadd.f32 %v11498_v53, %v5859_v9  ;;  %v5252_v15 = vpop.f32.mrf.mxu0 }
 0x5e8   : > { %v4470_v11 = vadd.f32 %v4420_v33, %v4192_v38  ;;  %v5830_v52 = vadd.f32 %v5798_v25, %v5729_v5  ;;  %v5304_v50 = vadd.f32 %v5252_v15, %v5026_v18  ;;  %v5497_v33 = vmul.f32 %v11483_v3, %v5660_v41  ;;  %v13545_v15 = vld [vmem:[#allocation54_spill] sm:$0xff] }
 0x5e9   : > { %5979 = vst.msk [vmem:[%s11514_s16 + $0x28] sm:$0xff] %vm281_vm0, %v5947_v31  ;;  %v6764_v5 = vadd.f32 %v6732_v23, %v6631_v7 }
 0x5ea   : > { %v4749_v51 = vadd.f32 %v11579_v34, %v4470_v11  ;;  %v5902_v39 = vsel %vm5350_vm4, %v5830_v52, 0.0  ;;  %v5340_v46 = vadd.f32 %v11466_v8, %v5304_v50 }
 0x5eb   : > { %5903 = vadd.xlane.f32.xlu1 %v5902_v39  ;;  %v5661_v29 = vld [vmem:[#allocation4 + $0x110] sm:$0xff] }
 0x5ec   : > { %v5762_v56 = vld [vmem:[#allocation4 + $0x111] sm:$0xff]  ;;  %5429 = vst.msk [vmem:[#allocation4 + $0x121] sm:$0xff] %vm5350_vm4, %v5340_v46  ;;  %v5698_v60 = vmul.f32 %v11504_v57, %v5661_v29  ;;  %v5027_v16 = vadd.f32 %v4977_v35, %v4749_v51  ;;  %v5598_v35 = vmul.f32 %v11489_v12, %v5761_v24  ;;  %v13544_v24 = vld [vmem:[#allocation136_spill] sm:$0xff] }
 0x5ed   : > { %v4980_v22 = vpop.f32.mrf.mxu3  ;;  %v5799_v36 = vmul.f32 %v11519_v62, %v5762_v56  ;;  %v11659_v32 = vld [vmem:[#allocation4 + $0x110] sm:$0xff]  ;;  %v4194_v52 = vadd.f32 %v13545_v15, %v13544_v24  ;;  %v6595_v51 = vld [vmem:[#allocation4 + $0x108] sm:$0xff] }
 0x5ee   : > { %v5862_v26 = vpop.xlane.xlu2 %5861  ;;  %v5730_v59 = vadd.f32 %v5698_v60, %v5629_v58  ;;  %v11665_v27 = vld [vmem:[#allocation4 + $0x111] sm:$0xff]  ;;  %v6834_v25 = vmul.f32 %v11625_v13, %v11659_v32  ;;  %v5630_v50 = vadd.f32 %v5598_v35, %v5497_v33  ;;  %v6632_v23 = vmul.f32 %v11597_v37, %v6595_v51 }
 0x5ef   : > { %v4423_v34 = vpop.f32.mrf.mxu1  ;;  %v5948_v17 = vadd.f32 %v11498_v53, %v5862_v26  ;;  %v5255_v55 = vpop.f32.mrf.mxu0  ;;  %v6935_v41 = vmul.f32 %v11636_v42, %v11665_v27 }
 0x5f0   : > { %v4471_v49 = vadd.f32 %v4423_v34, %v4193_v4  ;;  %v5305_v38 = vadd.f32 %v5255_v55, %v5027_v16  ;;  %v5831_v9 = vadd.f32 %v5799_v36, %v5730_v59  ;;  %v6866_v18 = vadd.f32 %v6834_v25, %v6764_v5  ;;  %v4708_v4 = vpop.f32.mrf.mxu2  ;;  %v13547_v25 = vld [vmem:[#allocation142_spill] sm:$0xff] }
 0x5f1   : > { %5980 = vst.msk [vmem:[%s11514_s16 + $0x30] sm:$0xff] %vm281_vm0, %v5948_v17  ;;  %v6733_v17 = vmul.f32 %v11608_v0, %v6028_v21  ;;  %v5498_v59 = vmul.f32 %v11483_v3, %v5661_v29  ;;  %v5599_v36 = vmul.f32 %v11489_v12, %v5762_v56 }
 0x5f2   : > { %v4750_v47 = vadd.f32 %v4702_v43, %v4471_v49  ;;  %v5341_v20 = vadd.f32 %v11466_v8, %v5305_v38  ;;  %v5905_v63 = vsel %vm5350_vm4, %v5831_v9, 0.0  ;;  %v11679_v48 = vadd.f32 %v6935_v41, %v6866_v18 }
 0x5f3   : > { %5906 = vadd.xlane.f32.xlu2 %v5905_v63  ;;  %v5662_v31 = vld [vmem:[#allocation4 + $0x120] sm:$0xff]  ;;  %v6765_v5 = vadd.f32 %v6733_v17, %v6632_v23  ;;  %v5631_v56 = vadd.f32 %v5599_v36, %v5498_v59  ;;  %v6734_v36 = vmul.f32 %v11608_v0, %v11665_v27 }
 0x5f4   : > { %v11671_v11 = vld [vmem:[#allocation4 + $0x121] sm:$0xff]  ;;  %5430 = vst.msk [vmem:[#allocation4 + $0x129] sm:$0xff] %vm5350_vm4, %v5341_v20  ;;  %v5699_v44 = vmul.f32 %v11504_v57, %v5662_v31  ;;  %v5028_v19 = vadd.f32 %v4980_v22, %v4750_v47 }
 0x5f5   : > { %v4983_v43 = vpop.f32.mrf.mxu3  ;;  %13546 = vst [vmem:[#allocation12_spill] sm:$0xff] %v11679_v48  ;;  %v5800_v34 = vmul.f32 %v11519_v62, %v11671_v11  ;;  %v6597_v7 = vld [vmem:[#allocation4 + $0x120] sm:$0xff]  ;;  %v5600_v23 = vmul.f32 %v11489_v12, %v11671_v11 }
 0x5f6   : > { %v5865_v39 = vpop.xlane.xlu0 %5864  ;;  %v5731_v26 = vadd.f32 %v5699_v44, %v5630_v50  ;;  %v6835_v38 = vmul.f32 %v11625_v13, %v6597_v7  ;;  %v13548_v20 = vld [vmem:[#allocation92_spill] sm:$0xff] }
 0x5f7   : > { %v4426_v46 = vpop.f32.mrf.mxu1  ;;  %v5949_v58 = vadd.f32 %v11498_v53, %v5865_v39  ;;  %v5258_v16 = vpop.f32.mrf.mxu0  ;;  %v4195_v63 = vadd.f32 %v13548_v20, %v13547_v25  ;;  %v11702_v18 = vld [vmem:[#allocation4 + $0x121] sm:$0xff]  ;;  %v13550_v25 = vld [vmem:[#allocation150_spill] sm:$0xff] }
 0x5f8   : > { %v4472_v60 = vadd.f32 %v4426_v46, %v4194_v52  ;;  %v5306_v49 = vadd.f32 %v5258_v16, %v5028_v19  ;;  %v5832_v22 = vadd.f32 %v5800_v34, %v5731_v26  ;;  %v6867_v52 = vadd.f32 %v6835_v38, %v6765_v5  ;;  %v11712_v19 = vld [vmem:[%s12968_s5 + $0x5] ss:$0 sm:$0xff]  ;;  %v13551_v20 = vld [vmem:[#allocation166_spill] sm:$0xff] }
 0x5f9   : > { %5981 = vst.msk [vmem:[%s11514_s16 + $0x38] sm:$0xff] %vm281_vm0, %v5949_v58  ;;  %v6936_v58 = vmul.f32 %v11636_v42, %v11702_v18  ;;  %v5499_v16 = vmul.f32 %v11483_v3, %v5662_v31  ;;  %v4196_v27 = vadd.f32 %v13551_v20, %v13550_v25 }
 0x5fa   : > { %v4751_v55 = vadd.f32 %v4705_v45, %v4472_v60  ;;  %v5342_v9 = vadd.f32 %v11466_v8, %v5306_v49  ;;  %v5908_v33 = vsel %vm5350_vm4, %v5832_v22, 0.0  ;;  %v4711_v60 = vpop.f32.mrf.mxu2  ;;  %v11726_v22 = vld [vmem:[%s12968_s5 + $0x4] ss:$0 sm:$0xff] }
 0x5fb   : > { %5909 = vadd.xlane.f32.xlu0 %v5908_v33  ;;  %v11693_v35 = vld [vmem:[#allocation4 + $0x128] sm:$0xff]  ;;  %v11730_v59 = vadd.f32 %v6936_v58, %v6867_v52  ;;  %v6067_v33 = vmul.f32 %v11726_v22, %v11671_v11 }
 0x5fc   : > { %v11695_v47 = vld [vmem:[#allocation4 + $0x129] sm:$0xff]  ;;  %5431 = vst.msk [vmem:[#allocation4 + $0x139] sm:$0xff] %vm5350_vm4, %v5342_v9  ;;  %v5700_v45 = vmul.f32 %v11504_v57, %v11693_v35  ;;  %v5029_v15 = vadd.f32 %v4983_v43, %v4751_v55  ;;  %v6633_v43 = vmul.f32 %v11597_v37, %v11659_v32  ;;  %v11739_v9 = vld [vmem:[%s12968_s5 + $0x6] ss:$0 sm:$0xff] }
 0x5fd   : > { %v4986_v29 = vpop.f32.mrf.mxu3  ;;  %v5801_v51 = vmul.f32 %v11519_v62, %v11695_v47  ;;  %v11707_v39 = vld [vmem:[#allocation4 + $0x122] sm:$0xff]  ;;  %13549 = vst [vmem:[#allocation76_spill] sm:$0xff] %v11730_v59 }
 0x5fe   : > { %v5868_v41 = vpop.xlane.xlu1 %5867  ;;  %v5732_v21 = vadd.f32 %v5700_v45, %v5631_v56  ;;  %v6598_v17 = vld [vmem:[#allocation4 + $0x128] sm:$0xff]  ;;  %v6168_v32 = vmul.f32 %v11712_v19, %v11707_v39  ;;  %v5632_v56 = vadd.f32 %v5600_v23, %v5499_v16 }
 0x5ff   : > { %v4429_v24 = vpop.f32.mrf.mxu1  ;;  %v5950_v50 = vadd.f32 %v11498_v53, %v5868_v41  ;;  %v5261_v46 = vpop.f32.mrf.mxu0  ;;  %v6836_v5 = vmul.f32 %v11625_v13, %v6598_v17  ;;  %v11748_v41 = vld [vmem:[#allocation4 + $0x129] sm:$0xff] }
 0x600   : > { %v4473_v44 = vadd.f32 %v4429_v24, %v4195_v63  ;;  %v5307_v26 = vadd.f32 %v5261_v46, %v5029_v15  ;;  %v5833_v34 = vadd.f32 %v5801_v51, %v5732_v21  ;;  %v6634_v24 = vmul.f32 %v11597_v37, %v6597_v7 }
 0x601   : > { %5982 = vst.msk [vmem:[%s11514_s16 + $0x40] sm:$0xff] %vm281_vm0, %v5950_v50  ;;  %v6200_v11 = vadd.f32 %v6168_v32, %v6067_v33  ;;  %v6766_v21 = vadd.f32 %v6734_v36, %v6633_v43  ;;  %v6735_v7 = vmul.f32 %v11608_v0, %v11702_v18  ;;  %v5500_v32 = vmul.f32 %v11483_v3, %v11693_v35  ;;  %v13554_v35 = vld [vmem:[#allocation109_spill] sm:$0xff] }
 0x602   : > { %v4752_v49 = vadd.f32 %v4708_v4, %v4473_v44  ;;  %v5343_v31 = vadd.f32 %v11466_v8, %v5307_v26  ;;  %v5911_v55 = vsel %vm5350_vm4, %v5833_v34, 0.0  ;;  %v5601_v36 = vmul.f32 %v11489_v12, %v11695_v47  ;;  %v4714_v25 = vpop.f32.mrf.mxu2 }
 0x603   : > { %5912 = vadd.xlane.f32.xlu1 %v5911_v55  ;;  %v5664_v38 = vld [vmem:[#allocation4 + $0x138] sm:$0xff]  ;;  %v6868_v17 = vadd.f32 %v6836_v5, %v6766_v21 }
 0x604   : > { %v5765_v4 = vld [vmem:[#allocation4 + $0x139] sm:$0xff]  ;;  %5432 = vst.msk [vmem:[#allocation4 + $0x141] sm:$0xff] %vm5350_vm4, %v5343_v31  ;;  %v5701_v45 = vmul.f32 %v11504_v57, %v5664_v38  ;;  %v5030_v50 = vadd.f32 %v4986_v29, %v4752_v49  ;;  %v6937_v29 = vmul.f32 %v11636_v42, %v11748_v41  ;;  %v5633_v47 = vadd.f32 %v5601_v36, %v5500_v32 }
 0x605   : > { %v4989_v63 = vpop.f32.mrf.mxu3  ;;  %v6269_v44 = vmul.f32 %v11739_v9, %v5765_v4  ;;  %v5802_v26 = vmul.f32 %v11519_v62, %v5765_v4  ;;  %v6800_v23 = vld [vmem:[#allocation4 + $0x138] sm:$0xff] }
 0x606   : > { %v5871_v15 = vpop.xlane.xlu2 %5870  ;;  %v5733_v58 = vadd.f32 %v5701_v45, %v5632_v56  ;;  %v6837_v55 = vmul.f32 %v11625_v13, %v6800_v23  ;;  %v11767_v33 = vadd.f32 %v6937_v29, %v6868_v17  ;;  %v6767_v45 = vadd.f32 %v6735_v7, %v6634_v24 }
 0x607   : > { %v4432_v52 = vpop.f32.mrf.mxu1  ;;  %v5951_v51 = vadd.f32 %v11498_v53, %v5871_v15  ;;  %v5264_v34 = vpop.f32.mrf.mxu0  ;;  %v11754_v16 = vadd.f32 %v6269_v44, %v6200_v11  ;;  %v13553_v15 = vld [vmem:[#allocation34_spill] sm:$0xff] }
 0x608   : > { %v4474_v46 = vadd.f32 %v4432_v52, %v4196_v27  ;;  %v5308_v43 = vadd.f32 %v5264_v34, %v5030_v50  ;;  %v5834_v49 = vadd.f32 %v5802_v26, %v5733_v58  ;;  %13552 = vst [vmem:[#allocation95_spill] sm:$0xff] %v11767_v33  ;;  %v4197_v52 = vadd.f32 %v13554_v35, %v13553_v15  ;;  %v11777_v50 = vld [vmem:[#allocation4 + $0x139] sm:$0xff]  ;;  %v13557_v15 = vld [vmem:[#allocation33_spill] sm:$0xff] }
 0x609   : > { %5983 = vst.msk [vmem:[%s11514_s16 + $0x48] sm:$0xff] %vm281_vm0, %v5951_v51  ;;  %v6869_v51 = vadd.f32 %v6837_v55, %v6767_v45  ;;  %v6938_v17 = vmul.f32 %v11636_v42, %v11777_v50  ;;  %v13556_v45 = vld [vmem:[#allocation171_spill] sm:$0xff] }
 0x60a   : > { %v4753_v31 = vadd.f32 %v4711_v60, %v4474_v46  ;;  %v5344_v5 = vadd.f32 %v11466_v8, %v5308_v43  ;;  %v5914_v20 = vsel %vm5350_vm4, %v5834_v49, 0.0  ;;  %v5501_v49 = vmul.f32 %v11483_v3, %v5664_v38 }
 0x60b   : > { %5915 = vadd.xlane.f32.xlu2 %v5914_v20  ;;  %v5665_v27 = vld [vmem:[#allocation4 + $0x140] sm:$0xff]  ;;  %v11788_v36 = vadd.f32 %v6938_v17, %v6869_v51  ;;  %v4198_v35 = vadd.f32 %v13557_v15, %v13556_v45 }
 0x60c   : > { %v11771_v56 = vld [vmem:[#allocation4 + $0x141] sm:$0xff]  ;;  %5433 = vst.msk [vmem:[#allocation4 + $0x151] sm:$0xff] %vm5350_vm4, %v5344_v5  ;;  %v5702_v60 = vmul.f32 %v11504_v57, %v5665_v27  ;;  %v5031_v21 = vadd.f32 %v4989_v63, %v4753_v31  ;;  %v5602_v63 = vmul.f32 %v11489_v12, %v5765_v4  ;;  %v5502_v17 = vmul.f32 %v11483_v3, %v5665_v27 }
 0x60d   : > { %v5803_v24 = vmul.f32 %v11519_v62, %v11771_v56  ;;  %v4992_v34 = vpop.f32.mrf.mxu3  ;;  %13555 = vst [vmem:[#allocation160_spill] sm:$0xff] %v11788_v36  ;;  %v13558_v15 = vld [vmem:[#allocation84_spill] sm:$0xff] }
 0x60e   : > { %v5874_v11 = vpop.xlane.xlu0 %5873  ;;  %v5734_v26 = vadd.f32 %v5702_v60, %v5633_v47  ;;  %v5634_v38 = vadd.f32 %v5602_v63, %v5501_v49  ;;  %v6070_v63 = vmul.f32 %v11726_v22, %v11771_v56 }
 0x60f   : > { %v4435_v44 = vpop.f32.mrf.mxu1  ;;  %v5952_v46 = vadd.f32 %v11498_v53, %v5874_v11  ;;  %v5267_v7 = vpop.f32.mrf.mxu0 }
 0x610   : > { %v4475_v58 = vadd.f32 %v4435_v44, %v4197_v52  ;;  %v5309_v29 = vadd.f32 %v5267_v7, %v5031_v21  ;;  %v5835_v43 = vadd.f32 %v5803_v24, %v5734_v26  ;;  %v4717_v52 = vpop.f32.mrf.mxu2  ;;  %v6636_v26 = vmul.f32 %v11597_v37, %v6800_v23 }
 0x611   : > { %5984 = vst.msk [vmem:[%s11514_s16 + $0x50] sm:$0xff] %vm281_vm0, %v5952_v46  ;;  %v11801_v46 = vld [vmem:[#allocation4 + $0x142] sm:$0xff]  ;;  %v6737_v37 = vmul.f32 %v11608_v0, %v11777_v50 }
 0x612   : > { %v4754_v32 = vadd.f32 %v4714_v25, %v4475_v58  ;;  %v5345_v31 = vadd.f32 %v11466_v8, %v5309_v29  ;;  %v5917_v55 = vsel %vm5350_vm4, %v5835_v43, 0.0 }
 0x613   : > { %5918 = vadd.xlane.f32.xlu0 %v5917_v55  ;;  %v5666_v5 = vld [vmem:[#allocation4 + $0x150] sm:$0xff] }
 0x614   : > { %v11792_v20 = vld [vmem:[#allocation4 + $0x151] sm:$0xff]  ;;  %5434 = vst.msk [vmem:[#allocation4 + $0x159] sm:$0xff] %vm5350_vm4, %v5345_v31  ;;  %v5703_v4 = vmul.f32 %v11504_v57, %v5666_v5  ;;  %v5032_v60 = vadd.f32 %v4992_v34, %v4754_v32  ;;  %v5603_v34 = vmul.f32 %v11489_v12, %v11771_v56  ;;  %v6171_v32 = vmul.f32 %v11712_v19, %v11801_v46 }
 0x615   : > { %v5804_v51 = vmul.f32 %v11519_v62, %v11792_v20  ;;  %v6601_v29 = vld [vmem:[#allocation4 + $0x150] sm:$0xff]  ;;  %v4995_v43 = vpop.f32.mrf.mxu3 }
 0x616   : > { %v5877_v25 = vpop.xlane.xlu1 %5876  ;;  %v5735_v21 = vadd.f32 %v5703_v4, %v5634_v38  ;;  %v6839_v45 = vmul.f32 %v11625_v13, %v6601_v29  ;;  %v5635_v4 = vadd.f32 %v5603_v34, %v5502_v17  ;;  %v11827_v29 = vld [vmem:[#allocation4 + $0x151] sm:$0xff] }
 0x617   : > { %v4438_v47 = vpop.f32.mrf.mxu1  ;;  %v5953_v11 = vadd.f32 %v11498_v53, %v5877_v25  ;;  %v5270_v58 = vpop.f32.mrf.mxu0 }
 0x618   : > { %v4476_v44 = vadd.f32 %v4438_v47, %v4198_v35  ;;  %v5310_v24 = vadd.f32 %v5270_v58, %v5032_v60  ;;  %v5836_v7 = vadd.f32 %v5804_v51, %v5735_v21  ;;  %v13559_v35 = vld [vmem:[#allocation98_spill] sm:$0xff]  ;;  %v4720_v38 = vpop.f32.mrf.mxu2  ;;  %v6769_v21 = vadd.f32 %v6737_v37, %v6636_v26 }
 0x619   : > { %5985 = vst.msk [vmem:[%s11514_s16 + $0x58] sm:$0xff] %vm281_vm0, %v5953_v11  ;;  %v6203_v11 = vadd.f32 %v6171_v32, %v6070_v63  ;;  %v5503_v26 = vmul.f32 %v11483_v3, %v5666_v5  ;;  %v5604_v63 = vmul.f32 %v11489_v12, %v11792_v20  ;;  %v6071_v5 = vmul.f32 %v11726_v22, %v11792_v20 }
 0x61a   : > { %v4755_v49 = vadd.f32 %v4717_v52, %v4476_v44  ;;  %v5346_v23 = vadd.f32 %v11466_v8, %v5310_v24  ;;  %v5920_v31 = vsel %vm5350_vm4, %v5836_v7, 0.0  ;;  %v4199_v52 = vadd.f32 %v13559_v35, %v13558_v15 }
 0x61b   : > { %5921 = vadd.xlane.f32.xlu1 %v5920_v31  ;;  %v5667_v27 = vld [vmem:[#allocation4 + $0x158] sm:$0xff]  ;;  %v6940_v15 = vmul.f32 %v11636_v42, %v11827_v29  ;;  %v5636_v42 = vadd.f32 %v5604_v63, %v5503_v26 }
 0x61c   : > { %v5768_v55 = vld [vmem:[#allocation4 + $0x159] sm:$0xff]  ;;  %5435 = vst.msk [vmem:[#allocation4 + $0x169] sm:$0xff] %vm5350_vm4, %v5346_v23  ;;  %v5704_v25 = vmul.f32 %v11504_v57, %v5667_v27  ;;  %v5033_v60 = vadd.f32 %v4995_v43, %v4755_v49  ;;  %v6871_v23 = vadd.f32 %v6839_v45, %v6769_v21 }
 0x61d   : > { %v6272_v44 = vmul.f32 %v11739_v9, %v5768_v55  ;;  %v5805_v24 = vmul.f32 %v11519_v62, %v5768_v55  ;;  %v11825_v7 = vld [vmem:[#allocation4 + $0x152] sm:$0xff]  ;;  %v4998_v37 = vpop.f32.mrf.mxu3 }
 0x61e   : > { %v5880_v0 = vpop.xlane.xlu2 %5879  ;;  %v5736_v58 = vadd.f32 %v5704_v25, %v5635_v4  ;;  %v6172_v31 = vmul.f32 %v11712_v19, %v11825_v7  ;;  %v11846_v25 = vadd.f32 %v6940_v15, %v6871_v23  ;;  %v6107_v15 = vld [vmem:[#allocation4 + $0x2] sm:$0xff] }
 0x61f   : > { %v4441_v47 = vpop.f32.mrf.mxu1  ;;  %v5954_v51 = vadd.f32 %v11498_v53, %v5880_v0  ;;  %v5273_v17 = vpop.f32.mrf.mxu0  ;;  %v11829_v34 = vadd.f32 %v6272_v44, %v6203_v11  ;;  %v13562_v0 = vld [vmem:[#allocation27_spill] sm:$0xff] }
 0x620   : > { %v4477_v13 = vadd.f32 %v4441_v47, %v4199_v52  ;;  %v5311_v43 = vadd.f32 %v5273_v17, %v5033_v60  ;;  %v5837_v49 = vadd.f32 %v5805_v24, %v5736_v58  ;;  %13560 = vst [vmem:[#allocation20_spill] sm:$0xff] %v11846_v25 }
 0x621   : > { %5986 = vst.msk [vmem:[%s11514_s16 + $0x60] sm:$0xff] %vm281_vm0, %v5954_v51  ;;  %v6204_v51 = vadd.f32 %v6172_v31, %v6071_v5  ;;  %v6006_v31 = vld [vmem:[#allocation4 + $0x1] sm:$0xff] }
 0x622   : > { %v4756_v32 = vadd.f32 %v4720_v38, %v4477_v13  ;;  %v5347_v35 = vadd.f32 %v11466_v8, %v5311_v43  ;;  %v5923_v45 = vsel %vm5350_vm4, %v5837_v49, 0.0  ;;  %v13561_v38 = vld [vmem:[#allocation149_spill] sm:$0xff]  ;;  %v4723_v43 = vpop.f32.mrf.mxu2 }
 0x623   : > { %5924 = vadd.xlane.f32.xlu2 %v5923_v45  ;;  %v5668_v52 = vld [vmem:[#allocation4 + $0x168] sm:$0xff]  ;;  %v4200_v47 = vadd.f32 %v13562_v0, %v13561_v38 }
 0x624   : > { %v11842_v4 = vld [vmem:[#allocation4 + $0x169] sm:$0xff]  ;;  %5436 = vst.msk [vmem:[#allocation4 + $0x171] sm:$0xff] %vm5350_vm4, %v5347_v35  ;;  %v5705_v60 = vmul.f32 %v11504_v57, %v5668_v52  ;;  %v5034_v11 = vadd.f32 %v4998_v37, %v4756_v32  ;;  %v5504_v32 = vmul.f32 %v11483_v3, %v5667_v27  ;;  %v5605_v37 = vmul.f32 %v11489_v12, %v5768_v55 }
 0x625   : > { %v6273_v13 = vmul.f32 %v11739_v9, %v11842_v4  ;;  %v5806_v17 = vmul.f32 %v11519_v62, %v11842_v4  ;;  %v5001_v38 = vpop.f32.mrf.mxu3 }
 0x626   : > { %v5883_v44 = vpop.xlane.xlu0 %5882  ;;  %v5737_v24 = vadd.f32 %v5705_v60, %v5636_v42  ;;  %v6043_v42 = vmul.f32 %v11726_v22, %v6006_v31  ;;  %v6144_v60 = vmul.f32 %v11712_v19, %v6107_v15  ;;  %v5637_v27 = vadd.f32 %v5605_v37, %v5504_v32 }
 0x627   : > { %v4444_v21 = vpop.f32.mrf.mxu1  ;;  %v5955_v20 = vadd.f32 %v11498_v53, %v5883_v44  ;;  %v5276_v23 = vpop.f32.mrf.mxu0  ;;  %v11857_v49 = vadd.f32 %v6273_v13, %v6204_v51  ;;  %v11876_v44 = vld [vmem:[%s12968_s5 + $0x7] ss:$0 sm:$0xff]  ;;  %v5505_v32 = vmul.f32 %v11483_v3, %v5668_v52  ;;  %v5606_v15 = vmul.f32 %v11489_v12, %v11842_v4  ;;  %v8304_v3 = vld [vmem:[%s12967_s4] ss:$0 sm:$0xff] }
 0x628   : > { %v4478_v58 = vadd.f32 %v4444_v21, %v4200_v47  ;;  %v5312_v26 = vadd.f32 %v5276_v23, %v5034_v11  ;;  %v5838_v63 = vadd.f32 %v5806_v17, %v5737_v24  ;;  %v11871_v11 = vld [vmem:[#allocation4 + $0x19] sm:$0xff]  ;;  %v6007_v17 = vld [vmem:[#allocation4 + $0x9] sm:$0xff]  ;;  %v6073_v12 = vmul.f32 %v11726_v22, %v11842_v4 }
 0x629   : > { %5987 = vst.msk [vmem:[%s11514_s16 + $0x68] sm:$0xff] %vm281_vm0, %v5955_v20  ;;  %v11883_v24 = vld [vmem:[#allocation4 + $0x1a] sm:$0xff]  ;;  %v6108_v23 = vld [vmem:[#allocation4 + $0xa] sm:$0xff] }
 0x62a   : > { %v5348_v35 = vadd.f32 %v11466_v8, %v5312_v26  ;;  %v4757_v45 = vadd.f32 %v4723_v43, %v4478_v58  ;;  %v5926_v5 = vsel %vm5350_vm4, %v5838_v63, 0.0  ;;  %v6176_v26 = vadd.f32 %v6144_v60, %v6043_v42 }
 0x62b   : > { %5927 = vadd.xlane.f32.xlu0 %v5926_v5  ;;  %v5669_v0 = vld [vmem:[#allocation4 + $0x170] sm:$0xff]  ;;  %v6245_v63 = vmul.f32 %v11739_v9, %v11871_v11  ;;  %v6346_v5 = vmul.f32 %v11876_v44, %v11883_v24  ;;  %v6145_v42 = vmul.f32 %v11712_v19, %v6108_v23 }
 0x62c   : > { %v11865_v47 = vld [vmem:[#allocation4 + $0x171] sm:$0xff]  ;;  %5437 = vst.msk [vmem:[#allocation4 + $0x181] sm:$0xff] %vm5350_vm4, %v5348_v35  ;;  %v5706_v55 = vmul.f32 %v11504_v57, %v5669_v0  ;;  %v5035_v51 = vadd.f32 %v5001_v38, %v4757_v45  ;;  %v6110_v35 = vld [vmem:[#allocation4 + $0x22] sm:$0xff]  ;;  %v6044_v38 = vmul.f32 %v11726_v22, %v6007_v17 }
 0x62d   : > { %v11878_v21 = vld [vmem:[#allocation4 + $0x16a] sm:$0xff]  ;;  %v5807_v58 = vmul.f32 %v11519_v62, %v11865_v47 }
 0x62e   : > { %v5886_v8 = vpop.xlane.xlu1 %5885  ;;  %v5738_v20 = vadd.f32 %v5706_v55, %v5637_v27  ;;  %v6174_v45 = vmul.f32 %v11712_v19, %v11878_v21  ;;  %v6277_v27 = vadd.f32 %v6245_v63, %v6176_v26  ;;  %v6177_v63 = vadd.f32 %v6145_v42, %v6044_v38  ;;  %v11925_v42 = vld [vmem:[#allocation4 + $0x3a] sm:$0xff] }
 0x62f   : > { %v5956_v13 = vadd.f32 %v11498_v53, %v5886_v8  ;;  %v5279_v43 = vpop.f32.mrf.mxu0  ;;  %v6149_v33 = vmul.f32 %v11712_v19, %v11925_v42 }
 0x630   : > { %v5313_v37 = vadd.f32 %v5279_v43, %v5035_v51  ;;  %v5839_v31 = vadd.f32 %v5807_v58, %v5738_v20  ;;  %v8305_v51 = vld [vmem:[#allocation4 + $0x21] sm:$0xff]  ;;  %v6147_v20 = vmul.f32 %v11712_v19, %v6110_v35  ;;  %v5638_v58 = vadd.f32 %v5606_v15, %v5505_v32 }
 0x631   : > { %5988 = vst.msk [vmem:[%s11514_s16 + $0x70] sm:$0xff] %vm281_vm0, %v5956_v13  ;;  %v6046_v13 = vmul.f32 %v8305_v51, %v11726_v22  ;;  %v6206_v23 = vadd.f32 %v6174_v45, %v6073_v12  ;;  %v6378_v4 = vadd.f32 %v6346_v5, %v6277_v27  ;;  %v8307_v5 = vld [vmem:[%s12968_s5] ss:$0 sm:$0xff] }
 0x632   : > { %v5349_v52 = vadd.f32 %v8304_v3, %v5313_v37  ;;  %v5929_v60 = vsel %vm5350_vm4, %v5839_v31, 0.0  ;;  %v11909_v31 = vld [vmem:[#allocation4 + $0x39] sm:$0xff]  ;;  %v6246_v3 = vmul.f32 %v8305_v51, %v11739_v9  ;;  %v5506_v12 = vmul.f32 %v8307_v5, %v5669_v0 }
 0x633   : > { %5930 = vadd.xlane.f32.xlu1 %v5929_v60  ;;  %v5670_v55 = vld [vmem:[#allocation4 + $0x180] sm:$0xff]  ;;  %v6248_v26 = vmul.f32 %v11909_v31, %v11739_v9  ;;  %v11914_v60 = vld [vmem:[#allocation4 + $0x172] sm:$0xff]  ;;  %v6410_v0 = vsel %vm5350_vm4, %v6378_v4, 0.0  ;;  %v6048_v25 = vmul.f32 %v11909_v31, %v11726_v22 }
 0x634   : > { %v5771_v8 = vld [vmem:[#allocation4 + $0x181] sm:$0xff]  ;;  %5438 = vst.msk [vmem:[#allocation4 + $0x189] sm:$0xff] %vm5350_vm4, %v5349_v52  ;;  %v5707_v17 = vmul.f32 %v11504_v57, %v5670_v55  ;;  %v6179_v52 = vadd.f32 %v6147_v20, %v6046_v13  ;;  %v6175_v55 = vmul.f32 %v11712_v19, %v11914_v60  ;;  %v6278_v51 = vadd.f32 %v6246_v3, %v6177_v63  ;;  %v6113_v20 = vld [vmem:[#allocation4 + $0x4a] sm:$0xff] }
 0x635   : > { %v6275_v43 = vmul.f32 %v11739_v9, %v5771_v8  ;;  %v5808_v57 = vmul.f32 %v11519_v62, %v5771_v8  ;;  %v6074_v62 = vmul.f32 %v11726_v22, %v11865_v47  ;;  %v8309_v63 = vld [vmem:[%s12968_s5 + $0x2] ss:$0 sm:$0xff] }
 0x636   : > { %v5889_v37 = vpop.xlane.xlu2 %5888  ;;  %v5739_v15 = vadd.f32 %v5707_v17, %v5638_v58  ;;  %v6280_v8 = vadd.f32 %v6248_v26, %v6179_v52  ;;  %v6111_v58 = vld [vmem:[#allocation4 + $0x32] sm:$0xff]  ;;  %v6045_v17 = vmul.f32 %v11726_v22, %v11871_v11  ;;  %v6146_v26 = vmul.f32 %v11712_v19, %v11883_v24 }
 0x637   : > { %v5957_v32 = vadd.f32 %v11498_v53, %v5889_v37  ;;  %v11918_v45 = vadd.f32 %v6275_v43, %v6206_v23  ;;  %v8308_v53 = vld [vmem:[%s12968_s5 + $0x1] ss:$0 sm:$0xff]  ;;  %v6349_v23 = vmul.f32 %v11876_v44, %v11925_v42  ;;  %v6347_v43 = vmul.f32 %v11876_v44, %v6110_v35 }
 0x638   : > { %v5840_v38 = vadd.f32 %v5808_v57, %v5739_v15  ;;  %v5607_v27 = vmul.f32 %v8308_v53, %v11865_v47  ;;  %v6207_v15 = vadd.f32 %v6175_v55, %v6074_v62  ;;  %v6150_v35 = vmul.f32 %v11712_v19, %v6113_v20  ;;  %v11950_v53 = vld [vmem:[#allocation5] ss:$0 sm:$0xff] }
 0x639   : > { %5989 = vst.msk [vmem:[%s11514_s16 + $0x78] sm:$0xff] %vm281_vm0, %v5957_v32  ;;  %v6381_v52 = vadd.f32 %v6349_v23, %v6280_v8  ;;  %v6379_v5 = vadd.f32 %v6347_v43, %v6278_v51  ;;  %v11960_v8 = vld [vmem:[#allocation4 + $0x31] sm:$0xff]  ;;  %v8313_v43 = vld [vmem:[#allocation4 + $0x49] sm:$0xff]  ;;  %v6181_v42 = vadd.f32 %v6149_v33, %v6048_v25 }
 0x63a   : > { %v5932_v13 = vsel %vm5350_vm4, %v5840_v38, 0.0  ;;  %v5639_v4 = vadd.f32 %v5607_v27, %v5506_v12  ;;  %v6148_v38 = vmul.f32 %v11712_v19, %v6111_v58  ;;  %v8311_v27 = vld [vmem:[%s12968_s5 + $0x3] ss:$0 sm:$0xff]  ;;  %v6047_v51 = vmul.f32 %v11960_v8, %v11726_v22 }
 0x63b   : > { %6411 = vadd.xlane.f32.xlu1 %v6410_v0  ;;  %5933 = vadd.xlane.f32.xlu2 %v5932_v13  ;;  %v5671_v37 = vld [vmem:[#allocation4 + $0x188] sm:$0xff]  ;;  %v6178_v13 = vadd.f32 %v6146_v26, %v6045_v17  ;;  %v6247_v17 = vmul.f32 %v11960_v8, %v11739_v9 }
 0x63c   : > { %v5772_v32 = vld [vmem:[#allocation4 + $0x189] sm:$0xff]  ;;  %v5708_v3 = vmul.f32 %v8309_v63, %v5671_v37  ;;  %v6049_v37 = vmul.f32 %v8313_v43, %v11726_v22  ;;  %v6249_v63 = vmul.f32 %v8313_v43, %v11739_v9  ;;  %v6348_v43 = vmul.f32 %v11876_v44, %v6111_v58 }
 0x63d   : > { %v6276_v11 = vmul.f32 %v11739_v9, %v5772_v32  ;;  %v5809_v62 = vmul.f32 %v8311_v27, %v5772_v32  ;;  %v11958_v0 = vld [vmem:[#allocation4 + $0x62] sm:$0xff]  ;;  %v6116_v26 = vld [vmem:[#allocation4 + $0x6a] sm:$0xff] }
 0x63e   : > { %v5892_v57 = vpop.xlane.xlu0 %5891  ;;  %v5740_v12 = vadd.f32 %v5708_v3, %v5639_v4  ;;  %v11967_v4 = vld [vmem:[#allocation4 + $0x61] sm:$0xff]  ;;  %v6114_v3 = vld [vmem:[#allocation4 + $0x52] sm:$0xff]  ;;  %v6352_v27 = vmul.f32 %v11876_v44, %v11958_v0 }
 0x63f   : > { %v5958_v24 = vadd.f32 %v11950_v53, %v5892_v57  ;;  %v11956_v55 = vadd.f32 %v6276_v11, %v6207_v15  ;;  %v6251_v32 = vmul.f32 %v11967_v4, %v11739_v9  ;;  %v6419_v15 = vsel %vm5350_vm4, %v6381_v52, 0.0  ;;  %v11981_v52 = vld [vmem:[#allocation4 + $0x51] sm:$0xff] }
 0x640   : > { %v5841_v23 = vadd.f32 %v5809_v62, %v5740_v12  ;;  %v6413_v11 = vsel %vm5350_vm4, %v6379_v5, 0.0  ;;  %v6180_v57 = vadd.f32 %v6148_v38, %v6047_v51  ;;  %v6182_v12 = vadd.f32 %v6150_v35, %v6049_v37  ;;  %v8316_v35 = vld [vmem:[#allocation4 + $0x69] sm:$0xff] }
 0x641   : > { %5990 = vst.msk [vmem:[%s11514_s16 + $0x80] sm:$0xff] %vm281_vm0, %v5958_v24  ;;  %v6350_v62 = vmul.f32 %v11876_v44, %v6113_v20  ;;  %v6050_v5 = vmul.f32 %v11981_v52, %v11726_v22  ;;  %v6151_v38 = vmul.f32 %v11712_v19, %v6114_v3  ;;  %v6052_v37 = vmul.f32 %v8316_v35, %v11726_v22 }
 0x642   : > { %v5935_v24 = vsel %vm5350_vm4, %v5841_v23, 0.0  ;;  %v6283_v51 = vadd.f32 %v6251_v32, %v6182_v12  ;;  %v6281_v23 = vadd.f32 %v6249_v63, %v6180_v57  ;;  %v6153_v20 = vmul.f32 %v11712_v19, %v6116_v26  ;;  %v11994_v57 = vld [vmem:[#allocation4 + $0x81] sm:$0xff] }
 0x643   : > { %6420 = vadd.xlane.f32.xlu1 %v6419_v15  ;;  %6414 = vadd.xlane.f32.xlu2 %v6413_v11  ;;  %v6279_v11 = vadd.f32 %v6247_v17, %v6178_v13  ;;  %v6252_v58 = vmul.f32 %v8316_v35, %v11739_v9  ;;  %v6254_v12 = vmul.f32 %v11994_v57, %v11739_v9  ;;  %v6318_v17 = vld [vmem:[#allocation4 + $0x82] sm:$0xff] }
 0x644   : > { %5936 = vadd.xlane.f32.xlu0 %v5935_v24  ;;  %v6384_v32 = vadd.f32 %v6352_v27, %v6283_v51  ;;  %v6382_v63 = vadd.f32 %v6350_v62, %v6281_v23  ;;  %v6183_v36 = vadd.f32 %v6151_v38, %v6050_v5  ;;  %v6250_v13 = vmul.f32 %v11981_v52, %v11739_v9  ;;  %v6117_v51 = vld [vmem:[#allocation4 + $0x7a] sm:$0xff]  ;;  %v6119_v23 = vld [vmem:[#allocation4 + $0x92] sm:$0xff] }
 0x645   : > { %v6380_v59 = vadd.f32 %v6348_v43, %v6279_v11  ;;  %v6185_v31 = vadd.f32 %v6153_v20, %v6052_v37  ;;  %v6353_v5 = vmul.f32 %v11876_v44, %v6116_v26  ;;  %v6355_v37 = vmul.f32 %v11876_v44, %v6318_v17 }
 0x646   : > { %v5895_v15 = vpop.xlane.xlu1 %5894  ;;  %v6284_v35 = vadd.f32 %v6252_v58, %v6183_v36  ;;  %v6422_v27 = vsel %vm5350_vm4, %v6382_v63, 0.0  ;;  %v6282_v38 = vadd.f32 %v6250_v13, %v6181_v42  ;;  %v6351_v25 = vmul.f32 %v11876_v44, %v6114_v3  ;;  %v12015_v63 = vld [vmem:[#allocation4 + $0x79] sm:$0xff]  ;;  %v8319_v13 = vld [vmem:[#allocation4 + $0x91] sm:$0xff] }
 0x647   : > { %v5959_v24 = vadd.f32 %v11950_v53, %v5895_v15  ;;  %v6428_v15 = vsel %vm5350_vm4, %v6384_v32, 0.0  ;;  %v6286_v62 = vadd.f32 %v6254_v12, %v6185_v31  ;;  %v6416_v43 = vsel %vm5350_vm4, %v6380_v59, 0.0  ;;  %v12013_v32 = vld [vmem:[#allocation4 + $0xaa] sm:$0xff] }
 0x648   : > { %v6385_v33 = vadd.f32 %v6353_v5, %v6284_v35  ;;  %v6154_v20 = vmul.f32 %v11712_v19, %v6117_v51  ;;  %v6152_v11 = vmul.f32 %v11712_v19, %v11958_v0  ;;  %v6156_v26 = vmul.f32 %v11712_v19, %v6119_v23  ;;  %v12024_v31 = vld [vmem:[#allocation4 + $0xa9] sm:$0xff]  ;;  %v6122_v5 = vld [vmem:[#allocation4 + $0xb2] sm:$0xff] }
 0x649   : > { %5991 = vst.msk [vmem:[%s11514_s16 + $0x88] sm:$0xff] %vm281_vm0, %v5959_v24  ;;  %v6387_v59 = vadd.f32 %v6355_v37, %v6286_v62  ;;  %v6383_v24 = vadd.f32 %v6351_v25, %v6282_v38  ;;  %v6053_v12 = vmul.f32 %v12015_v63, %v11726_v22  ;;  %v6051_v3 = vmul.f32 %v11967_v4, %v11726_v22 }
 0x64a   : > { %v6055_v0 = vmul.f32 %v8319_v13, %v11726_v22  ;;  %v6257_v35 = vmul.f32 %v12024_v31, %v11739_v9  ;;  %v6255_v42 = vmul.f32 %v8319_v13, %v11739_v9  ;;  %v6253_v4 = vmul.f32 %v12015_v63, %v11739_v9 }
 0x64b   : > { %6429 = vadd.xlane.f32.xlu1 %v6428_v15  ;;  %6423 = vadd.xlane.f32.xlu2 %v6422_v27  ;;  %v6120_v15 = vld [vmem:[#allocation4 + $0x9a] sm:$0xff]  ;;  %v6431_v27 = vsel %vm5350_vm4, %v6385_v33, 0.0  ;;  %v6186_v62 = vadd.f32 %v6154_v20, %v6053_v12  ;;  %v6437_v38 = vsel %vm5350_vm4, %v6387_v59, 0.0  ;;  %v6356_v25 = vmul.f32 %v11876_v44, %v6119_v23 }
 0x64c   : > { %6417 = vadd.xlane.f32.xlu0 %v6416_v43  ;;  %v6184_v43 = vadd.f32 %v6152_v11, %v6051_v3  ;;  %v6188_v37 = vadd.f32 %v6156_v26, %v6055_v0  ;;  %v6354_v33 = vmul.f32 %v11876_v44, %v6117_v51  ;;  %v12038_v20 = vld [vmem:[#allocation4 + $0x99] sm:$0xff]  ;;  %v6157_v12 = vmul.f32 %v11712_v19, %v6120_v15  ;;  %v8322_v3 = vld [vmem:[#allocation4 + $0xb1] sm:$0xff] }
 0x64d   : > { %v6056_v11 = vmul.f32 %v12038_v20, %v11726_v22  ;;  %v6287_v26 = vadd.f32 %v6255_v42, %v6186_v62  ;;  %v6058_v23 = vmul.f32 %v8322_v3, %v11726_v22  ;;  %v6159_v13 = vmul.f32 %v11712_v19, %v6122_v5  ;;  %v12050_v42 = vld [vmem:[#allocation4 + $0xc9] sm:$0xff] }
 0x64e   : > { %v5898_v36 = vpop.xlane.xlu2 %5897  ;;  %v6289_v59 = vadd.f32 %v6257_v35, %v6188_v37  ;;  %v6258_v51 = vmul.f32 %v8322_v3, %v11739_v9  ;;  %v6260_v62 = vmul.f32 %v12050_v42, %v11739_v9 }
 0x64f   : > { %v5960_v58 = vadd.f32 %v11950_v53, %v5898_v36  ;;  %v6358_v36 = vmul.f32 %v11876_v44, %v12013_v32  ;;  %v6388_v35 = vadd.f32 %v6356_v25, %v6287_v26  ;;  %v6189_v48 = vadd.f32 %v6157_v12, %v6056_v11  ;;  %v6125_v26 = vld [vmem:[#allocation4 + $0xda] sm:$0xff] }
 0x650   : > { %v6359_v11 = vmul.f32 %v11876_v44, %v6122_v5  ;;  %v6162_v5 = vmul.f32 %v11712_v19, %v6125_v26 }
 0x651   : > { %5992 = vst.msk [vmem:[%s11514_s16 + $0x90] sm:$0xff] %vm281_vm0, %v5960_v58  ;;  %v6425_v58 = vsel %vm5350_vm4, %v6383_v24, 0.0  ;;  %v6285_v24 = vadd.f32 %v6253_v4, %v6184_v43  ;;  %v6256_v43 = vmul.f32 %v12038_v20, %v11739_v9  ;;  %v6191_v4 = vadd.f32 %v6159_v13, %v6058_v23 }
 0x652   : > { %v6290_v3 = vadd.f32 %v6258_v51, %v6189_v48  ;;  %v6357_v13 = vmul.f32 %v11876_v44, %v6120_v15  ;;  %v6158_v51 = vmul.f32 %v11712_v19, %v12013_v32  ;;  %v6057_v15 = vmul.f32 %v12024_v31, %v11726_v22 }
 0x653   : > { %6438 = vadd.xlane.f32.xlu1 %v6437_v38  ;;  %6432 = vadd.xlane.f32.xlu2 %v6431_v27  ;;  %v6054_v27 = vmul.f32 %v11994_v57, %v11726_v22  ;;  %v6155_v38 = vmul.f32 %v11712_v19, %v6318_v17  ;;  %v6386_v37 = vadd.f32 %v6354_v33, %v6285_v24  ;;  %v6324_v57 = vld [vmem:[#allocation4 + $0xca] sm:$0xff] }
 0x654   : > { %6426 = vadd.xlane.f32.xlu0 %v6425_v58  ;;  %v6390_v58 = vadd.f32 %v6358_v36, %v6289_v59  ;;  %v6440_v36 = vsel %vm5350_vm4, %v6388_v35, 0.0  ;;  %v6292_v25 = vadd.f32 %v6260_v62, %v6191_v4  ;;  %v6123_v59 = vld [vmem:[#allocation4 + $0xc2] sm:$0xff]  ;;  %v6391_v23 = vadd.f32 %v6359_v11, %v6290_v3  ;;  %v12069_v35 = vld [vmem:[#allocation4 + $0xf2] sm:$0xff]  ;;  %v6128_v11 = vld [vmem:[#allocation4 + $0xfa] sm:$0xff] }
 0x655   : > { %v6187_v17 = vadd.f32 %v6155_v38, %v6054_v27  ;;  %v6434_v33 = vsel %vm5350_vm4, %v6386_v37, 0.0  ;;  %v6160_v24 = vmul.f32 %v11712_v19, %v6123_v59  ;;  %v12071_v62 = vld [vmem:[#allocation4 + $0xc1] sm:$0xff]  ;;  %v12080_v4 = vld [vmem:[#allocation4 + $0xf1] sm:$0xff] }
 0x656   : > { %v5901_v0 = vpop.xlane.xlu0 %5900  ;;  %13563 = vst [vmem:[#allocation102_spill] sm:$0xff] %v12071_v62  ;;  %v6059_v37 = vmul.f32 %v12071_v62, %v11726_v22  ;;  %v6263_v3 = vmul.f32 %v12080_v4, %v11739_v9  ;;  %v6259_v31 = vmul.f32 %v12071_v62, %v11739_v9 }
 0x657   : > { %v5961_v2 = vadd.f32 %v11950_v53, %v5901_v0  ;;  %v6446_v0 = vsel %vm5350_vm4, %v6390_v58, 0.0  ;;  %v6288_v12 = vadd.f32 %v6256_v43, %v6187_v17  ;;  %v8325_v43 = vld [vmem:[#allocation4 + $0xd9] sm:$0xff] }
 0x658   : > { %v6061_v32 = vmul.f32 %v8325_v43, %v11726_v22  ;;  %v6261_v17 = vmul.f32 %v8325_v43, %v11739_v9 }
 0x659   : > { %5993 = vst.msk [vmem:[%s11514_s16 + $0x98] sm:$0xff] %vm281_vm0, %v5961_v2  ;;  %v6361_v2 = vmul.f32 %v11876_v44, %v6324_v57  ;;  %v6389_v58 = vadd.f32 %v6357_v13, %v6288_v12  ;;  %v6362_v13 = vmul.f32 %v11876_v44, %v6125_v26  ;;  %v6165_v26 = vmul.f32 %v11712_v19, %v6128_v11 }
 0x65b   : > { %6447 = vadd.xlane.f32.xlu1 %v6446_v0  ;;  %6441 = vadd.xlane.f32.xlu2 %v6440_v36  ;;  %v6393_v38 = vadd.f32 %v6361_v2, %v6292_v25  ;;  %v6126_v0 = vld [vmem:[#allocation4 + $0xe2] sm:$0xff]  ;;  %v6449_v36 = vsel %vm5350_vm4, %v6391_v23, 0.0  ;;  %v6192_v25 = vadd.f32 %v6160_v24, %v6059_v37  ;;  %v6194_v2 = vadd.f32 %v6162_v5, %v6061_v32 }
 0x65c   : > { %6435 = vadd.xlane.f32.xlu0 %v6434_v33  ;;  %v6190_v33 = vadd.f32 %v6158_v51, %v6057_v15  ;;  %v6360_v23 = vmul.f32 %v11876_v44, %v6123_v59  ;;  %v12094_v24 = vld [vmem:[#allocation4 + $0xe1] sm:$0xff]  ;;  %v6163_v37 = vmul.f32 %v11712_v19, %v6126_v0  ;;  %v8328_v15 = vld [vmem:[#allocation4 + $0xf9] sm:$0xff]  ;;  %v6060_v59 = vmul.f32 %v12050_v42, %v11726_v22 }
 0x65d   : > { %v6455_v12 = vsel %vm5350_vm4, %v6393_v38, 0.0  ;;  %v6062_v51 = vmul.f32 %v12094_v24, %v11726_v22  ;;  %v6295_v38 = vadd.f32 %v6263_v3, %v6194_v2  ;;  %v6293_v5 = vadd.f32 %v6261_v17, %v6192_v25 }
 0x65e   : > { %v5904_v48 = vpop.xlane.xlu1 %5903  ;;  %v6064_v43 = vmul.f32 %v8328_v15, %v11726_v22  ;;  %v6291_v32 = vadd.f32 %v6259_v31, %v6190_v33  ;;  %v6262_v33 = vmul.f32 %v12094_v24, %v11739_v9 }
 0x65f   : > { %v5962_v27 = vadd.f32 %v11950_v53, %v5904_v48  ;;  %v6364_v48 = vmul.f32 %v11876_v44, %v12069_v35  ;;  %v6394_v10 = vadd.f32 %v6362_v13, %v6293_v5  ;;  %v6195_v2 = vadd.f32 %v6163_v37, %v6062_v51  ;;  %v6129_v37 = vld [vmem:[#allocation4 + $0x10a] sm:$0xff] }
 0x660   : > { %v6392_v25 = vadd.f32 %v6360_v23, %v6291_v32  ;;  %v6197_v31 = vadd.f32 %v6165_v26, %v6064_v43  ;;  %v6365_v23 = vmul.f32 %v11876_v44, %v6128_v11  ;;  %v6363_v26 = vmul.f32 %v11876_v44, %v6126_v0 }
 0x661   : > { %5994 = vst.msk [vmem:[%s11514_s16 + $0xa0] sm:$0xff] %vm281_vm0, %v5962_v27  ;;  %v6443_v27 = vsel %vm5350_vm4, %v6389_v58, 0.0  ;;  %v6264_v58 = vmul.f32 %v8328_v15, %v11739_v9  ;;  %v6396_v61 = vadd.f32 %v6364_v48, %v6295_v38  ;;  %v6330_v15 = vld [vmem:[#allocation4 + $0x112] sm:$0xff]  ;;  %v6458_v48 = vsel %vm5350_vm4, %v6394_v10, 0.0 }
 0x662   : > { %v6452_v38 = vsel %vm5350_vm4, %v6392_v25, 0.0  ;;  %v6367_v5 = vmul.f32 %v11876_v44, %v6330_v15  ;;  %v6166_v10 = vmul.f32 %v11712_v19, %v6129_v37  ;;  %v6164_v11 = vmul.f32 %v11712_v19, %v12069_v35  ;;  %v6132_v25 = vld [vmem:[#allocation4 + $0x12a] sm:$0xff] }
 0x663   : > { %6456 = vadd.xlane.f32.xlu1 %v6455_v12  ;;  %6450 = vadd.xlane.f32.xlu2 %v6449_v36  ;;  %v6161_v36 = vmul.f32 %v11712_v19, %v6324_v57  ;;  %v6296_v42 = vadd.f32 %v6264_v58, %v6195_v2  ;;  %v6464_v57 = vsel %vm5350_vm4, %v6396_v61, 0.0 }
 0x664   : > { %6444 = vadd.xlane.f32.xlu0 %v6443_v27  ;;  %v8329_v27 = vld [vmem:[#allocation4 + $0x111] sm:$0xff] }
 0x665   : > { %v6266_v3 = vmul.f32 %v8329_v27, %v11739_v9  ;;  %v6193_v62 = vadd.f32 %v6161_v36, %v6060_v59  ;;  %v6397_v43 = vadd.f32 %v6365_v23, %v6296_v42  ;;  %v6333_v36 = vld [vmem:[#allocation4 + $0x13a] sm:$0xff]  ;;  %v6267_v27 = vmul.f32 %v11739_v9, %v11702_v18  ;;  %v8331_v23 = vld [vmem:[#allocation4 + $0x111] sm:$0xff] }
 0x666   : > { %v5907_v12 = vpop.xlane.xlu2 %5906  ;;  %v6370_v2 = vmul.f32 %v11876_v44, %v6333_v36 }
 0x667   : > { %v5963_v17 = vadd.f32 %v11950_v53, %v5907_v12  ;;  %v6298_v13 = vadd.f32 %v6266_v3, %v6197_v31  ;;  %v6294_v51 = vadd.f32 %v6262_v33, %v6193_v62  ;;  %v12121_v62 = vld [vmem:[#allocation4 + $0x109] sm:$0xff]  ;;  %v6467_v0 = vsel %vm5350_vm4, %v6397_v43, 0.0 }
 0x668   : > { %v6065_v12 = vmul.f32 %v12121_v62, %v11726_v22  ;;  %v6063_v3 = vmul.f32 %v12080_v4, %v11726_v22  ;;  %v6368_v31 = vmul.f32 %v11876_v44, %v11707_v39  ;;  %v6167_v39 = vmul.f32 %v11712_v19, %v6330_v15 }
 0x669   : > { %5995 = vst.msk [vmem:[%s11514_s16 + $0xa8] sm:$0xff] %vm281_vm0, %v5963_v17  ;;  %v6399_v61 = vadd.f32 %v6367_v5, %v6298_v13  ;;  %v6395_v59 = vadd.f32 %v6363_v26, %v6294_v51  ;;  %v6265_v17 = vmul.f32 %v12121_v62, %v11739_v9  ;;  %v6169_v13 = vmul.f32 %v11712_v19, %v6132_v25 }
 0x66a   : > { %v6198_v33 = vadd.f32 %v6166_v10, %v6065_v12  ;;  %v6196_v42 = vadd.f32 %v6164_v11, %v6063_v3  ;;  %v6066_v51 = vmul.f32 %v8331_v23, %v11726_v22  ;;  %v6402_v43 = vadd.f32 %v6370_v2, %v11754_v16 }
 0x66b   : > { %6465 = vadd.xlane.f32.xlu1 %v6464_v57  ;;  %6459 = vadd.xlane.f32.xlu2 %v6458_v48  ;;  %v6473_v35 = vsel %vm5350_vm4, %v6399_v61, 0.0  ;;  %v6461_v18 = vsel %vm5350_vm4, %v6395_v59, 0.0  ;;  %v6366_v57 = vmul.f32 %v11876_v44, %v6129_v37  ;;  %v6068_v48 = vmul.f32 %v11726_v22, %v11748_v41  ;;  %v6336_v59 = vld [vmem:[#allocation4 + $0x15a] sm:$0xff] }
 0x66c   : > { %6453 = vadd.xlane.f32.xlu0 %v6452_v38  ;;  %v6299_v4 = vadd.f32 %v6267_v27, %v6198_v33  ;;  %v6297_v38 = vadd.f32 %v6265_v17, %v6196_v42  ;;  %v6270_v37 = vmul.f32 %v11739_v9, %v11771_v56  ;;  %v6268_v10 = vmul.f32 %v11739_v9, %v11748_v41  ;;  %v6339_v33 = vld [vmem:[#allocation4 + $0x182] sm:$0xff] }
 0x66d   : > { %v6199_v22 = vadd.f32 %v6167_v39, %v6066_v51  ;;  %v6482_v19 = vsel %vm5350_vm4, %v6402_v43, 0.0  ;;  %v6373_v12 = vmul.f32 %v11876_v44, %v6336_v59  ;;  %v6371_v41 = vmul.f32 %v11876_v44, %v11801_v46  ;;  %v8333_v46 = vld [vmem:[%s12968_s5 + $0x4] ss:$0 sm:$0xff] }
 0x66e   : > { %v5910_v32 = vpop.xlane.xlu0 %5909  ;;  %v6400_v26 = vadd.f32 %v6368_v31, %v6299_v4  ;;  %v6398_v61 = vadd.f32 %v6366_v57, %v6297_v38  ;;  %v6369_v27 = vmul.f32 %v11876_v44, %v6132_v25  ;;  %v8332_v31 = vld [vmem:[%s12968_s5 + $0x5] ss:$0 sm:$0xff]  ;;  %v6069_v25 = vmul.f32 %v8333_v46, %v11777_v50 }
 0x66f   : > { %v5964_v58 = vadd.f32 %v11950_v53, %v5910_v32  ;;  %v6300_v11 = vadd.f32 %v6268_v10, %v6199_v22  ;;  %v6405_v3 = vadd.f32 %v6373_v12, %v11829_v34  ;;  %v6271_v34 = vmul.f32 %v11739_v9, %v11827_v29 }
 0x670   : > { %v6476_v15 = vsel %vm5350_vm4, %v6400_v26, 0.0  ;;  %v6470_v56 = vsel %vm5350_vm4, %v6398_v61, 0.0  ;;  %v6374_v4 = vmul.f32 %v11876_v44, %v11878_v21  ;;  %v6372_v9 = vmul.f32 %v11876_v44, %v11825_v7  ;;  %v8334_v26 = vld [vmem:[%s12968_s5 + $0x6] ss:$0 sm:$0xff]  ;;  %v6340_v7 = vld [vmem:[#allocation4 + $0x18a] sm:$0xff] }
 0x671   : > { %5996 = vst.msk [vmem:[%s11514_s16 + $0xb0] sm:$0xff] %vm281_vm0, %v5964_v58  ;;  %v6201_v58 = vadd.f32 %v6169_v13, %v6068_v48  ;;  %v6401_v2 = vadd.f32 %v6369_v27, %v6300_v11  ;;  %v6491_v42 = vsel %vm5350_vm4, %v6405_v3, 0.0  ;;  %v12178_v48 = vld [vmem:[#allocation4 + $0x159] sm:$0xff]  ;;  %v6173_v23 = vmul.f32 %v8332_v31, %v6336_v59  ;;  %v8338_v27 = vld [vmem:[#allocation4 + $0x30] sm:$0xff] }
 0x672   : > { %v6072_v38 = vmul.f32 %v8333_v46, %v12178_v48  ;;  %v6406_v21 = vadd.f32 %v6374_v4, %v11857_v49  ;;  %v6575_v49 = vld [vmem:[#allocation4 + $0x18] sm:$0xff]  ;;  %v6375_v22 = vmul.f32 %v11876_v44, %v11914_v60 }
 0x673   : > { %6474 = vadd.xlane.f32.xlu1 %v6473_v35  ;;  %6468 = vadd.xlane.f32.xlu2 %v6467_v0  ;;  %v6302_v16 = vadd.f32 %v6270_v37, %v6201_v58  ;;  %v6479_v13 = vsel %vm5350_vm4, %v6401_v2, 0.0  ;;  %v6274_v37 = vmul.f32 %v8334_v26, %v11865_v47  ;;  %v12195_v58 = vld [vmem:[#allocation4 + $0x19] sm:$0xff]  ;;  %v6377_v47 = vmul.f32 %v11876_v44, %v6340_v7 }
 0x674   : > { %6462 = vadd.xlane.f32.xlu0 %v6461_v18  ;;  %v6170_v18 = vmul.f32 %v8332_v31, %v6333_v36  ;;  %v6376_v36 = vmul.f32 %v11876_v44, %v6339_v33  ;;  %v6494_v61 = vsel %vm5350_vm4, %v6406_v21, 0.0 }
 0x675   : > { %v6403_v17 = vadd.f32 %v6371_v41, %v6302_v16  ;;  %v12210_v16 = vld [vmem:[%s12968_s5 + $0x9] ss:$0 sm:$0xff]  ;;  %v6409_v12 = vadd.f32 %v6377_v47, %v11956_v55  ;;  %v12219_v41 = vld [vmem:[%s12968_s5 + $0xa] ss:$0 sm:$0xff]  ;;  %v12227_v55 = vld [vmem:[#allocation4 + $0x39] sm:$0xff] }
 0x676   : > { %v5913_v5 = vpop.xlane.xlu1 %5912  ;;  %v6202_v50 = vadd.f32 %v6170_v18, %v6069_v25  ;;  %v6408_v39 = vadd.f32 %v6376_v36, %v11918_v45  ;;  %v12233_v18 = vld [vmem:[%s12968_s5 + $0xb] ss:$0 sm:$0xff]  ;;  %v8340_v25 = vld [vmem:[#allocation4 + $0x38] sm:$0xff] }
 0x677   : > { %v5965_v32 = vadd.f32 %v11950_v53, %v5913_v5  ;;  %v6485_v57 = vsel %vm5350_vm4, %v6403_v17, 0.0  ;;  %v13564_v17 = vld [vmem:[#allocation120_spill] sm:$0xff]  ;;  %v6503_v2 = vsel %vm5350_vm4, %v6409_v12, 0.0  ;;  %v6916_v46 = vmul.f32 %v12233_v18, %v11960_v8  ;;  %v13565_v8 = vld [vmem:[#allocation22_spill] sm:$0xff] }
 0x678   : > { %v6303_v29 = vadd.f32 %v6271_v34, %v6202_v50  ;;  %v6500_v10 = vsel %vm5350_vm4, %v6408_v39, 0.0  ;;  %v6919_v39 = vmul.f32 %v12233_v18, %v11981_v52  ;;  %v6995_v52 = vsel %vm5350_vm4, %v11364_v28, 0.0 }
 0x679   : > { %5997 = vst.msk [vmem:[%s11514_s16 + $0xb8] sm:$0xff] %vm281_vm0, %v5965_v32  ;;  %v6205_v32 = vadd.f32 %v6173_v23, %v6072_v38  ;;  %v6986_v38 = vsel %vm5350_vm4, %v13565_v8, 0.0  ;;  %v12248_v23 = vld [vmem:[#allocation4 + $0x61] sm:$0xff] }
 0x67a   : > { %v6404_v43 = vadd.f32 %v6372_v9, %v6303_v29  ;;  %v6992_v29 = vsel %vm5350_vm4, %v11331_v40, 0.0  ;;  %v6719_v40 = vmul.f32 %v12210_v16, %v12248_v23 }
 0x67b   : > { %6483 = vadd.xlane.f32.xlu1 %v6482_v19  ;;  %6477 = vadd.xlane.f32.xlu2 %v6476_v15  ;;  %v6306_v59 = vadd.f32 %v6274_v37, %v6205_v32  ;;  %v12204_v19 = vld [vmem:[%s12968_s5 + $0x8] ss:$0 sm:$0xff]  ;;  %v8343_v32 = vld [vmem:[#allocation4 + $0x78] sm:$0xff] }
 0x67c   : > { %6471 = vadd.xlane.f32.xlu0 %v6470_v56  ;;  %v6488_v45 = vsel %vm5350_vm4, %v6404_v43, 0.0  ;;  %v6612_v15 = vmul.f32 %v12204_v19, %v6575_v49  ;;  %v6713_v56 = vmul.f32 %v12210_v16, %v12195_v58  ;;  %v6615_v34 = vmul.f32 %v8340_v25, %v12204_v19 }
 0x67d   : > { %v6407_v60 = vadd.f32 %v6375_v22, %v6306_v59  ;;  %v7001_v49 = vsel %vm5350_vm4, %v11395_v6, 0.0  ;;  %v6922_v22 = vmul.f32 %v12233_v18, %v12015_v63  ;;  %v7004_v63 = vsel %vm5350_vm4, %v11423_v14, 0.0 }
 0x67e   : > { %v5916_v0 = vpop.xlane.xlu2 %5915  ;;  %v6745_v3 = vadd.f32 %v6713_v56, %v6612_v15  ;;  %v8344_v15 = vld [vmem:[#allocation4 + $0x80] sm:$0xff] }
 0x67f   : > { %v5966_v35 = vadd.f32 %v11950_v53, %v5916_v0  ;;  %v6815_v0 = vmul.f32 %v8338_v27, %v12219_v41  ;;  %v6497_v33 = vsel %vm5350_vm4, %v6407_v60, 0.0  ;;  %v6621_v56 = vmul.f32 %v8344_v15, %v12204_v19 }
 0x681   : > { %5998 = vst.msk [vmem:[%s11514_s16 + $0xc0] sm:$0xff] %vm281_vm0, %v5966_v35  ;;  %v6983_v35 = vsel %vm5350_vm4, %v13564_v17, 0.0  ;;  %v6847_v31 = vadd.f32 %v6815_v0, %v6745_v3  ;;  %v7010_v0 = vsel %vm5350_vm4, %v11458_v54, 0.0  ;;  %v12280_v3 = vld [vmem:[#allocation4 + $0xa9] sm:$0xff] }
 0x682   : > { %v6725_v14 = vmul.f32 %v12210_v16, %v12280_v3 }
 0x683   : > { %6492 = vadd.xlane.f32.xlu1 %v6491_v42  ;;  %6486 = vadd.xlane.f32.xlu2 %v6485_v57  ;;  %v6716_v42 = vmul.f32 %v12210_v16, %v12227_v55  ;;  %v6948_v36 = vadd.f32 %v6916_v46, %v6847_v31  ;;  %v8346_v31 = vld [vmem:[#allocation4 + $0xa8] sm:$0xff] }
 0x684   : > { %6480 = vadd.xlane.f32.xlu0 %v6479_v13  ;;  %v8341_v13 = vld [vmem:[#allocation4 + $0x50] sm:$0xff]  ;;  %v6624_v54 = vmul.f32 %v8346_v31, %v12204_v19 }
 0x685   : > { %v6818_v50 = vmul.f32 %v8341_v13, %v12219_v41  ;;  %v6748_v9 = vadd.f32 %v6716_v42, %v6615_v34 }
 0x686   : > { %v5919_v51 = vpop.xlane.xlu0 %5918  ;;  %v6757_v13 = vadd.f32 %v6725_v14, %v6624_v54  ;;  %v6600_v54 = vld [vmem:[#allocation4 + $0x140] sm:$0xff] }
 0x687   : > { %v5967_v5 = vadd.f32 %v11950_v53, %v5919_v51  ;;  %v6980_v51 = vsel %vm5350_vm4, %v6948_v36, 0.0  ;;  %v6850_v21 = vadd.f32 %v6818_v50, %v6748_v9  ;;  %v7013_v50 = vsel %vm5350_vm4, %v11478_v1, 0.0  ;;  %v12301_v9 = vld [vmem:[#allocation4 + $0xc9] sm:$0xff]  ;;  %v12337_v14 = vld [vmem:[#allocation4 + $0x141] sm:$0xff] }
 0x689   : > { %5999 = vst.msk [vmem:[%s11514_s16 + $0xc8] sm:$0xff] %vm281_vm0, %v5967_v5  ;;  %v8342_v5 = vld [vmem:[#allocation4 + $0x60] sm:$0xff]  ;;  %v6951_v7 = vadd.f32 %v6919_v39, %v6850_v21  ;;  %v8348_v21 = vld [vmem:[#allocation4 + $0xc8] sm:$0xff] }
 0x68a   : > { %v6618_v43 = vmul.f32 %v8342_v5, %v12204_v19  ;;  %v6627_v39 = vmul.f32 %v8348_v21, %v12204_v19 }
 0x68b   : > { %6495 = vadd.xlane.f32.xlu2 %v6494_v61  ;;  %6501 = vadd.xlane.f32.xlu1 %v6500_v10  ;;  %v6821_v61 = vmul.f32 %v8343_v32, %v12219_v41  ;;  %v6989_v59 = vsel %vm5350_vm4, %v6951_v7, 0.0  ;;  %v8349_v7 = vld [vmem:[#allocation4 + $0xe0] sm:$0xff] }
 0x68c   : > { %6489 = vadd.xlane.f32.xlu0 %v6488_v45  ;;  %v6751_v10 = vadd.f32 %v6719_v40, %v6618_v43  ;;  %v12264_v45 = vld [vmem:[#allocation4 + $0x81] sm:$0xff]  ;;  %v6830_v32 = vmul.f32 %v8349_v7, %v12219_v41 }
 0x68d   : > { %v6722_v6 = vmul.f32 %v12210_v16, %v12264_v45 }
 0x68e   : > { %v5922_v11 = vpop.xlane.xlu1 %5921  ;;  %v6853_v47 = vadd.f32 %v6821_v61, %v6751_v10 }
 0x68f   : > { %v5968_v44 = vadd.f32 %v11950_v53, %v5922_v11  ;;  %v6754_v27 = vadd.f32 %v6722_v6, %v6621_v56  ;;  %v8350_v56 = vld [vmem:[#allocation4 + $0xf0] sm:$0xff] }
 0x690   : > { %v6954_v12 = vadd.f32 %v6922_v22, %v6853_v47  ;;  %v13568_v47 = vld [vmem:[#allocation24_spill] sm:$0xff]  ;;  %v6630_v6 = vmul.f32 %v8350_v56, %v12204_v19 }
 0x691   : > { %6000 = vst.msk [vmem:[%s11514_s16 + $0xd0] sm:$0xff] %vm281_vm0, %v5968_v44  ;;  %v8345_v44 = vld [vmem:[#allocation4 + $0x98] sm:$0xff]  ;;  %v7022_v22 = vsel %vm5350_vm4, %v13568_v47, 0.0  ;;  %v12378_v56 = vld [vmem:[#allocation4 + $0x180] sm:$0xff] }
 0x692   : > { %v6824_v60 = vmul.f32 %v8345_v44, %v12219_v41  ;;  %v6998_v17 = vsel %vm5350_vm4, %v6954_v12, 0.0 }
 0x693   : > { %6984 = vadd.xlane.f32.xlu1 %v6983_v35  ;;  %6504 = vadd.xlane.f32.xlu2 %v6503_v2  ;;  %v12283_v35 = vld [vmem:[#allocation5] ss:$0 sm:$0xff] }
 0x694   : > { %6498 = vadd.xlane.f32.xlu0 %v6497_v33  ;;  %v6856_v2 = vadd.f32 %v6824_v60, %v6754_v27  ;;  %v6925_v33 = vmul.f32 %v12233_v18, %v12038_v20  ;;  %v7019_v20 = vsel %vm5350_vm4, %v11538_v30, 0.0  ;;  %v6728_v30 = vmul.f32 %v12210_v16, %v12301_v9  ;;  %v8351_v60 = vld [vmem:[#allocation4 + $0x108] sm:$0xff] }
 0x695   : > { %v6833_v27 = vmul.f32 %v8351_v60, %v12219_v41 }
 0x696   : > { %v5925_v57 = vpop.xlane.xlu2 %5924  ;;  %v6760_v10 = vadd.f32 %v6728_v30, %v6627_v39 }
 0x697   : > { %v5969_v4 = vadd.f32 %v11950_v53, %v5925_v57  ;;  %v6957_v57 = vadd.f32 %v6925_v33, %v6856_v2 }
 0x699   : > { %6001 = vst.msk [vmem:[%s11514_s16 + $0xd8] sm:$0xff] %vm281_vm0, %v5969_v4  ;;  %v8347_v4 = vld [vmem:[#allocation4 + $0xc0] sm:$0xff] }
 0x69a   : > { %v6827_v36 = vmul.f32 %v8347_v4, %v12219_v41  ;;  %v12348_v4 = vld [vmem:[#allocation4 + $0x158] sm:$0xff] }
 0x69b   : > { %6993 = vadd.xlane.f32.xlu1 %v6992_v29  ;;  %6987 = vadd.xlane.f32.xlu2 %v6986_v38  ;;  %v7007_v29 = vsel %vm5350_vm4, %v6957_v57, 0.0  ;;  %v13566_v38 = vld [vmem:[#allocation102_spill] sm:$0xff] }
 0x69c   : > { %6981 = vadd.xlane.f32.xlu0 %v6980_v51  ;;  %v6859_v8 = vadd.f32 %v6827_v36, %v6757_v13  ;;  %v6928_v51 = vmul.f32 %v12233_v18, %v13566_v38  ;;  %v8352_v36 = vld [vmem:[#allocation4 + $0x128] sm:$0xff]  ;;  %v6738_v38 = vmul.f32 %v12210_v16, %v12337_v14 }
 0x69d   : > { %v6635_v13 = vmul.f32 %v8352_v36, %v12204_v19  ;;  %v6606_v36 = vld [vmem:[#allocation4 + $0x188] sm:$0xff] }
 0x69e   : > { %v5928_v26 = vpop.xlane.xlu0 %5927 }
 0x69f   : > { %v5970_v37 = vadd.f32 %v11950_v53, %v5928_v26 }
 0x6a1   : > { %6002 = vst.msk [vmem:[%s11514_s16 + $0xe0] sm:$0xff] %vm281_vm0, %v5970_v37  ;;  %v6960_v37 = vadd.f32 %v6928_v51, %v6859_v8  ;;  %v6637_v8 = vmul.f32 %v12204_v19, %v6600_v54  ;;  %v6838_v51 = vmul.f32 %v12219_v41, %v6600_v54  ;;  %v6843_v54 = vmul.f32 %v12219_v41, %v12378_v56 }
 0x6a3   : > { %7002 = vadd.xlane.f32.xlu1 %v7001_v49  ;;  %6996 = vadd.xlane.f32.xlu2 %v6995_v52  ;;  %v12315_v49 = vld [vmem:[#allocation4 + $0xf1] sm:$0xff]  ;;  %v7016_v15 = vsel %vm5350_vm4, %v6960_v37, 0.0  ;;  %v6770_v37 = vadd.f32 %v6738_v38, %v6637_v8  ;;  %v12411_v38 = vld [vmem:[#allocation4 + $0x49] sm:$0xff] }
 0x6a4   : > { %6990 = vadd.xlane.f32.xlu0 %v6989_v59  ;;  %v13567_v52 = vld [vmem:[#allocation58_spill] sm:$0xff] }
 0x6a5   : > { %v7028_v59 = vsel %vm5350_vm4, %v13567_v52, 0.0 }
 0x6a6   : > { %v5931_v11 = vpop.xlane.xlu1 %5930 }
 0x6a7   : > { %v5971_v28 = vadd.f32 %v11950_v53, %v5931_v11  ;;  %v6731_v11 = vmul.f32 %v12210_v16, %v12315_v49 }
 0x6a9   : > { %6003 = vst.msk [vmem:[%s11514_s16 + $0xe8] sm:$0xff] %vm281_vm0, %v5971_v28  ;;  %v6931_v28 = vmul.f32 %v12233_v18, %v12094_v24  ;;  %v6763_v31 = vadd.f32 %v6731_v11, %v6630_v6  ;;  %v13569_v24 = vld [vmem:[#allocation12_spill] sm:$0xff]  ;;  %v8354_v6 = vld [vmem:[#allocation4 + $0x150] sm:$0xff] }
 0x6aa   : > { %v6638_v11 = vmul.f32 %v8354_v6, %v12204_v19 }
 0x6ab   : > { %7011 = vadd.xlane.f32.xlu1 %v7010_v0  ;;  %7005 = vadd.xlane.f32.xlu2 %v7004_v63 }
 0x6ac   : > { %6999 = vadd.xlane.f32.xlu0 %v6998_v17 }
 0x6ae   : > { %v6412_v46 = vpop.xlane.xlu1 %6411  ;;  %v5934_v25 = vpop.xlane.xlu2 %5933 }
 0x6af   : > { %v6510_v34 = vadd.f32 %v12283_v35, %v6412_v46  ;;  %v5972_v42 = vadd.f32 %v11950_v53, %v5934_v25  ;;  %v7037_v46 = vsel %vm5350_vm4, %v13569_v24, 0.0  ;;  %v13570_v25 = vld [vmem:[#allocation137_spill] sm:$0xff] }
 0x6b0   : > { %v12395_v24 = vld [vmem:[%s12968_s5 + $0xc] ss:$0 sm:$0xff] }
 0x6b1   : > { %8113 = vst.msk [vmem:[%s11514_s16 + $0x100] sm:$0xff] %vm281_vm0, %v6510_v34  ;;  %v7031_v34 = vsel %vm5350_vm4, %v13570_v25, 0.0 }
 0x6b2   : > { %6004 = vst.msk [vmem:[%s11514_s16 + $0xf0] sm:$0xff] %vm281_vm0, %v5972_v42  ;;  %v6865_v42 = vadd.f32 %v6833_v27, %v6763_v31 }
 0x6b3   : > { %7020 = vadd.xlane.f32.xlu1 %v7019_v20  ;;  %7014 = vadd.xlane.f32.xlu2 %v7013_v50  ;;  %v8353_v20 = vld [vmem:[#allocation4 + $0x129] sm:$0xff] }
 0x6b4   : > { %7008 = vadd.xlane.f32.xlu0 %v7007_v29  ;;  %v6736_v50 = vmul.f32 %v8353_v20, %v12210_v16  ;;  %v6934_v29 = vmul.f32 %v12233_v18, %v12121_v62  ;;  %v12406_v20 = vld [vmem:[%s12968_s5 + $0xd] ss:$0 sm:$0xff] }
 0x6b6   : > { %v6421_v1 = vpop.xlane.xlu1 %6420  ;;  %v6415_v5 = vpop.xlane.xlu2 %6414  ;;  %v6966_v30 = vadd.f32 %v6934_v29, %v6865_v42 }
 0x6b7   : > { %v6513_v43 = vadd.f32 %v12283_v35, %v6421_v1  ;;  %v6511_v40 = vadd.f32 %v12283_v35, %v6415_v5  ;;  %v5937_v26 = vpop.xlane.xlu0 %5936  ;;  %v6840_v1 = vmul.f32 %v12219_v41, %v12348_v4 }
 0x6b8   : > { %v5973_v61 = vadd.f32 %v11950_v53, %v5937_v26  ;;  %v6862_v53 = vadd.f32 %v6830_v32, %v6760_v10  ;;  %v6603_v32 = vld [vmem:[#allocation4 + $0x168] sm:$0xff] }
 0x6b9   : > { %8116 = vst.msk [vmem:[%s11514_s16 + $0x118] sm:$0xff] %vm281_vm0, %v6513_v43  ;;  %v13571_v10 = vld [vmem:[#allocation160_spill] sm:$0xff]  ;;  %v6640_v60 = vmul.f32 %v12204_v19, %v6603_v32 }
 0x6ba   : > { %8114 = vst.msk [vmem:[%s11514_s16 + $0x108] sm:$0xff] %vm281_vm0, %v6511_v40  ;;  %v6963_v2 = vadd.f32 %v6931_v28, %v6862_v53  ;;  %v6768_v40 = vadd.f32 %v6736_v50, %v6635_v13  ;;  %v7046_v52 = vsel %vm5350_vm4, %v13571_v10, 0.0  ;;  %v6939_v53 = vmul.f32 %v12233_v18, %v12337_v14  ;;  %v8355_v28 = vld [vmem:[#allocation4 + $0x151] sm:$0xff]  ;;  %v12401_v13 = vld [vmem:[#allocation4 + $0x189] sm:$0xff] }
 0x6bb   : > { %6005 = vst.msk [vmem:[%s11514_s16 + $0xf8] sm:$0xff] %vm281_vm0, %v5973_v61  ;;  %7029 = vadd.xlane.f32.xlu1 %v7028_v59  ;;  %7023 = vadd.xlane.f32.xlu2 %v7022_v22  ;;  %v12365_v61 = vld [vmem:[#allocation4 + $0x169] sm:$0xff]  ;;  %v13572_v59 = vld [vmem:[#allocation76_spill] sm:$0xff]  ;;  %v7034_v22 = vsel %vm5350_vm4, %v6966_v30, 0.0 }
 0x6bc   : > { %7017 = vadd.xlane.f32.xlu0 %v7016_v15  ;;  %v7025_v57 = vsel %vm5350_vm4, %v6963_v2, 0.0  ;;  %v6870_v7 = vadd.f32 %v6838_v51, %v6768_v40  ;;  %v7040_v47 = vsel %vm5350_vm4, %v13572_v59, 0.0  ;;  %v6872_v15 = vadd.f32 %v6840_v1, %v6770_v37  ;;  %v6907_v30 = vld [vmem:[#allocation4 + $0x181] sm:$0xff] }
 0x6bd   : > { %v6741_v27 = vmul.f32 %v12210_v16, %v12365_v61  ;;  %v6643_v37 = vmul.f32 %v12204_v19, %v6606_v36  ;;  %v6942_v10 = vmul.f32 %v12233_v18, %v12365_v61  ;;  %v6639_v59 = vmul.f32 %v12204_v19, %v12348_v4 }
 0x6be   : > { %v6430_v12 = vpop.xlane.xlu1 %6429  ;;  %v6424_v44 = vpop.xlane.xlu2 %6423 }
 0x6bf   : > { %v6516_v0 = vadd.f32 %v12283_v35, %v6430_v12  ;;  %v6514_v63 = vadd.f32 %v12283_v35, %v6424_v44  ;;  %v6418_v17 = vpop.xlane.xlu0 %6417  ;;  %v6739_v12 = vmul.f32 %v8355_v28, %v12210_v16  ;;  %v6941_v44 = vmul.f32 %v12233_v18, %v12178_v48 }
 0x6c0   : > { %v6512_v33 = vadd.f32 %v12283_v35, %v6418_v17  ;;  %v12388_v17 = vld [vmem:[#allocation4 + $0x31] sm:$0xff]  ;;  %v6773_v29 = vadd.f32 %v6741_v27, %v6640_v60 }
 0x6c1   : > { %8119 = vst.msk [vmem:[%s11514_s16 + $0x130] sm:$0xff] %vm281_vm0, %v6516_v0  ;;  %v6971_v0 = vadd.f32 %v6939_v53, %v6870_v7  ;;  %v6973_v31 = vadd.f32 %v6941_v44, %v6872_v15  ;;  %v7184_v8 = vmul.f32 %v12395_v24, %v12388_v17  ;;  %v6744_v7 = vmul.f32 %v12210_v16, %v12401_v13 }
 0x6c2   : > { %8117 = vst.msk [vmem:[%s11514_s16 + $0x120] sm:$0xff] %vm281_vm0, %v6514_v63  ;;  %v6841_v63 = vmul.f32 %v12219_v41, %v6603_v32  ;;  %v12431_v32 = vld [vmem:[%s12968_s5 + $0xe] ss:$0 sm:$0xff] }
 0x6c3   : > { %8115 = vst.msk [vmem:[%s11514_s16 + $0x110] sm:$0xff] %vm281_vm0, %v6512_v33  ;;  %7038 = vadd.xlane.f32.xlu1 %v7037_v46  ;;  %7032 = vadd.xlane.f32.xlu2 %v7031_v34  ;;  %v12397_v46 = vld [vmem:[#allocation4 + $0x32] sm:$0xff]  ;;  %v7049_v51 = vsel %vm5350_vm4, %v6971_v0, 0.0  ;;  %v7055_v40 = vsel %vm5350_vm4, %v6973_v31, 0.0  ;;  %v7386_v6 = vmul.f32 %v12431_v32, %v12411_v38  ;;  %v6844_v0 = vmul.f32 %v12219_v41, %v6606_v36 }
 0x6c4   : > { %7026 = vadd.xlane.f32.xlu0 %v7025_v57  ;;  %v6771_v57 = vadd.f32 %v6739_v12, %v6638_v11 }
 0x6c6   : > { %v6439_v21 = vpop.xlane.xlu1 %6438  ;;  %v6433_v39 = vpop.xlane.xlu2 %6432  ;;  %v6873_v1 = vadd.f32 %v6841_v63, %v6771_v57  ;;  %v7246_v63 = vld [vmem:[#allocation4 + $0x1a] sm:$0xff] }
 0x6c7   : > { %v6519_v5 = vadd.f32 %v12283_v35, %v6439_v21  ;;  %v6517_v43 = vadd.f32 %v12283_v35, %v6433_v39  ;;  %v6427_v62 = vpop.xlane.xlu0 %6426  ;;  %v13573_v21 = vld [vmem:[#allocation95_spill] sm:$0xff] }
 0x6c8   : > { %v6515_v26 = vadd.f32 %v12283_v35, %v6427_v62  ;;  %v7043_v39 = vsel %vm5350_vm4, %v13573_v21, 0.0  ;;  %v7285_v62 = vmul.f32 %v12406_v20, %v12397_v46  ;;  %v6974_v11 = vadd.f32 %v6942_v10, %v6873_v1 }
 0x6c9   : > { %8122 = vst.msk [vmem:[%s11514_s16 + $0x148] sm:$0xff] %vm281_vm0, %v6519_v5  ;;  %v6604_v5 = vld [vmem:[#allocation4 + $0x170] sm:$0xff]  ;;  %v6743_v10 = vmul.f32 %v12210_v16, %v6907_v30 }
 0x6ca   : > { %8120 = vst.msk [vmem:[%s11514_s16 + $0x138] sm:$0xff] %vm281_vm0, %v6517_v43  ;;  %v12418_v43 = vld [vmem:[#allocation4 + $0x171] sm:$0xff]  ;;  %v6641_v15 = vmul.f32 %v12204_v19, %v6604_v5  ;;  %v6842_v28 = vmul.f32 %v12219_v41, %v6604_v5  ;;  %v7317_v12 = vadd.f32 %v7285_v62, %v7184_v8  ;;  %v7283_v8 = vmul.f32 %v12406_v20, %v7246_v63 }
 0x6cb   : > { %8118 = vst.msk [vmem:[%s11514_s16 + $0x128] sm:$0xff] %vm281_vm0, %v6515_v26  ;;  %7047 = vadd.xlane.f32.xlu1 %v7046_v52  ;;  %7041 = vadd.xlane.f32.xlu2 %v7040_v47  ;;  %v6875_v26 = vadd.f32 %v6843_v54, %v6773_v29  ;;  %v6809_v52 = vld [vmem:[#allocation4 + $0x1a0] sm:$0xff]  ;;  %v6740_v47 = vmul.f32 %v12210_v16, %v12178_v48  ;;  %v12465_v62 = vld [vmem:[#allocation4 + $0x52] sm:$0xff] }
 0x6cc   : > { %7035 = vadd.xlane.f32.xlu0 %v7034_v22  ;;  %v6944_v22 = vmul.f32 %v12233_v18, %v6907_v30  ;;  %v6742_v53 = vmul.f32 %v12210_v16, %v12418_v43  ;;  %v6776_v48 = vadd.f32 %v6744_v7, %v6643_v37  ;;  %v6846_v27 = vmul.f32 %v12219_v41, %v6809_v52  ;;  %v6910_v54 = vld [vmem:[#allocation4 + $0x1a1] sm:$0xff] }
 0x6cd   : > { %v12453_v57 = vadd.f32 %v7386_v6, %v7317_v12  ;;  %v7182_v29 = vmul.f32 %v12395_v24, %v12195_v58  ;;  %v6947_v1 = vmul.f32 %v12233_v18, %v6910_v54  ;;  %v13574_v58 = vld [vmem:[#allocation20_spill] sm:$0xff]  ;;  %v6642_v7 = vmul.f32 %v12204_v19, %v12378_v56  ;;  %v12486_v19 = vld [vmem:[%s12968_s5 + $0xf] ss:$0 sm:$0xff]  ;;  %v12504_v54 = vld [vmem:[#allocation4 + $0x199] sm:$0xff] }
 0x6ce   : > { %v6448_v2 = vpop.xlane.xlu1 %6447  ;;  %v6442_v33 = vpop.xlane.xlu2 %6441  ;;  %v6976_v60 = vadd.f32 %v6944_v22, %v6875_v26  ;;  %v7146_v26 = vld [vmem:[#allocation4 + $0x21] sm:$0xff]  ;;  %v7052_v37 = vsel %vm5350_vm4, %v13574_v58, 0.0  ;;  %v7384_v22 = vmul.f32 %v12431_v32, %v12388_v17  ;;  %v7288_v16 = vmul.f32 %v12406_v20, %v12465_v62  ;;  %v12490_v56 = vld [vmem:[#allocation4 + $0x69] sm:$0xff] }
 0x6cf   : > { %v6522_v25 = vadd.f32 %v12283_v35, %v6448_v2  ;;  %v6520_v34 = vadd.f32 %v12283_v35, %v6442_v33  ;;  %v6436_v42 = vpop.xlane.xlu0 %6435  ;;  %v7247_v52 = vld [vmem:[#allocation4 + $0x22] sm:$0xff]  ;;  %v7185_v30 = vmul.f32 %v12395_v24, %v12227_v55  ;;  %v7183_v17 = vmul.f32 %v12395_v24, %v7146_v26 }
 0x6d0   : > { %v6518_v50 = vadd.f32 %v12283_v35, %v6436_v42  ;;  %v6774_v42 = vadd.f32 %v6742_v53, %v6641_v15  ;;  %v7064_v21 = vsel %vm5350_vm4, %v6976_v60, 0.0  ;;  %v6808_v15 = vld [vmem:[#allocation4 + $0x198] sm:$0xff]  ;;  %v12497_v60 = vld [vmem:[#allocation4 + $0x4a] sm:$0xff] }
 0x6d1   : > { %8125 = vst.msk [vmem:[%s11514_s16 + $0x160] sm:$0xff] %vm281_vm0, %v6522_v25  ;;  %v6772_v25 = vadd.f32 %v6740_v47, %v6639_v59  ;;  %v6945_v59 = vmul.f32 %v12233_v18, %v12401_v13  ;;  %v6943_v47 = vmul.f32 %v12233_v18, %v12418_v43 }
 0x6d2   : > { %8123 = vst.msk [vmem:[%s11514_s16 + $0x150] sm:$0xff] %vm281_vm0, %v6520_v34  ;;  %v6876_v5 = vadd.f32 %v6844_v0, %v6774_v42  ;;  %v7385_v42 = vmul.f32 %v12431_v32, %v12227_v55 }
 0x6d3   : > { %8121 = vst.msk [vmem:[%s11514_s16 + $0x140] sm:$0xff] %vm281_vm0, %v6518_v50  ;;  %7056 = vadd.xlane.f32.xlu1 %v7055_v40  ;;  %7050 = vadd.xlane.f32.xlu2 %v7049_v51  ;;  %v7058_v50 = vsel %vm5350_vm4, %v6974_v11, 0.0  ;;  %v6874_v36 = vadd.f32 %v6842_v28, %v6772_v25  ;;  %v7150_v51 = vld [vmem:[#allocation4 + $0x51] sm:$0xff]  ;;  %v12467_v40 = vld [vmem:[#allocation4 + $0x3a] sm:$0xff]  ;;  %v7389_v25 = vmul.f32 %v12431_v32, %v12490_v56 }
 0x6d4   : > { %7044 = vadd.xlane.f32.xlu0 %v7043_v39  ;;  %v6878_v39 = vadd.f32 %v6846_v27, %v6776_v48  ;;  %v7187_v53 = vmul.f32 %v12395_v24, %v7150_v51  ;;  %v7286_v6 = vmul.f32 %v12406_v20, %v12467_v40  ;;  %v7284_v48 = vmul.f32 %v12406_v20, %v7247_v52 }
 0x6d6   : > { %v6457_v4 = vpop.xlane.xlu1 %6456  ;;  %v6451_v44 = vpop.xlane.xlu2 %6450  ;;  %v6979_v12 = vadd.f32 %v6947_v1, %v6878_v39 }
 0x6d7   : > { %v6525_v2 = vadd.f32 %v12283_v35, %v6457_v4  ;;  %v6523_v33 = vadd.f32 %v12283_v35, %v6451_v44  ;;  %v6445_v31 = vpop.xlane.xlu0 %6444  ;;  %v6977_v4 = vadd.f32 %v6945_v59, %v6876_v5  ;;  %v6975_v44 = vadd.f32 %v6943_v47, %v6874_v36 }
 0x6d8   : > { %v6521_v34 = vadd.f32 %v12283_v35, %v6445_v31  ;;  %v7315_v36 = vadd.f32 %v7283_v8, %v7182_v29  ;;  %v7073_v39 = vsel %vm5350_vm4, %v6979_v12, 0.0  ;;  %v7316_v5 = vadd.f32 %v7284_v48, %v7183_v17  ;;  %v7252_v12 = vld [vmem:[#allocation4 + $0x62] sm:$0xff]  ;;  %v12541_v48 = vld [vmem:[#allocation4 + $0x91] sm:$0xff] }
 0x6d9   : > { %8128 = vst.msk [vmem:[%s11514_s16 + $0x178] sm:$0xff] %vm281_vm0, %v6525_v2  ;;  %v6775_v2 = vadd.f32 %v6743_v10, %v6642_v7  ;;  %v7067_v1 = vsel %vm5350_vm4, %v6977_v4, 0.0  ;;  %v7061_v55 = vsel %vm5350_vm4, %v6975_v44, 0.0  ;;  %v6946_v29 = vmul.f32 %v12233_v18, %v12504_v54  ;;  %v7153_v4 = vld [vmem:[#allocation4 + $0x79] sm:$0xff] }
 0x6da   : > { %8126 = vst.msk [vmem:[%s11514_s16 + $0x168] sm:$0xff] %vm281_vm0, %v6523_v33  ;;  %v6845_v33 = vmul.f32 %v12219_v41, %v6808_v15  ;;  %v7485_v41 = vmul.f32 %v12486_v19, %v12397_v46  ;;  %v7453_v46 = vld [vmem:[#allocation4 + $0x6a] sm:$0xff]  ;;  %v7416_v8 = vadd.f32 %v7384_v22, %v7315_v36  ;;  %v7417_v7 = vadd.f32 %v7385_v42, %v7316_v5  ;;  %v7254_v44 = vld [vmem:[#allocation4 + $0x7a] sm:$0xff] }
 0x6db   : > { %8124 = vst.msk [vmem:[%s11514_s16 + $0x158] sm:$0xff] %vm281_vm0, %v6521_v34  ;;  %7065 = vadd.xlane.f32.xlu1 %v7064_v21  ;;  %7059 = vadd.xlane.f32.xlu2 %v7058_v50  ;;  %v7387_v34 = vmul.f32 %v12431_v32, %v7150_v51  ;;  %v7487_v50 = vmul.f32 %v12486_v19, %v12497_v60 }
 0x6dc   : > { %7053 = vadd.xlane.f32.xlu0 %v7052_v37  ;;  %v7320_v21 = vadd.f32 %v7288_v16, %v7187_v53  ;;  %v7318_v51 = vadd.f32 %v7286_v6, %v7185_v30  ;;  %v6877_v26 = vadd.f32 %v6845_v33, %v6775_v2  ;;  %v7517_v47 = vadd.f32 %v7485_v41, %v7416_v8 }
 0x6dd   : > { %v7519_v10 = vadd.f32 %v7487_v50, %v12453_v57  ;;  %v7490_v15 = vmul.f32 %v12486_v19, %v7453_v46  ;;  %v7488_v53 = vmul.f32 %v12486_v19, %v12465_v62  ;;  %v7486_v18 = vmul.f32 %v12486_v19, %v12467_v40 }
 0x6de   : > { %v6466_v11 = vpop.xlane.xlu1 %6465  ;;  %v6460_v28 = vpop.xlane.xlu2 %6459  ;;  %v7421_v58 = vadd.f32 %v7389_v25, %v7320_v21  ;;  %v7419_v37 = vadd.f32 %v7387_v34, %v7318_v51  ;;  %v6978_v6 = vadd.f32 %v6946_v29, %v6877_v26  ;;  %v7549_v40 = vsel %vm5350_vm4, %v7517_v47, 0.0  ;;  %v7456_v21 = vld [vmem:[#allocation4 + $0x92] sm:$0xff] }
 0x6df   : > { %v6528_v27 = vadd.f32 %v12283_v35, %v6466_v11  ;;  %v6526_v0 = vadd.f32 %v12283_v35, %v6460_v28  ;;  %v6454_v63 = vpop.xlane.xlu0 %6453  ;;  %v7518_v28 = vadd.f32 %v7486_v18, %v7417_v7  ;;  %v7555_v62 = vsel %vm5350_vm4, %v7519_v10, 0.0  ;;  %v7156_v51 = vld [vmem:[#allocation4 + $0x99] sm:$0xff] }
 0x6e0   : > { %v6524_v31 = vadd.f32 %v12283_v35, %v6454_v63  ;;  %v7522_v17 = vadd.f32 %v7490_v15, %v7421_v58  ;;  %v7520_v11 = vadd.f32 %v7488_v53, %v7419_v37  ;;  %v7188_v33 = vmul.f32 %v12395_v24, %v12248_v23 }
 0x6e1   : > { %8131 = vst.msk [vmem:[%s11514_s16 + $0x190] sm:$0xff] %vm281_vm0, %v6528_v27  ;;  %v7070_v27 = vsel %vm5350_vm4, %v6978_v6, 0.0  ;;  %v7552_v2 = vsel %vm5350_vm4, %v7518_v28, 0.0  ;;  %v7190_v25 = vmul.f32 %v12395_v24, %v7153_v4  ;;  %v7291_v34 = vmul.f32 %v12406_v20, %v7254_v44 }
 0x6e2   : > { %8129 = vst.msk [vmem:[%s11514_s16 + $0x180] sm:$0xff] %vm281_vm0, %v6526_v0  ;;  %v7564_v0 = vsel %vm5350_vm4, %v7522_v17, 0.0  ;;  %v7558_v63 = vsel %vm5350_vm4, %v7520_v11, 0.0  ;;  %v7392_v42 = vmul.f32 %v12431_v32, %v12541_v48  ;;  %v7289_v50 = vmul.f32 %v12406_v20, %v7252_v12 }
 0x6e3   : > { %8127 = vst.msk [vmem:[%s11514_s16 + $0x170] sm:$0xff] %vm281_vm0, %v6524_v31  ;;  %7074 = vadd.xlane.f32.xlu1 %v7073_v39  ;;  %7068 = vadd.xlane.f32.xlu2 %v7067_v1  ;;  %v7255_v31 = vld [vmem:[#allocation4 + $0x82] sm:$0xff]  ;;  %v7390_v39 = vmul.f32 %v12431_v32, %v7153_v4  ;;  %v7287_v1 = vmul.f32 %v12406_v20, %v12497_v60 }
 0x6e4   : > { %7062 = vadd.xlane.f32.xlu0 %v7061_v55  ;;  %v7189_v5 = vmul.f32 %v12395_v24, %v12490_v56  ;;  %v7290_v55 = vmul.f32 %v12406_v20, %v7453_v46  ;;  %v7191_v58 = vmul.f32 %v12395_v24, %v12264_v45  ;;  %v7292_v37 = vmul.f32 %v12406_v20, %v7255_v31  ;;  %v7257_v46 = vld [vmem:[#allocation4 + $0x9a] sm:$0xff] }
 0x6e5   : > { %v7186_v60 = vmul.f32 %v12395_v24, %v12411_v38  ;;  %v7388_v56 = vmul.f32 %v12431_v32, %v12248_v23  ;;  %v7391_v10 = vmul.f32 %v12431_v32, %v12264_v45  ;;  %v7321_v47 = vadd.f32 %v7289_v50, %v7188_v33  ;;  %v7358_v23 = vld [vmem:[#allocation4 + $0xb1] sm:$0xff] }
 0x6e6   : > { %v6475_v52 = vpop.xlane.xlu1 %6474  ;;  %v6469_v59 = vpop.xlane.xlu2 %6468  ;;  %v7393_v15 = vmul.f32 %v12431_v32, %v7156_v51  ;;  %v7491_v53 = vmul.f32 %v12486_v19, %v7254_v44  ;;  %v7489_v18 = vmul.f32 %v12486_v19, %v7252_v12  ;;  %v7193_v45 = vmul.f32 %v12395_v24, %v7156_v51  ;;  %v7459_v50 = vld [vmem:[#allocation4 + $0xb2] sm:$0xff] }
 0x6e7   : > { %v6531_v22 = vadd.f32 %v12283_v35, %v6475_v52  ;;  %v6529_v16 = vadd.f32 %v12283_v35, %v6469_v59  ;;  %v6463_v30 = vpop.xlane.xlu0 %6462  ;;  %v7323_v52 = vadd.f32 %v7291_v34, %v7190_v25  ;;  %v7493_v59 = vmul.f32 %v12486_v19, %v7456_v21 }
 0x6e8   : > { %v6527_v57 = vadd.f32 %v12283_v35, %v6463_v30  ;;  %v7319_v38 = vadd.f32 %v7287_v1, %v7186_v60  ;;  %v7324_v30 = vadd.f32 %v7292_v37, %v7191_v58  ;;  %v7395_v28 = vmul.f32 %v12431_v32, %v7358_v23  ;;  %v7159_v58 = vld [vmem:[#allocation4 + $0xc1] sm:$0xff] }
 0x6e9   : > { %8134 = vst.msk [vmem:[%s11514_s16 + $0x1a8] sm:$0xff] %vm281_vm0, %v6531_v22  ;;  %v7322_v22 = vadd.f32 %v7290_v55, %v7189_v5  ;;  %v7424_v6 = vadd.f32 %v7392_v42, %v7323_v52  ;;  %v7494_v34 = vmul.f32 %v12486_v19, %v7257_v46  ;;  %v7258_v5 = vld [vmem:[#allocation4 + $0xaa] sm:$0xff]  ;;  %v7192_v55 = vmul.f32 %v12395_v24, %v12541_v48 }
 0x6ea   : > { %8132 = vst.msk [vmem:[%s11514_s16 + $0x198] sm:$0xff] %vm281_vm0, %v6529_v16  ;;  %v7294_v16 = vmul.f32 %v12406_v20, %v7257_v46  ;;  %v7420_v17 = vadd.f32 %v7388_v56, %v7319_v38  ;;  %v12607_v56 = vld [vmem:[#allocation4 + $0xd9] sm:$0xff]  ;;  %v7194_v48 = vmul.f32 %v12395_v24, %v12280_v3  ;;  %v7295_v46 = vmul.f32 %v12406_v20, %v7258_v5 }
 0x6eb   : > { %8130 = vst.msk [vmem:[%s11514_s16 + $0x188] sm:$0xff] %vm281_vm0, %v6527_v57  ;;  %7556 = vadd.xlane.f32.xlu1 %v7555_v62  ;;  %7550 = vadd.xlane.f32.xlu2 %v7549_v40  ;;  %v7422_v57 = vadd.f32 %v7390_v39, %v7321_v47  ;;  %v7423_v11 = vadd.f32 %v7391_v10, %v7322_v22  ;;  %v7261_v10 = vld [vmem:[#allocation4 + $0xca] sm:$0xff] }
 0x6ec   : > { %7071 = vadd.xlane.f32.xlu0 %v7070_v27  ;;  %v7425_v62 = vadd.f32 %v7393_v15, %v7324_v30  ;;  %v7525_v4 = vadd.f32 %v7493_v59, %v7424_v6  ;;  %v7521_v27 = vadd.f32 %v7489_v18, %v7420_v17  ;;  %v7326_v25 = vadd.f32 %v7294_v16, %v7193_v45  ;;  %v7462_v30 = vld [vmem:[#allocation4 + $0xda] sm:$0xff] }
 0x6ed   : > { %v7523_v44 = vadd.f32 %v7491_v53, %v7422_v57  ;;  %v7394_v15 = vmul.f32 %v12431_v32, %v12280_v3  ;;  %v7195_v53 = vmul.f32 %v12395_v24, %v7358_v23  ;;  %v7296_v38 = vmul.f32 %v12406_v20, %v7459_v50  ;;  %v7162_v57 = vld [vmem:[#allocation4 + $0xe1] sm:$0xff] }
 0x6ee   : > { %v6484_v36 = vpop.xlane.xlu1 %6483  ;;  %v6478_v41 = vpop.xlane.xlu2 %6477  ;;  %v7427_v39 = vadd.f32 %v7395_v28, %v7326_v25  ;;  %v7526_v1 = vadd.f32 %v7494_v34, %v7425_v62  ;;  %v7196_v16 = vmul.f32 %v12395_v24, %v7159_v58  ;;  %v7396_v6 = vmul.f32 %v12431_v32, %v7159_v58  ;;  %v7263_v23 = vld [vmem:[#allocation4 + $0xe2] sm:$0xff] }
 0x6ef   : > { %v6534_v26 = vadd.f32 %v12283_v35, %v6484_v36  ;;  %v6532_v29 = vadd.f32 %v12283_v35, %v6478_v41  ;;  %v6472_v8 = vpop.xlane.xlu0 %6471  ;;  %v7293_v41 = vmul.f32 %v12406_v20, %v7456_v21  ;;  %v7567_v51 = vsel %vm5350_vm4, %v7523_v44, 0.0 }
 0x6f0   : > { %v6530_v7 = vadd.f32 %v12283_v35, %v6472_v8  ;;  %v7561_v21 = vsel %vm5350_vm4, %v7521_v27, 0.0  ;;  %v7576_v60 = vsel %vm5350_vm4, %v7526_v1, 0.0  ;;  %v7398_v3 = vmul.f32 %v12431_v32, %v12607_v56 }
 0x6f1   : > { %8137 = vst.msk [vmem:[%s11514_s16 + $0x1c0] sm:$0xff] %vm281_vm0, %v6534_v26  ;;  %v7496_v26 = vmul.f32 %v12486_v19, %v7459_v50  ;;  %v7325_v37 = vadd.f32 %v7293_v41, %v7192_v55  ;;  %v7298_v28 = vmul.f32 %v12406_v20, %v7261_v10  ;;  %v7499_v27 = vmul.f32 %v12486_v19, %v7462_v30 }
 0x6f2   : > { %8135 = vst.msk [vmem:[%s11514_s16 + $0x1b0] sm:$0xff] %vm281_vm0, %v6532_v29  ;;  %v7260_v29 = vld [vmem:[#allocation4 + $0xc2] sm:$0xff]  ;;  %v7199_v25 = vmul.f32 %v12395_v24, %v7162_v57  ;;  %v7328_v34 = vadd.f32 %v7296_v38, %v7195_v53  ;;  %v7264_v38 = vld [vmem:[#allocation4 + $0xf2] sm:$0xff] }
 0x6f3   : > { %8133 = vst.msk [vmem:[%s11514_s16 + $0x1a0] sm:$0xff] %vm281_vm0, %v6530_v7  ;;  %7565 = vadd.xlane.f32.xlu1 %v7564_v0  ;;  %7559 = vadd.xlane.f32.xlu2 %v7558_v63  ;;  %v7492_v0 = vmul.f32 %v12486_v19, %v7255_v31  ;;  %v7573_v31 = vsel %vm5350_vm4, %v7525_v4, 0.0  ;;  %v7528_v7 = vadd.f32 %v7496_v26, %v7427_v39 }
 0x6f4   : > { %7553 = vadd.xlane.f32.xlu0 %v7552_v2  ;;  %v7297_v47 = vmul.f32 %v12406_v20, %v7260_v29  ;;  %v7397_v4 = vmul.f32 %v12431_v32, %v12301_v9 }
 0x6f5   : > { %v7524_v36 = vadd.f32 %v7492_v0, %v7423_v11  ;;  %v7197_v11 = vmul.f32 %v12395_v24, %v12301_v9  ;;  %v7582_v62 = vsel %vm5350_vm4, %v7528_v7, 0.0  ;;  %v7497_v0 = vmul.f32 %v12486_v19, %v7260_v29 }
 0x6f6   : > { %v6493_v12 = vpop.xlane.xlu1 %6492  ;;  %v6487_v40 = vpop.xlane.xlu2 %6486  ;;  %v7329_v44 = vadd.f32 %v7297_v47, %v7196_v16  ;;  %v7300_v9 = vmul.f32 %v12406_v20, %v7263_v23  ;;  %v7429_v1 = vadd.f32 %v7397_v4, %v7328_v34  ;;  %v7498_v7 = vmul.f32 %v12486_v19, %v7261_v10 }
 0x6f7   : > { %v6537_v63 = vadd.f32 %v12283_v35, %v6493_v12  ;;  %v6535_v2 = vadd.f32 %v12283_v35, %v6487_v40  ;;  %v6481_v33 = vpop.xlane.xlu0 %6480  ;;  %v7570_v8 = vsel %vm5350_vm4, %v7524_v36, 0.0  ;;  %v7327_v12 = vadd.f32 %v7295_v46, %v7194_v48  ;;  %v7465_v48 = vld [vmem:[#allocation4 + $0xfa] sm:$0xff] }
 0x6f8   : > { %v6533_v42 = vadd.f32 %v12283_v35, %v6481_v33  ;;  %v7495_v40 = vmul.f32 %v12486_v19, %v7258_v5  ;;  %v12642_v33 = vld [vmem:[#allocation5] ss:$0 sm:$0xff]  ;;  %v7426_v36 = vadd.f32 %v7394_v15, %v7325_v37  ;;  %v7330_v41 = vadd.f32 %v7298_v28, %v7197_v11 }
 0x6f9   : > { %8140 = vst.msk [vmem:[%s11514_s16 + $0x1d8] sm:$0xff] %vm281_vm0, %v6537_v63  ;;  %v12637_v63 = vld [vmem:[#allocation4 + $0xf9] sm:$0xff]  ;;  %v7428_v50 = vadd.f32 %v7396_v6, %v7327_v12  ;;  %v7332_v37 = vadd.f32 %v7300_v9, %v7199_v25  ;;  %v7500_v46 = vmul.f32 %v12486_v19, %v7263_v23  ;;  %v7502_v10 = vmul.f32 %v12486_v19, %v7465_v48 }
 0x6fa   : > { %8138 = vst.msk [vmem:[%s11514_s16 + $0x1c8] sm:$0xff] %vm281_vm0, %v6535_v2  ;;  %v7399_v2 = vmul.f32 %v12431_v32, %v7162_v57  ;;  %v7401_v39 = vmul.f32 %v12431_v32, %v12637_v63  ;;  %v7165_v57 = vld [vmem:[#allocation4 + $0x109] sm:$0xff] }
 0x6fb   : > { %8136 = vst.msk [vmem:[%s11514_s16 + $0x1b8] sm:$0xff] %vm281_vm0, %v6533_v42  ;;  %7574 = vadd.xlane.f32.xlu1 %v7573_v31  ;;  %7568 = vadd.xlane.f32.xlu2 %v7567_v51  ;;  %v7430_v42 = vadd.f32 %v7398_v3, %v7329_v44  ;;  %v7529_v55 = vadd.f32 %v7497_v0, %v7428_v50  ;;  %v12676_v44 = vld [vmem:[#allocation4 + $0x122] sm:$0xff]  ;;  %v7267_v50 = vld [vmem:[#allocation4 + $0x112] sm:$0xff] }
 0x6fc   : > { %7562 = vadd.xlane.f32.xlu0 %v7561_v21  ;;  %v7527_v21 = vadd.f32 %v7495_v40, %v7426_v36  ;;  %v7431_v26 = vadd.f32 %v7399_v2, %v7330_v41  ;;  %v7201_v0 = vmul.f32 %v12395_v24, %v12637_v63  ;;  %v7302_v2 = vmul.f32 %v12406_v20, %v7465_v48 }
 0x6fd   : > { %v7531_v5 = vadd.f32 %v7499_v27, %v7430_v42  ;;  %v7585_v15 = vsel %vm5350_vm4, %v7529_v55, 0.0  ;;  %v7166_v27 = vld [vmem:[#allocation4 + $0x111] sm:$0xff]  ;;  %v7202_v9 = vmul.f32 %v12395_v24, %v7165_v57  ;;  %v7402_v42 = vmul.f32 %v12431_v32, %v7165_v57  ;;  %v12713_v57 = vld [vmem:[#allocation4 + $0x142] sm:$0xff] }
 0x6fe   : > { %v6496_v52 = vpop.xlane.xlu2 %6495  ;;  %v6502_v59 = vpop.xlane.xlu1 %6501  ;;  %v7532_v53 = vadd.f32 %v7500_v46, %v7431_v26  ;;  %v7400_v63 = vmul.f32 %v12431_v32, %v12315_v49  ;;  %v7304_v26 = vmul.f32 %v12406_v20, %v7267_v50 }
 0x6ff   : > { %v6538_v18 = vadd.f32 %v12283_v35, %v6496_v52  ;;  %v6540_v22 = vadd.f32 %v12283_v35, %v6502_v59  ;;  %v6490_v45 = vpop.xlane.xlu0 %6489  ;;  %v7433_v52 = vadd.f32 %v7401_v39, %v7332_v37  ;;  %v7530_v59 = vadd.f32 %v7498_v7, %v7429_v1  ;;  %v7168_v1 = vld [vmem:[#allocation4 + $0x129] sm:$0xff] }
 0x700   : > { %v6536_v17 = vadd.f32 %v12283_v35, %v6490_v45  ;;  %v7591_v47 = vsel %vm5350_vm4, %v7531_v5, 0.0  ;;  %v7198_v45 = vmul.f32 %v12395_v24, %v12607_v56  ;;  %v7594_v11 = vsel %vm5350_vm4, %v7532_v53, 0.0 }
 0x701   : > { %8141 = vst.msk [vmem:[%s11514_s16 + $0x1e0] sm:$0xff] %vm281_vm0, %v6538_v18  ;;  %v7299_v18 = vmul.f32 %v12406_v20, %v7462_v30  ;;  %v7534_v16 = vadd.f32 %v7502_v10, %v7433_v52  ;;  %v7588_v6 = vsel %vm5350_vm4, %v7530_v59, 0.0  ;;  %v7301_v30 = vmul.f32 %v12406_v20, %v7264_v38 }
 0x702   : > { %8143 = vst.msk [vmem:[%s11514_s16 + $0x1f0] sm:$0xff] %vm281_vm0, %v6540_v22  ;;  %v7266_v22 = vld [vmem:[#allocation4 + $0x10a] sm:$0xff]  ;;  %v7501_v39 = vmul.f32 %v12486_v19, %v7264_v38  ;;  %v7505_v5 = vmul.f32 %v12486_v19, %v12676_v44  ;;  %v7205_v37 = vmul.f32 %v12395_v24, %v7168_v1  ;;  %v7405_v48 = vmul.f32 %v12431_v32, %v7168_v1 }
 0x703   : > { %8139 = vst.msk [vmem:[%s11514_s16 + $0x1d0] sm:$0xff] %vm281_vm0, %v6536_v17  ;;  %7583 = vadd.xlane.f32.xlu1 %v7582_v62  ;;  %7577 = vadd.xlane.f32.xlu2 %v7576_v60  ;;  %v12667_v17 = vld [vmem:[#allocation4 + $0x121] sm:$0xff]  ;;  %v7303_v28 = vmul.f32 %v12406_v20, %v7266_v22  ;;  %v7200_v62 = vmul.f32 %v12395_v24, %v12315_v49  ;;  %v7600_v36 = vsel %vm5350_vm4, %v7534_v16, 0.0 }
 0x704   : > { %7571 = vadd.xlane.f32.xlu0 %v7570_v8  ;;  %v7331_v12 = vadd.f32 %v7299_v18, %v7198_v45  ;;  %v7404_v34 = vmul.f32 %v12431_v32, %v12667_v17  ;;  %v7503_v55 = vmul.f32 %v12486_v19, %v7266_v22  ;;  %v7203_v49 = vmul.f32 %v12395_v24, %v7166_v27 }
 0x705   : > { %v7333_v41 = vadd.f32 %v7301_v30, %v7200_v62 }
 0x706   : > { %v6985_v31 = vpop.xlane.xlu1 %6984  ;;  %v6505_v51 = vpop.xlane.xlu2 %6504  ;;  %v7336_v22 = vadd.f32 %v7304_v26, %v7203_v49  ;;  %v7172_v49 = vld [vmem:[#allocation4 + $0x159] sm:$0xff] }
 0x707   : > { %v7081_v29 = vadd.f32 %v12642_v33, %v6985_v31  ;;  %v6541_v8 = vadd.f32 %v12283_v35, %v6505_v51  ;;  %v6499_v58 = vpop.xlane.xlu0 %6498  ;;  %v7269_v31 = vld [vmem:[#allocation4 + $0x12a] sm:$0xff]  ;;  %v7335_v51 = vadd.f32 %v7303_v28, %v7202_v9  ;;  %v7270_v28 = vld [vmem:[#allocation4 + $0x13a] sm:$0xff] }
 0x708   : > { %v6539_v60 = vadd.f32 %v12283_v35, %v6499_v58  ;;  %v7579_v35 = vsel %vm5350_vm4, %v7527_v21, 0.0  ;;  %v7403_v21 = vmul.f32 %v12431_v32, %v7166_v27  ;;  %v7434_v58 = vadd.f32 %v7402_v42, %v7333_v41  ;;  %v7273_v26 = vld [vmem:[#allocation4 + $0x15a] sm:$0xff] }
 0x709   : > { %8150 = vst.msk [vmem:[%s11514_s16 + $0x208] sm:$0xff] %vm281_vm0, %v7081_v29  ;;  %v7334_v29 = vadd.f32 %v7302_v2, %v7201_v0  ;;  %v7306_v7 = vmul.f32 %v12406_v20, %v7269_v31  ;;  %v7437_v30 = vadd.f32 %v7405_v48, %v7336_v22  ;;  %v7171_v0 = vld [vmem:[#allocation4 + $0x151] sm:$0xff]  ;;  %v7307_v2 = vmul.f32 %v12406_v20, %v7270_v28 }
 0x70a   : > { %8144 = vst.msk [vmem:[%s11514_s16 + $0x1f8] sm:$0xff] %vm281_vm0, %v6541_v8  ;;  %v7436_v8 = vadd.f32 %v7404_v34, %v7335_v51  ;;  %v7204_v41 = vmul.f32 %v12395_v24, %v12667_v17  ;;  %v7408_v17 = vmul.f32 %v12431_v32, %v7171_v0 }
 0x70b   : > { %8142 = vst.msk [vmem:[%s11514_s16 + $0x1e8] sm:$0xff] %vm281_vm0, %v6539_v60  ;;  %7592 = vadd.xlane.f32.xlu1 %v7591_v47  ;;  %7586 = vadd.xlane.f32.xlu2 %v7585_v15  ;;  %v7432_v60 = vadd.f32 %v7400_v63, %v7331_v12  ;;  %v7535_v47 = vadd.f32 %v7503_v55, %v7434_v58 }
 0x70c   : > { %7580 = vadd.xlane.f32.xlu0 %v7579_v35  ;;  %v7537_v59 = vadd.f32 %v7505_v5, %v7436_v8  ;;  %v7407_v15 = vmul.f32 %v12431_v32, %v12337_v14  ;;  %v7435_v53 = vadd.f32 %v7403_v21, %v7334_v29  ;;  %v7338_v16 = vadd.f32 %v7306_v7, %v7205_v37  ;;  %v7275_v7 = vld [vmem:[#allocation4 + $0x172] sm:$0xff] }
 0x70d   : > { %v7533_v10 = vadd.f32 %v7501_v39, %v7432_v60  ;;  %v7506_v12 = vmul.f32 %v12486_v19, %v7269_v31  ;;  %v12734_v31 = vld [vmem:[#allocation4 + $0x16a] sm:$0xff]  ;;  %v7208_v55 = vmul.f32 %v12395_v24, %v7171_v0  ;;  %v7410_v21 = vmul.f32 %v12431_v32, %v12365_v61 }
 0x70e   : > { %v6994_v3 = vpop.xlane.xlu1 %6993  ;;  %v6988_v23 = vpop.xlane.xlu2 %6987  ;;  %v7609_v14 = vsel %vm5350_vm4, %v7537_v59, 0.0  ;;  %v7507_v37 = vmul.f32 %v12486_v19, %v7270_v28  ;;  %v7511_v61 = vmul.f32 %v12486_v19, %v12734_v31 }
 0x70f   : > { %v7084_v56 = vadd.f32 %v12642_v33, %v6994_v3  ;;  %v7082_v40 = vadd.f32 %v12642_v33, %v6988_v23  ;;  %v6982_v4 = vpop.xlane.xlu0 %6981  ;;  %v7603_v3 = vsel %vm5350_vm4, %v7535_v47, 0.0  ;;  %v7439_v23 = vadd.f32 %v7407_v15, %v7338_v16 }
 0x710   : > { %v7080_v25 = vadd.f32 %v12642_v33, %v6982_v4  ;;  %v7597_v62 = vsel %vm5350_vm4, %v7533_v10, 0.0  ;;  %v7169_v4 = vld [vmem:[#allocation4 + $0x139] sm:$0xff]  ;;  %v7538_v27 = vadd.f32 %v7506_v12, %v7437_v30  ;;  %v7209_v47 = vmul.f32 %v12395_v24, %v7172_v49 }
 0x711   : > { %8153 = vst.msk [vmem:[%s11514_s16 + $0x220] sm:$0xff] %vm281_vm0, %v7084_v56  ;;  %v7272_v56 = vld [vmem:[#allocation4 + $0x152] sm:$0xff]  ;;  %v7406_v51 = vmul.f32 %v12431_v32, %v7169_v4  ;;  %v7310_v15 = vmul.f32 %v12406_v20, %v7273_v26  ;;  %v7411_v10 = vmul.f32 %v12431_v32, %v12418_v43  ;;  %v7409_v12 = vmul.f32 %v12431_v32, %v7172_v49 }
 0x712   : > { %8151 = vst.msk [vmem:[%s11514_s16 + $0x210] sm:$0xff] %vm281_vm0, %v7082_v40  ;;  %v7508_v40 = vmul.f32 %v12486_v19, %v12713_v57  ;;  %v7612_v29 = vsel %vm5350_vm4, %v7538_v27, 0.0  ;;  %v7414_v49 = vmul.f32 %v12431_v32, %v12504_v54 }
 0x713   : > { %8149 = vst.msk [vmem:[%s11514_s16 + $0x200] sm:$0xff] %vm281_vm0, %v7080_v25  ;;  %7601 = vadd.xlane.f32.xlu1 %v7600_v36  ;;  %7595 = vadd.xlane.f32.xlu2 %v7594_v11  ;;  %v7305_v25 = vmul.f32 %v12406_v20, %v12676_v44  ;;  %v7309_v36 = vmul.f32 %v12406_v20, %v7272_v56 }
 0x714   : > { %7589 = vadd.xlane.f32.xlu0 %v7588_v6  ;;  %v7504_v6 = vmul.f32 %v12486_v19, %v7267_v50  ;;  %v7540_v42 = vadd.f32 %v7508_v40, %v7439_v23  ;;  %v7206_v44 = vmul.f32 %v12395_v24, %v7169_v4  ;;  %v7413_v23 = vmul.f32 %v12431_v32, %v12401_v13  ;;  %v7477_v4 = vld [vmem:[#allocation4 + $0x18a] sm:$0xff] }
 0x715   : > { %v7337_v58 = vadd.f32 %v7305_v25, %v7204_v41  ;;  %v7341_v48 = vadd.f32 %v7309_v36, %v7208_v55  ;;  %v7514_v41 = vmul.f32 %v12486_v19, %v7477_v4 }
 0x716   : > { %v7003_v46 = vpop.xlane.xlu1 %7002  ;;  %v6997_v52 = vpop.xlane.xlu2 %6996  ;;  %v7536_v11 = vadd.f32 %v7504_v6, %v7435_v53  ;;  %v7339_v8 = vadd.f32 %v7307_v2, %v7206_v44  ;;  %v7618_v60 = vsel %vm5350_vm4, %v7540_v42, 0.0  ;;  %v7175_v2 = vld [vmem:[#allocation4 + $0x181] sm:$0xff]  ;;  %v7510_v44 = vmul.f32 %v12486_v19, %v7273_v26 }
 0x717   : > { %v7087_v38 = vadd.f32 %v12642_v33, %v7003_v46  ;;  %v7085_v18 = vadd.f32 %v12642_v33, %v6997_v52  ;;  %v6991_v35 = vpop.xlane.xlu0 %6990  ;;  %v7509_v46 = vmul.f32 %v12486_v19, %v7272_v56  ;;  %v7170_v52 = vld [vmem:[#allocation4 + $0x141] sm:$0xff]  ;;  %v7438_v59 = vadd.f32 %v7406_v51, %v7337_v58 }
 0x718   : > { %v7083_v45 = vadd.f32 %v12642_v33, %v6991_v35  ;;  %v7606_v50 = vsel %vm5350_vm4, %v7536_v11, 0.0  ;;  %v7442_v53 = vadd.f32 %v7410_v21, %v7341_v48  ;;  %v7312_v35 = vmul.f32 %v12406_v20, %v7275_v7  ;;  %v7276_v56 = vld [vmem:[#allocation4 + $0x182] sm:$0xff]  ;;  %v7478_v26 = vld [vmem:[#allocation4 + $0x19a] sm:$0xff] }
 0x719   : > { %8156 = vst.msk [vmem:[%s11514_s16 + $0x238] sm:$0xff] %vm281_vm0, %v7087_v38  ;;  %v7440_v38 = vadd.f32 %v7408_v17, %v7339_v8  ;;  %v7207_v22 = vmul.f32 %v12395_v24, %v7170_v52  ;;  %v7311_v51 = vmul.f32 %v12406_v20, %v12734_v31  ;;  %v7176_v48 = vld [vmem:[#allocation4 + $0x189] sm:$0xff] }
 0x71a   : > { %8154 = vst.msk [vmem:[%s11514_s16 + $0x228] sm:$0xff] %vm281_vm0, %v7085_v18  ;;  %v7211_v18 = vmul.f32 %v12395_v24, %v12418_v43  ;;  %v7543_v30 = vadd.f32 %v7511_v61, %v7442_v53 }
 0x71b   : > { %8152 = vst.msk [vmem:[%s11514_s16 + $0x218] sm:$0xff] %vm281_vm0, %v7083_v45  ;;  %7610 = vadd.xlane.f32.xlu1 %v7609_v14  ;;  %7604 = vadd.xlane.f32.xlu2 %v7603_v3  ;;  %v7308_v45 = vmul.f32 %v12406_v20, %v12713_v57  ;;  %v7541_v14 = vadd.f32 %v7509_v46, %v7440_v38 }
 0x71c   : > { %7598 = vadd.xlane.f32.xlu0 %v7597_v62  ;;  %v7539_v3 = vadd.f32 %v7507_v37, %v7438_v59  ;;  %v7342_v62 = vadd.f32 %v7310_v15, %v7209_v47  ;;  %v7344_v40 = vadd.f32 %v7312_v35, %v7211_v18  ;;  %v7627_v13 = vsel %vm5350_vm4, %v7543_v30, 0.0  ;;  %v8356_v15 = vld [vmem:[%s12968_s5 + $0xc] ss:$0 sm:$0xff]  ;;  %v7378_v35 = vld [vmem:[#allocation4 + $0x1a1] sm:$0xff] }
 0x71d   : > { %v7340_v0 = vadd.f32 %v7308_v45, %v7207_v22  ;;  %v7621_v25 = vsel %vm5350_vm4, %v7541_v14, 0.0  ;;  %v7515_v59 = vmul.f32 %v12486_v19, %v7478_v26  ;;  %v7513_v47 = vmul.f32 %v12486_v19, %v7276_v56 }
 0x71e   : > { %v7012_v9 = vpop.xlane.xlu1 %7011  ;;  %v7006_v34 = vpop.xlane.xlu2 %7005  ;;  %v7443_v27 = vadd.f32 %v7411_v10, %v7342_v62  ;;  %v7615_v42 = vsel %vm5350_vm4, %v7539_v3, 0.0  ;;  %v7213_v53 = vmul.f32 %v8356_v15, %v7176_v48  ;;  %v7314_v38 = vmul.f32 %v12406_v20, %v7477_v4 }
 0x71f   : > { %v7090_v63 = vadd.f32 %v12642_v33, %v7012_v9  ;;  %v7088_v39 = vadd.f32 %v12642_v33, %v7006_v34  ;;  %v7000_v1 = vpop.xlane.xlu0 %6999  ;;  %v7445_v9 = vadd.f32 %v7413_v23, %v7344_v40  ;;  %v7313_v34 = vmul.f32 %v12406_v20, %v7276_v56  ;;  %v7479_v20 = vld [vmem:[#allocation4 + $0x1a2] sm:$0xff] }
 0x720   : > { %v7086_v5 = vadd.f32 %v12642_v33, %v7000_v1  ;;  %v7441_v36 = vadd.f32 %v7409_v12, %v7340_v0  ;;  %v7346_v3 = vadd.f32 %v7314_v38, %v7213_v53  ;;  %v7415_v23 = vmul.f32 %v12431_v32, %v7378_v35 }
 0x721   : > { %8159 = vst.msk [vmem:[%s11514_s16 + $0x250] sm:$0xff] %vm281_vm0, %v7090_v63  ;;  %v7212_v63 = vmul.f32 %v12395_v24, %v7175_v2  ;;  %v7546_v21 = vadd.f32 %v7514_v41, %v7445_v9 }
 0x722   : > { %8157 = vst.msk [vmem:[%s11514_s16 + $0x240] sm:$0xff] %vm281_vm0, %v7088_v39  ;;  %v7173_v39 = vld [vmem:[#allocation4 + $0x169] sm:$0xff]  ;;  %v7542_v37 = vadd.f32 %v7510_v44, %v7441_v36  ;;  %v7447_v62 = vadd.f32 %v7415_v23, %v7346_v3 }
 0x723   : > { %8155 = vst.msk [vmem:[%s11514_s16 + $0x230] sm:$0xff] %vm281_vm0, %v7086_v5  ;;  %7619 = vadd.xlane.f32.xlu1 %v7618_v60  ;;  %7613 = vadd.xlane.f32.xlu2 %v7612_v29  ;;  %v7345_v17 = vadd.f32 %v7313_v34, %v7212_v63  ;;  %v7412_v60 = vmul.f32 %v12431_v32, %v7175_v2  ;;  %v7636_v46 = vsel %vm5350_vm4, %v7546_v21, 0.0 }
 0x724   : > { %7607 = vadd.xlane.f32.xlu0 %v7606_v50  ;;  %v7512_v50 = vmul.f32 %v12486_v19, %v7275_v7  ;;  %v7210_v7 = vmul.f32 %v12395_v24, %v7173_v39  ;;  %v7624_v24 = vsel %vm5350_vm4, %v7542_v37, 0.0  ;;  %v7516_v32 = vmul.f32 %v12486_v19, %v7479_v20 }
 0x725   : > { %v7446_v52 = vadd.f32 %v7414_v49, %v7345_v17  ;;  %v12859_v49 = vld [vmem:[#allocation5] ss:$0 sm:$0xff] }
 0x726   : > { %v7021_v16 = vpop.xlane.xlu1 %7020  ;;  %v7015_v6 = vpop.xlane.xlu2 %7014  ;;  %v7544_v1 = vadd.f32 %v7512_v50, %v7443_v27  ;;  %v7343_v54 = vadd.f32 %v7311_v51, %v7210_v7  ;;  %v7548_v27 = vadd.f32 %v7516_v32, %v7447_v62 }
 0x727   : > { %v7093_v11 = vadd.f32 %v12642_v33, %v7021_v16  ;;  %v7091_v28 = vadd.f32 %v12642_v33, %v7015_v6  ;;  %v7009_v43 = vpop.xlane.xlu0 %7008  ;;  %v7547_v45 = vadd.f32 %v7515_v59, %v7446_v52 }
 0x728   : > { %v7089_v57 = vadd.f32 %v12642_v33, %v7009_v43  ;;  %v7630_v61 = vsel %vm5350_vm4, %v7544_v1, 0.0  ;;  %v7444_v18 = vadd.f32 %v7412_v60, %v7343_v54  ;;  %v7642_v19 = vsel %vm5350_vm4, %v7548_v27, 0.0 }
 0x729   : > { %8162 = vst.msk [vmem:[%s11514_s16 + $0x268] sm:$0xff] %vm281_vm0, %v7093_v11 }
 0x72a   : > { %8160 = vst.msk [vmem:[%s11514_s16 + $0x258] sm:$0xff] %vm281_vm0, %v7091_v28  ;;  %v7545_v16 = vadd.f32 %v7513_v47, %v7444_v18  ;;  %v7639_v28 = vsel %vm5350_vm4, %v7547_v45, 0.0 }
 0x72b   : > { %8158 = vst.msk [vmem:[%s11514_s16 + $0x248] sm:$0xff] %vm281_vm0, %v7089_v57  ;;  %7628 = vadd.xlane.f32.xlu1 %v7627_v13  ;;  %7622 = vadd.xlane.f32.xlu2 %v7621_v25 }
 0x72c   : > { %7616 = vadd.xlane.f32.xlu0 %v7615_v42  ;;  %v7633_v43 = vsel %vm5350_vm4, %v7545_v16, 0.0 }
 0x72e   : > { %v7030_v5 = vpop.xlane.xlu1 %7029  ;;  %v7024_v55 = vpop.xlane.xlu2 %7023 }
 0x72f   : > { %v7096_v29 = vadd.f32 %v12642_v33, %v7030_v5  ;;  %v7094_v8 = vadd.f32 %v12642_v33, %v7024_v55  ;;  %v7018_v58 = vpop.xlane.xlu0 %7017 }
 0x730   : > { %v7092_v31 = vadd.f32 %v12642_v33, %v7018_v58 }
 0x731   : > { %8165 = vst.msk [vmem:[%s11514_s16 + $0x280] sm:$0xff] %vm281_vm0, %v7096_v29 }
 0x732   : > { %8163 = vst.msk [vmem:[%s11514_s16 + $0x270] sm:$0xff] %vm281_vm0, %v7094_v8 }
 0x733   : > { %8161 = vst.msk [vmem:[%s11514_s16 + $0x260] sm:$0xff] %vm281_vm0, %v7092_v31  ;;  %7637 = vadd.xlane.f32.xlu1 %v7636_v46  ;;  %7631 = vadd.xlane.f32.xlu2 %v7630_v61 }
 0x734   : > { %7625 = vadd.xlane.f32.xlu0 %v7624_v24 }
 0x736   : > { %v7039_v10 = vpop.xlane.xlu1 %7038  ;;  %v7033_v22 = vpop.xlane.xlu2 %7032 }
 0x737   : > { %v7099_v6 = vadd.f32 %v12642_v33, %v7039_v10  ;;  %v7097_v30 = vadd.f32 %v12642_v33, %v7033_v22  ;;  %v7027_v14 = vpop.xlane.xlu0 %7026 }
 0x738   : > { %v7095_v11 = vadd.f32 %v12642_v33, %v7027_v14 }
 0x739   : > { %8168 = vst.msk [vmem:[%s11514_s16 + $0x298] sm:$0xff] %vm281_vm0, %v7099_v6 }
 0x73a   : > { %8166 = vst.msk [vmem:[%s11514_s16 + $0x288] sm:$0xff] %vm281_vm0, %v7097_v30 }
 0x73b   : > { %8164 = vst.msk [vmem:[%s11514_s16 + $0x278] sm:$0xff] %vm281_vm0, %v7095_v11  ;;  %7640 = vadd.xlane.f32.xlu2 %v7639_v28 }
 0x73c   : > { %7634 = vadd.xlane.f32.xlu0 %v7633_v43 }
 0x73e   : > { %v7048_v12 = vpop.xlane.xlu1 %7047  ;;  %v7042_v56 = vpop.xlane.xlu2 %7041 }
 0x73f   : > { %v7102_v57 = vadd.f32 %v12642_v33, %v7048_v12  ;;  %v7100_v40 = vadd.f32 %v12642_v33, %v7042_v56  ;;  %v7036_v4 = vpop.xlane.xlu0 %7035 }
 0x740   : > { %v7098_v0 = vadd.f32 %v12642_v33, %v7036_v4 }
 0x741   : > { %8171 = vst.msk [vmem:[%s11514_s16 + $0x2b0] sm:$0xff] %vm281_vm0, %v7102_v57 }
 0x742   : > { %8169 = vst.msk [vmem:[%s11514_s16 + $0x2a0] sm:$0xff] %vm281_vm0, %v7100_v40 }
 0x743   : > { %8167 = vst.msk [vmem:[%s11514_s16 + $0x290] sm:$0xff] %vm281_vm0, %v7098_v0 }
 0x744   : > { %7643 = vadd.xlane.f32.xlu0 %v7642_v19 }
 0x746   : > { %v7057_v2 = vpop.xlane.xlu1 %7056  ;;  %v7051_v13 = vpop.xlane.xlu2 %7050 }
 0x747   : > { %v7105_v25 = vadd.f32 %v12642_v33, %v7057_v2  ;;  %v7103_v9 = vadd.f32 %v12642_v33, %v7051_v13  ;;  %v7045_v34 = vpop.xlane.xlu0 %7044 }
 0x748   : > { %v7101_v42 = vadd.f32 %v12642_v33, %v7045_v34 }
 0x749   : > { %8174 = vst.msk [vmem:[%s11514_s16 + $0x2c8] sm:$0xff] %vm281_vm0, %v7105_v25 }
 0x74a   : > { %8172 = vst.msk [vmem:[%s11514_s16 + $0x2b8] sm:$0xff] %vm281_vm0, %v7103_v9 }
 0x74b   : > { %8170 = vst.msk [vmem:[%s11514_s16 + $0x2a8] sm:$0xff] %vm281_vm0, %v7101_v42 }
 0x74e   : > { %v7066_v50 = vpop.xlane.xlu1 %7065  ;;  %v7060_v36 = vpop.xlane.xlu2 %7059 }
 0x74f   : > { %v7108_v41 = vadd.f32 %v12642_v33, %v7066_v50  ;;  %v7106_v63 = vadd.f32 %v12642_v33, %v7060_v36  ;;  %v7054_v39 = vpop.xlane.xlu0 %7053 }
 0x750   : > { %v7104_v1 = vadd.f32 %v12642_v33, %v7054_v39 }
 0x751   : > { %8177 = vst.msk [vmem:[%s11514_s16 + $0x2e0] sm:$0xff] %vm281_vm0, %v7108_v41 }
 0x752   : > { %8175 = vst.msk [vmem:[%s11514_s16 + $0x2d0] sm:$0xff] %vm281_vm0, %v7106_v63 }
 0x753   : > { %8173 = vst.msk [vmem:[%s11514_s16 + $0x2c0] sm:$0xff] %vm281_vm0, %v7104_v1 }
 0x756   : > { %v7075_v44 = vpop.xlane.xlu1 %7074  ;;  %v7069_v51 = vpop.xlane.xlu2 %7068 }
 0x757   : > { %v7111_v5 = vadd.f32 %v12642_v33, %v7075_v44  ;;  %v7109_v55 = vadd.f32 %v12642_v33, %v7069_v51  ;;  %v7063_v21 = vpop.xlane.xlu0 %7062 }
 0x758   : > { %v7107_v17 = vadd.f32 %v12642_v33, %v7063_v21 }
 0x759   : > { %8180 = vst.msk [vmem:[%s11514_s16 + $0x2f8] sm:$0xff] %vm281_vm0, %v7111_v5 }
 0x75a   : > { %8178 = vst.msk [vmem:[%s11514_s16 + $0x2e8] sm:$0xff] %vm281_vm0, %v7109_v55 }
 0x75b   : > { %8176 = vst.msk [vmem:[%s11514_s16 + $0x2d8] sm:$0xff] %vm281_vm0, %v7107_v17 }
 0x75e   : > { %v7557_v29 = vpop.xlane.xlu1 %7556  ;;  %v7551_v8 = vpop.xlane.xlu2 %7550 }
 0x75f   : > { %v7651_v58 = vadd.f32 %v12859_v49, %v7557_v29  ;;  %v7649_v37 = vadd.f32 %v12859_v49, %v7551_v8  ;;  %v7072_v26 = vpop.xlane.xlu0 %7071 }
 0x760   : > { %v7110_v7 = vadd.f32 %v12642_v33, %v7072_v26 }
 0x761   : > { %8187 = vst.msk [vmem:[%s11514_s16 + $0x310] sm:$0xff] %vm281_vm0, %v7651_v58 }
 0x762   : > { %8185 = vst.msk [vmem:[%s11514_s16 + $0x300] sm:$0xff] %vm281_vm0, %v7649_v37 }
 0x763   : > { %8179 = vst.msk [vmem:[%s11514_s16 + $0x2f0] sm:$0xff] %vm281_vm0, %v7110_v7 }
 0x766   : > { %v7566_v31 = vpop.xlane.xlu1 %7565  ;;  %v7560_v60 = vpop.xlane.xlu2 %7559 }
 0x767   : > { %v7654_v48 = vadd.f32 %v12859_v49, %v7566_v31  ;;  %v7652_v61 = vadd.f32 %v12859_v49, %v7560_v60  ;;  %v7554_v54 = vpop.xlane.xlu0 %7553 }
 0x768   : > { %v7650_v46 = vadd.f32 %v12859_v49, %v7554_v54 }
 0x769   : > { %8190 = vst.msk [vmem:[%s11514_s16 + $0x328] sm:$0xff] %vm281_vm0, %v7654_v48 }
 0x76a   : > { %8188 = vst.msk [vmem:[%s11514_s16 + $0x318] sm:$0xff] %vm281_vm0, %v7652_v61 }
 0x76b   : > { %8186 = vst.msk [vmem:[%s11514_s16 + $0x308] sm:$0xff] %vm281_vm0, %v7650_v46 }
 0x76e   : > { %v7575_v33 = vpop.xlane.xlu1 %7574  ;;  %v7569_v52 = vpop.xlane.xlu2 %7568 }
 0x76f   : > { %v7657_v59 = vadd.f32 %v12859_v49, %v7575_v33  ;;  %v7655_v47 = vadd.f32 %v12859_v49, %v7569_v52  ;;  %v7563_v24 = vpop.xlane.xlu0 %7562 }
 0x770   : > { %v7653_v15 = vadd.f32 %v12859_v49, %v7563_v24 }
 0x771   : > { %8193 = vst.msk [vmem:[%s11514_s16 + $0x340] sm:$0xff] %vm281_vm0, %v7657_v59 }
 0x772   : > { %8191 = vst.msk [vmem:[%s11514_s16 + $0x330] sm:$0xff] %vm281_vm0, %v7655_v47 }
 0x773   : > { %8189 = vst.msk [vmem:[%s11514_s16 + $0x320] sm:$0xff] %vm281_vm0, %v7653_v15 }
 0x776   : > { %v7584_v53 = vpop.xlane.xlu1 %7583  ;;  %v7578_v38 = vpop.xlane.xlu2 %7577 }
 0x777   : > { %v7660_v18 = vadd.f32 %v12859_v49, %v7584_v53  ;;  %v7658_v35 = vadd.f32 %v12859_v49, %v7578_v38  ;;  %v7572_v10 = vpop.xlane.xlu0 %7571 }
 0x778   : > { %v7656_v22 = vadd.f32 %v12859_v49, %v7572_v10 }
 0x779   : > { %8196 = vst.msk [vmem:[%s11514_s16 + $0x358] sm:$0xff] %vm281_vm0, %v7660_v18 }
 0x77a   : > { %8194 = vst.msk [vmem:[%s11514_s16 + $0x348] sm:$0xff] %vm281_vm0, %v7658_v35 }
 0x77b   : > { %8192 = vst.msk [vmem:[%s11514_s16 + $0x338] sm:$0xff] %vm281_vm0, %v7656_v22 }
 0x77e   : > { %v7593_v45 = vpop.xlane.xlu1 %7592  ;;  %v7587_v16 = vpop.xlane.xlu2 %7586 }
 0x77f   : > { %v7663_v6 = vadd.f32 %v12859_v49, %v7593_v45  ;;  %v7661_v30 = vadd.f32 %v12859_v49, %v7587_v16  ;;  %v7581_v14 = vpop.xlane.xlu0 %7580 }
 0x780   : > { %v7659_v3 = vadd.f32 %v12859_v49, %v7581_v14 }
 0x781   : > { %8199 = vst.msk [vmem:[%s11514_s16 + $0x370] sm:$0xff] %vm281_vm0, %v7663_v6 }
 0x782   : > { %8197 = vst.msk [vmem:[%s11514_s16 + $0x360] sm:$0xff] %vm281_vm0, %v7661_v30 }
 0x783   : > { %8195 = vst.msk [vmem:[%s11514_s16 + $0x350] sm:$0xff] %vm281_vm0, %v7659_v3 }
 0x786   : > { %v7602_v23 = vpop.xlane.xlu1 %7601  ;;  %v7596_v11 = vpop.xlane.xlu2 %7595 }
 0x787   : > { %v7666_v20 = vadd.f32 %v12859_v49, %v7602_v23  ;;  %v7664_v28 = vadd.f32 %v12859_v49, %v7596_v11  ;;  %v7590_v43 = vpop.xlane.xlu0 %7589 }
 0x788   : > { %v7662_v62 = vadd.f32 %v12859_v49, %v7590_v43 }
 0x789   : > { %8202 = vst.msk [vmem:[%s11514_s16 + $0x388] sm:$0xff] %vm281_vm0, %v7666_v20 }
 0x78a   : > { %8200 = vst.msk [vmem:[%s11514_s16 + $0x378] sm:$0xff] %vm281_vm0, %v7664_v28 }
 0x78b   : > { %8198 = vst.msk [vmem:[%s11514_s16 + $0x368] sm:$0xff] %vm281_vm0, %v7662_v62 }
 0x78e   : > { %v7611_v32 = vpop.xlane.xlu1 %7610  ;;  %v7605_v12 = vpop.xlane.xlu2 %7604 }
 0x78f   : > { %v7669_v56 = vadd.f32 %v12859_v49, %v7611_v32  ;;  %v7667_v57 = vadd.f32 %v12859_v49, %v7605_v12  ;;  %v7599_v40 = vpop.xlane.xlu0 %7598 }
 0x790   : > { %v7665_v4 = vadd.f32 %v12859_v49, %v7599_v40 }
 0x791   : > { %8205 = vst.msk [vmem:[%s11514_s16 + $0x3a0] sm:$0xff] %vm281_vm0, %v7669_v56 }
 0x792   : > { %8203 = vst.msk [vmem:[%s11514_s16 + $0x390] sm:$0xff] %vm281_vm0, %v7667_v57 }
 0x793   : > { %8201 = vst.msk [vmem:[%s11514_s16 + $0x380] sm:$0xff] %vm281_vm0, %v7665_v4 }
 0x796   : > { %v7620_v27 = vpop.xlane.xlu1 %7619  ;;  %v7614_v0 = vpop.xlane.xlu2 %7613 }
 0x797   : > { %v7672_v19 = vadd.f32 %v12859_v49, %v7620_v27  ;;  %v7670_v2 = vadd.f32 %v12859_v49, %v7614_v0  ;;  %v7608_v13 = vpop.xlane.xlu0 %7607 }
 0x798   : > { %v7668_v25 = vadd.f32 %v12859_v49, %v7608_v13 }
 0x799   : > { %8208 = vst.msk [vmem:[%s11514_s16 + $0x3b8] sm:$0xff] %vm281_vm0, %v7672_v19 }
 0x79a   : > { %8206 = vst.msk [vmem:[%s11514_s16 + $0x3a8] sm:$0xff] %vm281_vm0, %v7670_v2 }
 0x79b   : > { %8204 = vst.msk [vmem:[%s11514_s16 + $0x398] sm:$0xff] %vm281_vm0, %v7668_v25 }
 0x79e   : > { %v7629_v9 = vpop.xlane.xlu1 %7628  ;;  %v7623_v34 = vpop.xlane.xlu2 %7622 }
 0x79f   : > { %v7675_v42 = vadd.f32 %v12859_v49, %v7629_v9  ;;  %v7673_v50 = vadd.f32 %v12859_v49, %v7623_v34  ;;  %v7617_v36 = vpop.xlane.xlu0 %7616 }
 0x7a0   : > { %v7671_v41 = vadd.f32 %v12859_v49, %v7617_v36 }
 0x7a1   : > { %8211 = vst.msk [vmem:[%s11514_s16 + $0x3d0] sm:$0xff] %vm281_vm0, %v7675_v42 }
 0x7a2   : > { %8209 = vst.msk [vmem:[%s11514_s16 + $0x3c0] sm:$0xff] %vm281_vm0, %v7673_v50 }
 0x7a3   : > { %8207 = vst.msk [vmem:[%s11514_s16 + $0x3b0] sm:$0xff] %vm281_vm0, %v7671_v41 }
 0x7a6   : > { %v7638_v63 = vpop.xlane.xlu1 %7637  ;;  %v7632_v39 = vpop.xlane.xlu2 %7631 }
 0x7a7   : > { %v7678_v1 = vadd.f32 %v12859_v49, %v7638_v63  ;;  %v7676_v44 = vadd.f32 %v12859_v49, %v7632_v39  ;;  %v7626_v51 = vpop.xlane.xlu0 %7625 }
 0x7a8   : > { %v7674_v5 = vadd.f32 %v12859_v49, %v7626_v51 }
 0x7a9   : > { %8214 = vst.msk [vmem:[%s11514_s16 + $0x3e8] sm:$0xff] %vm281_vm0, %v7678_v1 }
 0x7aa   : > { %8212 = vst.msk [vmem:[%s11514_s16 + $0x3d8] sm:$0xff] %vm281_vm0, %v7676_v44 }
 0x7ab   : > { %8210 = vst.msk [vmem:[%s11514_s16 + $0x3c8] sm:$0xff] %vm281_vm0, %v7674_v5 }
 0x7ae   : > { %v7641_v55 = vpop.xlane.xlu2 %7640 }
 0x7af   : > { %v7679_v21 = vadd.f32 %v12859_v49, %v7641_v55  ;;  %v7635_v17 = vpop.xlane.xlu0 %7634 }
 0x7b0   : > { %v7677_v29 = vadd.f32 %v12859_v49, %v7635_v17 }
 0x7b1   : > { %8215 = vst.msk [vmem:[%s11514_s16 + $0x3f0] sm:$0xff] %vm281_vm0, %v7679_v21 }
 0x7b2   : > { %8213 = vst.msk [vmem:[%s11514_s16 + $0x3e0] sm:$0xff] %vm281_vm0, %v7677_v29 }
 0x7b7   : > { %v7644_v8 = vpop.xlane.xlu0 %7643 }
 0x7b8   : > { %v7680_v58 = vadd.f32 %v12859_v49, %v7644_v8 }
 0x7ba   : > { %8216 = vst.msk [vmem:[%s11514_s16 + $0x3f8] sm:$0xff] %vm281_vm0, %v7680_v58 }
 0x7bb PF: > { %s19_s26 = sadd.s32 1, %s8363_s26  }
 0x7bc   : > { %p16_p4 = scmp.ge.s32.totalorder %s19_s26, 4  }
 0x7be   :  { %18 = sbr.rel (!%p16_p4) target bundleno = 3 (0x3), region = 118 }

</bundles_post_ra>
